<compile_context>
chip_gen: v7x
topology: tpu7x:2x2x1
jax: 0.10.0
libtpu: 0.0.40
codegen_flags: <defaults>
</compile_context>

<pallas_src>
import math
import numpy as np

import jax
import jax.numpy as jnp
from jax import lax
from jax.experimental import pallas as pl
from jax.experimental.pallas import tpu as pltpu

BN_EPS = 1e-5


# ----------------------------------------------------------------------------
# Bilinear (fill_up_weights) helpers
# ----------------------------------------------------------------------------
def _bilinear_w1d(f):
    c0 = (2 * f - 1 - f % 2) / (2.0 * f)
    return [1.0 - abs(t / f - c0) for t in range(2 * f)]


def _upsample_matrix(size, f):
    """(size*f, size) matrix U with (U @ y) == 1-D depthwise bilinear
    ConvTranspose(kernel=2f, stride=f, pad=f//2) of y (fill_up_weights)."""
    p = f // 2
    w1d = _bilinear_w1d(f)
    U = np.zeros((size * f, size), np.float32)
    for r in range(size * f):
        for n in range(size):
            t = r + p - n * f
            if 0 <= t < 2 * f:
                U[r, n] = np.float32(w1d[t])
    return U


# ----------------------------------------------------------------------------
# Fused per-stage Pallas kernel: proj(conv+BN+ReLU) -> bilinear up -> +skip
#                                -> node(conv+BN+ReLU)
# ----------------------------------------------------------------------------
def _make_stage_kernel(H, W, Ci, Co, f):
    Hf, Wf = H * f, W * f
    p = f // 2
    w1d = _bilinear_w1d(f)

    def kernel(x_ref, skip_ref, pw_ref, ps_ref, psh_ref, uw_ref,
               nw_ref, ns_ref, nsh_ref, o_ref, xpad_ref, z_ref):
        # ---- proj: 3x3 conv + folded BN + ReLU (bf16 MXU, f32 accum) -------
        # 1-px halo built in VMEM; only the border is zeroed (interior is
        # fully overwritten every grid step).
        xpad_ref[0:1, :, :] = jnp.zeros((1, W + 2, Ci), jnp.bfloat16)
        xpad_ref[H + 1:H + 2, :, :] = jnp.zeros((1, W + 2, Ci), jnp.bfloat16)
        xpad_ref[:, 0:1, :] = jnp.zeros((H + 2, 1, Ci), jnp.bfloat16)
        xpad_ref[:, W + 1:W + 2, :] = jnp.zeros((H + 2, 1, Ci), jnp.bfloat16)
        xpad_ref[1:H + 1, 1:W + 1, :] = x_ref[0]

        # Stack the 3 dx-shifted taps along the contraction axis once; the dy
        # taps are leading-axis (untiled) slices, so the whole conv is 3
        # matmuls with K = 3*Ci.
        xcat = jnp.concatenate(
            [xpad_ref[:, 0:W, :], xpad_ref[:, 1:W + 1, :],
             xpad_ref[:, 2:W + 2, :]], axis=-1)              # (H+2, W, 3*Ci)
        pacc = None
        for dy in range(3):
            part = lax.dot_general(
                xcat[dy:dy + H], pw_ref[dy], (((2,), (0,)), ((), ())),
                preferred_element_type=jnp.float32)
            pacc = part if pacc is None else pacc + part
        y = jnp.maximum(pacc * ps_ref[0] + psh_ref[0],
                        0.0).astype(jnp.bfloat16)            # (H, W, Co)

        # ---- bilinear upsample (separable) + residual add, in VMEM ---------
        # W direction: one MXU matmul per low-res row against the interleaving
        # matrix (row comes out already W-interleaved, channels on lanes).
        uw = uw_ref[...]                                     # (Wf, W)
        y_u = y.astype(uw.dtype)
        b = jnp.stack(
            [jnp.dot(uw, y_u[m], preferred_element_type=jnp.float32)
             for m in range(H)], axis=0)                     # (H, Wf, Co) f32
        # H direction: 2-tap bilinear, fully vectorized.  Each output row r
        # is w1d[(r+p)%f]*b[(r+p)//f] + w1d[(r+p)%f+f]*b[(r+p)//f-1]; built as
        # f phase-weighted copies of b interleaved by a free leading-dim
        # reshape, then shifted by the transposed-conv padding.  No per-row
        # stores; the upsample+skip result is written with one interior store.
        hi = jnp.stack([b * float(w1d[t]) for t in range(f)],
                       axis=1).reshape(Hf, Wf, Co)
        lo = jnp.stack([b * float(w1d[t + f]) for t in range(f)],
                       axis=1).reshape(Hf, Wf, Co)
        up = (jnp.concatenate(
                  [hi[p:], jnp.zeros((p, Wf, Co), jnp.float32)], axis=0)
              + jnp.concatenate(
                  [jnp.zeros((f - p, Wf, Co), jnp.float32),
                   lo[:Hf - (f - p)]], axis=0))              # (Hf, Wf, Co)

        z_int = (up + skip_ref[0].astype(jnp.float32)).astype(jnp.bfloat16)
        z_ref[0:1, :, :] = jnp.zeros((1, Wf + 2, Co), jnp.bfloat16)
        z_ref[Hf + 1:Hf + 2, :, :] = jnp.zeros((1, Wf + 2, Co), jnp.bfloat16)
        z_ref[:, 0:1, :] = jnp.zeros((Hf + 2, 1, Co), jnp.bfloat16)
        z_ref[:, Wf + 1:Wf + 2, :] = jnp.zeros((Hf + 2, 1, Co), jnp.bfloat16)
        z_ref[1:Hf + 1, 1:Wf + 1, :] = z_int

        # ---- node: 3x3 conv + folded BN + ReLU on (upsample + skip) --------
        zcat = jnp.concatenate(
            [z_ref[:, 0:Wf, :], z_ref[:, 1:Wf + 1, :],
             z_ref[:, 2:Wf + 2, :]], axis=-1)                # (Hf+2, Wf, 3*Co)
        nacc = None
        for dy in range(3):
            part = lax.dot_general(
                zcat[dy:dy + Hf], nw_ref[dy], (((2,), (0,)), ((), ())),
                preferred_element_type=jnp.float32)
            nacc = part if nacc is None else nacc + part
        out = jnp.maximum(nacc * ns_ref[0] + nsh_ref[0], 0.0)
        o_ref[0] = out.astype(o_ref.dtype)

    return kernel


def _stage_vmem_bytes(H, W, Ci, Co, f):
    """Rough VMEM footprint of one stage (double-buffered blocks + scratch +
    f32 temporaries), used to size vmem_limit_bytes."""
    Hf, Wf = H * f, W * f
    blocks = 2 * 2 * (H * W * Ci + 2 * Hf * Wf * Co)          # bf16, 2 buffers
    weights = 2 * 2 * 3 * 3 * Co * (Ci + Co) + 4 * Wf * W
    scratch = 2 * ((H + 2) * (W + 2) * Ci + (Hf + 2) * (Wf + 2) * Co)
    temps = 8 * 4 * Hf * Wf * Co                              # f32 temporaries
    return blocks + weights + scratch + temps


def ida_stage(x, skip, proj, node, f):
    """Fused IDAUp stage: node(up(proj(x)) + skip).
    x: (N,H,W,Ci) bf16, skip: (N,H*f,W*f,Co) bf16 -> (N,H*f,W*f,Co) bf16."""
    # TODO(synk): up_f == 1 stages (ConvTranspose k=2) are not supported.
    assert f >= 2 and f % 2 == 0, "up_f == 1 / odd up_f not supported"
    N, H, W, Ci = x.shape
    Co = skip.shape[-1]
    Hf, Wf = H * f, W * f
    assert skip.shape == (N, Hf, Wf, Co)
    pw, ps, psh = proj
    nw, ns, nsh = node
    # Power-of-two f -> bilinear weights are dyadic and exact in bf16;
    # otherwise keep the interleaving matrix in f32.
    uw_dtype = jnp.bfloat16 if (f & (f - 1)) == 0 else jnp.float32
    uw = jnp.asarray(_upsample_matrix(W, f), uw_dtype)

    vmem_limit = int(min(64 << 20,
                         max(32 << 20, 2 * _stage_vmem_bytes(H, W, Ci, Co, f))))

    return pl.pallas_call(
        _make_stage_kernel(H, W, Ci, Co, f),
        out_shape=jax.ShapeDtypeStruct((N, Hf, Wf, Co), x.dtype),
        grid=(N,),
        in_specs=[
            pl.BlockSpec((1, H, W, Ci), lambda n: (n, 0, 0, 0)),
            pl.BlockSpec((1, Hf, Wf, Co), lambda n: (n, 0, 0, 0)),
            pl.BlockSpec((3, 3 * Ci, Co), lambda n: (0, 0, 0)),
            pl.BlockSpec((1, Co), lambda n: (0, 0)),
            pl.BlockSpec((1, Co), lambda n: (0, 0)),
            pl.BlockSpec((Wf, W), lambda n: (0, 0)),
            pl.BlockSpec((3, 3 * Co, Co), lambda n: (0, 0, 0)),
            pl.BlockSpec((1, Co), lambda n: (0, 0)),
            pl.BlockSpec((1, Co), lambda n: (0, 0)),
        ],
        out_specs=pl.BlockSpec((1, Hf, Wf, Co), lambda n: (n, 0, 0, 0)),
        scratch_shapes=[
            pltpu.VMEM((H + 2, W + 2, Ci), jnp.bfloat16),    # padded proj input
            pltpu.VMEM((Hf + 2, Wf + 2, Co), jnp.bfloat16),  # up + skip (halo)
        ],
        compiler_params=pltpu.CompilerParams(
            dimension_semantics=("parallel",),
            vmem_limit_bytes=vmem_limit),
    )(x, skip, pw.reshape(3, 3 * Ci, Co), ps, psh, uw,
      nw.reshape(3, 3 * Co, Co), ns, nsh)


# ----------------------------------------------------------------------------
# Parameter init (deterministic, synthetic) + module wrapper
# ----------------------------------------------------------------------------
def _init_deform_conv(key, cin, cout):
    k1, k2, k3, k4, k5, k6 = jax.random.split(key, 6)
    w = (jax.random.normal(k1, (3, 3, cin, cout), jnp.float32)
         / math.sqrt(9 * cin)).astype(jnp.bfloat16)
    b = jax.random.normal(k2, (cout,), jnp.float32) * 0.01
    gamma = jax.random.uniform(k3, (cout,), jnp.float32, 0.5, 1.5)
    beta = jax.random.normal(k4, (cout,), jnp.float32) * 0.01
    mean = jax.random.normal(k5, (cout,), jnp.float32) * 0.01
    var = jax.random.uniform(k6, (cout,), jnp.float32, 0.5, 1.5)
    s = gamma / jnp.sqrt(var + BN_EPS)
    scale = s.reshape(1, cout)
    shift = ((b - mean) * s + beta).reshape(1, cout)
    return w, scale, shift


class IDAUpPallas:
    """Pallas port of IDAUp (DeformConv -> 3x3 conv + eval-mode BN + ReLU)."""

    def __init__(self, o, channels, up_f, key):
        self.o = o
        self.stages = []
        for i in range(1, len(channels)):
            key, kp, kn = jax.random.split(key, 3)
            proj = _init_deform_conv(kp, channels[i], o)
            node = _init_deform_conv(kn, o, o)
            self.stages.append(dict(proj=proj, node=node, f=int(up_f[i])))

    def __call__(self, layers, startp, endp):
        layers = list(layers)
        for i in range(startp + 1, endp):
            st = self.stages[i - startp - 1]
            layers[i] = ida_stage(layers[i], layers[i - 1],
                                  st["proj"], st["node"], st["f"])
        return layers


# ----------------------------------------------------------------------------
# Pure-JAX reference (mirrors the kernel's bf16 cast points exactly)
# ----------------------------------------------------------------------------
def _ref_conv_bn_relu(x_bf, w_bf, scale, shift):
    y = lax.conv_general_dilated(
        x_bf.astype(jnp.float32), w_bf.astype(jnp.float32), (1, 1), "SAME",
        dimension_numbers=("NHWC", "HWIO", "NHWC"))
    return jnp.maximum(y * scale + shift, 0.0)


def _ref_upsample(x, f):
    C = x.shape[-1]
    k, p = 2 * f, f // 2
    w1d = np.array(_bilinear_w1d(f), np.float32)
    w = jnp.asarray(np.tile(np.outer(w1d, w1d)[:, :, None, None], (1, 1, 1, C)))
    return lax.conv_general_dilated(
        x, w, (1, 1), [(k - 1 - p, k - 1 - p)] * 2, lhs_dilation=(f, f),
        dimension_numbers=("NHWC", "HWIO", "NHWC"), feature_group_count=C)


def _ref_stage(x_bf, skip_bf, proj, node, f):
    pw, ps, psh = proj
    nw, ns, nsh = node
    y = _ref_conv_bn_relu(x_bf, pw, ps, psh).astype(jnp.bfloat16)     # proj
    up = _ref_upsample(y.astype(jnp.float32), f)                      # up
    z = (up + skip_bf.astype(jnp.float32)).astype(jnp.bfloat16)       # + skip
    out = _ref_conv_bn_relu(z, nw, ns, nsh)                           # node
    return out.astype(jnp.bfloat16)


def _ref_forward(ida, layers, startp, endp):
    layers = list(layers)
    for i in range(startp + 1, endp):
        st = ida.stages[i - startp - 1]
        layers[i] = _ref_stage(layers[i], layers[i - 1],
                               st["proj"], st["node"], st["f"])
    return layers


# ----------------------------------------------------------------------------
if __name__ == "__main__":
    o = 8
    channels = [8, 4, 6]          # channels[0] == o, as in real IDAUp usage
    up_f = [1, 2, 4]
    spatial = [32, 16, 8]
    N = 2
    startp, endp = 0, len(channels)

    key = jax.random.PRNGKey(0)
    key, kmod = jax.random.split(key)
    kin = jax.random.split(key, len(channels))

    ida = IDAUpPallas(o, channels, up_f, kmod)

    # Build inputs in PyTorch NCHW convention, then NHWC bf16 at the boundary.
    layers_nchw = [jax.random.normal(kin[i], (N, channels[i], spatial[i], spatial[i]),
                                     jnp.float32) for i in range(len(channels))]
    layers = [jnp.transpose(x, (0, 2, 3, 1)).astype(jnp.bfloat16)
              for x in layers_nchw]

    out_layers = ida(layers, startp, endp)
    out_layers = [jax.block_until_ready(x) for x in out_layers]

    ref_layers = _ref_forward(ida, layers, startp, endp)
    for a, b in zip(out_layers, ref_layers):
        # bf16 I/O path: tolerance covers ~1-2 bf16 ulp from accumulation-order
        # differences between the fused kernel and the XLA reference.
        np.testing.assert_allclose(np.asarray(a.astype(jnp.float32)),
                                   np.asarray(b.astype(jnp.float32)),
                                   rtol=1e-2, atol=1e-2)

    print("KERNEL_OK")
</pallas_src>

<mosaic_0001>
module attributes {stable_mosaic.version = 11 : i64} {
  func.func @kernel(%arg0: i32, %arg1: memref<1x16x16x4xbf16, #tpu.memory_space<vmem>>, %arg2: memref<1x32x32x8xbf16, #tpu.memory_space<vmem>>, %arg3: memref<3x12x8xbf16, #tpu.memory_space<vmem>>, %arg4: memref<1x8xf32, #tpu.memory_space<vmem>>, %arg5: memref<1x8xf32, #tpu.memory_space<vmem>>, %arg6: memref<32x16xbf16, #tpu.memory_space<vmem>>, %arg7: memref<3x24x8xbf16, #tpu.memory_space<vmem>>, %arg8: memref<1x8xf32, #tpu.memory_space<vmem>>, %arg9: memref<1x8xf32, #tpu.memory_space<vmem>>, %arg10: memref<1x32x32x8xbf16, #tpu.memory_space<vmem>>, %arg11: memref<18x18x4xbf16, #tpu.memory_space<vmem>>, %arg12: memref<34x34x8xbf16, #tpu.memory_space<vmem>>) attributes {dimension_semantics = [#tpu.dimension_semantics<parallel>], iteration_bounds = array<i64: 2>, scalar_prefetch = 0 : i64, scratch_operands = 2 : i64, tpu.core_type = #tpu.core_type<tc>, window_params = [{transform_indices = @transform_0, window_bounds = array<i64: 1, 16, 16, 4>}, {transform_indices = @transform_1, window_bounds = array<i64: 1, 32, 32, 8>}, {pipeline_mode = #tpu.pipeline_mode<synchronous>, transform_indices = @transform_2, window_bounds = array<i64: 3, 12, 8>}, {pipeline_mode = #tpu.pipeline_mode<synchronous>, transform_indices = @transform_3, window_bounds = array<i64: 1, 8>}, {pipeline_mode = #tpu.pipeline_mode<synchronous>, transform_indices = @transform_4, window_bounds = array<i64: 1, 8>}, {pipeline_mode = #tpu.pipeline_mode<synchronous>, transform_indices = @transform_5, window_bounds = array<i64: 32, 16>}, {pipeline_mode = #tpu.pipeline_mode<synchronous>, transform_indices = @transform_6, window_bounds = array<i64: 3, 24, 8>}, {pipeline_mode = #tpu.pipeline_mode<synchronous>, transform_indices = @transform_7, window_bounds = array<i64: 1, 8>}, {pipeline_mode = #tpu.pipeline_mode<synchronous>, transform_indices = @transform_8, window_bounds = array<i64: 1, 8>}, {transform_indices = @transform_9, window_bounds = array<i64: 1, 32, 32, 8>}]} {
    %cst = arith.constant 0.000000e+00 : bf16
    %0 = vector.broadcast %cst : bf16 to vector<1x18x4xbf16>
    %c0 = arith.constant 0 : index
    %c0_0 = arith.constant 0 : index
    %c0_1 = arith.constant 0 : index
    %1 = vector.load %arg11[%c0, %c0_0, %c0_1] : memref<18x18x4xbf16, #tpu.memory_space<vmem>>, vector<1x18x4xbf16>
    tpu.vector_store %arg11[%c0, %c0_0, %c0_1], %0 {strides = array<i32>} : memref<18x18x4xbf16, #tpu.memory_space<vmem>>, vector<1x18x4xbf16>,
    %cst_2 = arith.constant 0.000000e+00 : bf16
    %2 = vector.broadcast %cst_2 : bf16 to vector<1x18x4xbf16>
    %c17 = arith.constant 17 : index
    %c0_3 = arith.constant 0 : index
    %c0_4 = arith.constant 0 : index
    %3 = vector.load %arg11[%c17, %c0_3, %c0_4] : memref<18x18x4xbf16, #tpu.memory_space<vmem>>, vector<1x18x4xbf16>
    tpu.vector_store %arg11[%c17, %c0_3, %c0_4], %2 {strides = array<i32>} : memref<18x18x4xbf16, #tpu.memory_space<vmem>>, vector<1x18x4xbf16>,
    %cst_5 = arith.constant 0.000000e+00 : bf16
    %4 = vector.broadcast %cst_5 : bf16 to vector<18x1x4xbf16>
    %c0_6 = arith.constant 0 : index
    %c0_7 = arith.constant 0 : index
    %c0_8 = arith.constant 0 : index
    %5 = vector.load %arg11[%c0_6, %c0_7, %c0_8] : memref<18x18x4xbf16, #tpu.memory_space<vmem>>, vector<18x1x4xbf16>
    tpu.vector_store %arg11[%c0_6, %c0_7, %c0_8], %4 {strides = array<i32>} : memref<18x18x4xbf16, #tpu.memory_space<vmem>>, vector<18x1x4xbf16>,
    %cst_9 = arith.constant 0.000000e+00 : bf16
    %6 = vector.broadcast %cst_9 : bf16 to vector<18x1x4xbf16>
    %c0_10 = arith.constant 0 : index
    %c17_11 = arith.constant 17 : index
    %c0_12 = arith.constant 0 : index
    %7 = vector.load %arg11[%c0_10, %c17_11, %c0_12] : memref<18x18x4xbf16, #tpu.memory_space<vmem>>, vector<18x1x4xbf16>
    tpu.vector_store %arg11[%c0_10, %c17_11, %c0_12], %6 {strides = array<i32>} : memref<18x18x4xbf16, #tpu.memory_space<vmem>>, vector<18x1x4xbf16>,
    %c0_13 = arith.constant 0 : index
    %c0_14 = arith.constant 0 : index
    %c0_15 = arith.constant 0 : index
    %c0_16 = arith.constant 0 : index
    %8 = vector.load %arg1[%c0_13, %c0_14, %c0_15, %c0_16] : memref<1x16x16x4xbf16, #tpu.memory_space<vmem>>, vector<1x16x16x4xbf16>
    %9 = vector.shape_cast %8 : vector<1x16x16x4xbf16> to vector<16x16x4xbf16>
    %c1 = arith.constant 1 : index
    %c1_17 = arith.constant 1 : index
    %c0_18 = arith.constant 0 : index
    %10 = vector.load %arg11[%c1, %c1_17, %c0_18] : memref<18x18x4xbf16, #tpu.memory_space<vmem>>, vector<16x16x4xbf16>
    tpu.vector_store %arg11[%c1, %c1_17, %c0_18], %9 {strides = array<i32>} : memref<18x18x4xbf16, #tpu.memory_space<vmem>>, vector<16x16x4xbf16>,
    %c0_19 = arith.constant 0 : index
    %c0_20 = arith.constant 0 : index
    %c0_21 = arith.constant 0 : index
    %11 = vector.load %arg11[%c0_19, %c0_20, %c0_21] : memref<18x18x4xbf16, #tpu.memory_space<vmem>>, vector<18x16x4xbf16>
    %c0_22 = arith.constant 0 : index
    %c1_23 = arith.constant 1 : index
    %c0_24 = arith.constant 0 : index
    %12 = vector.load %arg11[%c0_22, %c1_23, %c0_24] : memref<18x18x4xbf16, #tpu.memory_space<vmem>>, vector<18x16x4xbf16>
    %c0_25 = arith.constant 0 : index
    %c2 = arith.constant 2 : index
    %c0_26 = arith.constant 0 : index
    %13 = vector.load %arg11[%c0_25, %c2, %c0_26] : memref<18x18x4xbf16, #tpu.memory_space<vmem>>, vector<18x16x4xbf16>
    %14 = tpu.concatenate %11, %12, %13 in 2 : vector<18x16x4xbf16>, vector<18x16x4xbf16>, vector<18x16x4xbf16> -> vector<18x16x12xbf16>
    %15 = vector.extract_strided_slice %14 {offsets = [0, 0, 0], sizes = [16, 16, 12], strides = [1, 1, 1]} : vector<18x16x12xbf16> to vector<16x16x12xbf16>
    %c0_27 = arith.constant 0 : index
    %c0_28 = arith.constant 0 : index
    %c0_29 = arith.constant 0 : index
    %16 = vector.load %arg3[%c0_27, %c0_28, %c0_29] : memref<3x12x8xbf16, #tpu.memory_space<vmem>>, vector<1x12x8xbf16>
    %17 = vector.shape_cast %16 : vector<1x12x8xbf16> to vector<12x8xbf16>
    %cst_30 = arith.constant dense<0.000000e+00> : vector<16x16x8xf32>
    %18 = tpu.matmul %15, %17, %cst_30 {dimension_numbers = #tpu.dot_dimension_numbers<[2], [0], [0, 1], [1], [0, 0, 0, 1, 1, 1], [], []>} : vector<16x16x12xbf16>, vector<12x8xbf16>, vector<16x16x8xf32> -> vector<16x16x8xf32>
    %19 = vector.extract_strided_slice %14 {offsets = [1, 0, 0], sizes = [16, 16, 12], strides = [1, 1, 1]} : vector<18x16x12xbf16> to vector<16x16x12xbf16>
    %c1_31 = arith.constant 1 : index
    %c0_32 = arith.constant 0 : index
    %c0_33 = arith.constant 0 : index
    %20 = vector.load %arg3[%c1_31, %c0_32, %c0_33] : memref<3x12x8xbf16, #tpu.memory_space<vmem>>, vector<1x12x8xbf16>
    %21 = vector.shape_cast %20 : vector<1x12x8xbf16> to vector<12x8xbf16>
    %cst_34 = arith.constant dense<0.000000e+00> : vector<16x16x8xf32>
    %22 = tpu.matmul %19, %21, %cst_34 {dimension_numbers = #tpu.dot_dimension_numbers<[2], [0], [0, 1], [1], [0, 0, 0, 1, 1, 1], [], []>} : vector<16x16x12xbf16>, vector<12x8xbf16>, vector<16x16x8xf32> -> vector<16x16x8xf32>
    %23 = arith.addf %18, %22 : vector<16x16x8xf32>
    %24 = vector.extract_strided_slice %14 {offsets = [2, 0, 0], sizes = [16, 16, 12], strides = [1, 1, 1]} : vector<18x16x12xbf16> to vector<16x16x12xbf16>
    %c2_35 = arith.constant 2 : index
    %c0_36 = arith.constant 0 : index
    %c0_37 = arith.constant 0 : index
    %25 = vector.load %arg3[%c2_35, %c0_36, %c0_37] : memref<3x12x8xbf16, #tpu.memory_space<vmem>>, vector<1x12x8xbf16>
    %26 = vector.shape_cast %25 : vector<1x12x8xbf16> to vector<12x8xbf16>
    %cst_38 = arith.constant dense<0.000000e+00> : vector<16x16x8xf32>
    %27 = tpu.matmul %24, %26, %cst_38 {dimension_numbers = #tpu.dot_dimension_numbers<[2], [0], [0, 1], [1], [0, 0, 0, 1, 1, 1], [], []>} : vector<16x16x12xbf16>, vector<12x8xbf16>, vector<16x16x8xf32> -> vector<16x16x8xf32>
    %28 = arith.addf %23, %27 : vector<16x16x8xf32>
    %c0_39 = arith.constant 0 : index
    %c0_40 = arith.constant 0 : index
    %29 = vector.load %arg4[%c0_39, %c0_40] : memref<1x8xf32, #tpu.memory_space<vmem>>, vector<1x8xf32>
    %30 = vector.shape_cast %29 : vector<1x8xf32> to vector<8xf32>
    %31 = vector.shape_cast %30 : vector<8xf32> to vector<1x1x8xf32>
    %32 = vector.broadcast %31 : vector<1x1x8xf32> to vector<16x16x8xf32>
    %33 = arith.mulf %28, %32 : vector<16x16x8xf32>
    %c0_41 = arith.constant 0 : index
    %c0_42 = arith.constant 0 : index
    %34 = vector.load %arg5[%c0_41, %c0_42] : memref<1x8xf32, #tpu.memory_space<vmem>>, vector<1x8xf32>
    %35 = vector.shape_cast %34 : vector<1x8xf32> to vector<8xf32>
    %36 = vector.shape_cast %35 : vector<8xf32> to vector<1x1x8xf32>
    %37 = vector.broadcast %36 : vector<1x1x8xf32> to vector<16x16x8xf32>
    %38 = arith.addf %33, %37 : vector<16x16x8xf32>
    %cst_43 = arith.constant 0.000000e+00 : f32
    %39 = vector.broadcast %cst_43 : f32 to vector<16x16x8xf32>
    %40 = arith.maximumf %38, %39 : vector<16x16x8xf32>
    %41 = arith.truncf %40 : vector<16x16x8xf32> to vector<16x16x8xbf16>
    %c0_44 = arith.constant 0 : index
    %c0_45 = arith.constant 0 : index
    %42 = vector.load %arg6[%c0_44, %c0_45] : memref<32x16xbf16, #tpu.memory_space<vmem>>, vector<32x16xbf16>
    %43 = vector.extract_strided_slice %41 {offsets = [0, 0, 0], sizes = [1, 16, 8], strides = [1, 1, 1]} : vector<16x16x8xbf16> to vector<1x16x8xbf16>
    %44 = vector.shape_cast %43 : vector<1x16x8xbf16> to vector<16x8xbf16>
    %cst_46 = arith.constant dense<0.000000e+00> : vector<32x8xf32>
    %45 = tpu.matmul %42, %44, %cst_46 {dimension_numbers = #tpu.dot_dimension_numbers<[1], [0], [0], [1], [0, 0, 1, 1], [], []>} : vector<32x16xbf16>, vector<16x8xbf16>, vector<32x8xf32> -> vector<32x8xf32>
    %46 = vector.extract_strided_slice %41 {offsets = [1, 0, 0], sizes = [1, 16, 8], strides = [1, 1, 1]} : vector<16x16x8xbf16> to vector<1x16x8xbf16>
    %47 = vector.shape_cast %46 : vector<1x16x8xbf16> to vector<16x8xbf16>
    %cst_47 = arith.constant dense<0.000000e+00> : vector<32x8xf32>
    %48 = tpu.matmul %42, %47, %cst_47 {dimension_numbers = #tpu.dot_dimension_numbers<[1], [0], [0], [1], [0, 0, 1, 1], [], []>} : vector<32x16xbf16>, vector<16x8xbf16>, vector<32x8xf32> -> vector<32x8xf32>
    %49 = vector.extract_strided_slice %41 {offsets = [2, 0, 0], sizes = [1, 16, 8], strides = [1, 1, 1]} : vector<16x16x8xbf16> to vector<1x16x8xbf16>
    %50 = vector.shape_cast %49 : vector<1x16x8xbf16> to vector<16x8xbf16>
    %cst_48 = arith.constant dense<0.000000e+00> : vector<32x8xf32>
    %51 = tpu.matmul %42, %50, %cst_48 {dimension_numbers = #tpu.dot_dimension_numbers<[1], [0], [0], [1], [0, 0, 1, 1], [], []>} : vector<32x16xbf16>, vector<16x8xbf16>, vector<32x8xf32> -> vector<32x8xf32>
    %52 = vector.extract_strided_slice %41 {offsets = [3, 0, 0], sizes = [1, 16, 8], strides = [1, 1, 1]} : vector<16x16x8xbf16> to vector<1x16x8xbf16>
    %53 = vector.shape_cast %52 : vector<1x16x8xbf16> to vector<16x8xbf16>
    %cst_49 = arith.constant dense<0.000000e+00> : vector<32x8xf32>
    %54 = tpu.matmul %42, %53, %cst_49 {dimension_numbers = #tpu.dot_dimension_numbers<[1], [0], [0], [1], [0, 0, 1, 1], [], []>} : vector<32x16xbf16>, vector<16x8xbf16>, vector<32x8xf32> -> vector<32x8xf32>
    %55 = vector.extract_strided_slice %41 {offsets = [4, 0, 0], sizes = [1, 16, 8], strides = [1, 1, 1]} : vector<16x16x8xbf16> to vector<1x16x8xbf16>
    %56 = vector.shape_cast %55 : vector<1x16x8xbf16> to vector<16x8xbf16>
    %cst_50 = arith.constant dense<0.000000e+00> : vector<32x8xf32>
    %57 = tpu.matmul %42, %56, %cst_50 {dimension_numbers = #tpu.dot_dimension_numbers<[1], [0], [0], [1], [0, 0, 1, 1], [], []>} : vector<32x16xbf16>, vector<16x8xbf16>, vector<32x8xf32> -> vector<32x8xf32>
    %58 = vector.extract_strided_slice %41 {offsets = [5, 0, 0], sizes = [1, 16, 8], strides = [1, 1, 1]} : vector<16x16x8xbf16> to vector<1x16x8xbf16>
    %59 = vector.shape_cast %58 : vector<1x16x8xbf16> to vector<16x8xbf16>
    %cst_51 = arith.constant dense<0.000000e+00> : vector<32x8xf32>
    %60 = tpu.matmul %42, %59, %cst_51 {dimension_numbers = #tpu.dot_dimension_numbers<[1], [0], [0], [1], [0, 0, 1, 1], [], []>} : vector<32x16xbf16>, vector<16x8xbf16>, vector<32x8xf32> -> vector<32x8xf32>
    %61 = vector.extract_strided_slice %41 {offsets = [6, 0, 0], sizes = [1, 16, 8], strides = [1, 1, 1]} : vector<16x16x8xbf16> to vector<1x16x8xbf16>
    %62 = vector.shape_cast %61 : vector<1x16x8xbf16> to vector<16x8xbf16>
    %cst_52 = arith.constant dense<0.000000e+00> : vector<32x8xf32>
    %63 = tpu.matmul %42, %62, %cst_52 {dimension_numbers = #tpu.dot_dimension_numbers<[1], [0], [0], [1], [0, 0, 1, 1], [], []>} : vector<32x16xbf16>, vector<16x8xbf16>, vector<32x8xf32> -> vector<32x8xf32>
    %64 = vector.extract_strided_slice %41 {offsets = [7, 0, 0], sizes = [1, 16, 8], strides = [1, 1, 1]} : vector<16x16x8xbf16> to vector<1x16x8xbf16>
    %65 = vector.shape_cast %64 : vector<1x16x8xbf16> to vector<16x8xbf16>
    %cst_53 = arith.constant dense<0.000000e+00> : vector<32x8xf32>
    %66 = tpu.matmul %42, %65, %cst_53 {dimension_numbers = #tpu.dot_dimension_numbers<[1], [0], [0], [1], [0, 0, 1, 1], [], []>} : vector<32x16xbf16>, vector<16x8xbf16>, vector<32x8xf32> -> vector<32x8xf32>
    %67 = vector.extract_strided_slice %41 {offsets = [8, 0, 0], sizes = [1, 16, 8], strides = [1, 1, 1]} : vector<16x16x8xbf16> to vector<1x16x8xbf16>
    %68 = vector.shape_cast %67 : vector<1x16x8xbf16> to vector<16x8xbf16>
    %cst_54 = arith.constant dense<0.000000e+00> : vector<32x8xf32>
    %69 = tpu.matmul %42, %68, %cst_54 {dimension_numbers = #tpu.dot_dimension_numbers<[1], [0], [0], [1], [0, 0, 1, 1], [], []>} : vector<32x16xbf16>, vector<16x8xbf16>, vector<32x8xf32> -> vector<32x8xf32>
    %70 = vector.extract_strided_slice %41 {offsets = [9, 0, 0], sizes = [1, 16, 8], strides = [1, 1, 1]} : vector<16x16x8xbf16> to vector<1x16x8xbf16>
    %71 = vector.shape_cast %70 : vector<1x16x8xbf16> to vector<16x8xbf16>
    %cst_55 = arith.constant dense<0.000000e+00> : vector<32x8xf32>
    %72 = tpu.matmul %42, %71, %cst_55 {dimension_numbers = #tpu.dot_dimension_numbers<[1], [0], [0], [1], [0, 0, 1, 1], [], []>} : vector<32x16xbf16>, vector<16x8xbf16>, vector<32x8xf32> -> vector<32x8xf32>
    %73 = vector.extract_strided_slice %41 {offsets = [10, 0, 0], sizes = [1, 16, 8], strides = [1, 1, 1]} : vector<16x16x8xbf16> to vector<1x16x8xbf16>
    %74 = vector.shape_cast %73 : vector<1x16x8xbf16> to vector<16x8xbf16>
    %cst_56 = arith.constant dense<0.000000e+00> : vector<32x8xf32>
    %75 = tpu.matmul %42, %74, %cst_56 {dimension_numbers = #tpu.dot_dimension_numbers<[1], [0], [0], [1], [0, 0, 1, 1], [], []>} : vector<32x16xbf16>, vector<16x8xbf16>, vector<32x8xf32> -> vector<32x8xf32>
    %76 = vector.extract_strided_slice %41 {offsets = [11, 0, 0], sizes = [1, 16, 8], strides = [1, 1, 1]} : vector<16x16x8xbf16> to vector<1x16x8xbf16>
    %77 = vector.shape_cast %76 : vector<1x16x8xbf16> to vector<16x8xbf16>
    %cst_57 = arith.constant dense<0.000000e+00> : vector<32x8xf32>
    %78 = tpu.matmul %42, %77, %cst_57 {dimension_numbers = #tpu.dot_dimension_numbers<[1], [0], [0], [1], [0, 0, 1, 1], [], []>} : vector<32x16xbf16>, vector<16x8xbf16>, vector<32x8xf32> -> vector<32x8xf32>
    %79 = vector.extract_strided_slice %41 {offsets = [12, 0, 0], sizes = [1, 16, 8], strides = [1, 1, 1]} : vector<16x16x8xbf16> to vector<1x16x8xbf16>
    %80 = vector.shape_cast %79 : vector<1x16x8xbf16> to vector<16x8xbf16>
    %cst_58 = arith.constant dense<0.000000e+00> : vector<32x8xf32>
    %81 = tpu.matmul %42, %80, %cst_58 {dimension_numbers = #tpu.dot_dimension_numbers<[1], [0], [0], [1], [0, 0, 1, 1], [], []>} : vector<32x16xbf16>, vector<16x8xbf16>, vector<32x8xf32> -> vector<32x8xf32>
    %82 = vector.extract_strided_slice %41 {offsets = [13, 0, 0], sizes = [1, 16, 8], strides = [1, 1, 1]} : vector<16x16x8xbf16> to vector<1x16x8xbf16>
    %83 = vector.shape_cast %82 : vector<1x16x8xbf16> to vector<16x8xbf16>
    %cst_59 = arith.constant dense<0.000000e+00> : vector<32x8xf32>
    %84 = tpu.matmul %42, %83, %cst_59 {dimension_numbers = #tpu.dot_dimension_numbers<[1], [0], [0], [1], [0, 0, 1, 1], [], []>} : vector<32x16xbf16>, vector<16x8xbf16>, vector<32x8xf32> -> vector<32x8xf32>
    %85 = vector.extract_strided_slice %41 {offsets = [14, 0, 0], sizes = [1, 16, 8], strides = [1, 1, 1]} : vector<16x16x8xbf16> to vector<1x16x8xbf16>
    %86 = vector.shape_cast %85 : vector<1x16x8xbf16> to vector<16x8xbf16>
    %cst_60 = arith.constant dense<0.000000e+00> : vector<32x8xf32>
    %87 = tpu.matmul %42, %86, %cst_60 {dimension_numbers = #tpu.dot_dimension_numbers<[1], [0], [0], [1], [0, 0, 1, 1], [], []>} : vector<32x16xbf16>, vector<16x8xbf16>, vector<32x8xf32> -> vector<32x8xf32>
    %88 = vector.extract_strided_slice %41 {offsets = [15, 0, 0], sizes = [1, 16, 8], strides = [1, 1, 1]} : vector<16x16x8xbf16> to vector<1x16x8xbf16>
    %89 = vector.shape_cast %88 : vector<1x16x8xbf16> to vector<16x8xbf16>
    %cst_61 = arith.constant dense<0.000000e+00> : vector<32x8xf32>
    %90 = tpu.matmul %42, %89, %cst_61 {dimension_numbers = #tpu.dot_dimension_numbers<[1], [0], [0], [1], [0, 0, 1, 1], [], []>} : vector<32x16xbf16>, vector<16x8xbf16>, vector<32x8xf32> -> vector<32x8xf32>
    %91 = vector.shape_cast %45 : vector<32x8xf32> to vector<1x32x8xf32>
    %92 = vector.shape_cast %48 : vector<32x8xf32> to vector<1x32x8xf32>
    %93 = vector.shape_cast %51 : vector<32x8xf32> to vector<1x32x8xf32>
    %94 = vector.shape_cast %54 : vector<32x8xf32> to vector<1x32x8xf32>
    %95 = vector.shape_cast %57 : vector<32x8xf32> to vector<1x32x8xf32>
    %96 = vector.shape_cast %60 : vector<32x8xf32> to vector<1x32x8xf32>
    %97 = vector.shape_cast %63 : vector<32x8xf32> to vector<1x32x8xf32>
    %98 = vector.shape_cast %66 : vector<32x8xf32> to vector<1x32x8xf32>
    %99 = vector.shape_cast %69 : vector<32x8xf32> to vector<1x32x8xf32>
    %100 = vector.shape_cast %72 : vector<32x8xf32> to vector<1x32x8xf32>
    %101 = vector.shape_cast %75 : vector<32x8xf32> to vector<1x32x8xf32>
    %102 = vector.shape_cast %78 : vector<32x8xf32> to vector<1x32x8xf32>
    %103 = vector.shape_cast %81 : vector<32x8xf32> to vector<1x32x8xf32>
    %104 = vector.shape_cast %84 : vector<32x8xf32> to vector<1x32x8xf32>
    %105 = vector.shape_cast %87 : vector<32x8xf32> to vector<1x32x8xf32>
    %106 = vector.shape_cast %90 : vector<32x8xf32> to vector<1x32x8xf32>
    %107 = tpu.concatenate %91, %92, %93, %94, %95, %96, %97, %98, %99, %100, %101, %102, %103, %104, %105, %106 in 0 : vector<1x32x8xf32>, vector<1x32x8xf32>, vector<1x32x8xf32>, vector<1x32x8xf32>, vector<1x32x8xf32>, vector<1x32x8xf32>, vector<1x32x8xf32>, vector<1x32x8xf32>, vector<1x32x8xf32>, vector<1x32x8xf32>, vector<1x32x8xf32>, vector<1x32x8xf32>, vector<1x32x8xf32>, vector<1x32x8xf32>, vector<1x32x8xf32>, vector<1x32x8xf32> -> vector<16x32x8xf32>
    %cst_62 = arith.constant 2.500000e-01 : f32
    %108 = vector.broadcast %cst_62 : f32 to vector<16x32x8xf32>
    %109 = arith.mulf %107, %108 : vector<16x32x8xf32>
    %cst_63 = arith.constant 7.500000e-01 : f32
    %110 = vector.broadcast %cst_63 : f32 to vector<16x32x8xf32>
    %111 = arith.mulf %107, %110 : vector<16x32x8xf32>
    %112 = vector.shape_cast %109 : vector<16x32x8xf32> to vector<16x1x32x8xf32>
    %113 = vector.shape_cast %111 : vector<16x32x8xf32> to vector<16x1x32x8xf32>
    %114 = tpu.concatenate %112, %113 in 1 : vector<16x1x32x8xf32>, vector<16x1x32x8xf32> -> vector<16x2x32x8xf32>
    %115 = vector.shape_cast %114 : vector<16x2x32x8xf32> to vector<32x32x8xf32>
    %cst_64 = arith.constant 7.500000e-01 : f32
    %116 = vector.broadcast %cst_64 : f32 to vector<16x32x8xf32>
    %117 = arith.mulf %107, %116 : vector<16x32x8xf32>
    %cst_65 = arith.constant 2.500000e-01 : f32
    %118 = vector.broadcast %cst_65 : f32 to vector<16x32x8xf32>
    %119 = arith.mulf %107, %118 : vector<16x32x8xf32>
    %120 = vector.shape_cast %117 : vector<16x32x8xf32> to vector<16x1x32x8xf32>
    %121 = vector.shape_cast %119 : vector<16x32x8xf32> to vector<16x1x32x8xf32>
    %122 = tpu.concatenate %120, %121 in 1 : vector<16x1x32x8xf32>, vector<16x1x32x8xf32> -> vector<16x2x32x8xf32>
    %123 = vector.shape_cast %122 : vector<16x2x32x8xf32> to vector<32x32x8xf32>
    %124 = vector.extract_strided_slice %115 {offsets = [1, 0, 0], sizes = [31, 32, 8], strides = [1, 1, 1]} : vector<32x32x8xf32> to vector<31x32x8xf32>
    %cst_66 = arith.constant 0.000000e+00 : f32
    %125 = vector.broadcast %cst_66 : f32 to vector<1x32x8xf32>
    %126 = tpu.concatenate %124, %125 in 0 : vector<31x32x8xf32>, vector<1x32x8xf32> -> vector<32x32x8xf32>
    %cst_67 = arith.constant 0.000000e+00 : f32
    %127 = vector.broadcast %cst_67 : f32 to vector<1x32x8xf32>
    %128 = vector.extract_strided_slice %123 {offsets = [0, 0, 0], sizes = [31, 32, 8], strides = [1, 1, 1]} : vector<32x32x8xf32> to vector<31x32x8xf32>
    %129 = tpu.concatenate %127, %128 in 0 : vector<1x32x8xf32>, vector<31x32x8xf32> -> vector<32x32x8xf32>
    %130 = arith.addf %126, %129 : vector<32x32x8xf32>
    %c0_68 = arith.constant 0 : index
    %c0_69 = arith.constant 0 : index
    %c0_70 = arith.constant 0 : index
    %c0_71 = arith.constant 0 : index
    %131 = vector.load %arg2[%c0_68, %c0_69, %c0_70, %c0_71] : memref<1x32x32x8xbf16, #tpu.memory_space<vmem>>, vector<1x32x32x8xbf16>
    %132 = vector.shape_cast %131 : vector<1x32x32x8xbf16> to vector<32x32x8xbf16>
    %133 = arith.extf %132 : vector<32x32x8xbf16> to vector<32x32x8xf32>
    %134 = arith.addf %130, %133 : vector<32x32x8xf32>
    %135 = arith.truncf %134 : vector<32x32x8xf32> to vector<32x32x8xbf16>
    %cst_72 = arith.constant 0.000000e+00 : bf16
    %136 = vector.broadcast %cst_72 : bf16 to vector<1x34x8xbf16>
    %c0_73 = arith.constant 0 : index
    %c0_74 = arith.constant 0 : index
    %c0_75 = arith.constant 0 : index
    %137 = vector.load %arg12[%c0_73, %c0_74, %c0_75] : memref<34x34x8xbf16, #tpu.memory_space<vmem>>, vector<1x34x8xbf16>
    tpu.vector_store %arg12[%c0_73, %c0_74, %c0_75], %136 {strides = array<i32>} : memref<34x34x8xbf16, #tpu.memory_space<vmem>>, vector<1x34x8xbf16>,
    %cst_76 = arith.constant 0.000000e+00 : bf16
    %138 = vector.broadcast %cst_76 : bf16 to vector<1x34x8xbf16>
    %c33 = arith.constant 33 : index
    %c0_77 = arith.constant 0 : index
    %c0_78 = arith.constant 0 : index
    %139 = vector.load %arg12[%c33, %c0_77, %c0_78] : memref<34x34x8xbf16, #tpu.memory_space<vmem>>, vector<1x34x8xbf16>
    tpu.vector_store %arg12[%c33, %c0_77, %c0_78], %138 {strides = array<i32>} : memref<34x34x8xbf16, #tpu.memory_space<vmem>>, vector<1x34x8xbf16>,
    %cst_79 = arith.constant 0.000000e+00 : bf16
    %140 = vector.broadcast %cst_79 : bf16 to vector<34x1x8xbf16>
    %c0_80 = arith.constant 0 : index
    %c0_81 = arith.constant 0 : index
    %c0_82 = arith.constant 0 : index
    %141 = vector.load %arg12[%c0_80, %c0_81, %c0_82] : memref<34x34x8xbf16, #tpu.memory_space<vmem>>, vector<34x1x8xbf16>
    tpu.vector_store %arg12[%c0_80, %c0_81, %c0_82], %140 {strides = array<i32>} : memref<34x34x8xbf16, #tpu.memory_space<vmem>>, vector<34x1x8xbf16>,
    %cst_83 = arith.constant 0.000000e+00 : bf16
    %142 = vector.broadcast %cst_83 : bf16 to vector<34x1x8xbf16>
    %c0_84 = arith.constant 0 : index
    %c33_85 = arith.constant 33 : index
    %c0_86 = arith.constant 0 : index
    %143 = vector.load %arg12[%c0_84, %c33_85, %c0_86] : memref<34x34x8xbf16, #tpu.memory_space<vmem>>, vector<34x1x8xbf16>
    tpu.vector_store %arg12[%c0_84, %c33_85, %c0_86], %142 {strides = array<i32>} : memref<34x34x8xbf16, #tpu.memory_space<vmem>>, vector<34x1x8xbf16>,
    %c1_87 = arith.constant 1 : index
    %c1_88 = arith.constant 1 : index
    %c0_89 = arith.constant 0 : index
    %144 = vector.load %arg12[%c1_87, %c1_88, %c0_89] : memref<34x34x8xbf16, #tpu.memory_space<vmem>>, vector<32x32x8xbf16>
    tpu.vector_store %arg12[%c1_87, %c1_88, %c0_89], %135 {strides = array<i32>} : memref<34x34x8xbf16, #tpu.memory_space<vmem>>, vector<32x32x8xbf16>,
    %c0_90 = arith.constant 0 : index
    %c0_91 = arith.constant 0 : index
    %c0_92 = arith.constant 0 : index
    %145 = vector.load %arg12[%c0_90, %c0_91, %c0_92] : memref<34x34x8xbf16, #tpu.memory_space<vmem>>, vector<34x32x8xbf16>
    %c0_93 = arith.constant 0 : index
    %c1_94 = arith.constant 1 : index
    %c0_95 = arith.constant 0 : index
    %146 = vector.load %arg12[%c0_93, %c1_94, %c0_95] : memref<34x34x8xbf16, #tpu.memory_space<vmem>>, vector<34x32x8xbf16>
    %c0_96 = arith.constant 0 : index
    %c2_97 = arith.constant 2 : index
    %c0_98 = arith.constant 0 : index
    %147 = vector.load %arg12[%c0_96, %c2_97, %c0_98] : memref<34x34x8xbf16, #tpu.memory_space<vmem>>, vector<34x32x8xbf16>
    %148 = tpu.concatenate %145, %146, %147 in 2 : vector<34x32x8xbf16>, vector<34x32x8xbf16>, vector<34x32x8xbf16> -> vector<34x32x24xbf16>
    %149 = vector.extract_strided_slice %148 {offsets = [0, 0, 0], sizes = [32, 32, 24], strides = [1, 1, 1]} : vector<34x32x24xbf16> to vector<32x32x24xbf16>
    %c0_99 = arith.constant 0 : index
    %c0_100 = arith.constant 0 : index
    %c0_101 = arith.constant 0 : index
    %150 = vector.load %arg7[%c0_99, %c0_100, %c0_101] : memref<3x24x8xbf16, #tpu.memory_space<vmem>>, vector<1x24x8xbf16>
    %151 = vector.shape_cast %150 : vector<1x24x8xbf16> to vector<24x8xbf16>
    %cst_102 = arith.constant dense<0.000000e+00> : vector<32x32x8xf32>
    %152 = tpu.matmul %149, %151, %cst_102 {dimension_numbers = #tpu.dot_dimension_numbers<[2], [0], [0, 1], [1], [0, 0, 0, 1, 1, 1], [], []>} : vector<32x32x24xbf16>, vector<24x8xbf16>, vector<32x32x8xf32> -> vector<32x32x8xf32>
    %153 = vector.extract_strided_slice %148 {offsets = [1, 0, 0], sizes = [32, 32, 24], strides = [1, 1, 1]} : vector<34x32x24xbf16> to vector<32x32x24xbf16>
    %c1_103 = arith.constant 1 : index
    %c0_104 = arith.constant 0 : index
    %c0_105 = arith.constant 0 : index
    %154 = vector.load %arg7[%c1_103, %c0_104, %c0_105] : memref<3x24x8xbf16, #tpu.memory_space<vmem>>, vector<1x24x8xbf16>
    %155 = vector.shape_cast %154 : vector<1x24x8xbf16> to vector<24x8xbf16>
    %cst_106 = arith.constant dense<0.000000e+00> : vector<32x32x8xf32>
    %156 = tpu.matmul %153, %155, %cst_106 {dimension_numbers = #tpu.dot_dimension_numbers<[2], [0], [0, 1], [1], [0, 0, 0, 1, 1, 1], [], []>} : vector<32x32x24xbf16>, vector<24x8xbf16>, vector<32x32x8xf32> -> vector<32x32x8xf32>
    %157 = arith.addf %152, %156 : vector<32x32x8xf32>
    %158 = vector.extract_strided_slice %148 {offsets = [2, 0, 0], sizes = [32, 32, 24], strides = [1, 1, 1]} : vector<34x32x24xbf16> to vector<32x32x24xbf16>
    %c2_107 = arith.constant 2 : index
    %c0_108 = arith.constant 0 : index
    %c0_109 = arith.constant 0 : index
    %159 = vector.load %arg7[%c2_107, %c0_108, %c0_109] : memref<3x24x8xbf16, #tpu.memory_space<vmem>>, vector<1x24x8xbf16>
    %160 = vector.shape_cast %159 : vector<1x24x8xbf16> to vector<24x8xbf16>
    %cst_110 = arith.constant dense<0.000000e+00> : vector<32x32x8xf32>
    %161 = tpu.matmul %158, %160, %cst_110 {dimension_numbers = #tpu.dot_dimension_numbers<[2], [0], [0, 1], [1], [0, 0, 0, 1, 1, 1], [], []>} : vector<32x32x24xbf16>, vector<24x8xbf16>, vector<32x32x8xf32> -> vector<32x32x8xf32>
    %162 = arith.addf %157, %161 : vector<32x32x8xf32>
    %c0_111 = arith.constant 0 : index
    %c0_112 = arith.constant 0 : index
    %163 = vector.load %arg8[%c0_111, %c0_112] : memref<1x8xf32, #tpu.memory_space<vmem>>, vector<1x8xf32>
    %164 = vector.shape_cast %163 : vector<1x8xf32> to vector<8xf32>
    %165 = vector.shape_cast %164 : vector<8xf32> to vector<1x1x8xf32>
    %166 = vector.broadcast %165 : vector<1x1x8xf32> to vector<32x32x8xf32>
    %167 = arith.mulf %162, %166 : vector<32x32x8xf32>
    %c0_113 = arith.constant 0 : index
    %c0_114 = arith.constant 0 : index
    %168 = vector.load %arg9[%c0_113, %c0_114] : memref<1x8xf32, #tpu.memory_space<vmem>>, vector<1x8xf32>
    %169 = vector.shape_cast %168 : vector<1x8xf32> to vector<8xf32>
    %170 = vector.shape_cast %169 : vector<8xf32> to vector<1x1x8xf32>
    %171 = vector.broadcast %170 : vector<1x1x8xf32> to vector<32x32x8xf32>
    %172 = arith.addf %167, %171 : vector<32x32x8xf32>
    %cst_115 = arith.constant 0.000000e+00 : f32
    %173 = vector.broadcast %cst_115 : f32 to vector<32x32x8xf32>
    %174 = arith.maximumf %172, %173 : vector<32x32x8xf32>
    %175 = arith.truncf %174 : vector<32x32x8xf32> to vector<32x32x8xbf16>
    %c0_116 = arith.constant 0 : index
    %c0_117 = arith.constant 0 : index
    %c0_118 = arith.constant 0 : index
    %c0_119 = arith.constant 0 : index
    %176 = vector.load %arg10[%c0_116, %c0_117, %c0_118, %c0_119] : memref<1x32x32x8xbf16, #tpu.memory_space<vmem>>, vector<1x32x32x8xbf16>
    %177 = vector.shape_cast %176 : vector<1x32x32x8xbf16> to vector<32x32x8xbf16>
    %178 = vector.shape_cast %175 : vector<32x32x8xbf16> to vector<1x32x32x8xbf16>
    tpu.vector_store %arg10[%c0_116, %c0_117, %c0_118, %c0_119], %178 {strides = array<i32>} : memref<1x32x32x8xbf16, #tpu.memory_space<vmem>>, vector<1x32x32x8xbf16>,
    return
  }
  func.func @transform_0(%arg0: i32) -> (i32, i32, i32, i32) {
    %c0_i32 = arith.constant 0 : i32
    %c0_i32_0 = arith.constant 0 : i32
    %c0_i32_1 = arith.constant 0 : i32
    %c0_i32_2 = arith.constant 0 : i32
    return %arg0, %c0_i32, %c0_i32_0, %c0_i32_1 : i32, i32, i32, i32
  }
  func.func @transform_1(%arg0: i32) -> (i32, i32, i32, i32) {
    %c0_i32 = arith.constant 0 : i32
    %c0_i32_0 = arith.constant 0 : i32
    %c0_i32_1 = arith.constant 0 : i32
    %c0_i32_2 = arith.constant 0 : i32
    return %arg0, %c0_i32, %c0_i32_0, %c0_i32_1 : i32, i32, i32, i32
  }
  func.func @transform_2(%arg0: i32) -> (i32, i32, i32) {
    %c0_i32 = arith.constant 0 : i32
    %c0_i32_0 = arith.constant 0 : i32
    %c0_i32_1 = arith.constant 0 : i32
    %c0_i32_2 = arith.constant 0 : i32
    return %c0_i32, %c0_i32_0, %c0_i32_1 : i32, i32, i32
  }
  func.func @transform_3(%arg0: i32) -> (i32, i32) {
    %c0_i32 = arith.constant 0 : i32
    %c0_i32_0 = arith.constant 0 : i32
    %c0_i32_1 = arith.constant 0 : i32
    return %c0_i32, %c0_i32_0 : i32, i32
  }
  func.func @transform_4(%arg0: i32) -> (i32, i32) {
    %c0_i32 = arith.constant 0 : i32
    %c0_i32_0 = arith.constant 0 : i32
    %c0_i32_1 = arith.constant 0 : i32
    return %c0_i32, %c0_i32_0 : i32, i32
  }
  func.func @transform_5(%arg0: i32) -> (i32, i32) {
    %c0_i32 = arith.constant 0 : i32
    %c0_i32_0 = arith.constant 0 : i32
    %c0_i32_1 = arith.constant 0 : i32
    return %c0_i32, %c0_i32_0 : i32, i32
  }
  func.func @transform_6(%arg0: i32) -> (i32, i32, i32) {
    %c0_i32 = arith.constant 0 : i32
    %c0_i32_0 = arith.constant 0 : i32
    %c0_i32_1 = arith.constant 0 : i32
    %c0_i32_2 = arith.constant 0 : i32
    return %c0_i32, %c0_i32_0, %c0_i32_1 : i32, i32, i32
  }
  func.func @transform_7(%arg0: i32) -> (i32, i32) {
    %c0_i32 = arith.constant 0 : i32
    %c0_i32_0 = arith.constant 0 : i32
    %c0_i32_1 = arith.constant 0 : i32
    return %c0_i32, %c0_i32_0 : i32, i32
  }
  func.func @transform_8(%arg0: i32) -> (i32, i32) {
    %c0_i32 = arith.constant 0 : i32
    %c0_i32_0 = arith.constant 0 : i32
    %c0_i32_1 = arith.constant 0 : i32
    return %c0_i32, %c0_i32_0 : i32, i32
  }
  func.func @transform_9(%arg0: i32) -> (i32, i32, i32, i32) {
    %c0_i32 = arith.constant 0 : i32
    %c0_i32_0 = arith.constant 0 : i32
    %c0_i32_1 = arith.constant 0 : i32
    %c0_i32_2 = arith.constant 0 : i32
    return %arg0, %c0_i32, %c0_i32_0, %c0_i32_1 : i32, i32, i32, i32
  }
}

</mosaic_0001>

<bundles_post_ra>
// kernel: tpu_custom_call.1
= control target key start
LH: loop header
LB: loop body
LE: loop exit
PB: predicated region body
PF: predicated region fallthrough
CT: control target
= control target key end

     0   :  { %s14011_s30 = smov 0   ;;  %s19864_s0 = inlined_call_operand.vmem [shape: bf16[2,16,16,4], index: 0, kind: input, shape index: {}]   ;;  %s19865_s1 = inlined_call_operand.vmem [shape: bf16[2,32,32,8], index: 1, kind: input, shape index: {}]   ;;  %s19866_s2 = inlined_call_operand.vmem [shape: bf16[3,12,8], index: 2, kind: input, shape index: {}]   ;;  %s19867_s3 = inlined_call_operand.vmem [shape: f32[1,8], index: 3, kind: input, shape index: {}]   ;;  %s19868_s4 = inlined_call_operand.vmem [shape: f32[1,8], index: 4, kind: input, shape index: {}]   ;;  %s19869_s5 = inlined_call_operand.vmem [shape: bf16[32,16], index: 5, kind: input, shape index: {}]   ;;  %s19870_s6 = inlined_call_operand.vmem [shape: bf16[3,24,8], index: 6, kind: input, shape index: {}]   ;;  %s19871_s7 = inlined_call_operand.vmem [shape: f32[1,8], index: 7, kind: input, shape index: {}]   ;;  %s19872_s8 = inlined_call_operand.vmem [shape: f32[1,8], index: 8, kind: input, shape index: {}]   ;;  %s19873_s9 = inlined_call_operand.vmem [shape: bf16[2,32,32,8], index: 9, kind: output, shape index: {}]  }
   0x1 LB: > { %s11159_s10 = sadd.s32 4294967295, %s13955_s30   ;;  %p11163_p0 = scmp.ge.s32.totalorder %s13955_s30, 1  ;;  %s13955_s30 = sphi %s14011_s30, %s19_s30  }
   0x2   : > { %p297_p1 = scmp.lt.s32.totalorder %s13955_s30, 3 }
   0x4   : > { %p298_p2 = pnand %p11163_p0, %p297_p1 }
   0x6   : > { %301 = sbr.rel (%p298_p2) target bundleno = 1987 (0x7c3), region = 56 }
   0xd   : > { %p338_p3 = scmp.lt.s32.totalorder %s11159_s10, 1  ;;  %vm357_vm0 = vcmask 24576   ;;  %vm364_vm1 = vsmask.f32 256  ;;  %v369_v1 = vld [vmem:[#allocation2 + $0xc] sm:$0x1] }
   0xe   : > { %vm14021_vm2 = vmand %vm357_vm0, %vm364_vm1  ;;  %vm420_vm3 = vsmask.f32 7938  ;;  %v425_v2 = vld [vmem:[#allocation2 + $0x14] sm:$0x1]  ;;  %vm354_vm4 = vcmask 27648   ;;  %vm3858_vm6 = vcmask 57344  }
   0xf   : > { %s20421_s10 = smov (!%p338_p3, %s11159_s10), 1  ;;  %v370_v3 = vsel %vm14021_vm2, 0, %v369_v1  ;;  %vm14031_vm5 = vmand %vm357_vm0, %vm420_vm3  ;;  %vm508_vm7 = vsmask.f32 4368  ;;  %vm3853_vm8 = vcmask 60416   ;;  %v13957_v8 = vmov 0  }
  0x10   : > { %371 = vst [vmem:[#allocation2 + $0xc] sm:$0x1] %v370_v3  ;;  %v426_v5 = vsel %vm14031_vm5, 0, %v425_v2  ;;  %s11915_s11 = sshll.u32 %s20421_s10, 7  ;;  %v372_v6 = vld [vmem:[#allocation2 + $0x18] sm:$0x1]  ;;  %vm14061_vm9 = vmand %vm3858_vm6, %vm364_vm1 }
  0x11   : > { %427 = vst [vmem:[#allocation2 + $0x14] sm:$0x1] %v426_v5  ;;  %v428_v7 = vld [vmem:[#allocation2 + $0x20] sm:$0x1]  ;;  %355 = vst.msk [vmem:[#allocation2] sm:$0xf] %vm354_vm4, %v13957_v8  ;;  %s14057_s14 = scalar_lea.vmem %s19864_s0, %s11915_s11 }
  0x12   : > { %356 = vst.msk [vmem:[#allocation2 + $0x4] sm:$0xf] %vm354_vm4, %v13957_v8  ;;  %360 = vst.msk [vmem:[#allocation2 + $0xcc] sm:$0xf] %vm354_vm4, %v13957_v8  ;;  %v373_v10 = vsel %vm14021_vm2, 0, %v372_v6  ;;  %v429_v11 = vsel %vm14031_vm5, 0, %v428_v7 }
  0x13   : > { %358 = vst.msk [vmem:[#allocation2 + $0x8] sm:$0x1] %vm357_vm0, %v13957_v8  ;;  %362 = vst.msk [vmem:[#allocation2 + $0xd4] sm:$0x1] %vm357_vm0, %v13957_v8  ;;  %v378_v12 = vld [vmem:[#allocation2 + $0x30] sm:$0x1] }
  0x14   : > { %361 = vst.msk [vmem:[#allocation2 + $0xd0] sm:$0xf] %vm354_vm4, %v13957_v8  ;;  %v434_v13 = vld [vmem:[#allocation2 + $0x38] sm:$0x1]  ;;  %v476_v14 = vld [vmem:[%s14057_s14] sm:$0xf]  ;;  %vm14073_vm10 = vmand %vm3858_vm6, %vm420_vm3 }
  0x15   : > { %3854 = vst.msk [vmem:[#allocation3] sm:$0xf] %vm3853_vm8, %v13957_v8  ;;  %3855 = vst.msk [vmem:[#allocation3 + $0x4] sm:$0xf] %vm3853_vm8, %v13957_v8  ;;  %v477_v15 = vld [vmem:[%s14057_s14 + $0x4] sm:$0xf] }
  0x16   : > { %3856 = vst.msk [vmem:[#allocation3 + $0x8] sm:$0xf] %vm3853_vm8, %v13957_v8  ;;  %3857 = vst.msk [vmem:[#allocation3 + $0xc] sm:$0xf] %vm3853_vm8, %v13957_v8  ;;  %v19995_v16 = vmov 0  ;;  %v379_v17 = vsel %vm14021_vm2, 0, %v378_v12 }
  0x17   : > { %3859 = vst.msk [vmem:[#allocation3 + $0x10] sm:$0x1] %vm3858_vm6, %v13957_v8  ;;  %3865 = vst.msk [vmem:[#allocation3 + $0x2a4] sm:$0x1] %vm3858_vm6, %v13957_v8  ;;  %v19996_v16 = vsel %vm14073_vm10, 4294967295, %v19995_v16  ;;  %v435_v18 = vsel %vm14031_vm5, 0, %v434_v13 }
  0x18   : > { %3861 = vst.msk [vmem:[#allocation3 + $0x294] sm:$0xf] %vm3853_vm8, %v13957_v8  ;;  %3862 = vst.msk [vmem:[#allocation3 + $0x298] sm:$0xf] %vm3853_vm8, %v13957_v8  ;;  %v511_v19 = vshrl.u32 %v476_v14, 16  ;;  %v514_v20 = vshll.u32 %v476_v14, 16 }
  0x19   : > { %3863 = vst.msk [vmem:[#allocation3 + $0x29c] sm:$0xf] %vm3853_vm8, %v13957_v8  ;;  %3864 = vst.msk [vmem:[#allocation3 + $0x2a0] sm:$0xf] %vm3853_vm8, %v13957_v8  ;;  %v519_v21 = vshrl.u32 %v477_v15, 16  ;;  %v522_v22 = vshll.u32 %v477_v15, 16 }
  0x1a   : > { %19997 = vst [vmem:[#allocation4_spill] sm:$0xff] %v19996_v16  ;;  %374 = vst [vmem:[#allocation2 + $0x18] sm:$0x1] %v373_v10  ;;  %v478_v23 = vld [vmem:[%s14057_s14 + $0x8] sm:$0xf]  ;;  %v513_v29 = vrot.slane %v511_v19, 7 }
  0x1b   : > { %430 = vst [vmem:[#allocation2 + $0x20] sm:$0x1] %v429_v11  ;;  %380 = vst [vmem:[#allocation2 + $0x30] sm:$0x1] %v379_v17  ;;  %v479_v24 = vld [vmem:[%s14057_s14 + $0xc] sm:$0xf] }
  0x1c   : > { %436 = vst [vmem:[#allocation2 + $0x38] sm:$0x1] %v435_v18  ;;  %v528_v25 = vshrl.u32 %v478_v23, 16  ;;  %v531_v26 = vshll.u32 %v478_v23, 16  ;;  %v482_v27 = vld [vmem:[%s14057_s14 + $0x18] sm:$0xf]  ;;  %vm14086_vm11 = vmor %vm364_vm1, %vm508_vm7  ;;  %v516_v40 = vor.u32 %v514_v20, %v513_v29 }
  0x1d   : > { %v521_v30 = vrot.slane %v519_v21, 7  ;;  %v536_v31 = vshrl.u32 %v479_v24, 16  ;;  %v539_v32 = vshll.u32 %v479_v24, 16  ;;  %v483_v33 = vld [vmem:[%s14057_s14 + $0x1c] sm:$0xf]  ;;  %vm14093_vm12 = vmand %vm354_vm4, %vm420_vm3  ;;  %v562_v37 = vshrl.u32 %v482_v27, 16 }
  0x1e   : > { %v833_v35 = vld [vmem:[#allocation2 + $0xc] sm:$0xf]  ;;  %v530_v36 = vrot.slane %v528_v25, 7  ;;  %v565_v38 = vshll.u32 %v482_v27, 16  ;;  %v570_v39 = vshrl.u32 %v483_v33, 16  ;;  %v517_v41 = vrot.slane %v513_v29, 4 }
  0x1f   : > { %v524_v42 = vor.u32 %v522_v22, %v521_v30  ;;  %v526_v43 = vrot.slane %v521_v30, 4  ;;  %v837_v44 = vld [vmem:[#allocation2 + $0x14] sm:$0x1]  ;;  %v375_v45 = vld [vmem:[#allocation2 + $0x24] sm:$0x1]  ;;  %v538_v48 = vrot.slane %v536_v31, 7  ;;  %v834_v52 = vsel %vm14093_vm12, %v516_v40, %v833_v35 }
  0x20   : > { %v533_v46 = vor.u32 %v531_v26, %v530_v36  ;;  %v534_v47 = vrot.slane %v530_v36, 4  ;;  %v564_v49 = vrot.slane %v562_v37, 7  ;;  %v431_v50 = vld [vmem:[#allocation2 + $0x2c] sm:$0x1]  ;;  %v572_v56 = vrot.slane %v570_v39, 7  ;;  %s13958_s15 = smov 8  }
  0x21   : > { %v525_v51 = vsel %vm14086_vm11, %v517_v41, %v524_v42  ;;  %v838_v53 = vsel %vm14021_vm2, %v526_v43, %v837_v44  ;;  %v840_v54 = vld [vmem:[#allocation2 + $0x18] sm:$0xf]  ;;  %835 = vst [vmem:[#allocation2 + $0xc] sm:$0xf] %v834_v52  ;;  %v541_v57 = vor.u32 %v539_v32, %v538_v48  ;;  %v543_v58 = vrot.slane %v538_v48, 4  ;;  %s13959_s16 = smov 4  }
  0x22   : > { %v844_v55 = vld [vmem:[#allocation2 + $0x20] sm:$0x1]  ;;  %836 = vst.msk [vmem:[#allocation2 + $0x10] sm:$0xf] %vm354_vm4, %v525_v51  ;;  %839 = vst [vmem:[#allocation2 + $0x14] sm:$0x1] %v838_v53  ;;  %v841_v59 = vsel %vm14093_vm12, %v533_v46, %v840_v54  ;;  %v567_v60 = vor.u32 %v565_v38, %v564_v49 }
  0x23   : > { %v854_v61 = vld [vmem:[#allocation2 + $0x30] sm:$0xf]  ;;  %v858_v62 = vld [vmem:[#allocation2 + $0x38] sm:$0x1]  ;;  %vm1468_vm13 = vcmask 1046528   ;;  %v568_v63 = vrot.slane %v564_v49, 4  ;;  %v542_v6 = vsel %vm14086_vm11, %v534_v47, %v541_v57  ;;  %v845_v7 = vsel %vm14021_vm2, %v543_v58, %v844_v55 }
  0x24   : > { %842 = vst [vmem:[#allocation2 + $0x18] sm:$0xf] %v841_v59  ;;  %v573_v1 = vshll.u32 %v483_v33, 16  ;;  %v577_v2 = vrot.slane %v572_v56, 4  ;;  %v376_v3 = vsel %vm14021_vm2, 0, %v375_v45  ;;  %v855_v8 = vsel %vm14093_vm12, %v567_v60, %v854_v61  ;;  %s11916_s12 = sshll.u32 %s20421_s10, 9 }
  0x25   : > { %v14109_v5 = vld [vmem:[%s14057_s14 + $0x10] sm:$0xf]  ;;  %377 = vst [vmem:[#allocation2 + $0x24] sm:$0x1] %v376_v3  ;;  %v432_v10 = vsel %vm14031_vm5, 0, %v431_v50  ;;  %vm1676_vm15 = vcmask 1045504   ;;  %s18990_s20 = scalar_lea.vmem %s19873_s9, %s11916_s12 }
  0x26   : > { %v481_v11 = vld [vmem:[%s14057_s14 + $0x14] sm:$0xf]  ;;  %v384_v12 = vld [vmem:[#allocation2 + $0x48] sm:$0x1]  ;;  %843 = vst.msk [vmem:[#allocation2 + $0x1c] sm:$0xf] %vm354_vm4, %v542_v6  ;;  %v575_v13 = vor.u32 %v573_v1, %v572_v56  ;;  %v859_v14 = vsel %vm14021_vm2, %v577_v2, %v858_v62 }
  0x27   : > { %846 = vst [vmem:[#allocation2 + $0x20] sm:$0x1] %v845_v7  ;;  %856 = vst [vmem:[#allocation2 + $0x30] sm:$0xf] %v855_v8  ;;  %v545_v15 = vshrl.u32 %v14109_v5, 16  ;;  %v548_v17 = vshll.u32 %v14109_v5, 16 }
  0x28   : > { %433 = vst [vmem:[#allocation2 + $0x2c] sm:$0x1] %v432_v10  ;;  %v440_v18 = vld [vmem:[#allocation2 + $0x50] sm:$0x1]  ;;  %v14126_v19 = vld [vmem:[%s14057_s14 + $0x28] sm:$0xf]  ;;  %v576_v25 = vsel %vm14086_vm11, %v568_v63, %v575_v13 }
  0x29   : > { %860 = vst [vmem:[#allocation2 + $0x38] sm:$0x1] %v859_v14  ;;  %v553_v20 = vshrl.u32 %v481_v11, 16  ;;  %v556_v21 = vshll.u32 %v481_v11, 16  ;;  %v385_v22 = vsel %vm14021_vm2, 0, %v384_v12  ;;  %v441_v23 = vsel %vm14031_vm5, 0, %v440_v18 }
  0x2a   : > { %v14133_v24 = vld [vmem:[%s14057_s14 + $0x2c] sm:$0xf]  ;;  %v547_v26 = vrot.slane %v545_v15, 7  ;;  %386 = vst [vmem:[#allocation2 + $0x48] sm:$0x1] %v385_v22  ;;  %v596_v27 = vshrl.u32 %v14126_v19, 16 }
  0x2b   : > { %442 = vst [vmem:[#allocation2 + $0x50] sm:$0x1] %v441_v23  ;;  %v599_v29 = vshll.u32 %v14126_v19, 16  ;;  %v381_v30 = vld [vmem:[#allocation2 + $0x3c] sm:$0x1]  ;;  %v14140_v31 = vrot.slane %v553_v20, 7 }
  0x2c   : > { %vm1161_vm14 = vsmask.f32 7424  ;;  %857 = vst.msk [vmem:[#allocation2 + $0x34] sm:$0xf] %vm354_vm4, %v576_v25  ;;  %v604_v32 = vshrl.u32 %v14133_v24, 16  ;;  %v607_v33 = vshll.u32 %v14133_v24, 16  ;;  %v550_v61 = vor.u32 %v548_v17, %v547_v26 }
  0x2d   : > { %v382_v35 = vsel %vm14021_vm2, 0, %v381_v30  ;;  %v948_v36 = vld [vmem:[#allocation2 + $0x10] sm:$0xf]  ;;  %v1000_v37 = vld [vmem:[#allocation2 + $0xc] sm:$0xe]  ;;  %v551_v41 = vrot.slane %v547_v26, 4  ;;  %v558_v42 = vor.u32 %v556_v21, %v14140_v31 }
  0x2e   : > { %383 = vst [vmem:[#allocation2 + $0x3c] sm:$0x1] %v382_v35  ;;  %v13727_v38 = vld [vmem:[#allocation2 + $0x14] ss:$0 sps:$4 sm:$0x11]   ;;  %v11207_v39 = vcombine.low %v1000_v37, %v948_v36  ;;  %v560_v46 = vrot.slane %v14140_v31, 4 }
  0x2f   : > { %v947_v40 = vld [vmem:[#allocation2 + $0xc] sm:$0xf]  ;;  %v949_v44 = vld [vmem:[#allocation2 + $0x18] sm:$0xf]  ;;  %v14150_v47 = vrot.slane %v596_v27, 7  ;;  %v1473_v49 = vrot.slane %v13727_v38, 1  ;;  %v559_v52 = vsel %vm14086_vm11, %v551_v41, %v558_v42 }
  0x30   : > { %v14147_v43 = vcombine.low %v947_v40, %v948_v36  ;;  %v1001_v45 = vld [vmem:[#allocation2 + $0x18] sm:$0xe]  ;;  %v1472_v48 = vrot.slane %v11207_v39, 1  ;;  %v1182_v50 = vshll.u32 %v13727_v38, 16  ;;  %v950_v51 = vld [vmem:[#allocation2 + $0x1c] sm:$0xf] }
  0x31   : > { %v14156_v55 = vcombine.low %v949_v44, %v950_v51  ;;  %v11208_v56 = vcombine.low %v1001_v45, %v950_v51  ;;  %v953_v57 = vld [vmem:[#allocation2 + $0x30] sm:$0xf]  ;;  %850 = vst.msk [vmem:[#allocation2 + $0x28] sm:$0xf] %vm354_vm4, %v559_v52  ;;  %v602_v10 = vrot.slane %v14150_v47, 4  ;;  %v601_v15 = vor.u32 %v599_v29, %v14150_v47  ;;  %s13960_s17 = smov 16  }
  0x32   : > { %v1175_v53 = vshrl.u32 %v14147_v43, 16  ;;  %v1177_v54 = vshll.u32 %v14147_v43, 16  ;;  %v1474_v58 = vsel %vm1468_vm13, %v1472_v48, %v1473_v49  ;;  %v1184_v59 = vrot.slane %v1182_v50, 1  ;;  %v13731_v60 = vld [vmem:[#allocation2 + $0x20] ss:$0 sps:$4 sm:$0x11]  }
  0x33   : > { %1525 = vrot.lane.b32.xlu1 %v1474_v58, %s13958_s15  ;;  %v1475_v63 = vrot.slane %v11208_v56, 1  ;;  %v1187_v1 = vshrl.u32 %v14156_v55, 16  ;;  %v1189_v2 = vshll.u32 %v14156_v55, 16  ;;  %v954_v3 = vld [vmem:[#allocation2 + $0x34] sm:$0xf]  ;;  %v1476_v5 = vrot.slane %v13731_v60, 1 }
  0x34   : > { %v1179_v62 = vrot.slane %v1177_v54, 1  ;;  %v1194_v6 = vshll.u32 %v13731_v60, 16  ;;  %v14163_v7 = vcombine.low %v953_v57, %v954_v3  ;;  %v13734_v8 = vld [vmem:[#allocation2 + $0x38] ss:$0 sps:$4 sm:$0x11]   ;;  %v606_v17 = vrot.slane %v604_v32, 7 }
  0x35   : > { %v1191_v12 = vrot.slane %v1189_v2, 1  ;;  %v847_v13 = vld [vmem:[#allocation2 + $0x24] sm:$0xf]  ;;  %v851_v14 = vld [vmem:[#allocation2 + $0x2c] sm:$0x1]  ;;  %v1477_v18 = vsel %vm1468_vm13, %v1475_v63, %v1476_v5  ;;  %v1218_v26 = vshll.u32 %v13734_v8, 16 }
  0x36   : > { %v1180_v11 = vor.u32 %v1179_v62, %v1175_v53  ;;  %v1196_v19 = vrot.slane %v1194_v6, 1  ;;  %v1211_v20 = vshrl.u32 %v14163_v7, 16  ;;  %v1213_v21 = vshll.u32 %v14163_v7, 16  ;;  %v1003_v22 = vld [vmem:[#allocation2 + $0x30] sm:$0xe] }
  0x37   : > { %1527 = vrot.lane.b32.xlu1 %v1477_v18, %s13958_s15  ;;  %v1192_v25 = vor.u32 %v1191_v12, %v1187_v1  ;;  %v848_v27 = vsel %vm14093_vm12, %v550_v61, %v847_v13  ;;  %v868_v29 = vld [vmem:[#allocation2 + $0x48] sm:$0xf]  ;;  %v437_v30 = vld [vmem:[#allocation2 + $0x44] sm:$0x1]  ;;  %v852_v32 = vsel %vm14021_vm2, %v560_v46, %v851_v14  ;;  %v11210_v35 = vcombine.low %v1003_v22, %v954_v3  ;;  %v872_v37 = vld [vmem:[#allocation2 + $0x50] sm:$0x1] }
  0x38   : > { %v1185_v23 = vsel %vm1161_vm14, %v1180_v11, %v1184_v59  ;;  %v1215_v31 = vrot.slane %v1213_v21, 1  ;;  %849 = vst [vmem:[#allocation2 + $0x24] sm:$0xf] %v848_v27  ;;  %v1482_v36 = vrot.slane %v13734_v8, 1  ;;  %v484_v38 = vld [vmem:[%s14057_s14 + $0x20] sm:$0xf]  ;;  %v609_v41 = vor.u32 %v607_v33, %v606_v17 }
  0x39   : > { %1380 = vrot.lane.b32.xlu0 %v1185_v23, %s13959_s16  ;;  %v1197_v39 = vsel %vm1161_vm14, %v1192_v25, %v1196_v19  ;;  %v1220_v40 = vrot.slane %v1218_v26, 1  ;;  %853 = vst [vmem:[#allocation2 + $0x2c] sm:$0x1] %v852_v32  ;;  %v611_v42 = vrot.slane %v606_v17, 4  ;;  %v485_v44 = vld [vmem:[%s14057_s14 + $0x24] sm:$0xf]  ;;  %v869_v46 = vsel %vm14093_vm12, %v601_v15, %v868_v29 }
  0x3a   : > { %v1216_v45 = vor.u32 %v1215_v31, %v1211_v20  ;;  %v1481_v47 = vrot.slane %v11210_v35, 1  ;;  %v438_v48 = vsel %vm14031_vm5, 0, %v437_v30  ;;  %v390_v49 = vld [vmem:[#allocation2 + $0x60] sm:$0x1]  ;;  %v446_v50 = vld [vmem:[#allocation2 + $0x68] sm:$0x1]  ;;  %v610_v51 = vsel %vm14086_vm11, %v602_v10, %v609_v41 }
  0x3b   : > { %870 = vst [vmem:[#allocation2 + $0x48] sm:$0xf] %v869_v46  ;;  %v873_v24 = vsel %vm14021_vm2, %v611_v42, %v872_v37  ;;  %439 = vst [vmem:[#allocation2 + $0x44] sm:$0x1] %v438_v48  ;;  %v579_v33 = vshrl.u32 %v484_v38, 16  ;;  %v582_v52 = vshll.u32 %v484_v38, 16 }
  0x3c   : > { %v490_v53 = vld [vmem:[%s14057_s14 + $0x38] sm:$0xf]  ;;  %v491_v54 = vld [vmem:[%s14057_s14 + $0x3c] sm:$0xf]  ;;  %v1221_v56 = vsel %vm1161_vm14, %v1216_v45, %v1220_v40  ;;  %v1483_v57 = vsel %vm1468_vm13, %v1481_v47, %v1482_v36  ;;  %871 = vst.msk [vmem:[#allocation2 + $0x4c] sm:$0xf] %vm354_vm4, %v610_v51 }
  0x3d   : > { %1382 = vrot.lane.b32.xlu0 %v1197_v39, %s13959_s16  ;;  %874 = vst [vmem:[#allocation2 + $0x50] sm:$0x1] %v873_v24  ;;  %v587_v58 = vshrl.u32 %v485_v44, 16  ;;  %v590_v59 = vshll.u32 %v485_v44, 16  ;;  %1386 = vrot.lane.b32.xlu1 %v1221_v56, %s13959_s16  ;;  %v952_v60 = vld [vmem:[#allocation2 + $0x28] sm:$0xf] }
  0x3e   : > { %v581_v61 = vrot.slane %v579_v33, 7  ;;  %v391_v62 = vsel %vm14021_vm2, 0, %v390_v49  ;;  %v447_v63 = vsel %vm14031_vm5, 0, %v446_v50  ;;  %v630_v1 = vshrl.u32 %v490_v53, 16  ;;  %v861_v3 = vld [vmem:[#allocation2 + $0x3c] sm:$0xf] }
  0x3f   : > { %v589_v2 = vrot.slane %v587_v58, 7  ;;  %392 = vst [vmem:[#allocation2 + $0x60] sm:$0x1] %v391_v62  ;;  %448 = vst [vmem:[#allocation2 + $0x68] sm:$0x1] %v447_v63  ;;  %v633_v5 = vshll.u32 %v490_v53, 16 }
  0x40   : > { %v638_v6 = vshrl.u32 %v491_v54, 16  ;;  %v641_v8 = vshll.u32 %v491_v54, 16  ;;  %v951_v10 = vld [vmem:[#allocation2 + $0x24] sm:$0xf]  ;;  %v584_v12 = vor.u32 %v582_v52, %v581_v61  ;;  %v585_v13 = vrot.slane %v581_v61, 4 }
  0x41   : > { %v1002_v11 = vld [vmem:[#allocation2 + $0x24] sm:$0xe]  ;;  %v632_v14 = vrot.slane %v630_v1, 7  ;;  %v14201_v15 = vcombine.low %v951_v10, %v952_v60  ;;  %v13736_v17 = vld [vmem:[#allocation2 + $0x2c] ss:$0 sps:$4 sm:$0x11]   ;;  %v592_v19 = vor.u32 %v590_v59, %v589_v2  ;;  %1531 = vrot.lane.b32.xlu1 %v1483_v57, %s13958_s15 }
  0x42   : > { %v11209_v18 = vcombine.low %v1002_v11, %v952_v60  ;;  %v594_v20 = vrot.slane %v589_v2, 4  ;;  %v862_v21 = vsel %vm14093_vm12, %v584_v12, %v861_v3  ;;  %v640_v25 = vrot.slane %v638_v6, 7  ;;  %v387_v26 = vld [vmem:[#allocation2 + $0x54] sm:$0x1]  ;;  %v957_v32 = vld [vmem:[#allocation2 + $0x48] sm:$0xf] }
  0x43   : > { %v635_v22 = vor.u32 %v633_v5, %v632_v14  ;;  %v636_v23 = vrot.slane %v632_v14, 4  ;;  %v1199_v27 = vshrl.u32 %v14201_v15, 16  ;;  %v1201_v29 = vshll.u32 %v14201_v15, 16  ;;  %863 = vst [vmem:[#allocation2 + $0x3c] sm:$0xf] %v862_v21 }
  0x44   : > { %v1206_v30 = vshll.u32 %v13736_v17, 16  ;;  %v1478_v31 = vrot.slane %v11209_v18, 1  ;;  %v1479_v35 = vrot.slane %v13736_v17, 1  ;;  %v958_v36 = vld [vmem:[#allocation2 + $0x4c] sm:$0xf]  ;;  %v593_v37 = vsel %vm14086_vm11, %v585_v13, %v592_v19 }
  0x45   : > { %v643_v38 = vor.u32 %v641_v8, %v640_v25  ;;  %v645_v39 = vrot.slane %v640_v25, 4  ;;  %v1203_v40 = vrot.slane %v1201_v29, 1  ;;  %v14210_v42 = vcombine.low %v957_v32, %v958_v36  ;;  %v13739_v44 = vld [vmem:[#allocation2 + $0x50] ss:$0 sps:$4 sm:$0x11]  }
  0x46   : > { %v1208_v41 = vrot.slane %v1206_v30, 1  ;;  %864 = vst.msk [vmem:[#allocation2 + $0x40] sm:$0xf] %vm354_vm4, %v593_v37  ;;  %v388_v45 = vsel %vm14021_vm2, 0, %v387_v26  ;;  %v443_v47 = vld [vmem:[#allocation2 + $0x5c] sm:$0x1]  ;;  %v1480_v6 = vsel %vm1468_vm13, %v1478_v31, %v1479_v35 }
  0x47   : > { %v865_v46 = vld [vmem:[#allocation2 + $0x44] sm:$0x1]  ;;  %v1005_v48 = vld [vmem:[#allocation2 + $0x48] sm:$0xe]  ;;  %v644_v49 = vsel %vm14086_vm11, %v636_v23, %v643_v38  ;;  %v882_v50 = vld [vmem:[#allocation2 + $0x60] sm:$0xf]  ;;  %v1204_v24 = vor.u32 %v1203_v40, %v1199_v27 }
  0x48   : > { %389 = vst [vmem:[#allocation2 + $0x54] sm:$0x1] %v388_v45  ;;  %v488_v51 = vld [vmem:[%s14057_s14 + $0x30] sm:$0xf]  ;;  %v1235_v33 = vshrl.u32 %v14210_v42, 16  ;;  %v1237_v52 = vshll.u32 %v14210_v42, 16  ;;  %v866_v56 = vsel %vm14021_vm2, %v594_v20, %v865_v46  ;;  %v11212_v57 = vcombine.low %v1005_v48, %v958_v36 }
  0x49   : > { %v1242_v53 = vshll.u32 %v13739_v44, 16  ;;  %885 = vst.msk [vmem:[#allocation2 + $0x64] sm:$0xf] %vm354_vm4, %v644_v49  ;;  %v886_v54 = vld [vmem:[#allocation2 + $0x68] sm:$0x1]  ;;  %v1488_v58 = vrot.slane %v13739_v44, 1  ;;  %v883_v59 = vsel %vm14093_vm12, %v635_v22, %v882_v50  ;;  %v1209_v62 = vsel %vm1161_vm14, %v1204_v24, %v1208_v41 }
  0x4a   : > { %v489_v60 = vld [vmem:[%s14057_s14 + $0x34] sm:$0xf]  ;;  %v396_v61 = vld [vmem:[#allocation2 + $0x78] sm:$0x1]  ;;  %v1239_v63 = vrot.slane %v1237_v52, 1  ;;  %v887_v2 = vsel %vm14021_vm2, %v645_v39, %v886_v54  ;;  %1384 = vrot.lane.b32.xlu0 %v1209_v62, %s13959_s16  ;;  %v1487_v10 = vrot.slane %v11212_v57, 1 }
  0x4b   : > { %v1244_v1 = vrot.slane %v1242_v53, 1  ;;  %867 = vst [vmem:[#allocation2 + $0x44] sm:$0x1] %v866_v56  ;;  %884 = vst [vmem:[#allocation2 + $0x60] sm:$0xf] %v883_v59  ;;  %v444_v12 = vsel %vm14031_vm5, 0, %v443_v47 }
  0x4c   : > { %v452_v3 = vld [vmem:[#allocation2 + $0x80] sm:$0x1]  ;;  %v14230_v5 = vld [vmem:[%s14057_s14 + $0x48] sm:$0xf]  ;;  %v955_v8 = vld [vmem:[#allocation2 + $0x3c] sm:$0xf]  ;;  %v1240_v13 = vor.u32 %v1239_v63, %v1235_v33  ;;  %v1489_v21 = vsel %vm1468_vm13, %v1487_v10, %v1488_v58 }
  0x4d   : > { %v1004_v11 = vld [vmem:[#allocation2 + $0x3c] sm:$0xe]  ;;  %888 = vst [vmem:[#allocation2 + $0x68] sm:$0x1] %v887_v2  ;;  %445 = vst [vmem:[#allocation2 + $0x5c] sm:$0x1] %v444_v12 }
  0x4e   : > { %v613_v14 = vshrl.u32 %v488_v51, 16  ;;  %v616_v17 = vshll.u32 %v488_v51, 16  ;;  %v621_v18 = vshrl.u32 %v489_v60, 16  ;;  %v14237_v19 = vld [vmem:[%s14057_s14 + $0x4c] sm:$0xf]  ;;  %v624_v22 = vshll.u32 %v489_v60, 16  ;;  %1529 = vrot.lane.b32.xlu0 %v1480_v6, %s13958_s15 }
  0x4f   : > { %v956_v20 = vld [vmem:[#allocation2 + $0x40] sm:$0xf]  ;;  %v397_v23 = vsel %vm14021_vm2, 0, %v396_v61  ;;  %v453_v25 = vsel %vm14031_vm5, 0, %v452_v3  ;;  %v1245_v26 = vsel %vm1161_vm14, %v1240_v13, %v1244_v1  ;;  %v875_v32 = vld [vmem:[#allocation2 + $0x54] sm:$0xf] }
  0x50   : > { %v14245_v27 = vcombine.low %v955_v8, %v956_v20  ;;  %v11211_v29 = vcombine.low %v1004_v11, %v956_v20  ;;  %v615_v30 = vrot.slane %v613_v14, 7  ;;  %398 = vst [vmem:[#allocation2 + $0x78] sm:$0x1] %v397_v23  ;;  %454 = vst [vmem:[#allocation2 + $0x80] sm:$0x1] %v453_v25  ;;  %1390 = vrot.lane.b32.xlu1 %v1245_v26, %s13959_s16  ;;  %v623_v31 = vrot.slane %v621_v18, 7 }
  0x51   : > { %v664_v35 = vshrl.u32 %v14230_v5, 16  ;;  %v667_v36 = vshll.u32 %v14230_v5, 16  ;;  %v672_v37 = vshrl.u32 %v14237_v19, 16  ;;  %v962_v41 = vld [vmem:[#allocation2 + $0x64] sm:$0xf]  ;;  %v675_v25 = vshll.u32 %v14237_v19, 16 }
  0x52   : > { %v1223_v38 = vshrl.u32 %v14245_v27, 16  ;;  %v1225_v39 = vshll.u32 %v14245_v27, 16  ;;  %v1484_v40 = vrot.slane %v11211_v29, 1  ;;  %v618_v44 = vor.u32 %v616_v17, %v615_v30  ;;  %v13741_v45 = vld [vmem:[#allocation2 + $0x44] ss:$0 sps:$4 sm:$0x11]  }
  0x53   : > { %v619_v47 = vrot.slane %v615_v30, 4  ;;  %v626_v46 = vor.u32 %v624_v22, %v623_v31  ;;  %v961_v49 = vld [vmem:[#allocation2 + $0x60] sm:$0xf]  ;;  %v628_v50 = vrot.slane %v623_v31, 4  ;;  %v1230_v24 = vshll.u32 %v13741_v45, 16 }
  0x54   : > { %v1227_v48 = vrot.slane %v1225_v39, 1  ;;  %v876_v51 = vsel %vm14093_vm12, %v618_v44, %v875_v32  ;;  %1535 = vrot.lane.b32.xlu1 %v1489_v21, %s13958_s15  ;;  %v1485_v33 = vrot.slane %v13741_v45, 1  ;;  %v14257_v52 = vcombine.low %v961_v49, %v962_v41  ;;  %v13744_v53 = vld [vmem:[#allocation2 + $0x68] ss:$0 sps:$4 sm:$0x11]  }
  0x55   : > { %v627_v54 = vsel %vm14086_vm11, %v619_v47, %v626_v46  ;;  %877 = vst [vmem:[#allocation2 + $0x54] sm:$0xf] %v876_v51  ;;  %v879_v57 = vld [vmem:[#allocation2 + $0x5c] sm:$0x1]  ;;  %v1007_v58 = vld [vmem:[#allocation2 + $0x60] sm:$0xe] }
  0x56   : > { %v1228_v56 = vor.u32 %v1227_v48, %v1223_v38  ;;  %878 = vst.msk [vmem:[#allocation2 + $0x58] sm:$0xf] %vm354_vm4, %v627_v54  ;;  %v666_v59 = vrot.slane %v664_v35, 7  ;;  %v674_v60 = vrot.slane %v672_v37, 7  ;;  %v393_v61 = vld [vmem:[#allocation2 + $0x6c] sm:$0x1]  ;;  %v1486_v63 = vsel %vm1468_vm13, %v1484_v40, %v1485_v33 }
  0x57   : > { %v1232_v62 = vrot.slane %v1230_v24, 1  ;;  %v1259_v1 = vshrl.u32 %v14257_v52, 16  ;;  %v1261_v2 = vshll.u32 %v14257_v52, 16  ;;  %v449_v3 = vld [vmem:[#allocation2 + $0x74] sm:$0x1]  ;;  %v1266_v5 = vshll.u32 %v13744_v53, 16 }
  0x58   : > { %v880_v6 = vsel %vm14021_vm2, %v628_v50, %v879_v57  ;;  %v11214_v8 = vcombine.low %v1007_v58, %v962_v41  ;;  %v1494_v10 = vrot.slane %v13744_v53, 1  ;;  %v896_v11 = vld [vmem:[#allocation2 + $0x78] sm:$0xf]  ;;  %v492_v12 = vld [vmem:[%s14057_s14 + $0x40] sm:$0xf]  ;;  %v669_v17 = vor.u32 %v667_v36, %v666_v59 }
  0x59   : > { %v1233_v13 = vsel %vm1161_vm14, %v1228_v56, %v1232_v62  ;;  %v1263_v14 = vrot.slane %v1261_v2, 1  ;;  %881 = vst [vmem:[#allocation2 + $0x5c] sm:$0x1] %v880_v6  ;;  %v670_v18 = vrot.slane %v666_v59, 4  ;;  %v900_v20 = vld [vmem:[#allocation2 + $0x80] sm:$0x1]  ;;  %v677_v41 = vor.u32 %v675_v25, %v674_v60 }
  0x5a   : > { %v493_v21 = vld [vmem:[%s14057_s14 + $0x44] sm:$0xf]  ;;  %1388 = vrot.lane.b32.xlu0 %v1233_v13, %s13959_s16  ;;  %v1268_v22 = vrot.slane %v1266_v5, 1  ;;  %v1493_v23 = vrot.slane %v11214_v8, 1  ;;  %v679_v26 = vrot.slane %v674_v60, 4  ;;  %v897_v31 = vsel %vm14093_vm12, %v669_v17, %v896_v11 }
  0x5b   : > { %v402_v29 = vld [vmem:[#allocation2 + $0x90] sm:$0x1]  ;;  %v1264_v30 = vor.u32 %v1263_v14, %v1259_v1  ;;  %v394_v32 = vsel %vm14021_vm2, 0, %v393_v61  ;;  %v450_v35 = vsel %vm14031_vm5, 0, %v449_v3  ;;  %v458_v36 = vld [vmem:[#allocation2 + $0x98] sm:$0x1]  ;;  %v678_v24 = vsel %vm14086_vm11, %v670_v18, %v677_v41 }
  0x5c   : > { %v498_v37 = vld [vmem:[%s14057_s14 + $0x58] sm:$0xf]  ;;  %v959_v38 = vld [vmem:[#allocation2 + $0x54] sm:$0xf]  ;;  %v1495_v39 = vsel %vm1468_vm13, %v1493_v23, %v1494_v10  ;;  %898 = vst [vmem:[#allocation2 + $0x78] sm:$0xf] %v897_v31  ;;  %v901_v19 = vsel %vm14021_vm2, %v679_v26, %v900_v20 }
  0x5d   : > { %v1006_v40 = vld [vmem:[#allocation2 + $0x54] sm:$0xe]  ;;  %395 = vst [vmem:[#allocation2 + $0x6c] sm:$0x1] %v394_v32  ;;  %451 = vst [vmem:[#allocation2 + $0x74] sm:$0x1] %v450_v35  ;;  %v1269_v45 = vsel %vm1161_vm14, %v1264_v30, %v1268_v22 }
  0x5e   : > { %v647_v44 = vshrl.u32 %v492_v12, 16  ;;  %v960_v47 = vld [vmem:[#allocation2 + $0x58] sm:$0xf]  ;;  %902 = vst [vmem:[#allocation2 + $0x80] sm:$0x1] %v901_v19  ;;  %v650_v46 = vshll.u32 %v492_v12, 16  ;;  %1533 = vrot.lane.b32.xlu0 %v1486_v63, %s13958_s15  ;;  %1394 = vrot.lane.b32.xlu1 %v1269_v45, %s13959_s16 }
  0x5f   : > { %v655_v48 = vshrl.u32 %v493_v21, 16  ;;  %v658_v49 = vshll.u32 %v493_v21, 16  ;;  %v14285_v50 = vcombine.low %v959_v38, %v960_v47  ;;  %v11213_v51 = vcombine.low %v1006_v40, %v960_v47  ;;  %899 = vst.msk [vmem:[#allocation2 + $0x7c] sm:$0xf] %vm354_vm4, %v678_v24  ;;  %v499_v6 = vld [vmem:[%s14057_s14 + $0x5c] sm:$0xf] }
  0x60   : > { %v649_v33 = vrot.slane %v647_v44, 7  ;;  %v403_v54 = vsel %vm14021_vm2, 0, %v402_v29  ;;  %v459_v56 = vsel %vm14031_vm5, 0, %v458_v36  ;;  %v698_v57 = vshrl.u32 %v498_v37, 16  ;;  %v399_v17 = vld [vmem:[#allocation2 + $0x84] sm:$0x1] }
  0x61   : > { %v657_v53 = vrot.slane %v655_v48, 7  ;;  %v13746_v58 = vld [vmem:[#allocation2 + $0x5c] ss:$0 sps:$4 sm:$0x11]   ;;  %v1247_v59 = vshrl.u32 %v14285_v50, 16  ;;  %v1249_v61 = vshll.u32 %v14285_v50, 16 }
  0x62   : > { %v652_v60 = vor.u32 %v650_v46, %v649_v33  ;;  %404 = vst [vmem:[#allocation2 + $0x90] sm:$0x1] %v403_v54  ;;  %460 = vst [vmem:[#allocation2 + $0x98] sm:$0x1] %v459_v56  ;;  %v1490_v62 = vrot.slane %v11213_v51, 1  ;;  %v653_v63 = vrot.slane %v649_v33, 4  ;;  %1539 = vrot.lane.b32.xlu1 %v1495_v39, %s13958_s15 }
  0x63   : > { %v660_v1 = vor.u32 %v658_v49, %v657_v53  ;;  %v1254_v2 = vshll.u32 %v13746_v58, 16  ;;  %v1491_v3 = vrot.slane %v13746_v58, 1  ;;  %v662_v5 = vrot.slane %v657_v53, 4  ;;  %v965_v11 = vld [vmem:[#allocation2 + $0x78] sm:$0xf] }
  0x64   : > { %v700_v8 = vrot.slane %v698_v57, 7  ;;  %v1251_v10 = vrot.slane %v1249_v61, 1  ;;  %v889_v13 = vld [vmem:[#allocation2 + $0x6c] sm:$0xf]  ;;  %v701_v14 = vshll.u32 %v498_v37, 16  ;;  %v706_v31 = vshrl.u32 %v499_v6, 16 }
  0x65   : > { %v661_v12 = vsel %vm14086_vm11, %v653_v63, %v660_v1  ;;  %v455_v18 = vld [vmem:[#allocation2 + $0x8c] sm:$0x1]  ;;  %v1256_v20 = vrot.slane %v1254_v2, 1  ;;  %v14300_v21 = vld [vmem:[#allocation2 + $0x80] ss:$0 sps:$4 sm:$0x11]   ;;  %v890_v22 = vsel %vm14093_vm12, %v652_v60, %v889_v13  ;;  %v1492_v25 = vsel %vm1468_vm13, %v1490_v62, %v1491_v3 }
  0x66   : > { %892 = vst.msk [vmem:[#allocation2 + $0x70] sm:$0xf] %vm354_vm4, %v661_v12  ;;  %v1252_v23 = vor.u32 %v1251_v10, %v1247_v59  ;;  %891 = vst [vmem:[#allocation2 + $0x6c] sm:$0xf] %v890_v22  ;;  %v893_v26 = vld [vmem:[#allocation2 + $0x74] sm:$0x1]  ;;  %v703_v30 = vor.u32 %v701_v14, %v700_v8 }
  0x67   : > { %v1009_v29 = vld [vmem:[#allocation2 + $0x78] sm:$0xe]  ;;  %v496_v32 = vld [vmem:[%s14057_s14 + $0x50] sm:$0xf]  ;;  %v966_v35 = vld [vmem:[#allocation2 + $0x7c] sm:$0xf]  ;;  %v894_v37 = vsel %vm14021_vm2, %v662_v5, %v893_v26 }
  0x68   : > { %v1290_v36 = vshll.u32 %v14300_v21, 16  ;;  %v704_v38 = vrot.slane %v700_v8, 4  ;;  %v709_v39 = vshll.u32 %v499_v6, 16  ;;  %v1257_v40 = vsel %vm1161_vm14, %v1252_v23, %v1256_v20  ;;  %895 = vst [vmem:[#allocation2 + $0x74] sm:$0x1] %v894_v37 }
  0x69   : > { %v14311_v41 = vcombine.low %v965_v11, %v966_v35  ;;  %v11216_v19 = vcombine.low %v1009_v29, %v966_v35  ;;  %v708_v44 = vrot.slane %v706_v31, 7  ;;  %v910_v45 = vld [vmem:[#allocation2 + $0x90] sm:$0xf]  ;;  %v497_v47 = vld [vmem:[%s14057_s14 + $0x54] sm:$0xf]  ;;  %1392 = vrot.lane.b32.xlu0 %v1257_v40, %s13959_s16  ;;  %v1500_v46 = vrot.slane %v14300_v21, 1 }
  0x6a   : > { %v911_v48 = vsel %vm14093_vm12, %v703_v30, %v910_v45  ;;  %v400_v49 = vsel %vm14021_vm2, 0, %v399_v17  ;;  %v456_v51 = vsel %vm14031_vm5, 0, %v455_v18  ;;  %v1292_v53 = vrot.slane %v1290_v36, 1  ;;  %v914_v56 = vld [vmem:[#allocation2 + $0x98] sm:$0x1] }
  0x6b   : > { %v1283_v24 = vshrl.u32 %v14311_v41, 16  ;;  %v1285_v33 = vshll.u32 %v14311_v41, 16  ;;  %v711_v54 = vor.u32 %v709_v39, %v708_v44  ;;  %912 = vst [vmem:[#allocation2 + $0x90] sm:$0xf] %v911_v48  ;;  %401 = vst [vmem:[#allocation2 + $0x84] sm:$0x1] %v400_v49 }
  0x6c   : > { %457 = vst [vmem:[#allocation2 + $0x8c] sm:$0x1] %v456_v51  ;;  %v713_v57 = vrot.slane %v708_v44, 4  ;;  %v681_v58 = vshrl.u32 %v496_v32, 16  ;;  %v684_v59 = vshll.u32 %v496_v32, 16  ;;  %v689_v60 = vshrl.u32 %v497_v47, 16 }
  0x6d   : > { %v408_v61 = vld [vmem:[#allocation2 + $0xa8] sm:$0x1]  ;;  %v1287_v62 = vrot.slane %v1285_v33, 1  ;;  %v964_v63 = vld [vmem:[#allocation2 + $0x70] sm:$0xf]  ;;  %v1499_v1 = vrot.slane %v11216_v19, 1  ;;  %v712_v2 = vsel %vm14086_vm11, %v704_v38, %v711_v54  ;;  %1537 = vrot.lane.b32.xlu0 %v1492_v25, %s13958_s15 }
  0x6e   : > { %v692_v3 = vshll.u32 %v497_v47, 16  ;;  %v963_v5 = vld [vmem:[#allocation2 + $0x6c] sm:$0xf]  ;;  %913 = vst.msk [vmem:[#allocation2 + $0x94] sm:$0xf] %vm354_vm4, %v712_v2  ;;  %v915_v8 = vsel %vm14021_vm2, %v713_v57, %v914_v56  ;;  %v683_v10 = vrot.slane %v681_v58, 7 }
  0x6f   : > { %v1008_v6 = vld [vmem:[#allocation2 + $0x6c] sm:$0xe]  ;;  %v691_v11 = vrot.slane %v689_v60, 7  ;;  %v1288_v12 = vor.u32 %v1287_v62, %v1283_v24  ;;  %v14330_v13 = vcombine.low %v963_v5, %v964_v63  ;;  %916 = vst [vmem:[#allocation2 + $0x98] sm:$0x1] %v915_v8  ;;  %v409_v17 = vsel %vm14021_vm2, 0, %v408_v61 }
  0x70   : > { %v11215_v14 = vcombine.low %v1008_v6, %v964_v63  ;;  %v464_v18 = vld [vmem:[#allocation2 + $0xb0] sm:$0x1]  ;;  %v13751_v20 = vld [vmem:[#allocation2 + $0x74] ss:$0 sps:$4 sm:$0x11]   ;;  %v686_v21 = vor.u32 %v684_v59, %v683_v10  ;;  %v687_v22 = vrot.slane %v683_v10, 4  ;;  %v1501_v19 = vsel %vm1468_vm13, %v1499_v1, %v1500_v46 }
  0x71   : > { %v694_v23 = vor.u32 %v692_v3, %v691_v11  ;;  %410 = vst [vmem:[#allocation2 + $0xa8] sm:$0x1] %v409_v17  ;;  %v502_v25 = vld [vmem:[%s14057_s14 + $0x68] sm:$0xf]  ;;  %v1293_v26 = vsel %vm1161_vm14, %v1288_v12, %v1292_v53  ;;  %v1271_v29 = vshrl.u32 %v14330_v13, 16  ;;  %v1273_v30 = vshll.u32 %v14330_v13, 16 }
  0x72   : > { %v1496_v31 = vrot.slane %v11215_v14, 1  ;;  %v503_v32 = vld [vmem:[%s14057_s14 + $0x6c] sm:$0xf]  ;;  %1398 = vrot.lane.b32.xlu1 %v1293_v26, %s13959_s16  ;;  %v1278_v35 = vshll.u32 %v13751_v20, 16  ;;  %v1497_v36 = vrot.slane %v13751_v20, 1  ;;  %v696_v39 = vrot.slane %v691_v11, 4 }
  0x73   : > { %v969_v37 = vld [vmem:[#allocation2 + $0x90] sm:$0xf]  ;;  %v695_v38 = vsel %vm14086_vm11, %v687_v22, %v694_v23  ;;  %v1275_v40 = vrot.slane %v1273_v30, 1  ;;  %v903_v44 = vld [vmem:[#allocation2 + $0x84] sm:$0xf]  ;;  %v465_v47 = vsel %vm14031_vm5, 0, %v464_v18 }
  0x74   : > { %906 = vst.msk [vmem:[#allocation2 + $0x88] sm:$0xf] %vm354_vm4, %v695_v38  ;;  %v907_v45 = vld [vmem:[#allocation2 + $0x8c] sm:$0x1]  ;;  %v1280_v48 = vrot.slane %v1278_v35, 1  ;;  %v904_v49 = vsel %vm14093_vm12, %v686_v21, %v903_v44  ;;  %v732_v46 = vshrl.u32 %v502_v25, 16  ;;  %v1498_v59 = vsel %vm1468_vm13, %v1496_v31, %v1497_v36 }
  0x75   : > { %v908_v51 = vsel %vm14021_vm2, %v696_v39, %v907_v45  ;;  %v1011_v24 = vld [vmem:[#allocation2 + $0x90] sm:$0xe]  ;;  %466 = vst [vmem:[#allocation2 + $0xb0] sm:$0x1] %v465_v47  ;;  %v405_v33 = vld [vmem:[#allocation2 + $0x9c] sm:$0x1]  ;;  %v1276_v53 = vor.u32 %v1275_v40, %v1271_v29 }
  0x76   : > { %v970_v54 = vld [vmem:[#allocation2 + $0x94] sm:$0xf]  ;;  %905 = vst [vmem:[#allocation2 + $0x84] sm:$0xf] %v904_v49  ;;  %909 = vst [vmem:[#allocation2 + $0x8c] sm:$0x1] %v908_v51  ;;  %1543 = vrot.lane.b32.xlu1 %v1501_v19, %s13958_s15 }
  0x77   : > { %v735_v56 = vshll.u32 %v502_v25, 16  ;;  %v740_v57 = vshrl.u32 %v503_v32, 16  ;;  %v461_v58 = vld [vmem:[#allocation2 + $0xa4] sm:$0x1]  ;;  %v14352_v60 = vcombine.low %v969_v37, %v970_v54  ;;  %v11218_v62 = vcombine.low %v1011_v24, %v970_v54  ;;  %v500_v6 = vld [vmem:[%s14057_s14 + $0x60] sm:$0xf] }
  0x78   : > { %v13754_v61 = vld [vmem:[#allocation2 + $0x98] ss:$0 sps:$4 sm:$0x11]   ;;  %v743_v63 = vshll.u32 %v503_v32, 16  ;;  %v1281_v1 = vsel %vm1161_vm14, %v1276_v53, %v1280_v48  ;;  %v734_v2 = vrot.slane %v732_v46, 7  ;;  %v406_v5 = vsel %vm14021_vm2, 0, %v405_v33 }
  0x79   : > { %v742_v3 = vrot.slane %v740_v57, 7  ;;  %1396 = vrot.lane.b32.xlu0 %v1281_v1, %s13959_s16  ;;  %v1307_v8 = vshrl.u32 %v14352_v60, 16  ;;  %v1309_v10 = vshll.u32 %v14352_v60, 16  ;;  %v1314_v11 = vshll.u32 %v13754_v61, 16  ;;  %v924_v14 = vld [vmem:[#allocation2 + $0xa8] sm:$0xf] }
  0x7a   : > { %v1505_v12 = vrot.slane %v11218_v62, 1  ;;  %407 = vst [vmem:[#allocation2 + $0x9c] sm:$0x1] %v406_v5  ;;  %v1506_v17 = vrot.slane %v13754_v61, 1  ;;  %v737_v18 = vor.u32 %v735_v56, %v734_v2  ;;  %v738_v20 = vrot.slane %v734_v2, 4 }
  0x7b   : > { %v745_v21 = vor.u32 %v743_v63, %v742_v3  ;;  %v501_v22 = vld [vmem:[%s14057_s14 + $0x64] sm:$0xf]  ;;  %v1311_v23 = vrot.slane %v1309_v10, 1  ;;  %v1316_v25 = vrot.slane %v1314_v11, 1  ;;  %v968_v26 = vld [vmem:[#allocation2 + $0x88] sm:$0xf] }
  0x7c   : > { %v747_v29 = vrot.slane %v742_v3, 4  ;;  %v462_v30 = vsel %vm14031_vm5, 0, %v461_v58  ;;  %v925_v32 = vsel %vm14093_vm12, %v737_v18, %v924_v14  ;;  %v928_v35 = vld [vmem:[#allocation2 + $0xb0] sm:$0x1]  ;;  %v715_v36 = vshrl.u32 %v500_v6, 16 }
  0x7d   : > { %v746_v31 = vsel %vm14086_vm11, %v738_v20, %v745_v21  ;;  %463 = vst [vmem:[#allocation2 + $0xa4] sm:$0x1] %v462_v30  ;;  %v414_v37 = vld [vmem:[#allocation2 + $0xc0] sm:$0x1]  ;;  %1541 = vrot.lane.b32.xlu0 %v1498_v59, %s13958_s15  ;;  %v1312_v38 = vor.u32 %v1311_v23, %v1307_v8  ;;  %v967_v39 = vld [vmem:[#allocation2 + $0x84] sm:$0xf]  ;;  %v1507_v40 = vsel %vm1468_vm13, %v1505_v12, %v1506_v17 }
  0x7e   : > { %v1010_v19 = vld [vmem:[#allocation2 + $0x84] sm:$0xe]  ;;  %926 = vst [vmem:[#allocation2 + $0xa8] sm:$0xf] %v925_v32  ;;  %927 = vst.msk [vmem:[#allocation2 + $0xac] sm:$0xf] %vm354_vm4, %v746_v31  ;;  %v929_v44 = vsel %vm14021_vm2, %v747_v29, %v928_v35  ;;  %v14373_v47 = vcombine.low %v967_v39, %v968_v26 }
  0x7f   : > { %v470_v45 = vld [vmem:[#allocation2 + $0xc8] sm:$0x1]  ;;  %v13756_v48 = vld [vmem:[#allocation2 + $0x8c] ss:$0 sps:$4 sm:$0x11]   ;;  %v11217_v49 = vcombine.low %v1010_v19, %v968_v26  ;;  %v717_v51 = vrot.slane %v715_v36, 7  ;;  %v1317_v33 = vsel %vm1161_vm14, %v1312_v38, %v1316_v25 }
  0x80   : > { %930 = vst [vmem:[#allocation2 + $0xb0] sm:$0x1] %v929_v44  ;;  %v718_v24 = vshll.u32 %v500_v6, 16  ;;  %v723_v53 = vshrl.u32 %v501_v22, 16  ;;  %v726_v54 = vshll.u32 %v501_v22, 16  ;;  %v415_v46 = vsel %vm14021_vm2, 0, %v414_v37  ;;  %1402 = vrot.lane.b32.xlu1 %v1317_v33, %s13959_s16 }
  0x81   : > { %v506_v56 = vld [vmem:[%s14057_s14 + $0x78] sm:$0xf]  ;;  %v1295_v57 = vshrl.u32 %v14373_v47, 16  ;;  %v1297_v58 = vshll.u32 %v14373_v47, 16  ;;  %v1302_v59 = vshll.u32 %v13756_v48, 16  ;;  %v1502_v61 = vrot.slane %v11217_v49, 1 }
  0x82   : > { %v917_v62 = vld [vmem:[#allocation2 + $0x9c] sm:$0xf]  ;;  %416 = vst [vmem:[#allocation2 + $0xc0] sm:$0x1] %v415_v46  ;;  %v1503_v63 = vrot.slane %v13756_v48, 1  ;;  %v720_v1 = vor.u32 %v718_v24, %v717_v51  ;;  %v721_v2 = vrot.slane %v717_v51, 4 }
  0x83   : > { %v725_v3 = vrot.slane %v723_v53, 7  ;;  %v1299_v5 = vrot.slane %v1297_v58, 1  ;;  %v1304_v6 = vrot.slane %v1302_v59, 1  ;;  %v471_v8 = vsel %vm14031_vm5, 0, %v470_v45  ;;  %v507_v18 = vld [vmem:[%s14057_s14 + $0x7c] sm:$0xf] }
  0x84   : > { %v766_v10 = vshrl.u32 %v506_v56, 16  ;;  %v918_v14 = vsel %vm14093_vm12, %v720_v1, %v917_v62  ;;  %v921_v17 = vld [vmem:[#allocation2 + $0xa4] sm:$0x1]  ;;  %472 = vst [vmem:[#allocation2 + $0xc8] sm:$0x1] %v471_v8  ;;  %1547 = vrot.lane.b32.xlu1 %v1507_v40, %s13958_s15  ;;  %v1504_v21 = vsel %vm1468_vm13, %v1502_v61, %v1503_v63  ;;  %v769_v40 = vshll.u32 %v506_v56, 16 }
  0x85   : > { %v728_v11 = vor.u32 %v726_v54, %v725_v3  ;;  %v730_v12 = vrot.slane %v725_v3, 4  ;;  %v1300_v20 = vor.u32 %v1299_v5, %v1295_v57  ;;  %v973_v22 = vld [vmem:[#allocation2 + $0xa8] sm:$0xf]  ;;  %v974_v23 = vld [vmem:[#allocation2 + $0xac] sm:$0xf]  ;;  %v774_v19 = vshrl.u32 %v507_v18, 16 }
  0x86   : > { %919 = vst [vmem:[#allocation2 + $0x9c] sm:$0xf] %v918_v14  ;;  %v1013_v25 = vld [vmem:[#allocation2 + $0xa8] sm:$0xe]  ;;  %v411_v26 = vld [vmem:[#allocation2 + $0xb4] sm:$0x1]  ;;  %v14389_v29 = vcombine.low %v973_v22, %v974_v23 }
  0x87   : > { %v14391_v30 = vld [vmem:[#allocation2 + $0xb0] ss:$0 sps:$4 sm:$0x11]   ;;  %v729_v31 = vsel %vm14086_vm11, %v721_v2, %v728_v11  ;;  %v922_v32 = vsel %vm14021_vm2, %v730_v12, %v921_v17  ;;  %v11220_v35 = vcombine.low %v1013_v25, %v974_v23  ;;  %v467_v36 = vld [vmem:[#allocation2 + $0xbc] sm:$0x1]  ;;  %v1305_v38 = vsel %vm1161_vm14, %v1300_v20, %v1304_v6 }
  0x88   : > { %v14397_v37 = vld [vmem:[#allocation2] sm:$0xe]  ;;  %920 = vst.msk [vmem:[#allocation2 + $0xa0] sm:$0xf] %vm354_vm4, %v729_v31  ;;  %923 = vst [vmem:[#allocation2 + $0xa4] sm:$0x1] %v922_v32  ;;  %1400 = vrot.lane.b32.xlu0 %v1305_v38, %s13959_s16 }
  0x89   : > { %v768_v39 = vrot.slane %v766_v10, 7  ;;  %v504_v44 = vld [vmem:[%s14057_s14 + $0x70] sm:$0xf]  ;;  %v1331_v45 = vshrl.u32 %v14389_v29, 16  ;;  %v1333_v48 = vshll.u32 %v14389_v29, 16  ;;  %v1338_v49 = vshll.u32 %v14391_v30, 16 }
  0x8a   : > { %v1511_v51 = vrot.slane %v11220_v35, 1  ;;  %v938_v24 = vld [vmem:[#allocation2 + $0xc0] sm:$0xf]  ;;  %v505_v33 = vld [vmem:[%s14057_s14 + $0x74] sm:$0xf]  ;;  %v1512_v54 = vrot.slane %v14391_v30, 1 }
  0x8b   : > { %v366_v53 = vld [vmem:[#allocation2] sm:$0x1]  ;;  %v771_v46 = vor.u32 %v769_v40, %v768_v39  ;;  %v772_v57 = vrot.slane %v768_v39, 4  ;;  %v776_v58 = vrot.slane %v774_v19, 7  ;;  %v422_v56 = vld [vmem:[#allocation2 + $0x8] sm:$0x1] }
  0x8c   : > { %v1335_v59 = vrot.slane %v1333_v48, 1  ;;  %v1340_v61 = vrot.slane %v1338_v49, 1  ;;  %v777_v62 = vshll.u32 %v507_v18, 16  ;;  %v412_v63 = vsel %vm14021_vm2, 0, %v411_v26  ;;  %v14410_v1 = vld [vmem:[#allocation2 + $0x4] sm:$0xf]  ;;  %1545 = vrot.lane.b32.xlu0 %v1504_v21, %s13958_s15 }
  0x8d   : > { %v781_v2 = vrot.slane %v776_v58, 4  ;;  %v939_v3 = vsel %vm14093_vm12, %v771_v46, %v938_v24  ;;  %v942_v5 = vld [vmem:[#allocation2 + $0xc8] sm:$0x1]  ;;  %413 = vst [vmem:[#allocation2 + $0xb4] sm:$0x1] %v412_v63  ;;  %v468_v6 = vsel %vm14031_vm5, 0, %v467_v36  ;;  %v11206_v8 = vcombine.low %v14397_v37, %v14410_v1 }
  0x8e   : > { %v13770_v10 = vld [vmem:[%s19866_s2 + $0x8] sm:$0x3f]   ;;  %v1336_v11 = vor.u32 %v1335_v59, %v1331_v45  ;;  %v971_v12 = vld [vmem:[#allocation2 + $0x9c] sm:$0xf]  ;;  %v779_v17 = vor.u32 %v777_v62, %v776_v58  ;;  %940 = vst [vmem:[#allocation2 + $0xc0] sm:$0xf] %v939_v3  ;;  %v1513_v40 = vsel %vm1468_vm13, %v1511_v51, %v1512_v54 }
  0x8f   : > { %v1012_v14 = vld [vmem:[#allocation2 + $0x9c] sm:$0xe]  ;;  %469 = vst [vmem:[#allocation2 + $0xbc] sm:$0x1] %v468_v6  ;;  %v749_v18 = vshrl.u32 %v504_v44, 16  ;;  %v752_v20 = vshll.u32 %v504_v44, 16  ;;  %v943_v22 = vsel %vm14021_vm2, %v781_v2, %v942_v5  ;;  %13708 = vmatprep.subr.msk.bf16.mxu0 %vm1676_vm15, %v13770_v10 }
  0x90   : > { %v757_v23 = vshrl.u32 %v505_v33, 16  ;;  %v760_v25 = vshll.u32 %v505_v33, 16  ;;  %v367_v26 = vsel %vm14021_vm2, 0, %v366_v53  ;;  %v1341_v30 = vsel %vm1161_vm14, %v1336_v11, %v1340_v61  ;;  %v972_v31 = vld [vmem:[#allocation2 + $0xa0] sm:$0xf] }
  0x91   : > { %v780_v21 = vsel %vm14086_vm11, %v772_v57, %v779_v17  ;;  %944 = vst [vmem:[#allocation2 + $0xc8] sm:$0x1] %v943_v22  ;;  %v751_v32 = vrot.slane %v749_v18, 7  ;;  %368 = vst [vmem:[#allocation2] sm:$0x1] %v367_v26  ;;  %v423_v35 = vsel %vm14031_vm5, 0, %v422_v56  ;;  %1406 = vrot.lane.b32.xlu1 %v1341_v30, %s13959_s16  ;;  %v14432_v36 = vcombine.low %v971_v12, %v972_v31 }
  0x92   : > { %v13761_v37 = vld [vmem:[#allocation2 + $0xa4] ss:$0 sps:$4 sm:$0x11]   ;;  %v11219_v38 = vcombine.low %v1012_v14, %v972_v31  ;;  %941 = vst.msk [vmem:[#allocation2 + $0xc4] sm:$0xf] %vm354_vm4, %v780_v21  ;;  %v759_v39 = vrot.slane %v757_v23, 7 }
  0x93   : > { %424 = vst [vmem:[#allocation2 + $0x8] sm:$0x1] %v423_v35  ;;  %v754_v19 = vor.u32 %v752_v20, %v751_v32  ;;  %v755_v44 = vrot.slane %v751_v32, 4  ;;  %v1319_v45 = vshrl.u32 %v14432_v36, 16  ;;  %v1321_v48 = vshll.u32 %v14432_v36, 16 }
  0x94   : > { %v1326_v49 = vshll.u32 %v13761_v37, 16  ;;  %v14438_v24 = vrot.slane %v11206_v8, 1  ;;  %v1508_v33 = vrot.slane %v11219_v38, 1  ;;  %v762_v53 = vor.u32 %v760_v25, %v759_v39  ;;  %v931_v57 = vld [vmem:[#allocation2 + $0xb4] sm:$0xf] }
  0x95   : > { %v764_v46 = vrot.slane %v759_v39, 4  ;;  %v14444_v51 = vld [vmem:[%s19866_s2] sm:$0x3f]   ;;  %v1323_v54 = vrot.slane %v1321_v48, 1  ;;  %1551 = vrot.lane.b32.xlu1 %v1513_v40, %s13958_s15  ;;  %v1509_v56 = vrot.slane %v13761_v37, 1  ;;  %v932_v59 = vsel %vm14093_vm12, %v754_v19, %v931_v57 }
  0x96   : > { %v1328_v58 = vrot.slane %v1326_v49, 1  ;;  %v935_v61 = vld [vmem:[#allocation2 + $0xbc] sm:$0x1]  ;;  %v977_v62 = vld [vmem:[#allocation2 + $0xc0] sm:$0xf]  ;;  %v763_v63 = vsel %vm14086_vm11, %v755_v44, %v762_v53  ;;  %v1678_v8 = vsel %vm1676_vm15, %v13770_v10, 0 }
  0x97   : > { %933 = vst [vmem:[#allocation2 + $0xb4] sm:$0xf] %v932_v59  ;;  %v936_v2 = vsel %vm14021_vm2, %v764_v46, %v935_v61  ;;  %v1015_v3 = vld [vmem:[#allocation2 + $0xc0] sm:$0xe]  ;;  %v1324_v5 = vor.u32 %v1323_v54, %v1319_v45  ;;  %934 = vst.msk [vmem:[#allocation2 + $0xb8] sm:$0xf] %vm354_vm4, %v763_v63  ;;  %12791 = vmatpush3.bf16.msra.mxu0 %v1678_v8  ;;  %v1510_v25 = vsel %vm1468_vm13, %v1508_v33, %v1509_v56 }
  0x98   : > { %v13764_v6 = vld [vmem:[#allocation2 + $0xc8] ss:$0 sps:$4 sm:$0x11]   ;;  %937 = vst [vmem:[#allocation2 + $0xbc] sm:$0x1] %v936_v2  ;;  %13709 = vmatprep.subr.msk.bf16.mxu0 %vm1676_vm15, %v14444_v51  ;;  %vm1559_vm0 = vcmask 31744  }
  0x99   : > { %v978_v11 = vld [vmem:[#allocation2 + $0xc4] sm:$0xf]  ;;  %v945_v34 = vld [vmem:[#allocation2] sm:$0xf]  ;;  %v1329_v12 = vsel %vm1161_vm14, %v1324_v5, %v1328_v58  ;;  %v1362_v17 = vshll.u32 %v13764_v6, 16  ;;  %v1518_v31 = vrot.slane %v13764_v6, 1 }
  0x9a   : > { %v14456_v14 = vcombine.low %v977_v62, %v978_v11  ;;  %v11222_v18 = vcombine.low %v1015_v3, %v978_v11  ;;  %v417_v20 = vld [vmem:[#allocation2 + $0xcc] sm:$0x1]  ;;  %1404 = vrot.lane.b32.xlu0 %v1329_v12, %s13959_s16  ;;  %v14462_v22 = vcombine.low %v945_v34, %v14410_v1  ;;  %v13769_v23 = vld [vmem:[#allocation2 + $0x8] ss:$0 sps:$4 sm:$0x11]   ;;  %vm1596_vm1 = vcmask 64512  }
  0x9b   : > { %v418_v10 = vsel %vm14021_vm2, 0, %v417_v20  ;;  %v1364_v21 = vrot.slane %v1362_v17, 1  ;;  %v473_v1 = vld [vmem:[#allocation2 + $0xd4] sm:$0x1]  ;;  %v1170_v44 = vshll.u32 %v13769_v23, 16  ;;  %v1470_v45 = vrot.slane %v13769_v23, 1 }
  0x9c   : > { %v1355_v26 = vshrl.u32 %v14456_v14, 16  ;;  %v1357_v30 = vshll.u32 %v14456_v14, 16  ;;  %419 = vst [vmem:[#allocation2 + $0xcc] sm:$0x1] %v418_v10  ;;  %v1517_v32 = vrot.slane %v11222_v18, 1  ;;  %v1163_v35 = vshrl.u32 %v14462_v22, 16 }
  0x9d   : > { %v1165_v37 = vshll.u32 %v14462_v22, 16  ;;  %v474_v0 = vsel %vm14031_vm5, 0, %v473_v1  ;;  %v980_v62 = vld [vmem:[#allocation2 + $0xd0] sm:$0xf]  ;;  %v1471_v12 = vsel %vm1468_vm13, %v14438_v24, %v1470_v45  ;;  %v1016_v17 = vld [vmem:[#allocation2 + $0xcc] sm:$0xe]  ;;  %vm15025_vm5 = vmand %vm3853_vm8, %vm420_vm3 }
  0x9e   : > { %v1359_v38 = vrot.slane %v1357_v30, 1  ;;  %v975_v39 = vld [vmem:[#allocation2 + $0xb4] sm:$0xf]  ;;  %1549 = vrot.lane.b32.xlu0 %v1510_v25, %s13958_s15  ;;  %v976_v19 = vld [vmem:[#allocation2 + $0xb8] sm:$0xf]  ;;  %v1519_v3 = vsel %vm1468_vm13, %v1517_v32, %v1518_v31  ;;  %v1172_v20 = vrot.slane %v1170_v44, 1  ;;  %v11223_v23 = vcombine.low %v1016_v17, %v980_v62 }
  0x9f   : > { %v1014_v40 = vld [vmem:[#allocation2 + $0xb4] sm:$0xe]  ;;  %475 = vst [vmem:[#allocation2 + $0xd4] sm:$0x1] %v474_v0  ;;  %v14474_v49 = vcombine.low %v975_v39, %v976_v19  ;;  %v1167_v46 = vrot.slane %v1165_v37, 1  ;;  %vm1643_vm2 = vcmask 97280  }
  0xa0   : > { %v1360_v48 = vor.u32 %v1359_v38, %v1355_v26  ;;  %v13766_v33 = vld [vmem:[#allocation2 + $0xbc] ss:$0 sps:$4 sm:$0x11]   ;;  %v11221_v53 = vcombine.low %v1014_v40, %v976_v19  ;;  %v13772_v25 = vld [vmem:[%s19866_s2 + $0x10] sm:$0x3f]   ;;  %vm2358_vm4 = vcmask 130048  }
  0xa1   : > { %v1343_v54 = vshrl.u32 %v14474_v49, 16  ;;  %v1345_v58 = vshll.u32 %v14474_v49, 16  ;;  %v1350_v4 = vshll.u32 %v13766_v33, 16  ;;  %v1515_v59 = vrot.slane %v13766_v33, 1 }
  0xa2   : > { %v1365_v57 = vsel %vm1161_vm14, %v1360_v48, %v1364_v21  ;;  %v1514_v56 = vrot.slane %v11221_v53, 1  ;;  %v1168_v18 = vor.u32 %v1167_v46, %v1163_v35  ;;  %v1520_v21 = vrot.slane %v11223_v23, 1 }
  0xa3   : > { %1410 = vrot.lane.b32.xlu1 %v1365_v57, %s13959_s16  ;;  %v979_v61 = vld [vmem:[#allocation2 + $0xcc] sm:$0xf]  ;;  %v1347_v63 = vrot.slane %v1345_v58, 1  ;;  %v1352_v2 = vrot.slane %v1350_v4, 1  ;;  %v14496_v32 = vsel %vm1676_vm15, %v13772_v25, 0  ;;  %v1849_v53 = vsel %vm1676_vm15, %v14444_v51, 0 }
  0xa4   : > { %v14481_v5 = vcombine.low %v979_v61, %v980_v62  ;;  %v1516_v10 = vsel %vm1468_vm13, %v1514_v56, %v1515_v59  ;;  %v1173_v37 = vsel %vm1161_vm14, %v1168_v18, %v1172_v20  ;;  %vm8251_vm3 = vcmask 1043456  }
  0xa5   : > { %v1348_v6 = vor.u32 %v1347_v63, %v1343_v54  ;;  %v1526_v40 = vpop.permute.xlu1 %1525  ;;  %vm8122_vm6 = vcmask 195584  }
  0xa6   : > { %v13774_v8 = vld [vmem:[#allocation2 + $0xd4] ss:$0 sps:$4 sm:$0x11]   ;;  %v1369_v11 = vshll.u32 %v14481_v5, 16  ;;  %v1367_v26 = vshrl.u32 %v14481_v5, 16 }
  0xa7   : > { %1555 = vrot.lane.b32.xlu1 %v1519_v3, %s13958_s15  ;;  %v1353_v34 = vsel %vm1161_vm14, %v1348_v6, %v1352_v2  ;;  %v1374_v31 = vshll.u32 %v13774_v8, 16  ;;  %v1521_v24 = vrot.slane %v13774_v8, 1 }
  0xa8   : > { %1408 = vrot.lane.b32.xlu0 %v1353_v34, %s13959_s16  ;;  %v1371_v30 = vrot.slane %v1369_v11, 1 }
  0xa9   : > { %v1522_v35 = vsel %vm1468_vm13, %v1520_v21, %v1521_v24  ;;  %v1376_v38 = vrot.slane %v1374_v31, 1  ;;  %v1528_v48 = vpop.permute.xlu1 %1527 }
  0xaa   : > { %v1372_v1 = vor.u32 %v1371_v30, %v1367_v26 }
  0xab   : > { %1523 = vrot.lane.b32.xlu1 %v1471_v12, %s13958_s15  ;;  %v1381_v0 = vpop.permute.xlu0 %1380 }
  0xac   : > { %1553 = vrot.lane.b32.xlu0 %v1516_v10, %s13958_s15  ;;  %v1377_v39 = vsel %vm1161_vm14, %v1372_v1, %v1376_v38  ;;  %v1563_v19 = vsel %vm1559_vm0, %v14147_v43, %v1381_v0 }
  0xad   : > { %v14508_v44 = vsel %vm1596_vm1, %v1563_v19, %v1526_v40 }
  0xae   : > { %12792 = vmatprep.mubr.msk.bf16.mxu0 %vm1643_vm2, %v14508_v44 }
  0xaf   : > { %1557 = vrot.lane.b32.xlu1 %v1522_v35, %s13958_s15  ;;  %v1383_v45 = vpop.permute.xlu0 %1382  ;;  %v1387_v43 = vpop.permute.xlu1 %1386 }
  0xb0   : > { %1378 = vrot.lane.b32.xlu0 %v1173_v37, %s13959_s16  ;;  %v1565_v33 = vsel %vm1559_vm0, %v14156_v55, %v1383_v45  ;;  %v1569_v54 = vsel %vm1559_vm0, %v14163_v7, %v1387_v43 }
  0xb1   : > { %v14517_v46 = vsel %vm1596_vm1, %v1565_v33, %v1528_v48 }
  0xb2   : > { %12793 = vmatmul.mubr.msk.bf16.vlgmr.msra.gmra.mrb[0].mxu0 %vm1643_vm2, %v14517_v46 }
  0xb3   : > { %12825 = vmatpush3.bf16.msra.mxu0 %v1849_v53  ;;  %v1532_v58 = vpop.permute.xlu1 %1531 }
  0xb4   : > { %1412 = vrot.lane.b32.xlu0 %v1377_v39, %s13959_s16  ;;  %13710 = vmatprep.subr.msk.bf16.mxu0 %vm1676_vm15, %v13772_v25  ;;  %v14530_v56 = vsel %vm1596_vm1, %v1569_v54, %v1532_v58  ;;  %s14860_s16 = scalar_lea.vmem %s19865_s1, %s11916_s12 }
  0xbc   : > { %v1385_v57 = vpop.permute.xlu0 %1384 }
  0xbd   : > { %v1567_v55 = vsel %vm1559_vm0, %v14201_v15, %v1385_v57 }
  0xc0   : > { %v1530_v4 = vpop.permute.xlu0 %1529 }
  0xc1   : > { %v14527_v51 = vsel %vm1596_vm1, %v1567_v55, %v1530_v4  ;;  %v14660_v4 = vld [vmem:[%s19867_s3] ss:$0 sm:$0xff] }
  0xc2   : > { %12796 = vmatprep.mubr.msk.bf16.mxu0 %vm1643_vm2, %v14527_v51  ;;  %v1391_v59 = vpop.permute.xlu1 %1390 }
  0xc3   : > { %12797 = vmatmul.mubr.msk.bf16.gmra.mrb[4].mxu0 %vm1643_vm2, %v14530_v56  ;;  %v1573_v7 = vsel %vm1559_vm0, %v14210_v42, %v1391_v59 }
  0xc6   : > { %v1536_v62 = vpop.permute.xlu1 %1535 }
  0xc7   : > { %v14544_v3 = vsel %vm1596_vm1, %v1573_v7, %v1536_v62 }
  0xcc   : > { %v1389_v61 = vpop.permute.xlu0 %1388 }
  0xcd   : > { %v1571_v15 = vsel %vm1559_vm0, %v14245_v27, %v1389_v61 }
  0xd0   : > { %v1534_v63 = vpop.permute.xlu0 %1533  ;;  %v1395_v6 = vpop.permute.xlu1 %1394 }
  0xd1   : > { %v14541_v2 = vsel %vm1596_vm1, %v1571_v15, %v1534_v63  ;;  %v1577_v42 = vsel %vm1559_vm0, %v14257_v52, %v1395_v6 }
  0xd2   : > { %12800 = vmatprep.mubr.msk.bf16.mxu0 %vm1643_vm2, %v14541_v2 }
  0xd3   : > { %12801 = vmatmul.mubr.msk.bf16.gmra.mrb[8].mxu0 %vm1643_vm2, %v14544_v3 }
  0xd4   : > { %v1540_v11 = vpop.permute.xlu1 %1539 }
  0xd5   : > { %v14558_v17 = vsel %vm1596_vm1, %v1577_v42, %v1540_v11 }
  0xdb   : > { %v1393_v8 = vpop.permute.xlu0 %1392 }
  0xdc   : > { %v1575_v27 = vsel %vm1559_vm0, %v14285_v50, %v1393_v8 }
  0xdf   : > { %v1538_v34 = vpop.permute.xlu0 %1537 }
  0xe0   : > { %v14555_v12 = vsel %vm1596_vm1, %v1575_v27, %v1538_v34 }
  0xe1   : > { %12804 = vmatprep.mubr.msk.bf16.mxu0 %vm1643_vm2, %v14555_v12 }
  0xe2   : > { %12805 = vmatmul.mubr.msk.bf16.gmra.mrb[12].mxu0 %vm1643_vm2, %v14558_v17 }
  0xe4   : > { %v1399_v18 = vpop.permute.xlu1 %1398 }
  0xe5   : > { %v1581_v52 = vsel %vm1559_vm0, %v14311_v41, %v1399_v18 }
  0xe8   : > { %v1544_v23 = vpop.permute.xlu1 %1543 }
  0xe9   : > { %v1618_v26 = vsel %vm1596_vm1, %v1581_v52, %v1544_v23 }
  0xeb   : > { %v1397_v20 = vpop.permute.xlu0 %1396 }
  0xec   : > { %v1579_v50 = vsel %vm1559_vm0, %v14330_v13, %v1397_v20 }
  0xef   : > { %v1542_v10 = vpop.permute.xlu0 %1541 }
  0xf0   : > { %v1616_v25 = vsel %vm1596_vm1, %v1579_v50, %v1542_v10 }
  0xf1   : > { %12808 = vmatprep.mubr.msk.bf16.mxu0 %vm1643_vm2, %v1616_v25 }
  0xf2   : > { %12809 = vmatmul.mubr.msk.bf16.gmra.mrb[16].mxu0 %vm1643_vm2, %v1618_v26  ;;  %v1403_v30 = vpop.permute.xlu1 %1402 }
  0xf3   : > { %v1585_v21 = vsel %vm1559_vm0, %v14352_v60, %v1403_v30 }
  0xf6   : > { %v1548_v24 = vpop.permute.xlu1 %1547 }
  0xf7   : > { %v1622_v37 = vsel %vm1596_vm1, %v1585_v21, %v1548_v24  ;;  %v14684_v21 = vld [vmem:[%s19869_s5 + $0x8] sm:$0xff]  }
  0xfa   : > { %v1401_v31 = vpop.permute.xlu0 %1400 }
  0xfb   : > { %v1583_v41 = vsel %vm1559_vm0, %v14373_v47, %v1401_v31 }
  0xfe   : > { %v1546_v35 = vpop.permute.xlu0 %1545 }
  0xff   : > { %v1620_v13 = vsel %vm1596_vm1, %v1583_v41, %v1546_v35 }
 0x100   : > { %12812 = vmatprep.mubr.msk.bf16.mxu0 %vm1643_vm2, %v1620_v13 }
 0x101   : > { %12813 = vmatmul.mubr.msk.bf16.gmra.mrb[20].mxu0 %vm1643_vm2, %v1622_v37 }
 0x103   : > { %v1407_v1 = vpop.permute.xlu1 %1406 }
 0x104   : > { %v1589_v39 = vsel %vm1559_vm0, %v14389_v29, %v1407_v1 }
 0x107   : > { %v1552_v40 = vpop.permute.xlu1 %1551 }
 0x108   : > { %v1626_v19 = vsel %vm1596_vm1, %v1589_v39, %v1552_v40 }
 0x10c   : > { %v1405_v38 = vpop.permute.xlu0 %1404 }
 0x10d   : > { %v1587_v60 = vsel %vm1559_vm0, %v14432_v36, %v1405_v38 }
 0x110   : > { %v1550_v0 = vpop.permute.xlu0 %1549 }
 0x111   : > { %v1624_v47 = vsel %vm1596_vm1, %v1587_v60, %v1550_v0 }
 0x112   : > { %12816 = vmatprep.mubr.msk.bf16.mxu0 %vm1643_vm2, %v1624_v47 }
 0x113   : > { %12817 = vmatmul.mubr.msk.bf16.gmra.mrb[24].mxu0 %vm1643_vm2, %v1626_v19 }
 0x115   : > { %v1411_v45 = vpop.permute.xlu1 %1410 }
 0x116   : > { %v1593_v33 = vsel %vm1559_vm0, %v14456_v14, %v1411_v45 }
 0x119   : > { %v1556_v53 = vpop.permute.xlu1 %1555 }
 0x11a   : > { %v1409_v48 = vpop.permute.xlu0 %1408  ;;  %v1630_v57 = vsel %vm1596_vm1, %v1593_v33, %v1556_v53 }
 0x11b   : > { %v1591_v29 = vsel %vm1559_vm0, %v14474_v49, %v1409_v48 }
 0x11d   : > { %v1524_v54 = vpop.permute.xlu1 %1523 }
 0x11e   : > { %v1554_v43 = vpop.permute.xlu0 %1553 }
 0x11f   : > { %v1628_v36 = vsel %vm1596_vm1, %v1591_v29, %v1554_v43 }
 0x120   : > { %12820 = vmatprep.mubr.msk.bf16.mxu0 %vm1643_vm2, %v1628_v36 }
 0x121   : > { %12821 = vmatmul.mubr.msk.bf16.gmra.mrb[28].mxu0 %vm1643_vm2, %v1630_v57 }
 0x122   : > { %v1379_v58 = vpop.permute.xlu0 %1378 }
 0x123   : > { %v1561_v55 = vsel %vm1559_vm0, %v14462_v22, %v1379_v58 }
 0x124   : > { %v1598_v14 = vsel %vm1596_vm1, %v1561_v55, %v1524_v54 }
 0x125   : > { %12826 = vmatprep.mubr.msk.bf16.mxu0 %vm1643_vm2, %v1598_v14 }
 0x126   : > { %v1413_v22 = vpop.permute.xlu0 %1412 }
 0x127   : > { %v1595_v49 = vsel %vm1559_vm0, %v14481_v5, %v1413_v22 }
 0x129   : > { %12827 = vmatmul.mubr.msk.bf16.vlgmr.msra.gmra.mrb[0].mxu0 %vm1643_vm2, %v14508_v44 }
 0x12a   : > { %12830 = vmatprep.mubr.msk.bf16.mxu0 %vm1643_vm2, %v14517_v46  ;;  %12859 = vmatpush3.bf16.msra.mxu0 %v14496_v32  ;;  %v1558_v32 = vpop.permute.xlu1 %1557 }
 0x12b   : > { %v1632_v44 = vsel %vm1596_vm1, %v1595_v49, %v1558_v32 }
 0x131   : > { %12831 = vmatmul.mubr.msk.bf16.gmra.mrb[4].mxu0 %vm1643_vm2, %v14527_v51 }
 0x132   : > { %12834 = vmatprep.mubr.msk.bf16.mxu0 %vm1643_vm2, %v14530_v56 }
 0x139   : > { %12835 = vmatmul.mubr.msk.bf16.gmra.mrb[8].mxu0 %vm1643_vm2, %v14541_v2 }
 0x13a   : > { %12838 = vmatprep.mubr.msk.bf16.mxu0 %vm1643_vm2, %v14544_v3 }
 0x141   : > { %12839 = vmatmul.mubr.msk.bf16.gmra.mrb[12].mxu0 %vm1643_vm2, %v14555_v12 }
 0x142   : > { %12842 = vmatprep.mubr.msk.bf16.mxu0 %vm1643_vm2, %v14558_v17 }
 0x149   : > { %12843 = vmatmul.mubr.msk.bf16.gmra.mrb[16].mxu0 %vm1643_vm2, %v1616_v25 }
 0x14a   : > { %12846 = vmatprep.mubr.msk.bf16.mxu0 %vm1643_vm2, %v1618_v26 }
 0x151   : > { %12847 = vmatmul.mubr.msk.bf16.gmra.mrb[20].mxu0 %vm1643_vm2, %v1620_v13 }
 0x152   : > { %12850 = vmatprep.mubr.msk.bf16.mxu0 %vm1643_vm2, %v1622_v37 }
 0x159   : > { %12851 = vmatmul.mubr.msk.bf16.gmra.mrb[24].mxu0 %vm1643_vm2, %v1624_v47 }
 0x15a   : > { %12854 = vmatprep.mubr.msk.bf16.mxu0 %vm1643_vm2, %v1626_v19 }
 0x161   : > { %12855 = vmatmul.mubr.msk.bf16.gmra.mrb[28].mxu0 %vm1643_vm2, %v1628_v36 }
 0x162   : > { %12860 = vmatprep.mubr.msk.bf16.mxu0 %vm1643_vm2, %v14517_v46  ;;  %v14653_v46 = vld [vmem:[%s19869_s5] sm:$0xff]  }
 0x163   : > { %12894 = vmatprep.mubr.msk.bf16.mxu1 %vm2358_vm4, %v14653_v46 }
 0x169   : > { %12861 = vmatmul.mubr.msk.bf16.vlgmr.msra.gmra.mrb[0].mxu0 %vm1643_vm2, %v14527_v51  ;;  %v14665_v51 = vld [vmem:[%s19868_s4] ss:$0 sm:$0xff] }
 0x16a   : > { %12864 = vmatprep.mubr.msk.bf16.mxu0 %vm1643_vm2, %v14530_v56 }
 0x171   : > { %12865 = vmatmul.mubr.msk.bf16.gmra.mrb[4].mxu0 %vm1643_vm2, %v14541_v2 }
 0x172   : > { %12868 = vmatprep.mubr.msk.bf16.mxu0 %vm1643_vm2, %v14544_v3 }
 0x179   : > { %12869 = vmatmul.mubr.msk.bf16.gmra.mrb[8].mxu0 %vm1643_vm2, %v14555_v12 }
 0x17a   : > { %12872 = vmatprep.mubr.msk.bf16.mxu0 %vm1643_vm2, %v14558_v17 }
 0x181   : > { %12873 = vmatmul.mubr.msk.bf16.gmra.mrb[12].mxu0 %vm1643_vm2, %v1616_v25 }
 0x182   : > { %12876 = vmatprep.mubr.msk.bf16.mxu0 %vm1643_vm2, %v1618_v26 }
 0x189   : > { %12877 = vmatmul.mubr.msk.bf16.gmra.mrb[16].mxu0 %vm1643_vm2, %v1620_v13 }
 0x18a   : > { %12880 = vmatprep.mubr.msk.bf16.mxu0 %vm1643_vm2, %v1622_v37 }
 0x191   : > { %12881 = vmatmul.mubr.msk.bf16.gmra.mrb[20].mxu0 %vm1643_vm2, %v1624_v47 }
 0x192   : > { %12884 = vmatprep.mubr.msk.bf16.mxu0 %vm1643_vm2, %v1626_v19 }
 0x199   : > { %12885 = vmatmul.mubr.msk.bf16.gmra.mrb[24].mxu0 %vm1643_vm2, %v1628_v36 }
 0x19a   : > { %12888 = vmatprep.mubr.msk.bf16.mxu0 %vm1643_vm2, %v1630_v57 }
 0x1a1   : > { %12889 = vmatmul.mubr.msk.bf16.gmra.mrb[28].mxu0 %vm1643_vm2, %v1632_v44 }
 0x23c   : > { %v12862_v5 = vpop.f32.mrb[0].mxu0 }
 0x23d   : > { %v2227_v56 = vmul.f32 %v12862_v5, %v14660_v4  ;;  %v2059_v59 = vpop.f32.mrb[1].mxu0 }
 0x23e   : > { %v2225_v61 = vmul.f32 %v14660_v4, %v2059_v59  ;;  %v12863_v7 = vpop.f32.mrb[2].mxu0 }
 0x23f   : > { %v2266_v62 = vadd.f32 %v14665_v51, %v2227_v56  ;;  %v2228_v15 = vmul.f32 %v12863_v7, %v14660_v4  ;;  %v2062_v63 = vpop.f32.mrb[3].mxu0 }
 0x240   : > { %v2264_v2 = vadd.f32 %v14665_v51, %v2225_v61  ;;  %v2226_v3 = vmul.f32 %v14660_v4, %v2062_v63 }
 0x241   : > { %v2267_v6 = vadd.f32 %v14665_v51, %v2228_v15  ;;  %v2298_v42 = vmax.f32 %v2266_v62, 0.0 }
 0x242   : > { %v2265_v8 = vadd.f32 %v14665_v51, %v2226_v3  ;;  %v2296_v27 = vmax.f32 %v2264_v2, 0.0 }
 0x243   : > { %v2299_v11 = vmax.f32 %v2267_v6, 0.0 }
 0x244   : > { %v2297_v34 = vmax.f32 %v2265_v8, 0.0  ;;  %v12866_v12 = vpop.f32.mrb[4].mxu0 }
 0x245   : > { %v2231_v17 = vmul.f32 %v12866_v12, %v14660_v4  ;;  %v2075_v18 = vpop.f32.mrb[5].mxu0  ;;  %v2329_v20 = vpack.c.bf16 %v2299_v11, %v2298_v42 }
 0x246   : > { %v2229_v52 = vmul.f32 %v14660_v4, %v2075_v18  ;;  %v12867_v23 = vpop.f32.mrb[6].mxu0  ;;  %v2328_v50 = vpack.c.bf16 %v2297_v34, %v2296_v27 }
 0x247   : > { %v2270_v10 = vadd.f32 %v14665_v51, %v2231_v17  ;;  %v2232_v25 = vmul.f32 %v12867_v23, %v14660_v4  ;;  %v2078_v26 = vpop.f32.mrb[7].mxu0 }
 0x248   : > { %v2268_v30 = vadd.f32 %v14665_v51, %v2229_v52  ;;  %v2230_v31 = vmul.f32 %v14660_v4, %v2078_v26  ;;  %12892 = vmatprep.subr.bf16.mxu1 %v2328_v50 }
 0x249   : > { %v2271_v24 = vadd.f32 %v14665_v51, %v2232_v25  ;;  %12893 = vmatpush3.bf16.msra.mxu1 %v2328_v50  ;;  %v2302_v35 = vmax.f32 %v2270_v10, 0.0 }
 0x24a   : > { %v2269_v41 = vadd.f32 %v14665_v51, %v2230_v31  ;;  %12898 = vmatprep.subr.bf16.mxu1 %v2329_v20  ;;  %v2300_v37 = vmax.f32 %v2268_v30, 0.0 }
 0x24b   : > { %v2303_v13 = vmax.f32 %v2271_v24, 0.0 }
 0x24c   : > { %v2301_v1 = vmax.f32 %v2269_v41, 0.0  ;;  %v12870_v38 = vpop.f32.mrb[8].mxu0  ;;  %12895 = vmatmul.mubr.msk.bf16.vlgmr.msra.gmra.mrb[0].mxu1 %vm2358_vm4, %v14684_v21 }
 0x24d   : > { %v2235_v39 = vmul.f32 %v12870_v38, %v14660_v4  ;;  %v2091_v40 = vpop.f32.mrb[9].mxu0  ;;  %12899 = vmatpush3.bf16.msra.mxu1 %v2329_v20  ;;  %12900 = vmatprep.mubr.msk.bf16.mxu1 %vm2358_vm4, %v14653_v46  ;;  %v2331_v60 = vpack.c.bf16 %v2303_v13, %v2302_v35 }
 0x24e   : > { %v2233_v0 = vmul.f32 %v14660_v4, %v2091_v40  ;;  %v12871_v47 = vpop.f32.mrb[10].mxu0  ;;  %v2330_v19 = vpack.c.bf16 %v2301_v1, %v2300_v37 }
 0x24f   : > { %v2274_v45 = vadd.f32 %v14665_v51, %v2235_v39  ;;  %v2236_v48 = vmul.f32 %v12871_v47, %v14660_v4  ;;  %v2094_v33 = vpop.f32.mrb[11].mxu0 }
 0x250   : > { %v2272_v53 = vadd.f32 %v14665_v51, %v2233_v0  ;;  %v2234_v29 = vmul.f32 %v14660_v4, %v2094_v33  ;;  %12904 = vmatprep.subr.bf16.mxu1 %v2330_v19 }
 0x251   : > { %v2275_v43 = vadd.f32 %v14665_v51, %v2236_v48  ;;  %v2306_v57 = vmax.f32 %v2274_v45, 0.0 }
 0x252   : > { %v2273_v36 = vadd.f32 %v14665_v51, %v2234_v29  ;;  %v2304_v58 = vmax.f32 %v2272_v53, 0.0 }
 0x253   : > { %v2307_v54 = vmax.f32 %v2275_v43, 0.0 }
 0x254   : > { %v2305_v55 = vmax.f32 %v2273_v36, 0.0  ;;  %v12874_v14 = vpop.f32.mrb[12].mxu0  ;;  %12901 = vmatmul.mubr.msk.bf16.vlgmr.msra.gmra.mrb[4].mxu1 %vm2358_vm4, %v14684_v21 }
 0x255   : > { %v2239_v22 = vmul.f32 %v12874_v14, %v14660_v4  ;;  %12905 = vmatpush3.bf16.msra.mxu1 %v2330_v19  ;;  %v2107_v49 = vpop.f32.mrb[13].mxu0  ;;  %12906 = vmatprep.mubr.msk.bf16.mxu1 %vm2358_vm4, %v14653_v46  ;;  %v14705_v32 = vpack.c.bf16 %v2307_v54, %v2306_v57 }
 0x256   : > { %v2237_v44 = vmul.f32 %v14660_v4, %v2107_v49  ;;  %12910 = vmatprep.subr.bf16.mxu1 %v2331_v60  ;;  %v12875_v5 = vpop.f32.mrb[14].mxu0  ;;  %v2332_v56 = vpack.c.bf16 %v2305_v55, %v2304_v58 }
 0x257   : > { %v2278_v59 = vadd.f32 %v14665_v51, %v2239_v22  ;;  %v2240_v61 = vmul.f32 %v12875_v5, %v14660_v4  ;;  %v2110_v7 = vpop.f32.mrb[15].mxu0 }
 0x258   : > { %v2276_v62 = vadd.f32 %v14665_v51, %v2237_v44  ;;  %v2238_v15 = vmul.f32 %v14660_v4, %v2110_v7 }
 0x259   : > { %v2279_v63 = vadd.f32 %v14665_v51, %v2240_v61  ;;  %v2310_v3 = vmax.f32 %v2278_v59, 0.0 }
 0x25a   : > { %v2277_v2 = vadd.f32 %v14665_v51, %v2238_v15  ;;  %v2308_v8 = vmax.f32 %v2276_v62, 0.0 }
 0x25b   : > { %v2311_v6 = vmax.f32 %v2279_v63, 0.0 }
 0x25c   : > { %v2309_v42 = vmax.f32 %v2277_v2, 0.0  ;;  %v12878_v11 = vpop.f32.mrb[16].mxu0  ;;  %12907 = vmatmul.mubr.msk.bf16.vlgmr.msra.gmra.mrb[8].mxu1 %vm2358_vm4, %v14684_v21 }
 0x25d   : > { %v2243_v27 = vmul.f32 %v12878_v11, %v14660_v4  ;;  %12911 = vmatpush3.bf16.msra.mxu1 %v2331_v60  ;;  %v2123_v34 = vpop.f32.mrb[17].mxu0  ;;  %12912 = vmatprep.mubr.msk.bf16.mxu1 %vm2358_vm4, %v14653_v46  ;;  %v14719_v12 = vpack.c.bf16 %v2311_v6, %v2310_v3 }
 0x25e   : > { %v2241_v17 = vmul.f32 %v14660_v4, %v2123_v34  ;;  %12916 = vmatprep.subr.bf16.mxu1 %v2332_v56  ;;  %v12879_v18 = vpop.f32.mrb[18].mxu0  ;;  %v2334_v20 = vpack.c.bf16 %v2309_v42, %v2308_v8 }
 0x25f   : > { %v2282_v52 = vadd.f32 %v14665_v51, %v2243_v27  ;;  %v2244_v23 = vmul.f32 %v12879_v18, %v14660_v4  ;;  %v2126_v50 = vpop.f32.mrb[19].mxu0 }
 0x260   : > { %v2280_v10 = vadd.f32 %v14665_v51, %v2241_v17  ;;  %v2242_v25 = vmul.f32 %v14660_v4, %v2126_v50 }
 0x261   : > { %v2283_v26 = vadd.f32 %v14665_v51, %v2244_v23  ;;  %v2314_v31 = vmax.f32 %v2282_v52, 0.0 }
 0x262   : > { %v2281_v30 = vadd.f32 %v14665_v51, %v2242_v25  ;;  %v2312_v41 = vmax.f32 %v2280_v10, 0.0 }
 0x263   : > { %v2315_v24 = vmax.f32 %v2283_v26, 0.0 }
 0x264   : > { %v2313_v35 = vmax.f32 %v2281_v30, 0.0  ;;  %v12882_v13 = vpop.f32.mrb[20].mxu0  ;;  %12913 = vmatmul.mubr.msk.bf16.vlgmr.msra.gmra.mrb[12].mxu1 %vm2358_vm4, %v14684_v21 }
 0x265   : > { %v2247_v37 = vmul.f32 %v12882_v13, %v14660_v4  ;;  %12917 = vmatpush3.bf16.msra.mxu1 %v2332_v56  ;;  %v2139_v1 = vpop.f32.mrb[21].mxu0  ;;  %12918 = vmatprep.mubr.msk.bf16.mxu1 %vm2358_vm4, %v14653_v46  ;;  %v14733_v38 = vpack.c.bf16 %v2315_v24, %v2314_v31 }
 0x266   : > { %v2245_v39 = vmul.f32 %v14660_v4, %v2139_v1  ;;  %12922 = vmatprep.subr.bf16.mxu1 %v14705_v32  ;;  %v12883_v40 = vpop.f32.mrb[22].mxu0  ;;  %v14737_v60 = vpack.c.bf16 %v2313_v35, %v2312_v41  ;;  %v3974_v35 = vld [vmem:[#allocation3 + $0x24] sm:$0x1]  ;;  %v3877_v1 = vld [vmem:[#allocation3 + $0x3c] sm:$0x1] }
 0x267   : > { %v2286_v0 = vadd.f32 %v14665_v51, %v2247_v37  ;;  %v2248_v47 = vmul.f32 %v12883_v40, %v14660_v4  ;;  %v2142_v19 = vpop.f32.mrb[23].mxu0  ;;  %v3975_v13 = vsel %vm14073_vm10, 0, %v3974_v35  ;;  %v3874_v37 = vld [vmem:[#allocation3 + $0x28] sm:$0x1]  ;;  %v3977_v40 = vld [vmem:[#allocation3 + $0x38] sm:$0x1] }
 0x268   : > { %v2284_v45 = vadd.f32 %v14665_v51, %v2245_v39  ;;  %v2246_v48 = vmul.f32 %v14660_v4, %v2142_v19  ;;  %3976 = vst [vmem:[#allocation3 + $0x24] sm:$0x1] %v3975_v13  ;;  %v3878_v39 = vsel %vm14061_vm9, 0, %v3877_v1  ;;  %v3880_v19 = vld [vmem:[#allocation3 + $0x50] sm:$0x1]  ;;  %v14907_v13 = vld [vmem:[%s14860_s16 + $0x58] sm:$0xff]  }
 0x269   : > { %v2287_v33 = vadd.f32 %v14665_v51, %v2248_v47  ;;  %v2318_v29 = vmax.f32 %v2286_v0, 0.0  ;;  %3879 = vst [vmem:[#allocation3 + $0x3c] sm:$0x1] %v3878_v39  ;;  %v3978_v0 = vsel %vm14073_vm10, 0, %v3977_v40 }
 0x26a   : > { %v2285_v53 = vadd.f32 %v14665_v51, %v2246_v48  ;;  %v2316_v36 = vmax.f32 %v2284_v45, 0.0  ;;  %3979 = vst [vmem:[#allocation3 + $0x38] sm:$0x1] %v3978_v0  ;;  %v3883_v45 = vld [vmem:[#allocation3 + $0x64] sm:$0x1]  ;;  %v3881_v48 = vsel %vm14061_vm9, 0, %v3880_v19 }
 0x26b   : > { %v2319_v43 = vmax.f32 %v2287_v33, 0.0  ;;  %v3884_v33 = vsel %vm14061_vm9, 0, %v3883_v45  ;;  %3882 = vst [vmem:[#allocation3 + $0x50] sm:$0x1] %v3881_v48  ;;  %v14920_v0 = vld [vmem:[%s14860_s16 + $0x60] sm:$0xff]  }
 0x26c   : > { %v2317_v57 = vmax.f32 %v2285_v53, 0.0  ;;  %v12886_v54 = vpop.f32.mrb[24].mxu0  ;;  %12919 = vmatmul.mubr.msk.bf16.vlgmr.msra.gmra.mrb[16].mxu1 %vm2358_vm4, %v14684_v21  ;;  %3885 = vst [vmem:[#allocation3 + $0x64] sm:$0x1] %v3884_v33  ;;  %v3983_v53 = vld [vmem:[#allocation3 + $0x60] sm:$0x1] }
 0x26d   : > { %v2251_v58 = vmul.f32 %v12886_v54, %v14660_v4  ;;  %12923 = vmatpush3.bf16.msra.mxu1 %v14705_v32  ;;  %v2155_v55 = vpop.f32.mrb[25].mxu0  ;;  %12924 = vmatprep.mubr.msk.bf16.mxu1 %vm2358_vm4, %v14653_v46  ;;  %v2339_v14 = vpack.c.bf16 %v2319_v43, %v2318_v29  ;;  %v3986_v29 = vld [vmem:[#allocation3 + $0x74] sm:$0x1]  ;;  %v3984_v43 = vsel %vm14073_vm10, 0, %v3983_v53  ;;  %v14927_v33 = vld [vmem:[%s14860_s16 + $0x78] sm:$0xff]  }
 0x26e   : > { %v2249_v22 = vmul.f32 %v14660_v4, %v2155_v55  ;;  %12928 = vmatprep.subr.bf16.mxu1 %v2334_v20  ;;  %v12887_v49 = vpop.f32.mrb[26].mxu0  ;;  %v2338_v44 = vpack.c.bf16 %v2317_v57, %v2316_v36  ;;  %3985 = vst [vmem:[#allocation3 + $0x60] sm:$0x1] %v3984_v43  ;;  %v3889_v36 = vld [vmem:[#allocation3 + $0x8c] sm:$0x1]  ;;  %v14930_v53 = vld [vmem:[%s14860_s16 + $0x88] sm:$0xff]  }
 0x26f   : > { %v2290_v5 = vadd.f32 %v14665_v51, %v2251_v58  ;;  %v2252_v56 = vmul.f32 %v12887_v49, %v14660_v4  ;;  %v2158_v59 = vpop.f32.mrb[27].mxu0  ;;  %v3890_v54 = vsel %vm14061_vm9, 0, %v3889_v36  ;;  %v3989_v58 = vld [vmem:[#allocation3 + $0x88] sm:$0x1]  ;;  %v3992_v55 = vld [vmem:[#allocation3 + $0x9c] sm:$0x1] }
 0x270   : > { %v2288_v61 = vadd.f32 %v14665_v51, %v2249_v22  ;;  %v2250_v7 = vmul.f32 %v14660_v4, %v2158_v59  ;;  %3891 = vst [vmem:[#allocation3 + $0x8c] sm:$0x1] %v3890_v54  ;;  %v3993_v22 = vsel %vm14073_vm10, 0, %v3992_v55  ;;  %v3892_v49 = vld [vmem:[#allocation3 + $0xa0] sm:$0x1]  ;;  %v14937_v36 = vld [vmem:[%s14860_s16 + $0x70] sm:$0xff]  }
 0x271   : > { %v2291_v32 = vadd.f32 %v14665_v51, %v2252_v56  ;;  %v2322_v15 = vmax.f32 %v2290_v5, 0.0  ;;  %3994 = vst [vmem:[#allocation3 + $0x9c] sm:$0x1] %v3993_v22  ;;  %v3893_v5 = vsel %vm14061_vm9, 0, %v3892_v49  ;;  %v3995_v59 = vld [vmem:[#allocation3 + $0xb0] sm:$0x1] }
 0x272   : > { %v2289_v62 = vadd.f32 %v14665_v51, %v2250_v7  ;;  %v2320_v2 = vmax.f32 %v2288_v61, 0.0  ;;  %3894 = vst [vmem:[#allocation3 + $0xa0] sm:$0x1] %v3893_v5  ;;  %v3998_v61 = vld [vmem:[#allocation3 + $0xc4] sm:$0x1]  ;;  %v3996_v7 = vsel %vm14073_vm10, 0, %v3995_v59 }
 0x273   : > { %v2323_v63 = vmax.f32 %v2291_v32, 0.0  ;;  %v3999_v32 = vsel %vm14073_vm10, 0, %v3998_v61  ;;  %3997 = vst [vmem:[#allocation3 + $0xb0] sm:$0x1] %v3996_v7  ;;  %v14947_v22 = vld [vmem:[%s14860_s16 + $0x98] sm:$0xff]   ;;  %v14950_v49 = vld [vmem:[%s14860_s16 + $0xa8] sm:$0xff]  }
 0x274   : > { %v2321_v3 = vmax.f32 %v2289_v62, 0.0  ;;  %v12890_v6 = vpop.f32.mrb[28].mxu0  ;;  %12925 = vmatmul.mubr.msk.bf16.vlgmr.msra.gmra.mrb[20].mxu1 %vm2358_vm4, %v14684_v21  ;;  %4000 = vst [vmem:[#allocation3 + $0xc4] sm:$0x1] %v3999_v32  ;;  %v3898_v62 = vld [vmem:[#allocation3 + $0xc8] sm:$0x1] }
 0x275   : > { %v2255_v8 = vmul.f32 %v12890_v6, %v14660_v4  ;;  %12929 = vmatpush3.bf16.msra.mxu1 %v2334_v20  ;;  %v2171_v42 = vpop.f32.mrb[29].mxu0  ;;  %12930 = vmatprep.mubr.msk.bf16.mxu1 %vm2358_vm4, %v14653_v46  ;;  %v2341_v11 = vpack.c.bf16 %v2323_v63, %v2322_v15  ;;  %v3899_v15 = vsel %vm14061_vm9, 0, %v3898_v62  ;;  %v3901_v63 = vld [vmem:[#allocation3 + $0xdc] sm:$0x1]  ;;  %v4004_v6 = vld [vmem:[#allocation3 + $0xec] sm:$0x1] }
 0x276   : > { %v2253_v27 = vmul.f32 %v14660_v4, %v2171_v42  ;;  %12934 = vmatprep.subr.bf16.mxu1 %v14719_v12  ;;  %v12891_v34 = vpop.f32.mrb[30].mxu0  ;;  %v2340_v17 = vpack.c.bf16 %v2321_v3, %v2320_v2  ;;  %3900 = vst [vmem:[#allocation3 + $0xc8] sm:$0x1] %v3899_v15  ;;  %v3902_v2 = vsel %vm14061_vm9, 0, %v3901_v63  ;;  %v4001_v3 = vld [vmem:[#allocation3 + $0xd8] sm:$0x1] }
 0x277   : > { %v2294_v18 = vadd.f32 %v14665_v51, %v2255_v8  ;;  %v2256_v52 = vmul.f32 %v12891_v34, %v14660_v4  ;;  %v2174_v23 = vpop.f32.mrb[31].mxu0  ;;  %3903 = vst [vmem:[#allocation3 + $0xdc] sm:$0x1] %v3902_v2  ;;  %v4002_v8 = vsel %vm14073_vm10, 0, %v4001_v3  ;;  %v4005_v42 = vsel %vm14073_vm10, 0, %v4004_v6  ;;  %v14873_v34 = vld [vmem:[%s14860_s16 + $0x18] sm:$0xff]  }
 0x278   : > { %v2292_v50 = vadd.f32 %v14665_v51, %v2253_v27  ;;  %v2254_v20 = vmul.f32 %v14660_v4, %v2174_v23  ;;  %4003 = vst [vmem:[#allocation3 + $0xd8] sm:$0x1] %v4002_v8  ;;  %4006 = vst [vmem:[#allocation3 + $0xec] sm:$0x1] %v4005_v42  ;;  %v14870_v27 = vld [vmem:[%s14860_s16] sm:$0xff]   ;;  %v14957_v61 = vld [vmem:[%s14860_s16 + $0x90] sm:$0xff]  }
 0x279   : > { %v2295_v10 = vadd.f32 %v14665_v51, %v2256_v52  ;;  %v2326_v26 = vmax.f32 %v2294_v18, 0.0  ;;  %v14879_v18 = vld [vmem:[%s14860_s16 + $0x10] sm:$0xff]   ;;  %v14882_v52 = vld [vmem:[%s14860_s16 + $0x20] sm:$0xff]   ;;  %20002 = vst [vmem:[#allocation5_spill] sm:$0xff] %v14957_v61  ;;  %v14974_v5 = vld [vmem:[%s14860_s16 + $0xb8] sm:$0xff]  }
 0x27a   : > { %v2293_v25 = vadd.f32 %v14665_v51, %v2254_v20  ;;  %v2324_v31 = vmax.f32 %v2292_v50, 0.0  ;;  %v3871_v51 = vld [vmem:[#allocation3 + $0x14] sm:$0x1]  ;;  %v12176_v50 = vunpack.c.l.bf16 %v14870_v27  ;;  %v14887_v20 = vld [vmem:[%s14860_s16 + $0x38] sm:$0xff]   ;;  %v14960_v7 = vld [vmem:[%s14860_s16 + $0xa0] sm:$0xff]   ;;  %20004 = vst [vmem:[#allocation7_spill] sm:$0xff] %v14974_v5 }
 0x27b   : > { %v2327_v30 = vmax.f32 %v2295_v10, 0.0  ;;  %v14890_v10 = vld [vmem:[%s14860_s16 + $0x48] sm:$0xff]   ;;  %20003 = vst [vmem:[#allocation6_spill] sm:$0xff] %v14960_v7  ;;  %v5682_v35 = vld [vmem:[#allocation3 + $0x24] sm:$0x1] }
 0x27c   : > { %v2325_v24 = vmax.f32 %v2293_v25, 0.0  ;;  %12931 = vmatmul.mubr.msk.bf16.vlgmr.msra.gmra.mrb[24].mxu1 %vm2358_vm4, %v14684_v21  ;;  %v14977_v63 = vld [vmem:[%s14860_s16 + $0xc8] sm:$0xff]   ;;  %v5691_v5 = vld [vmem:[#allocation3 + $0x38] sm:$0x1] }
 0x27d   : > { %12935 = vmatpush3.bf16.msra.mxu1 %v14719_v12  ;;  %12936 = vmatprep.mubr.msk.bf16.mxu1 %vm2358_vm4, %v14653_v46  ;;  %v2343_v41 = vpack.c.bf16 %v2327_v30, %v2326_v26  ;;  %v3872_v12 = vsel %vm14061_vm9, 0, %v3871_v51  ;;  %v12177_v26 = vunpack.c.h.bf16 %v14870_v27  ;;  %v12188_v30 = vunpack.c.l.bf16 %v14873_v34  ;;  %20005 = vst [vmem:[#allocation8_spill] sm:$0xff] %v14977_v63 }
 0x27e   : > { %12940 = vmatprep.subr.bf16.mxu1 %v14737_v60  ;;  %v2342_v4 = vpack.c.bf16 %v2325_v24, %v2324_v31  ;;  %3873 = vst [vmem:[#allocation3 + $0x14] sm:$0x1] %v3872_v12  ;;  %v14897_v24 = vld [vmem:[%s14860_s16 + $0x30] sm:$0xff]  }
 0x284   : > { %12937 = vmatmul.mubr.msk.bf16.vlgmr.msra.gmra.mrb[28].mxu1 %vm2358_vm4, %v14684_v21 }
 0x285   : > { %12941 = vmatpush3.bf16.msra.mxu1 %v14737_v60  ;;  %12942 = vmatprep.mubr.msk.bf16.mxu1 %vm2358_vm4, %v14653_v46  ;;  %v3980_v60 = vld [vmem:[#allocation3 + $0x4c] sm:$0x1] }
 0x286   : > { %12946 = vmatprep.subr.bf16.mxu1 %v14733_v38  ;;  %v3981_v47 = vsel %vm14073_vm10, 0, %v3980_v60  ;;  %v14917_v60 = vld [vmem:[%s14860_s16 + $0x50] sm:$0xff]  }
 0x287   : > { %3982 = vst [vmem:[#allocation3 + $0x4c] sm:$0x1] %v3981_v47 }
 0x28c   : > { %12943 = vmatmul.mubr.msk.bf16.vlgmr.msra.gmra.mrb[32].mxu1 %vm2358_vm4, %v14684_v21 }
 0x28d   : > { %12947 = vmatpush3.bf16.msra.mxu1 %v14733_v38  ;;  %12948 = vmatprep.mubr.msk.bf16.mxu1 %vm2358_vm4, %v14653_v46  ;;  %v3875_v38 = vsel %vm14061_vm9, 0, %v3874_v37  ;;  %v14910_v37 = vld [vmem:[%s14860_s16 + $0x68] sm:$0xff]  }
 0x28e   : > { %12952 = vmatprep.subr.bf16.mxu1 %v2338_v44  ;;  %3876 = vst [vmem:[#allocation3 + $0x28] sm:$0x1] %v3875_v38 }
 0x294   : > { %12949 = vmatmul.mubr.msk.bf16.vlgmr.msra.gmra.mrb[36].mxu1 %vm2358_vm4, %v14684_v21 }
 0x295   : > { %12953 = vmatpush3.bf16.msra.mxu1 %v2338_v44  ;;  %12954 = vmatprep.mubr.msk.bf16.mxu1 %vm2358_vm4, %v14653_v46  ;;  %v3895_v44 = vld [vmem:[#allocation3 + $0xb4] sm:$0x1] }
 0x296   : > { %12958 = vmatprep.subr.bf16.mxu1 %v2339_v14  ;;  %v3896_v56 = vsel %vm14061_vm9, 0, %v3895_v44  ;;  %v15001_v44 = vld [vmem:[%s14860_s16 + $0xc0] sm:$0xff]  }
 0x297   : > { %3897 = vst [vmem:[#allocation3 + $0xb4] sm:$0x1] %v3896_v56  ;;  %20007 = vst [vmem:[#allocation10_spill] sm:$0xff] %v15001_v44 }
 0x29c   : > { %12955 = vmatmul.mubr.msk.bf16.vlgmr.msra.gmra.mrb[40].mxu1 %vm2358_vm4, %v14684_v21 }
 0x29d   : > { %12959 = vmatpush3.bf16.msra.mxu1 %v2339_v14  ;;  %12960 = vmatprep.mubr.msk.bf16.mxu1 %vm2358_vm4, %v14653_v46  ;;  %v3990_v14 = vsel %vm14073_vm10, 0, %v3989_v58  ;;  %v14991_v58 = vld [vmem:[%s14860_s16 + $0xb0] sm:$0xff]  }
 0x29e   : > { %12964 = vmatprep.subr.bf16.mxu1 %v2340_v17  ;;  %3991 = vst [vmem:[#allocation3 + $0x88] sm:$0x1] %v3990_v14  ;;  %20006 = vst [vmem:[#allocation9_spill] sm:$0xff] %v14991_v58 }
 0x2a4   : > { %12961 = vmatmul.mubr.msk.bf16.vlgmr.msra.gmra.mrb[44].mxu1 %vm2358_vm4, %v14684_v21 }
 0x2a5   : > { %12965 = vmatpush3.bf16.msra.mxu1 %v2340_v17  ;;  %12966 = vmatprep.mubr.msk.bf16.mxu1 %vm2358_vm4, %v14653_v46  ;;  %v14876_v17 = vld [vmem:[%s14860_s16 + $0x28] sm:$0xff]  }
 0x2a6   : > { %12970 = vmatprep.subr.bf16.mxu1 %v2341_v11 }
 0x2ac   : > { %12967 = vmatmul.mubr.msk.bf16.vlgmr.msra.gmra.mrb[48].mxu1 %vm2358_vm4, %v14684_v21 }
 0x2ad   : > { %12971 = vmatpush3.bf16.msra.mxu1 %v2341_v11  ;;  %12972 = vmatprep.mubr.msk.bf16.mxu1 %vm2358_vm4, %v14653_v46  ;;  %v14867_v11 = vld [vmem:[%s14860_s16 + $0x8] sm:$0xff]  }
 0x2ae   : > { %12976 = vmatprep.subr.bf16.mxu1 %v2342_v4  ;;  %v12180_v23 = vunpack.c.l.bf16 %v14867_v11  ;;  %v12181_v25 = vunpack.c.h.bf16 %v14867_v11 }
 0x2b4   : > { %12973 = vmatmul.mubr.msk.bf16.vlgmr.msra.gmra.mrb[52].mxu1 %vm2358_vm4, %v14684_v21 }
 0x2b5   : > { %12977 = vmatpush3.bf16.msra.mxu1 %v2342_v4  ;;  %12978 = vmatprep.mubr.msk.bf16.mxu1 %vm2358_vm4, %v14653_v46 }
 0x2b6   : > { %12982 = vmatprep.subr.bf16.mxu1 %v2343_v41 }
 0x2bc   : > { %12979 = vmatmul.mubr.msk.bf16.vlgmr.msra.gmra.mrb[56].mxu1 %vm2358_vm4, %v14684_v21 }
 0x2bd   : > { %12983 = vmatpush3.bf16.msra.mxu1 %v2343_v41  ;;  %12984 = vmatprep.mubr.msk.bf16.mxu1 %vm2358_vm4, %v14653_v46  ;;  %v3987_v46 = vsel %vm14073_vm10, 0, %v3986_v29  ;;  %v14900_v41 = vld [vmem:[%s14860_s16 + $0x40] sm:$0xff]  }
 0x2be   : > { %3988 = vst [vmem:[#allocation3 + $0x74] sm:$0x1] %v3987_v46 }
 0x2c4   : > { %12985 = vmatmul.mubr.msk.bf16.vlgmr.msra.gmra.mrb[60].mxu1 %vm2358_vm4, %v14684_v21  ;;  %v3886_v21 = vld [vmem:[#allocation3 + $0x78] sm:$0x1] }
 0x2c5   : > { %v3887_v57 = vsel %vm14061_vm9, 0, %v3886_v21 }
 0x2c6   : > { %3888 = vst [vmem:[#allocation3 + $0x78] sm:$0x1] %v3887_v57  ;;  %v14940_v57 = vld [vmem:[%s14860_s16 + $0x80] sm:$0xff]  }
 0x31f   : > { %v12896_v2 = vpop.f32.mrb[0].mxu1 }
 0x320   : > { %v3215_v59 = vmul.f32 0.75, %v12896_v2  ;;  %v2399_v56 = vpop.f32.mrb[1].mxu1  ;;  %v3151_v14 = vmul.f32 0.25, %v12896_v2 }
 0x321   : > { %v14979_v3 = vmul.f32 0.75, %v2399_v56  ;;  %v12897_v6 = vpop.f32.mrb[2].mxu1  ;;  %v14986_v32 = vmul.f32 0.25, %v2399_v56  ;;  %v3907_v56 = vld [vmem:[#allocation3 + $0x104] sm:$0x1] }
 0x322   : > { %v3663_v62 = vadd.f32 %v12180_v23, %v3215_v59  ;;  %v14988_v15 = vmul.f32 0.75, %v12897_v6  ;;  %v2402_v55 = vpop.f32.mrb[3].mxu1  ;;  %v3904_v23 = vld [vmem:[#allocation3 + $0xf0] sm:$0x1]  ;;  %v15003_v46 = vmul.f32 0.25, %v12897_v6 }
 0x323   : > { %v3661_v54 = vadd.f32 %v12176_v50, %v14979_v3  ;;  %v14996_v8 = vmul.f32 0.75, %v2402_v55  ;;  %v3905_v50 = vsel %vm14061_vm9, 0, %v3904_v23  ;;  %v15010_v48 = vmul.f32 0.25, %v2402_v55 }
 0x324   : > { %v11920_v21 = vpack.c.bf16 %v3663_v62, %v3663_v62  ;;  %v3664_v43 = vadd.f32 %v12181_v25, %v14988_v15  ;;  %3906 = vst [vmem:[#allocation3 + $0xf0] sm:$0x1] %v3905_v50  ;;  %v3908_v62 = vsel %vm14061_vm9, 0, %v3907_v56 }
 0x325   : > { %v11918_v29 = vpack.c.bf16 %v3661_v54, %v3661_v54  ;;  %v3662_v2 = vadd.f32 %v12177_v26, %v14996_v8  ;;  %3909 = vst [vmem:[#allocation3 + $0x104] sm:$0x1] %v3908_v62  ;;  %v5676_v62 = vld [vmem:[#allocation3 + $0x14] sm:$0xf] }
 0x326   : > { %v4411_v6 = vshrl.u32 %v11920_v21, 16  ;;  %v11921_v42 = vpack.c.bf16 %v3664_v43, %v3664_v43  ;;  %v4414_v25 = vshll.u32 %v11920_v21, 16 }
 0x327   : > { %v4394_v23 = vshrl.u32 %v11918_v29, 16  ;;  %v4397_v54 = vshll.u32 %v11918_v29, 16  ;;  %v11919_v55 = vpack.c.bf16 %v3662_v2, %v3662_v2  ;;  %v12902_v19 = vpop.f32.mrb[4].mxu1 }
 0x328   : > { %v4413_v47 = vrot.slane %v4411_v6, 7  ;;  %v4420_v40 = vshrl.u32 %v11921_v42, 16  ;;  %v4423_v27 = vshll.u32 %v11921_v42, 16  ;;  %v15019_v26 = vmul.f32 0.25, %v12902_v19  ;;  %v2448_v50 = vpop.f32.mrb[5].mxu1 }
 0x329   : > { %v4396_v39 = vrot.slane %v4394_v23, 7  ;;  %v4402_v56 = vshrl.u32 %v11919_v55, 16  ;;  %v4405_v38 = vshll.u32 %v11919_v55, 16  ;;  %v15021_v43 = vmul.f32 0.75, %v12902_v19  ;;  %v12903_v45 = vpop.f32.mrb[6].mxu1 }
 0x32a   : > { %v4416_v29 = vor.u32 %v4414_v25, %v4413_v47  ;;  %v4418_v2 = vrot.slane %v4413_v47, 4  ;;  %v4422_v6 = vrot.slane %v4420_v40, 7  ;;  %v3283_v42 = vadd.f32 %v3215_v59, %v15019_v26  ;;  %v2451_v11 = vpop.f32.mrb[7].mxu1 }
 0x32b   : > { %v4399_v1 = vor.u32 %v4397_v54, %v4396_v39  ;;  %v4400_v23 = vrot.slane %v4396_v39, 4  ;;  %v4404_v55 = vrot.slane %v4402_v56, 7  ;;  %v3287_v19 = vadd.f32 %v15021_v43, %v3151_v14 }
 0x32c   : > { %v4425_v12 = vor.u32 %v4423_v27, %v4422_v6  ;;  %v4427_v51 = vrot.slane %v4422_v6, 4  ;;  %v3667_v4 = vadd.f32 %v12188_v30, %v3283_v42  ;;  %v15033_v31 = vmul.f32 0.25, %v2448_v50 }
 0x32d   : > { %v5677_v47 = vsel %vm15025_vm5, %v4399_v1, %v5676_v62  ;;  %v4407_v40 = vor.u32 %v4405_v38, %v4404_v55  ;;  %v4409_v25 = vrot.slane %v4404_v55, 4  ;;  %v20010_v59 = vunpack.c.l.bf16 %v14876_v17 }
 0x32e   : > { %5678 = vst [vmem:[#allocation3 + $0x14] sm:$0xf] %v5677_v47  ;;  %v4426_v39 = vsel %vm14086_vm11, %v4418_v2, %v4425_v12  ;;  %v5683_v14 = vsel %vm14061_vm9, %v4427_v51, %v5682_v35  ;;  %v11924_v27 = vpack.c.bf16 %v3667_v4, %v3667_v4  ;;  %v15043_v56 = vmul.f32 0.75, %v2448_v50 }
 0x32f   : > { %v3671_v54 = vadd.f32 %v20010_v59, %v3287_v19  ;;  %5681 = vst.msk [vmem:[#allocation3 + $0x20] sm:$0xf] %vm3853_vm8, %v4426_v39  ;;  %5684 = vst [vmem:[#allocation3 + $0x24] sm:$0x1] %v5683_v14  ;;  %v4408_v30 = vsel %vm14086_vm11, %v4400_v23, %v4407_v40  ;;  %v4417_v1 = vsel %vm14086_vm11, %v4409_v25, %v4416_v29  ;;  %v15052_v12 = vpop.f32.mrb[8].mxu1  ;;  %v15058_v50 = vmul.f32 0.25, %v12903_v45 }
 0x330   : > { %v3281_v62 = vadd.f32 %v14979_v3, %v15033_v31  ;;  %5679 = vst.msk [vmem:[#allocation3 + $0x18] sm:$0xf] %vm3853_vm8, %v4408_v30  ;;  %5680 = vst.msk [vmem:[#allocation3 + $0x1c] sm:$0xf] %vm3853_vm8, %v4417_v1  ;;  %v4446_v4 = vshrl.u32 %v11924_v27, 16  ;;  %v4449_v51 = vshll.u32 %v11924_v27, 16  ;;  %v3285_v35 = vadd.f32 %v15043_v56, %v14986_v32 }
 0x331   : > { %v11928_v38 = vpack.c.bf16 %v3671_v54, %v3671_v54  ;;  %v15060_v2 = vpop.f32.mrb[9].mxu1  ;;  %v20011_v42 = vunpack.c.l.bf16 %v14879_v18  ;;  %v15064_v23 = vmul.f32 0.75, %v12903_v45  ;;  %v20012_v47 = vunpack.c.l.bf16 %v14882_v52 }
 0x332   : > { %v15066_v55 = vpop.f32.mrb[10].mxu1  ;;  %v4448_v19 = vrot.slane %v4446_v4, 7  ;;  %v3284_v32 = vadd.f32 %v14988_v15, %v15058_v50  ;;  %v15072_v25 = vmul.f32 0.25, %v2451_v11  ;;  %v15080_v14 = vmul.f32 0.75, %v2451_v11 }
 0x333   : > { %v4481_v29 = vshrl.u32 %v11928_v38, 16  ;;  %v4484_v6 = vshll.u32 %v11928_v38, 16  ;;  %v3665_v3 = vadd.f32 %v20011_v42, %v3281_v62  ;;  %v3669_v40 = vadd.f32 %v20012_v47, %v3285_v35  ;;  %v15074_v59 = vpop.f32.mrb[11].mxu1 }
 0x334   : > { %v3288_v45 = vadd.f32 %v15064_v23, %v15003_v46  ;;  %v15082_v27 = vor.u32 %v4449_v51, %v4448_v19  ;;  %v4453_v30 = vrot.slane %v4448_v19, 4  ;;  %v20013_v38 = vunpack.c.h.bf16 %v14873_v34  ;;  %v5685_v19 = vld [vmem:[#allocation3 + $0x28] sm:$0xf] }
 0x335   : > { %v15076_v54 = vrot.slane %v4481_v29, 7  ;;  %v11922_v39 = vpack.c.bf16 %v3665_v3, %v3665_v3  ;;  %v11926_v1 = vpack.c.bf16 %v3669_v40, %v3669_v40  ;;  %v20014_v46 = vunpack.c.h.bf16 %v14876_v17 }
 0x336   : > { %v3668_v62 = vadd.f32 %v20013_v38, %v3284_v32  ;;  %v3282_v34 = vadd.f32 %v14996_v8, %v15072_v25  ;;  %v15099_v40 = vmul.f32 0.25, %v15052_v12  ;;  %v5694_v8 = vld [vmem:[#allocation3 + $0x3c] sm:$0xf] }
 0x337   : > { %v15087_v15 = vor.u32 %v4484_v6, %v15076_v54  ;;  %v4488_v4 = vrot.slane %v15076_v54, 4  ;;  %v4429_v35 = vshrl.u32 %v11922_v39, 16  ;;  %v4432_v29 = vshll.u32 %v11922_v39, 16  ;;  %v15101_v32 = vpop.f32.mrb[12].mxu1 }
 0x338   : > { %v4464_v42 = vshrl.u32 %v11926_v1, 16  ;;  %v4467_v3 = vshll.u32 %v11926_v1, 16  ;;  %v3672_v11 = vadd.f32 %v20014_v46, %v3288_v45  ;;  %v11925_v47 = vpack.c.bf16 %v3668_v62, %v3668_v62  ;;  %v15105_v1 = vpop.f32.mrb[13].mxu1 }
 0x339   : > { %v15092_v51 = vrot.slane %v4429_v35, 7  ;;  %v3286_v6 = vadd.f32 %v15080_v14, %v15010_v48  ;;  %v20015_v35 = vunpack.c.h.bf16 %v14879_v18  ;;  %v20016_v46 = vunpack.c.h.bf16 %v14882_v52  ;;  %v15113_v44 = vpop.f32.mrb[14].mxu1 }
 0x33a   : > { %v15103_v54 = vrot.slane %v4464_v42, 7  ;;  %v11929_v39 = vpack.c.bf16 %v3672_v11, %v3672_v11  ;;  %v4455_v17 = vshrl.u32 %v11925_v47, 16  ;;  %v4458_v45 = vshll.u32 %v11925_v47, 16  ;;  %v15117_v63 = vpop.f32.mrb[15].mxu1 }
 0x33b   : > { %v4434_v38 = vor.u32 %v4432_v29, %v15092_v51  ;;  %v4435_v62 = vrot.slane %v15092_v51, 4  ;;  %v3666_v48 = vadd.f32 %v20015_v35, %v3282_v34  ;;  %v3670_v16 = vadd.f32 %v20016_v46, %v3286_v6 }
 0x33c   : > { %v4469_v42 = vor.u32 %v4467_v3, %v15103_v54  ;;  %v4470_v11 = vrot.slane %v15103_v54, 4  ;;  %v4457_v47 = vrot.slane %v4455_v17, 7  ;;  %v4490_v58 = vshrl.u32 %v11929_v39, 16  ;;  %v5700_v54 = vld [vmem:[#allocation3 + $0x4c] sm:$0x1] }
 0x33d   : > { %v5686_v29 = vsel %vm15025_vm5, %v4434_v38, %v5685_v19  ;;  %v4493_v51 = vshll.u32 %v11929_v39, 16  ;;  %v11923_v18 = vpack.c.bf16 %v3666_v48, %v3666_v48  ;;  %v11927_v34 = vpack.c.bf16 %v3670_v16, %v3670_v16 }
 0x33e   : > { %5687 = vst [vmem:[#allocation3 + $0x28] sm:$0xf] %v5686_v29  ;;  %v5695_v52 = vsel %vm15025_vm5, %v4469_v42, %v5694_v8  ;;  %v4460_v6 = vor.u32 %v4458_v45, %v4457_v47  ;;  %v4462_v35 = vrot.slane %v4457_v47, 4  ;;  %v4492_v3 = vrot.slane %v4490_v58, 7 }
 0x33f   : > { %5696 = vst [vmem:[#allocation3 + $0x3c] sm:$0xf] %v5695_v52  ;;  %v4437_v17 = vshrl.u32 %v11923_v18, 16  ;;  %v4440_v46 = vshll.u32 %v11923_v18, 16  ;;  %v4472_v7 = vshrl.u32 %v11927_v34, 16  ;;  %v4475_v61 = vshll.u32 %v11927_v34, 16 }
 0x340   : > { %v4461_v19 = vsel %vm14086_vm11, %v4453_v30, %v4460_v6  ;;  %v4495_v39 = vor.u32 %v4493_v51, %v4492_v3  ;;  %v4497_v38 = vrot.slane %v4492_v3, 4  ;;  %v5692_v16 = vsel %vm14061_vm9, %v4462_v35, %v5691_v5  ;;  %v15133_v42 = vpop.f32.mrb[16].mxu1 }
 0x341   : > { %5690 = vst.msk [vmem:[#allocation3 + $0x34] sm:$0xf] %vm3853_vm8, %v4461_v19  ;;  %5693 = vst [vmem:[#allocation3 + $0x38] sm:$0x1] %v5692_v16  ;;  %v4439_v45 = vrot.slane %v4437_v17, 7  ;;  %v4474_v8 = vrot.slane %v4472_v7, 7  ;;  %v3291_v48 = vadd.f32 %v15021_v43, %v15099_v40  ;;  %v20017_v52 = vunpack.c.l.bf16 %v14887_v20 }
 0x342   : > { %v15129_v58 = vmul.f32 0.75, %v15052_v12  ;;  %v4496_v30 = vsel %vm14086_vm11, %v4488_v4, %v4495_v39  ;;  %v5701_v47 = vsel %vm14061_vm9, %v4497_v38, %v5700_v54  ;;  %v15140_v5 = vmul.f32 0.25, %v15060_v2  ;;  %v15145_v7 = vpop.f32.mrb[17].mxu1 }
 0x343   : > { %v15143_v29 = vmul.f32 0.75, %v15060_v2  ;;  %5699 = vst.msk [vmem:[#allocation3 + $0x48] sm:$0xf] %vm3853_vm8, %v4496_v30  ;;  %5702 = vst [vmem:[#allocation3 + $0x4c] sm:$0x1] %v5701_v47  ;;  %v4442_v43 = vor.u32 %v4440_v46, %v4439_v45  ;;  %v4444_v12 = vrot.slane %v4439_v45, 4  ;;  %v4477_v51 = vor.u32 %v4475_v61, %v4474_v8 }
 0x344   : > { %v4479_v18 = vrot.slane %v4474_v8, 4  ;;  %v15148_v34 = vpop.f32.mrb[18].mxu1  ;;  %v3295_v4 = vadd.f32 %v15129_v58, %v15019_v26  ;;  %v3675_v6 = vadd.f32 %v20017_v52, %v3291_v48  ;;  %v3289_v2 = vadd.f32 %v15043_v56, %v15140_v5 }
 0x345   : > { %v3293_v35 = vadd.f32 %v15143_v29, %v15033_v31  ;;  %v15158_v3 = vpop.f32.mrb[19].mxu1  ;;  %v4443_v61 = vsel %vm14086_vm11, %v4435_v62, %v4442_v43  ;;  %v4452_v54 = vsel %vm14086_vm11, %v4444_v12, %v15082_v27  ;;  %v4478_v26 = vsel %vm14086_vm11, %v4470_v11, %v4477_v51 }
 0x346   : > { %v4487_v17 = vsel %vm14086_vm11, %v4479_v18, %v15087_v15  ;;  %5688 = vst.msk [vmem:[#allocation3 + $0x2c] sm:$0xf] %vm3853_vm8, %v4443_v61  ;;  %5689 = vst.msk [vmem:[#allocation3 + $0x30] sm:$0xf] %vm3853_vm8, %v4452_v54  ;;  %v20018_v31 = vunpack.c.l.bf16 %v14890_v10  ;;  %v11932_v62 = vpack.c.bf16 %v3675_v6, %v3675_v6  ;;  %v20019_v27 = vunpack.c.l.bf16 %v14897_v24 }
 0x347   : > { %5697 = vst.msk [vmem:[#allocation3 + $0x40] sm:$0xf] %vm3853_vm8, %v4478_v26  ;;  %5698 = vst.msk [vmem:[#allocation3 + $0x44] sm:$0xf] %vm3853_vm8, %v4487_v17  ;;  %v20020_v11 = vunpack.c.l.bf16 %v14900_v41  ;;  %v15181_v15 = vmul.f32 0.25, %v15066_v55  ;;  %v15184_v39 = vmul.f32 0.75, %v15066_v55  ;;  %v20021_v54 = vunpack.c.h.bf16 %v14887_v20 }
 0x348   : > { %v3679_v56 = vadd.f32 %v20018_v31, %v3295_v4  ;;  %v3673_v46 = vadd.f32 %v20019_v27, %v3289_v2  ;;  %v15187_v38 = vmul.f32 0.25, %v15074_v59  ;;  %v15190_v16 = vmul.f32 0.75, %v15074_v59  ;;  %v15198_v51 = vpop.f32.mrb[20].mxu1  ;;  %v5703_v27 = vld [vmem:[#allocation3 + $0x50] sm:$0xf] }
 0x349   : > { %v3677_v19 = vadd.f32 %v20020_v11, %v3293_v35  ;;  %v4516_v8 = vshrl.u32 %v11932_v62, 16  ;;  %v4519_v48 = vshll.u32 %v11932_v62, 16  ;;  %v3292_v43 = vadd.f32 %v15064_v23, %v15181_v15  ;;  %v15200_v6 = vpop.f32.mrb[21].mxu1 }
 0x34a   : > { %v11936_v45 = vpack.c.bf16 %v3679_v56, %v3679_v56  ;;  %v11930_v30 = vpack.c.bf16 %v3673_v46, %v3673_v46  ;;  %v3296_v12 = vadd.f32 %v15184_v39, %v15058_v50  ;;  %v3290_v55 = vadd.f32 %v15080_v14, %v15187_v38  ;;  %v15204_v26 = vpop.f32.mrb[22].mxu1 }
 0x34b   : > { %v11934_v47 = vpack.c.bf16 %v3677_v19, %v3677_v19  ;;  %v4518_v18 = vrot.slane %v4516_v8, 7  ;;  %v3676_v23 = vadd.f32 %v20021_v54, %v3292_v43  ;;  %v15210_v56 = vpop.f32.mrb[23].mxu1  ;;  %v20022_v46 = vunpack.c.h.bf16 %v14890_v10 }
 0x34c   : > { %v4551_v4 = vshrl.u32 %v11936_v45, 16  ;;  %v4554_v59 = vshll.u32 %v11936_v45, 16  ;;  %v4499_v52 = vshrl.u32 %v11930_v30, 16  ;;  %v4502_v2 = vshll.u32 %v11930_v30, 16 }
 0x34d   : > { %v4534_v35 = vshrl.u32 %v11934_v47, 16  ;;  %v4537_v61 = vshll.u32 %v11934_v47, 16  ;;  %v15206_v50 = vor.u32 %v4519_v48, %v4518_v18  ;;  %v4523_v17 = vrot.slane %v4518_v18, 4  ;;  %v5712_v47 = vld [vmem:[#allocation3 + $0x64] sm:$0xf] }
 0x34e   : > { %v4553_v14 = vrot.slane %v4551_v4, 7  ;;  %v15208_v31 = vrot.slane %v4499_v52, 7  ;;  %v3680_v11 = vadd.f32 %v20022_v46, %v3296_v12  ;;  %v11933_v19 = vpack.c.bf16 %v3676_v23, %v3676_v23 }
 0x34f   : > { %v15212_v62 = vrot.slane %v4534_v35, 7  ;;  %v3294_v20 = vadd.f32 %v15190_v16, %v15072_v25  ;;  %v20023_v25 = vunpack.c.h.bf16 %v14897_v24  ;;  %v20024_v35 = vunpack.c.h.bf16 %v14900_v41 }
 0x350   : > { %v15218_v45 = vor.u32 %v4554_v59, %v4553_v14  ;;  %v4558_v8 = vrot.slane %v4553_v14, 4  ;;  %v4504_v48 = vor.u32 %v4502_v2, %v15208_v31  ;;  %v4505_v30 = vrot.slane %v15208_v31, 4  ;;  %v15232_v31 = vpop.f32.mrb[24].mxu1 }
 0x351   : > { %v4539_v43 = vor.u32 %v4537_v61, %v15212_v62  ;;  %v4540_v18 = vrot.slane %v15212_v62, 4  ;;  %v11937_v4 = vpack.c.bf16 %v3680_v11, %v3680_v11  ;;  %v4525_v52 = vshrl.u32 %v11933_v19, 16  ;;  %v5709_v62 = vld [vmem:[#allocation3 + $0x60] sm:$0x1]  ;;  %v15240_v41 = vpop.f32.mrb[25].mxu1 }
 0x352   : > { %v5704_v10 = vsel %vm15025_vm5, %v4504_v48, %v5703_v27  ;;  %v4528_v12 = vshll.u32 %v11933_v19, 16  ;;  %v3674_v59 = vadd.f32 %v20023_v25, %v3290_v55  ;;  %v3678_v54 = vadd.f32 %v20024_v35, %v3294_v20  ;;  %v5718_v48 = vld [vmem:[#allocation3 + $0x74] sm:$0x1] }
 0x353   : > { %5705 = vst [vmem:[#allocation3 + $0x50] sm:$0xf] %v5704_v10  ;;  %v5713_v2 = vsel %vm15025_vm5, %v4539_v43, %v5712_v47  ;;  %v4527_v23 = vrot.slane %v4525_v52, 7  ;;  %v4560_v61 = vshrl.u32 %v11937_v4, 16  ;;  %v4563_v14 = vshll.u32 %v11937_v4, 16  ;;  %v15245_v43 = vpop.f32.mrb[26].mxu1 }
 0x354   : > { %5714 = vst [vmem:[#allocation3 + $0x64] sm:$0xf] %v5713_v2  ;;  %v11931_v46 = vpack.c.bf16 %v3674_v59, %v3674_v59  ;;  %v11935_v27 = vpack.c.bf16 %v3678_v54, %v3678_v54  ;;  %v15235_v11 = vmul.f32 0.25, %v15101_v32  ;;  %v15238_v24 = vmul.f32 0.75, %v15101_v32  ;;  %v15247_v59 = vpop.f32.mrb[27].mxu1 }
 0x355   : > { %v4530_v55 = vor.u32 %v4528_v12, %v4527_v23  ;;  %v4532_v19 = vrot.slane %v4527_v23, 4  ;;  %v4562_v20 = vrot.slane %v4560_v61, 7  ;;  %v15243_v47 = vmul.f32 0.25, %v15105_v1 }
 0x356   : > { %v4507_v4 = vshrl.u32 %v11931_v46, 16  ;;  %v4510_v52 = vshll.u32 %v11931_v46, 16  ;;  %v4542_v10 = vshrl.u32 %v11935_v27, 16  ;;  %v4545_v25 = vshll.u32 %v11935_v27, 16 }
 0x357   : > { %v4531_v32 = vsel %vm14086_vm11, %v4523_v17, %v4530_v55  ;;  %v4565_v35 = vor.u32 %v4563_v14, %v4562_v20  ;;  %v4567_v54 = vrot.slane %v4562_v20, 4  ;;  %v5710_v12 = vsel %vm14061_vm9, %v4532_v19, %v5709_v62 }
 0x358   : > { %5708 = vst.msk [vmem:[#allocation3 + $0x5c] sm:$0xf] %vm3853_vm8, %v4531_v32  ;;  %5711 = vst [vmem:[#allocation3 + $0x60] sm:$0x1] %v5710_v12  ;;  %v4509_v2 = vrot.slane %v4507_v4, 7  ;;  %v4544_v23 = vrot.slane %v4542_v10, 7  ;;  %v3299_v61 = vadd.f32 %v15129_v58, %v15235_v11  ;;  %v3303_v46 = vadd.f32 %v15238_v24, %v15099_v40 }
 0x359   : > { %v4566_v27 = vsel %vm14086_vm11, %v4558_v8, %v4565_v35  ;;  %v5719_v17 = vsel %vm14061_vm9, %v4567_v54, %v5718_v48  ;;  %v15263_v14 = vmul.f32 0.75, %v15105_v1  ;;  %v3297_v62 = vadd.f32 %v15143_v29, %v15243_v47  ;;  %v15276_v29 = vpop.f32.mrb[28].mxu1 }
 0x35a   : > { %5717 = vst.msk [vmem:[#allocation3 + $0x70] sm:$0xf] %vm3853_vm8, %v4566_v27  ;;  %5720 = vst [vmem:[#allocation3 + $0x74] sm:$0x1] %v5719_v17  ;;  %v4512_v55 = vor.u32 %v4510_v52, %v4509_v2  ;;  %v4514_v58 = vrot.slane %v4509_v2, 4  ;;  %v4547_v19 = vor.u32 %v4545_v25, %v4544_v23  ;;  %v4549_v20 = vrot.slane %v4544_v23, 4 }
 0x35b   : > { %v20025_v40 = vunpack.c.l.bf16 %v14907_v13  ;;  %v20026_v8 = vunpack.c.l.bf16 %v14910_v37  ;;  %v3301_v1 = vadd.f32 %v15263_v14, %v15140_v5  ;;  %v20027_v48 = vunpack.c.l.bf16 %v14917_v60  ;;  %v15288_v5 = vpop.f32.mrb[29].mxu1 }
 0x35c   : > { %v4513_v52 = vsel %vm14086_vm11, %v4505_v30, %v4512_v55  ;;  %v4522_v25 = vsel %vm14086_vm11, %v4514_v58, %v15206_v50  ;;  %v4548_v35 = vsel %vm14086_vm11, %v4540_v18, %v4547_v19  ;;  %v4557_v54 = vsel %vm14086_vm11, %v4549_v20, %v15218_v45  ;;  %v15296_v23 = vpop.f32.mrb[30].mxu1 }
 0x35d   : > { %v3683_v4 = vadd.f32 %v20025_v40, %v3299_v61  ;;  %v3687_v10 = vadd.f32 %v20026_v8, %v3303_v46  ;;  %v3681_v32 = vadd.f32 %v20027_v48, %v3297_v62  ;;  %5706 = vst.msk [vmem:[#allocation3 + $0x54] sm:$0xf] %vm3853_vm8, %v4513_v52  ;;  %5707 = vst.msk [vmem:[#allocation3 + $0x58] sm:$0xf] %vm3853_vm8, %v4522_v25  ;;  %v20028_v50 = vunpack.c.l.bf16 %v14920_v0  ;;  %v15310_v17 = vpop.f32.mrb[31].mxu1 }
 0x35e   : > { %5715 = vst.msk [vmem:[#allocation3 + $0x68] sm:$0xf] %vm3853_vm8, %v4548_v35  ;;  %5716 = vst.msk [vmem:[#allocation3 + $0x6c] sm:$0xf] %vm3853_vm8, %v4557_v54  ;;  %v15299_v45 = vmul.f32 0.25, %v15113_v44  ;;  %v15302_v61 = vmul.f32 0.75, %v15113_v44  ;;  %v20030_v54 = vunpack.c.h.bf16 %v14907_v13  ;;  %v20032_v13 = vunpack.c.h.bf16 %v14910_v37 }
 0x35f   : > { %v11940_v30 = vpack.c.bf16 %v3683_v4, %v3683_v4  ;;  %v11944_v12 = vpack.c.bf16 %v3687_v10, %v3687_v10  ;;  %v3685_v2 = vadd.f32 %v20028_v50, %v3301_v1  ;;  %v11938_v18 = vpack.c.bf16 %v3681_v32, %v3681_v32  ;;  %20029 = vst [vmem:[#allocation11_spill] sm:$0xff] %v15310_v17  ;;  %v5969_v44 = vld [vmem:[#allocation3 + $0x18] sm:$0xf] }
 0x360   : > { %v15305_v46 = vmul.f32 0.25, %v15117_v63  ;;  %v15308_v27 = vmul.f32 0.75, %v15117_v63  ;;  %v3300_v8 = vadd.f32 %v15184_v39, %v15299_v45  ;;  %v5721_v48 = vld [vmem:[#allocation3 + $0x78] sm:$0xf]  ;;  %v3304_v63 = vadd.f32 %v15302_v61, %v15181_v15 }
 0x361   : > { %v4586_v62 = vshrl.u32 %v11940_v30, 16  ;;  %v4589_v55 = vshll.u32 %v11940_v30, 16  ;;  %v4621_v58 = vshrl.u32 %v11944_v12, 16  ;;  %v4624_v19 = vshll.u32 %v11944_v12, 16 }
 0x362   : > { %v11942_v20 = vpack.c.bf16 %v3685_v2, %v3685_v2  ;;  %v4569_v40 = vshrl.u32 %v11938_v18, 16  ;;  %v4572_v4 = vshll.u32 %v11938_v18, 16  ;;  %v3298_v32 = vadd.f32 %v15190_v16, %v15305_v46  ;;  %v6135_v2 = vld [vmem:[#allocation3 + $0x14] sm:$0xe]  ;;  %v15334_v18 = vpop.f32.mrb[32].mxu1 }
 0x363   : > { %v15314_v10 = vrot.slane %v4586_v62, 7  ;;  %v15316_v1 = vrot.slane %v4621_v58, 7  ;;  %v3684_v30 = vadd.f32 %v20030_v54, %v3300_v8  ;;  %20031 = vst [vmem:[#allocation12_spill] sm:$0xff] %v15334_v18  ;;  %v11546_v54 = vcombine.low %v6135_v2, %v5969_v44 }
 0x364   : > { %v15322_v52 = vrot.slane %v4569_v40, 7  ;;  %v4604_v25 = vshrl.u32 %v11942_v20, 16  ;;  %v4607_v35 = vshll.u32 %v11942_v20, 16  ;;  %v15342_v20 = vpop.f32.mrb[33].mxu1  ;;  %v5730_v40 = vld [vmem:[#allocation3 + $0x8c] sm:$0xf] }
 0x365   : > { %v15327_v39 = vor.u32 %v4589_v55, %v15314_v10  ;;  %v4593_v12 = vrot.slane %v15314_v10, 4  ;;  %v15331_v50 = vor.u32 %v4624_v19, %v15316_v1  ;;  %v4628_v15 = vrot.slane %v15316_v1, 4  ;;  %20033 = vst [vmem:[#allocation13_spill] sm:$0xff] %v15342_v20  ;;  %v15348_v18 = vpop.f32.mrb[34].mxu1 }
 0x366   : > { %v4574_v16 = vor.u32 %v4572_v4, %v15322_v52  ;;  %v4575_v62 = vrot.slane %v15322_v52, 4  ;;  %v15338_v58 = vrot.slane %v4604_v25, 7  ;;  %v3688_v55 = vadd.f32 %v20032_v13, %v3304_v63  ;;  %20035 = vst [vmem:[#allocation14_spill] sm:$0xff] %v15348_v18  ;;  %v15354_v25 = vld [vmem:[#allocation3 + $0x1c] sm:$0xff]   ;;  %v15358_v2 = vpop.f32.mrb[35].mxu1 }
 0x367   : > { %v11941_v8 = vpack.c.bf16 %v3684_v30, %v3684_v30  ;;  %v3302_v19 = vadd.f32 %v15308_v27, %v15187_v38  ;;  %v20034_v10 = vunpack.c.h.bf16 %v14917_v60  ;;  %v20036_v38 = vunpack.c.h.bf16 %v14920_v0  ;;  %20037 = vst [vmem:[#allocation15_spill] sm:$0xff] %v15358_v2 }
 0x368   : > { %v4609_v4 = vor.u32 %v4607_v35, %v15338_v58  ;;  %v5722_v37 = vsel %vm15025_vm5, %v4574_v16, %v5721_v48  ;;  %v11945_v63 = vpack.c.bf16 %v3688_v55, %v3688_v55  ;;  %v7533_v18 = vrot.slane %v11546_v54, 1 }
 0x369   : > { %v3682_v1 = vadd.f32 %v20034_v10, %v3298_v32  ;;  %5723 = vst [vmem:[#allocation3 + $0x78] sm:$0xf] %v5722_v37  ;;  %v4595_v30 = vshrl.u32 %v11941_v8, 16  ;;  %v4598_v13 = vshll.u32 %v11941_v8, 16  ;;  %v3686_v60 = vadd.f32 %v20036_v38, %v3302_v19  ;;  %v5968_v37 = vld [vmem:[#allocation3 + $0x14] sm:$0xf] }
 0x36a   : > { %v5731_v35 = vsel %vm15025_vm5, %v4609_v4, %v5730_v40  ;;  %v4630_v10 = vshrl.u32 %v11945_v63, 16  ;;  %v4633_v52 = vshll.u32 %v11945_v63, 16  ;;  %v5727_v8 = vld [vmem:[#allocation3 + $0x88] sm:$0x1]  ;;  %v7534_v0 = vrot.slane %v15354_v25, 1 }
 0x36b   : > { %v11939_v32 = vpack.c.bf16 %v3682_v1, %v3682_v1  ;;  %5732 = vst [vmem:[#allocation3 + $0x8c] sm:$0xf] %v5731_v35  ;;  %v4597_v48 = vrot.slane %v4595_v30, 7  ;;  %v11943_v16 = vpack.c.bf16 %v3686_v60, %v3686_v60  ;;  %v15363_v19 = vcombine.low %v5968_v37, %v5969_v44  ;;  %v5736_v4 = vld [vmem:[#allocation3 + $0x9c] sm:$0x1] }
 0x36c   : > { %v4632_v17 = vrot.slane %v4630_v10, 7  ;;  %v15366_v1 = vmul.f32 0.25, %v15133_v42 }
 0x36d   : > { %v4577_v55 = vshrl.u32 %v11939_v32, 16  ;;  %v4580_v20 = vshll.u32 %v11939_v32, 16  ;;  %20038 = vst [vmem:[#allocation16_spill] sm:$0xff] %v15363_v19  ;;  %v4600_v38 = vor.u32 %v4598_v13, %v4597_v48  ;;  %v4602_v40 = vrot.slane %v4597_v48, 4 }
 0x36e   : > { %v4612_v54 = vshrl.u32 %v11943_v16, 16  ;;  %v4635_v35 = vor.u32 %v4633_v52, %v4632_v17  ;;  %v4637_v30 = vrot.slane %v4632_v17, 4  ;;  %v4615_v60 = vshll.u32 %v11943_v16, 16  ;;  %v15374_v13 = vld [vmem:[#allocation3 + $0x24] ss:$0 sps:$4 sm:$0x11]  }
 0x36f   : > { %v4579_v63 = vrot.slane %v4577_v55, 7  ;;  %v7535_v32 = vsel %vm1468_vm13, %v7533_v18, %v7534_v0  ;;  %v4601_v10 = vsel %vm14086_vm11, %v4593_v12, %v4600_v38  ;;  %v5728_v44 = vsel %vm14061_vm9, %v4602_v40, %v5727_v8 }
 0x370   : > { %7702 = vrot.lane.b32.xlu0 %v7535_v32, %s13960_s17  ;;  %v4636_v52 = vsel %vm14086_vm11, %v4628_v15, %v4635_v35  ;;  %5726 = vst.msk [vmem:[#allocation3 + $0x84] sm:$0xf] %vm3853_vm8, %v4601_v10  ;;  %5729 = vst [vmem:[#allocation3 + $0x88] sm:$0x1] %v5728_v44  ;;  %v5737_v17 = vsel %vm14061_vm9, %v4637_v30, %v5736_v4  ;;  %v4614_v12 = vrot.slane %v4612_v54, 7  ;;  %v15382_v18 = vmul.f32 0.75, %v15133_v42 }
 0x371   : > { %v4582_v37 = vor.u32 %v4580_v20, %v4579_v63  ;;  %v4584_v2 = vrot.slane %v4579_v63, 4  ;;  %v15384_v20 = vpop.f32.mrb[36].mxu1  ;;  %5735 = vst.msk [vmem:[#allocation3 + $0x98] sm:$0xf] %vm3853_vm8, %v4636_v52  ;;  %5738 = vst [vmem:[#allocation3 + $0x9c] sm:$0x1] %v5737_v17  ;;  %v3307_v16 = vadd.f32 %v15238_v24, %v15366_v1  ;;  %v20043_v44 = vunpack.c.l.bf16 %v14940_v57 }
 0x372   : > { %v15395_v55 = vmul.f32 0.25, %v15145_v7  ;;  %v4617_v42 = vor.u32 %v4615_v60, %v4614_v12  ;;  %v4619_v8 = vrot.slane %v4614_v12, 4  ;;  %v3311_v38 = vadd.f32 %v15382_v18, %v15235_v11  ;;  %v15439_v17 = vpop.f32.mrb[37].mxu1 }
 0x373   : > { %v4583_v48 = vsel %vm14086_vm11, %v4575_v62, %v4582_v37  ;;  %v4592_v15 = vsel %vm14086_vm11, %v4584_v2, %v15327_v39  ;;  %v15402_v62 = vmul.f32 0.75, %v15145_v7  ;;  %v20039_v39 = vunpack.c.l.bf16 %v14927_v33 }
 0x374   : > { %5724 = vst.msk [vmem:[#allocation3 + $0x7c] sm:$0xf] %vm3853_vm8, %v4583_v48  ;;  %5725 = vst.msk [vmem:[#allocation3 + $0x80] sm:$0xf] %vm3853_vm8, %v4592_v15  ;;  %v3305_v24 = vadd.f32 %v15263_v14, %v15395_v55  ;;  %v7536_v40 = vrot.slane %v15374_v13, 1  ;;  %v15410_v4 = vmul.f32 0.25, %v15148_v34  ;;  %v4627_v7 = vsel %vm14086_vm11, %v4619_v8, %v15331_v50 }
 0x375   : > { %v3691_v2 = vadd.f32 %v20039_v39, %v3307_v16  ;;  %v20040_v63 = vrot.slane %v15338_v58, 4  ;;  %v20041_v11 = vunpack.c.l.bf16 %v14930_v53  ;;  %v3309_v14 = vadd.f32 %v15402_v62, %v15243_v47  ;;  %5734 = vst.msk [vmem:[#allocation3 + $0x94] sm:$0xf] %vm3853_vm8, %v4627_v7 }
 0x376   : > { %v20042_v58 = vunpack.c.l.bf16 %v14937_v36  ;;  %v7537_v32 = vsel %vm1468_vm13, %v7534_v0, %v7536_v40  ;;  %v15429_v10 = vmul.f32 0.75, %v15148_v34  ;;  %v3308_v47 = vadd.f32 %v15302_v61, %v15410_v4 }
 0x377   : > { %v4618_v54 = vsel %vm14086_vm11, %v20040_v63, %v4617_v42  ;;  %v3695_v35 = vadd.f32 %v20041_v11, %v3311_v38  ;;  %v11948_v30 = vpack.c.bf16 %v3691_v2, %v3691_v2  ;;  %v3693_v37 = vadd.f32 %v20043_v44, %v3309_v14  ;;  %7704 = vrot.lane.b32.xlu0 %v7537_v32, %s13960_s17 }
 0x378   : > { %5733 = vst.msk [vmem:[#allocation3 + $0x90] sm:$0xf] %vm3853_vm8, %v4618_v54  ;;  %v3689_v60 = vadd.f32 %v20042_v58, %v3305_v24  ;;  %v15437_v52 = vmul.f32 0.25, %v15158_v3  ;;  %v3312_v34 = vadd.f32 %v15429_v10, %v15299_v45  ;;  %v20044_v8 = vunpack.c.h.bf16 %v14927_v33 }
 0x379   : > { %v11952_v50 = vpack.c.bf16 %v3695_v35, %v3695_v35  ;;  %v4656_v12 = vshrl.u32 %v11948_v30, 16  ;;  %v4659_v48 = vshll.u32 %v11948_v30, 16  ;;  %v11950_v42 = vpack.c.bf16 %v3693_v37, %v3693_v37  ;;  %v5739_v30 = vld [vmem:[#allocation3 + $0xa0] sm:$0xf]  ;;  %v5748_v37 = vld [vmem:[#allocation3 + $0xb4] sm:$0xf] }
 0x37a   : > { %v11946_v0 = vpack.c.bf16 %v3689_v60, %v3689_v60  ;;  %v3692_v38 = vadd.f32 %v20044_v8, %v3308_v47  ;;  %v20045_v24 = vunpack.c.h.bf16 %v14930_v53 }
 0x37b   : > { %v4691_v15 = vshrl.u32 %v11952_v50, 16  ;;  %v4694_v16 = vshll.u32 %v11952_v50, 16  ;;  %v4658_v39 = vrot.slane %v4656_v12, 7  ;;  %v4674_v54 = vshrl.u32 %v11950_v42, 16 }
 0x37c   : > { %v4639_v2 = vshrl.u32 %v11946_v0, 16  ;;  %v4642_v61 = vshll.u32 %v11946_v0, 16  ;;  %v3696_v40 = vadd.f32 %v20045_v24, %v3312_v34  ;;  %v4677_v7 = vshll.u32 %v11950_v42, 16  ;;  %v15459_v42 = vpop.f32.mrb[38].mxu1 }
 0x37d   : > { %v4693_v63 = vrot.slane %v4691_v15, 7  ;;  %v11949_v11 = vpack.c.bf16 %v3692_v38, %v3692_v38  ;;  %v15447_v35 = vor.u32 %v4659_v48, %v4658_v39  ;;  %v4663_v14 = vrot.slane %v4658_v39, 4  ;;  %v5745_v38 = vld [vmem:[#allocation3 + $0xb0] sm:$0x1] }
 0x37e   : > { %v15449_v45 = vrot.slane %v4639_v2, 7  ;;  %v11953_v58 = vpack.c.bf16 %v3696_v40, %v3696_v40  ;;  %v15453_v32 = vrot.slane %v4674_v54, 7  ;;  %v15464_v39 = vmul.f32 0.75, %v15158_v3 }
 0x37f   : > { %v15451_v60 = vor.u32 %v4694_v16, %v4693_v63  ;;  %v4698_v33 = vrot.slane %v4693_v63, 4  ;;  %v4665_v50 = vshrl.u32 %v11949_v11, 16  ;;  %v4668_v47 = vshll.u32 %v11949_v11, 16  ;;  %v5754_v63 = vld [vmem:[#allocation3 + $0xc4] sm:$0x1] }
 0x380   : > { %v4644_v53 = vor.u32 %v4642_v61, %v15449_v45  ;;  %v4645_v44 = vrot.slane %v15449_v45, 4  ;;  %v4700_v12 = vshrl.u32 %v11953_v58, 16  ;;  %v4679_v48 = vor.u32 %v4677_v7, %v15453_v32 }
 0x381   : > { %v4680_v0 = vrot.slane %v15453_v32, 4  ;;  %v4667_v34 = vrot.slane %v4665_v50, 7  ;;  %v4703_v15 = vshll.u32 %v11953_v58, 16  ;;  %v3306_v2 = vadd.f32 %v15308_v27, %v15437_v52 }
 0x382   : > { %v5740_v16 = vsel %vm15025_vm5, %v4644_v53, %v5739_v30  ;;  %v4702_v8 = vrot.slane %v4700_v12, 7  ;;  %v5749_v61 = vsel %vm15025_vm5, %v4679_v48, %v5748_v37  ;;  %v6631_v54 = vshrl.u32 %v15363_v19, 16  ;;  %v15488_v48 = vpop.f32.mrb[39].mxu1 }
 0x383   : > { %5741 = vst [vmem:[#allocation3 + $0xa0] sm:$0xf] %v5740_v16  ;;  %v4670_v24 = vor.u32 %v4668_v47, %v4667_v34  ;;  %v4672_v40 = vrot.slane %v4667_v34, 4  ;;  %5750 = vst [vmem:[#allocation3 + $0xb4] sm:$0xf] %v5749_v61  ;;  %v3310_v30 = vadd.f32 %v15464_v39, %v15305_v46  ;;  %v20046_v3 = vunpack.c.h.bf16 %v14937_v36 }
 0x384   : > { %v4705_v7 = vor.u32 %v4703_v15, %v4702_v8  ;;  %v4707_v11 = vrot.slane %v4702_v8, 4  ;;  %v6633_v53 = vshll.u32 %v15363_v19, 16  ;;  %v6638_v37 = vshll.u32 %v15354_v25, 16 }
 0x385   : > { %v3690_v58 = vadd.f32 %v20046_v3, %v3306_v2  ;;  %v4671_v27 = vsel %vm14086_vm11, %v4663_v14, %v4670_v24  ;;  %v5746_v50 = vsel %vm14061_vm9, %v4672_v40, %v5745_v38  ;;  %v20047_v46 = vunpack.c.h.bf16 %v14940_v57 }
 0x386   : > { %v4706_v47 = vsel %vm14086_vm11, %v4698_v33, %v4705_v7  ;;  %5744 = vst.msk [vmem:[#allocation3 + $0xac] sm:$0xf] %vm3853_vm8, %v4671_v27  ;;  %5747 = vst [vmem:[#allocation3 + $0xb0] sm:$0x1] %v5746_v50  ;;  %v5755_v36 = vsel %vm14061_vm9, %v4707_v11, %v5754_v63  ;;  %v6635_v34 = vrot.slane %v6633_v53, 1  ;;  %v6640_v15 = vrot.slane %v6638_v37, 1 }
 0x387   : > { %v3694_v12 = vadd.f32 %v20047_v46, %v3310_v30  ;;  %v11947_v14 = vpack.c.bf16 %v3690_v58, %v3690_v58  ;;  %5753 = vst.msk [vmem:[#allocation3 + $0xc0] sm:$0xf] %vm3853_vm8, %v4706_v47  ;;  %5756 = vst [vmem:[#allocation3 + $0xc4] sm:$0x1] %v5755_v36  ;;  %v15492_v16 = vmul.f32 0.25, %v15198_v51  ;;  %v15495_v33 = vmul.f32 0.75, %v15198_v51 }
 0x388   : > { %v15498_v57 = vmul.f32 0.25, %v15200_v6  ;;  %v6636_v61 = vor.u32 %v6635_v34, %v6631_v54  ;;  %v15505_v63 = vmul.f32 0.75, %v15200_v6  ;;  %v20048_v58 = vunpack.c.l.bf16 %v14947_v22  ;;  %v20050_v37 = vld [vmem:[#allocation5_spill] sm:$0xff] }
 0x389   : > { %v11951_v8 = vpack.c.bf16 %v3694_v12, %v3694_v12  ;;  %v4647_v38 = vshrl.u32 %v11947_v14, 16  ;;  %v4650_v2 = vshll.u32 %v11947_v14, 16  ;;  %v3315_v24 = vadd.f32 %v15382_v18, %v15492_v16  ;;  %v20052_v12 = vld [vmem:[#allocation6_spill] sm:$0xff] }
 0x38a   : > { %v3319_v40 = vadd.f32 %v15495_v33, %v15366_v1  ;;  %v3313_v30 = vadd.f32 %v15402_v62, %v15498_v57  ;;  %v6641_v3 = vsel %vm1161_vm14, %v6636_v61, %v6640_v15  ;;  %v20049_v27 = vunpack.c.l.bf16 %v14950_v49 }
 0x38b   : > { %v4649_v7 = vrot.slane %v4647_v38, 7  ;;  %v4682_v11 = vshrl.u32 %v11951_v8, 16  ;;  %v4685_v51 = vshll.u32 %v11951_v8, 16  ;;  %v3699_v54 = vadd.f32 %v20048_v58, %v3315_v24  ;;  %7294 = vrot.lane.b32.xlu0 %v6641_v3, %s13958_s15 }
 0x38c   : > { %v3703_v18 = vadd.f32 %v20049_v27, %v3319_v40  ;;  %v3317_v1 = vadd.f32 %v15505_v63, %v15395_v55  ;;  %v20051_v47 = vunpack.c.l.bf16 %v20050_v37  ;;  %v20053_v14 = vunpack.c.l.bf16 %v20052_v12 }
 0x38d   : > { %v4652_v50 = vor.u32 %v4650_v2, %v4649_v7  ;;  %v4654_v6 = vrot.slane %v4649_v7, 4  ;;  %v4684_v53 = vrot.slane %v4682_v11, 7  ;;  %v11956_v62 = vpack.c.bf16 %v3699_v54, %v3699_v54 }
 0x38e   : > { %v3697_v36 = vadd.f32 %v20051_v47, %v3313_v30  ;;  %v11960_v46 = vpack.c.bf16 %v3703_v18, %v3703_v18  ;;  %v3701_v34 = vadd.f32 %v20053_v14, %v3317_v1  ;;  %v6642_v8 = vshrl.u32 %v15354_v25, 16  ;;  %v5973_v18 = vld [vmem:[#allocation3 + $0x2c] sm:$0xf] }
 0x38f   : > { %v4653_v55 = vsel %vm14086_vm11, %v4645_v44, %v4652_v50  ;;  %v4662_v38 = vsel %vm14086_vm11, %v4654_v6, %v15447_v35  ;;  %v4687_v2 = vor.u32 %v4685_v51, %v4684_v53  ;;  %v4689_v61 = vrot.slane %v4684_v53, 4  ;;  %v5757_v53 = vld [vmem:[#allocation3 + $0xc8] sm:$0xf] }
 0x390   : > { %5742 = vst.msk [vmem:[#allocation3 + $0xa4] sm:$0xf] %vm3853_vm8, %v4653_v55  ;;  %5743 = vst.msk [vmem:[#allocation3 + $0xa8] sm:$0xf] %vm3853_vm8, %v4662_v38  ;;  %v4726_v24 = vshrl.u32 %v11956_v62, 16  ;;  %v4729_v40 = vshll.u32 %v11956_v62, 16  ;;  %v11954_v35 = vpack.c.bf16 %v3697_v36, %v3697_v36  ;;  %v11958_v44 = vpack.c.bf16 %v3701_v34, %v3701_v34 }
 0x391   : > { %v4761_v7 = vshrl.u32 %v11960_v46, 16  ;;  %v4764_v11 = vshll.u32 %v11960_v46, 16  ;;  %v4688_v25 = vsel %vm14086_vm11, %v4680_v0, %v4687_v2  ;;  %v4697_v45 = vsel %vm14086_vm11, %v4689_v61, %v15451_v60  ;;  %v6136_v62 = vld [vmem:[#allocation3 + $0x28] sm:$0xe]  ;;  %v5766_v46 = vld [vmem:[#allocation3 + $0xdc] sm:$0xf] }
 0x392   : > { %5751 = vst.msk [vmem:[#allocation3 + $0xb8] sm:$0xf] %vm3853_vm8, %v4688_v25  ;;  %5752 = vst.msk [vmem:[#allocation3 + $0xbc] sm:$0xf] %vm3853_vm8, %v4697_v45  ;;  %v15540_v51 = vrot.slane %v4726_v24, 7  ;;  %v6644_v3 = vor.u32 %v6642_v8, %v6640_v15  ;;  %v6646_v32 = vshll.u32 %v15374_v13, 16  ;;  %v11547_v38 = vcombine.low %v6136_v62, %v5973_v18 }
 0x393   : > { %v15542_v30 = vrot.slane %v4761_v7, 7  ;;  %v4709_v58 = vshrl.u32 %v11954_v35, 16  ;;  %v4712_v54 = vshll.u32 %v11954_v35, 16  ;;  %v4744_v0 = vshrl.u32 %v11958_v44, 16  ;;  %v15569_v55 = vld [vmem:[#allocation3 + $0x30] sm:$0xff]   ;;  %v15575_v7 = vpop.f32.mrb[40].mxu1 }
 0x394   : > { %v4747_v27 = vshll.u32 %v11958_v44, 16  ;;  %v15546_v60 = vor.u32 %v4729_v40, %v15540_v51  ;;  %v4733_v1 = vrot.slane %v15540_v51, 4  ;;  %v6648_v13 = vrot.slane %v6646_v32, 1  ;;  %v15591_v32 = vpop.f32.mrb[41].mxu1 }
 0x395   : > { %v15550_v50 = vor.u32 %v4764_v11, %v15542_v30  ;;  %v4768_v6 = vrot.slane %v15542_v30, 4  ;;  %v15553_v47 = vrot.slane %v4709_v58, 7  ;;  %v15555_v15 = vrot.slane %v4744_v0, 7 }
 0x396   : > { %v15558_v36 = vmul.f32 0.25, %v15204_v26  ;;  %v15561_v14 = vmul.f32 0.75, %v15204_v26  ;;  %v15564_v34 = vmul.f32 0.25, %v15210_v56  ;;  %v15567_v8 = vmul.f32 0.75, %v15210_v56 }
 0x397   : > { %v4714_v2 = vor.u32 %v4712_v54, %v15553_v47  ;;  %v4749_v24 = vor.u32 %v4747_v27, %v15555_v15  ;;  %v6649_v26 = vsel %vm1161_vm14, %v6644_v3, %v6648_v13  ;;  %v7538_v3 = vrot.slane %v11547_v38, 1  ;;  %v5972_v27 = vld [vmem:[#allocation3 + $0x28] sm:$0xf] }
 0x398   : > { %v3316_v11 = vadd.f32 %v15429_v10, %v15558_v36  ;;  %v3320_v56 = vadd.f32 %v15561_v14, %v15410_v4  ;;  %v3314_v25 = vadd.f32 %v15464_v39, %v15564_v34  ;;  %7296 = vrot.lane.b32.xlu0 %v6649_v26, %s13958_s15  ;;  %v3318_v44 = vadd.f32 %v15567_v8, %v15437_v52 }
 0x399   : > { %v5758_v45 = vsel %vm15025_vm5, %v4714_v2, %v5757_v53  ;;  %v5767_v35 = vsel %vm15025_vm5, %v4749_v24, %v5766_v46  ;;  %v20054_v4 = vunpack.c.h.bf16 %v14947_v22  ;;  %v20055_v39 = vunpack.c.h.bf16 %v14950_v49 }
 0x39a   : > { %5759 = vst [vmem:[#allocation3 + $0xc8] sm:$0xf] %v5758_v45  ;;  %5768 = vst [vmem:[#allocation3 + $0xdc] sm:$0xf] %v5767_v35  ;;  %v20056_v54 = vunpack.c.h.bf16 %v20050_v37  ;;  %v19889_v53 = vrot.slane %v15569_v55, 1  ;;  %v20057_v13 = vunpack.c.h.bf16 %v20052_v12  ;;  %v15602_v62 = vcombine.low %v5972_v27, %v5973_v18 }
 0x39b   : > { %v3700_v10 = vadd.f32 %v20054_v4, %v3316_v11  ;;  %v3704_v58 = vadd.f32 %v20055_v39, %v3320_v56  ;;  %v15605_v46 = vmul.f32 0.25, %v15232_v31  ;;  %v15608_v22 = vmul.f32 0.75, %v15232_v31  ;;  %v15621_v4 = vpop.f32.mrb[42].mxu1 }
 0x39c   : > { %v3698_v0 = vadd.f32 %v20056_v54, %v3314_v25  ;;  %v3702_v52 = vadd.f32 %v20057_v13, %v3318_v44  ;;  %20058 = vst [vmem:[#allocation5_spill] sm:$0xff] %v15602_v62  ;;  %v7540_v37 = vsel %vm1468_vm13, %v7538_v3, %v19889_v53  ;;  %v15619_v26 = vmul.f32 0.25, %v15240_v41 }
 0x39d   : > { %v11957_v38 = vpack.c.bf16 %v3700_v10, %v3700_v10  ;;  %v11961_v49 = vpack.c.bf16 %v3704_v58, %v3704_v58  ;;  %7706 = vrot.lane.b32.xlu0 %v7540_v37, %s13960_s17  ;;  %v3323_v12 = vadd.f32 %v15495_v33, %v15605_v46  ;;  %v3327_v18 = vadd.f32 %v15608_v22, %v15492_v16  ;;  %v5763_v58 = vld [vmem:[#allocation3 + $0xd8] sm:$0x1]  ;;  %v20059_v33 = vld [vmem:[#allocation7_spill] sm:$0xff]  ;;  %v20061_v16 = vld [vmem:[#allocation8_spill] sm:$0xff] }
 0x39e   : > { %v11955_v2 = vpack.c.bf16 %v3698_v0, %v3698_v0  ;;  %v11959_v24 = vpack.c.bf16 %v3702_v52, %v3702_v52  ;;  %v20060_v54 = vunpack.c.l.bf16 %v20059_v33  ;;  %v20062_v27 = vunpack.c.l.bf16 %v20061_v16  ;;  %v5772_v52 = vld [vmem:[#allocation3 + $0xec] sm:$0x1] }
 0x39f   : > { %v4735_v31 = vshrl.u32 %v11957_v38, 16  ;;  %v4738_v11 = vshll.u32 %v11957_v38, 16  ;;  %v4770_v56 = vshrl.u32 %v11961_v49, 16  ;;  %v4773_v25 = vshll.u32 %v11961_v49, 16 }
 0x3a0   : > { %v4717_v45 = vshrl.u32 %v11955_v2, 16  ;;  %v4720_v35 = vshll.u32 %v11955_v2, 16  ;;  %v4752_v44 = vshrl.u32 %v11959_v24, 16  ;;  %v4755_v3 = vshll.u32 %v11959_v24, 16 }
 0x3a1   : > { %v4737_v10 = vrot.slane %v4735_v31, 7  ;;  %v4772_v39 = vrot.slane %v4770_v56, 7  ;;  %v3707_v0 = vadd.f32 %v20060_v54, %v3323_v12  ;;  %v3711_v13 = vadd.f32 %v20062_v27, %v3327_v18  ;;  %v15632_v54 = vld [vmem:[#allocation3 + $0x38] ss:$0 sps:$4 sm:$0x11]   ;;  %v15678_v27 = vpop.f32.mrb[43].mxu1 }
 0x3a2   : > { %v4719_v37 = vrot.slane %v4717_v45, 7  ;;  %v4754_v38 = vrot.slane %v4752_v44, 7  ;;  %v15628_v49 = vmul.f32 0.75, %v15240_v41  ;;  %v3321_v2 = vadd.f32 %v15505_v63, %v15619_v26 }
 0x3a3   : > { %v4740_v24 = vor.u32 %v4738_v11, %v4737_v10  ;;  %v4742_v53 = vrot.slane %v4737_v10, 4  ;;  %v4775_v31 = vor.u32 %v4773_v25, %v4772_v39  ;;  %v4777_v56 = vrot.slane %v4772_v39, 4 }
 0x3a4   : > { %v4722_v40 = vor.u32 %v4720_v35, %v4719_v37  ;;  %v4724_v61 = vrot.slane %v4719_v37, 4  ;;  %v4757_v33 = vor.u32 %v4755_v3, %v4754_v38  ;;  %v4759_v12 = vrot.slane %v4754_v38, 4  ;;  %v13919_v3 = vld [vmem:[%s14860_s16 + $0xb8] sm:$0xff]  }
 0x3a5   : > { %v4741_v18 = vsel %vm14086_vm11, %v4733_v1, %v4740_v24  ;;  %v4776_v41 = vsel %vm14086_vm11, %v4768_v6, %v4775_v31  ;;  %v5764_v63 = vsel %vm14061_vm9, %v4742_v53, %v5763_v58  ;;  %v5773_v11 = vsel %vm14061_vm9, %v4777_v56, %v5772_v52 }
 0x3a6   : > { %5762 = vst.msk [vmem:[#allocation3 + $0xd4] sm:$0xf] %vm3853_vm8, %v4741_v18  ;;  %5765 = vst [vmem:[#allocation3 + $0xd8] sm:$0x1] %v5764_v63  ;;  %v20063_v51 = vrot.slane %v15553_v47, 4  ;;  %v4732_v1 = vsel %vm14086_vm11, %v4724_v61, %v15546_v60  ;;  %v20064_v6 = vrot.slane %v15555_v15, 4  ;;  %v4767_v25 = vsel %vm14086_vm11, %v4759_v12, %v15550_v50 }
 0x3a7   : > { %5771 = vst.msk [vmem:[#allocation3 + $0xe8] sm:$0xf] %vm3853_vm8, %v4776_v41  ;;  %5774 = vst [vmem:[#allocation3 + $0xec] sm:$0x1] %v5773_v11  ;;  %v11964_v47 = vpack.c.bf16 %v3707_v0, %v3707_v0  ;;  %v3325_v60 = vadd.f32 %v15628_v49, %v15498_v57  ;;  %v20065_v15 = vld [vmem:[#allocation9_spill] sm:$0xff]  ;;  %v7541_v35 = vrot.slane %v15632_v54, 1  ;;  %v12269_v10 = vunpack.c.h.bf16 %v13919_v3 }
 0x3a8   : > { %v4723_v30 = vsel %vm14086_vm11, %v20063_v51, %v4722_v40  ;;  %v4758_v53 = vsel %vm14086_vm11, %v20064_v6, %v4757_v33  ;;  %5761 = vst.msk [vmem:[#allocation3 + $0xd0] sm:$0xf] %vm3853_vm8, %v4732_v1  ;;  %5770 = vst.msk [vmem:[#allocation3 + $0xe4] sm:$0xf] %vm3853_vm8, %v4767_v25  ;;  %v11968_v40 = vpack.c.bf16 %v3711_v13, %v3711_v13  ;;  %v20066_v61 = vunpack.c.l.bf16 %v20065_v15  ;;  %v20067_v57 = vld [vmem:[#allocation10_spill] sm:$0xff]  ;;  %v13920_v33 = vld [vmem:[%s14860_s16 + $0xc8] sm:$0xff]  }
 0x3a9   : > { %5760 = vst.msk [vmem:[#allocation3 + $0xcc] sm:$0xf] %vm3853_vm8, %v4723_v30  ;;  %5769 = vst.msk [vmem:[#allocation3 + $0xe0] sm:$0xf] %vm3853_vm8, %v4758_v53  ;;  %v15672_v50 = vmul.f32 0.25, %v15245_v43  ;;  %v15675_v44 = vmul.f32 0.75, %v15245_v43  ;;  %v20068_v13 = vunpack.c.l.bf16 %v20067_v57  ;;  %v12277_v12 = vunpack.c.h.bf16 %v13920_v33 }
 0x3aa   : > { %v3705_v45 = vadd.f32 %v20066_v61, %v3321_v2  ;;  %v4796_v39 = vshrl.u32 %v11964_v47, 16  ;;  %v4799_v58 = vshll.u32 %v11964_v47, 16  ;;  %v4831_v0 = vshrl.u32 %v11968_v40, 16  ;;  %v4007_v51 = vld [vmem:[#allocation3 + $0x100] sm:$0x1] }
 0x3ab   : > { %v4834_v16 = vshll.u32 %v11968_v40, 16  ;;  %v3709_v52 = vadd.f32 %v20068_v13, %v3325_v60  ;;  %v20069_v38 = vrot.slane %v15569_v55, 1  ;;  %v3324_v43 = vadd.f32 %v15561_v14, %v15672_v50  ;;  %v4010_v30 = vld [vmem:[#allocation3 + $0x114] sm:$0x1]  ;;  %v5775_v25 = vld [vmem:[#allocation3 + $0xf0] sm:$0xf] }
 0x3ac   : > { %v11962_v37 = vpack.c.bf16 %v3705_v45, %v3705_v45  ;;  %v15687_v24 = vrot.slane %v4796_v39, 7  ;;  %v15689_v31 = vrot.slane %v4831_v0, 7  ;;  %v3328_v56 = vadd.f32 %v15675_v44, %v15558_v36  ;;  %v5784_v15 = vld [vmem:[#allocation3 + $0x104] sm:$0xf] }
 0x3ad   : > { %v7542_v2 = vsel %vm1468_vm13, %v20069_v38, %v7541_v35  ;;  %v11966_v18 = vpack.c.bf16 %v3709_v52, %v3709_v52  ;;  %v3708_v11 = vadd.f32 %v12269_v10, %v3324_v43  ;;  %v4008_v45 = vsel %vm14073_vm10, 0, %v4007_v51  ;;  %v5977_v38 = vld [vmem:[#allocation3 + $0x40] sm:$0xf]  ;;  %v13922_v51 = vld [vmem:[%s14860_s16 + $0xc0] sm:$0xff]  }
 0x3ae   : > { %7708 = vrot.lane.b32.xlu0 %v7542_v2, %s13960_s17  ;;  %v4779_v41 = vshrl.u32 %v11962_v37, 16  ;;  %v4782_v63 = vshll.u32 %v11962_v37, 16  ;;  %v15696_v1 = vor.u32 %v4799_v58, %v15687_v24  ;;  %v4803_v14 = vrot.slane %v15687_v24, 4  ;;  %4009 = vst [vmem:[#allocation3 + $0x100] sm:$0x1] %v4008_v45 }
 0x3af   : > { %v15700_v6 = vor.u32 %v4834_v16, %v15689_v31  ;;  %v4838_v53 = vrot.slane %v15689_v31, 4  ;;  %v4814_v47 = vshrl.u32 %v11966_v18, 16  ;;  %v4817_v40 = vshll.u32 %v11966_v18, 16  ;;  %v13921_v18 = vld [vmem:[%s14860_s16 + $0xb0] sm:$0xff]  }
 0x3b0   : > { %v15703_v36 = vrot.slane %v4779_v41, 7  ;;  %v3712_v60 = vadd.f32 %v12277_v12, %v3328_v56  ;;  %v4011_v35 = vsel %vm14073_vm10, 0, %v4010_v30  ;;  %v11965_v3 = vpack.c.bf16 %v3708_v11, %v3708_v11  ;;  %v15725_v56 = vld [vmem:[#allocation3 + $0x44] sm:$0xff]   ;;  %v5976_v41 = vld [vmem:[#allocation3 + $0x3c] sm:$0xf] }
 0x3b1   : > { %v15710_v10 = vmul.f32 0.25, %v15247_v59  ;;  %v15714_v0 = vrot.slane %v4814_v47, 7  ;;  %4012 = vst [vmem:[#allocation3 + $0x114] sm:$0x1] %v4011_v35  ;;  %v15717_v52 = vmul.f32 0.75, %v15247_v59  ;;  %v12273_v30 = vunpack.c.h.bf16 %v13922_v51 }
 0x3b2   : > { %v4784_v39 = vor.u32 %v4782_v63, %v15703_v36  ;;  %v4785_v58 = vrot.slane %v15703_v36, 4  ;;  %v11969_v16 = vpack.c.bf16 %v3712_v60, %v3712_v60  ;;  %v4805_v57 = vshrl.u32 %v11965_v3, 16 }
 0x3b3   : > { %v4808_v13 = vshll.u32 %v11965_v3, 16  ;;  %v3322_v37 = vadd.f32 %v15567_v8, %v15710_v10  ;;  %v4819_v2 = vor.u32 %v4817_v40, %v15714_v0  ;;  %v4820_v43 = vrot.slane %v15714_v0, 4 }
 0x3b4   : > { %v5776_v24 = vsel %vm15025_vm5, %v4784_v39, %v5775_v25  ;;  %v4840_v31 = vshrl.u32 %v11969_v16, 16  ;;  %v4807_v33 = vrot.slane %v4805_v57, 7  ;;  %v4843_v12 = vshll.u32 %v11969_v16, 16  ;;  %v6137_v25 = vld [vmem:[#allocation3 + $0x3c] sm:$0xe]  ;;  %v15737_v57 = vld [vmem:[%s14860_s16 + $0xd8] sm:$0xff]  }
 0x3b5   : > { %5777 = vst [vmem:[#allocation3 + $0xf0] sm:$0xf] %v5776_v24  ;;  %v3326_v59 = vadd.f32 %v15717_v52, %v15564_v34  ;;  %v12265_v8 = vunpack.c.h.bf16 %v13921_v18  ;;  %v5785_v63 = vsel %vm15025_vm5, %v4819_v2, %v5784_v15  ;;  %v15733_v47 = vcombine.low %v5976_v41, %v5977_v38  ;;  %v5781_v2 = vld [vmem:[#allocation3 + $0x100] sm:$0x1] }
 0x3b6   : > { %v4842_v11 = vrot.slane %v4840_v31, 7  ;;  %5786 = vst [vmem:[#allocation3 + $0x104] sm:$0xf] %v5785_v63  ;;  %v4810_v40 = vor.u32 %v4808_v13, %v4807_v33  ;;  %v4812_v60 = vrot.slane %v4807_v33, 4  ;;  %v11548_v35 = vcombine.low %v6137_v25, %v5977_v38  ;;  %v15762_v63 = vld [vmem:[%s14860_s16 + $0xd0] sm:$0xff]  }
 0x3b7   : > { %20071 = vst [vmem:[#allocation6_spill] sm:$0xff] %v15733_v47  ;;  %v3706_v45 = vadd.f32 %v12265_v8, %v3322_v37  ;;  %v3710_v39 = vadd.f32 %v12273_v30, %v3326_v59  ;;  %v7544_v16 = vrot.slane %v15725_v56, 1  ;;  %v15742_v13 = vmul.f32 0.25, %v15276_v29 }
 0x3b8   : > { %v4845_v3 = vor.u32 %v4843_v12, %v4842_v11  ;;  %v4847_v34 = vrot.slane %v4842_v11, 4  ;;  %v4811_v15 = vsel %vm14086_vm11, %v4803_v14, %v4810_v40  ;;  %v5790_v24 = vld [vmem:[#allocation3 + $0x114] sm:$0x1]  ;;  %v7543_v18 = vrot.slane %v11548_v35, 1  ;;  %v15764_v11 = vpop.f32.mrb[44].mxu1 }
 0x3b9   : > { %v11963_v31 = vpack.c.bf16 %v3706_v45, %v3706_v45  ;;  %5780 = vst.msk [vmem:[#allocation3 + $0xfc] sm:$0xf] %vm3853_vm8, %v4811_v15  ;;  %v5782_v38 = vsel %vm14061_vm9, %v4812_v60, %v5781_v2  ;;  %v11967_v14 = vpack.c.bf16 %v3710_v39, %v3710_v39  ;;  %v15752_v12 = vld [vmem:[%s14860_s16 + $0xe8] sm:$0xff]   ;;  %v15759_v41 = vmul.f32 0.75, %v15276_v29  ;;  %v15781_v2 = vld [vmem:[%s14860_s16 + $0xe0] sm:$0xff]  }
 0x3ba   : > { %v4846_v37 = vsel %vm14086_vm11, %v4838_v53, %v4845_v3  ;;  %v5791_v33 = vsel %vm14061_vm9, %v4847_v34, %v5790_v24  ;;  %5783 = vst [vmem:[#allocation3 + $0x100] sm:$0x1] %v5782_v38  ;;  %v7545_v53 = vsel %vm1468_vm13, %v7543_v18, %v7544_v16  ;;  %v3331_v25 = vadd.f32 %v15608_v22, %v15742_v13  ;;  %v15785_v18 = vpop.f32.mrb[45].mxu1 }
 0x3bb   : > { %5789 = vst.msk [vmem:[#allocation3 + $0x110] sm:$0xf] %vm3853_vm8, %v4846_v37  ;;  %5792 = vst [vmem:[#allocation3 + $0x114] sm:$0x1] %v5791_v33  ;;  %v4787_v59 = vshrl.u32 %v11963_v31, 16  ;;  %v4790_v8 = vshll.u32 %v11963_v31, 16  ;;  %7710 = vrot.lane.b32.xlu0 %v7545_v53, %s13960_s17  ;;  %v12284_v40 = vunpack.c.l.bf16 %v15737_v57  ;;  %v3335_v45 = vadd.f32 %v15759_v41, %v15605_v46 }
 0x3bc   : > { %v4822_v51 = vshrl.u32 %v11967_v14, 16  ;;  %v4825_v30 = vshll.u32 %v11967_v14, 16  ;;  %v12292_v29 = vunpack.c.l.bf16 %v15752_v12  ;;  %v15774_v35 = vmul.f32 0.25, %v15288_v5 }
 0x3bd   : > { %v4789_v60 = vrot.slane %v4787_v59, 7  ;;  %v3715_v34 = vadd.f32 %v12284_v40, %v3331_v25  ;;  %v15777_v39 = vmul.f32 0.75, %v15288_v5  ;;  %v12280_v15 = vunpack.c.l.bf16 %v15762_v63  ;;  %v15789_v5 = vld [vmem:[#allocation3 + $0x4c] ss:$0 sps:$4 sm:$0x11]  }
 0x3be   : > { %v4824_v3 = vrot.slane %v4822_v51, 7  ;;  %v3719_v31 = vadd.f32 %v12292_v29, %v3335_v45  ;;  %v3329_v46 = vadd.f32 %v15628_v49, %v15774_v35  ;;  %v12288_v53 = vunpack.c.l.bf16 %v15781_v2  ;;  %v3910_v51 = vld [vmem:[#allocation3 + $0x118] sm:$0x1] }
 0x3bf   : > { %v4792_v22 = vor.u32 %v4790_v8, %v4789_v60  ;;  %v4794_v24 = vrot.slane %v4789_v60, 4  ;;  %v11972_v33 = vpack.c.bf16 %v3715_v34, %v3715_v34  ;;  %v3333_v14 = vadd.f32 %v15777_v39, %v15619_v26 }
 0x3c0   : > { %v4827_v37 = vor.u32 %v4825_v30, %v4824_v3  ;;  %v4829_v38 = vrot.slane %v4824_v3, 4  ;;  %v11976_v49 = vpack.c.bf16 %v3719_v31, %v3719_v31  ;;  %v3913_v30 = vld [vmem:[#allocation3 + $0x12c] sm:$0x1]  ;;  %v3713_v0 = vadd.f32 %v12280_v15, %v3329_v46  ;;  %v15822_v15 = vpop.f32.mrb[46].mxu1  ;;  %v15887_v46 = vld [vmem:[%s14860_s16 + $0xf8] sm:$0xff]  }
 0x3c1   : > { %v4793_v59 = vsel %vm14086_vm11, %v4785_v58, %v4792_v22  ;;  %v4802_v8 = vsel %vm14086_vm11, %v4794_v24, %v15696_v1  ;;  %v4866_v58 = vshrl.u32 %v11972_v33, 16  ;;  %v4869_v1 = vshll.u32 %v11972_v33, 16  ;;  %v4013_v33 = vld [vmem:[#allocation3 + $0x128] sm:$0x1] }
 0x3c2   : > { %v4828_v26 = vsel %vm14086_vm11, %v4820_v43, %v4827_v37  ;;  %v4837_v36 = vsel %vm14086_vm11, %v4829_v38, %v15700_v6  ;;  %5778 = vst.msk [vmem:[#allocation3 + $0xf4] sm:$0xf] %vm3853_vm8, %v4793_v59  ;;  %5779 = vst.msk [vmem:[#allocation3 + $0xf8] sm:$0xf] %vm3853_vm8, %v4802_v8  ;;  %v4901_v25 = vshrl.u32 %v11976_v49, 16  ;;  %v4904_v40 = vshll.u32 %v11976_v49, 16 }
 0x3c3   : > { %5787 = vst.msk [vmem:[#allocation3 + $0x108] sm:$0xf] %vm3853_vm8, %v4828_v26  ;;  %5788 = vst.msk [vmem:[#allocation3 + $0x10c] sm:$0xf] %vm3853_vm8, %v4837_v36  ;;  %v3717_v60 = vadd.f32 %v12288_v53, %v3333_v14  ;;  %v15810_v45 = vrot.slane %v4866_v58, 7  ;;  %v3911_v43 = vsel %vm14061_vm9, 0, %v3910_v51  ;;  %v11970_v34 = vpack.c.bf16 %v3713_v0, %v3713_v0 }
 0x3c4   : > { %v3914_v6 = vsel %vm14061_vm9, 0, %v3913_v30  ;;  %v7546_v29 = vrot.slane %v15789_v5, 1  ;;  %v15817_v3 = vrot.slane %v4901_v25, 7  ;;  %3912 = vst [vmem:[#allocation3 + $0x118] sm:$0x1] %v3911_v43  ;;  %v15820_v24 = vmul.f32 0.25, %v15296_v23 }
 0x3c5   : > { %3915 = vst [vmem:[#allocation3 + $0x12c] sm:$0x1] %v3914_v6  ;;  %v11974_v22 = vpack.c.bf16 %v3717_v60, %v3717_v60  ;;  %v15825_v31 = vor.u32 %v4869_v1, %v15810_v45  ;;  %v15832_v38 = vmul.f32 0.75, %v15296_v23  ;;  %v4849_v8 = vshrl.u32 %v11970_v34, 16  ;;  %v4016_v53 = vld [vmem:[#allocation3 + $0x13c] sm:$0x1] }
 0x3c6   : > { %v7547_v37 = vsel %vm1468_vm13, %v7544_v16, %v7546_v29  ;;  %v15835_v14 = vor.u32 %v4904_v40, %v15817_v3  ;;  %v4852_v49 = vshll.u32 %v11970_v34, 16  ;;  %v3332_v26 = vadd.f32 %v15675_v44, %v15820_v24  ;;  %v20072_v0 = vld [vmem:[#allocation11_spill] sm:$0xff] }
 0x3c7   : > { %7712 = vrot.lane.b32.xlu0 %v7547_v37, %s13960_s17  ;;  %v4884_v51 = vshrl.u32 %v11974_v22, 16  ;;  %v4887_v30 = vshll.u32 %v11974_v22, 16  ;;  %v3336_v23 = vadd.f32 %v15832_v38, %v15672_v50  ;;  %v15843_v16 = vrot.slane %v4849_v8, 7 }
 0x3c8   : > { %v12285_v36 = vunpack.c.h.bf16 %v15737_v57  ;;  %v12293_v58 = vunpack.c.h.bf16 %v15752_v12  ;;  %v4014_v1 = vsel %vm14073_vm10, 0, %v4013_v33  ;;  %v4017_v40 = vsel %vm14073_vm10, 0, %v4016_v53 }
 0x3c9   : > { %v15849_v25 = vrot.slane %v4884_v51, 7  ;;  %4015 = vst [vmem:[#allocation3 + $0x128] sm:$0x1] %v4014_v1  ;;  %v15854_v44 = vmul.f32 0.25, %v20072_v0  ;;  %v15857_v50 = vmul.f32 0.75, %v20072_v0  ;;  %v4854_v60 = vor.u32 %v4852_v49, %v15843_v16 }
 0x3ca   : > { %v3716_v12 = vadd.f32 %v12285_v36, %v3332_v26  ;;  %v3720_v43 = vadd.f32 %v12293_v58, %v3336_v23  ;;  %4018 = vst [vmem:[#allocation3 + $0x13c] sm:$0x1] %v4017_v40  ;;  %v12281_v51 = vunpack.c.h.bf16 %v15762_v63  ;;  %v12289_v26 = vunpack.c.h.bf16 %v15781_v2  ;;  %v15875_v40 = vpop.f32.mrb[47].mxu1 }
 0x3cb   : > { %v4889_v6 = vor.u32 %v4887_v30, %v15849_v25  ;;  %v5793_v34 = vld [vmem:[#allocation3 + $0x118] sm:$0xf]  ;;  %v3330_v37 = vadd.f32 %v15717_v52, %v15854_v44  ;;  %v3334_v33 = vadd.f32 %v15857_v50, %v15710_v10  ;;  %v6651_v23 = vshrl.u32 %v15602_v62, 16 }
 0x3cc   : > { %v5802_v22 = vld [vmem:[#allocation3 + $0x12c] sm:$0xf]  ;;  %v5794_v8 = vsel %vm15025_vm5, %v4854_v60, %v5793_v34  ;;  %v11973_v49 = vpack.c.bf16 %v3716_v12, %v3716_v12  ;;  %v11977_v53 = vpack.c.bf16 %v3720_v43, %v3720_v43  ;;  %v6653_v52 = vshll.u32 %v15602_v62, 16 }
 0x3cd   : > { %5795 = vst [vmem:[#allocation3 + $0x118] sm:$0xf] %v5794_v8  ;;  %v5803_v30 = vsel %vm15025_vm5, %v4889_v6, %v5802_v22  ;;  %v3714_v0 = vadd.f32 %v12281_v51, %v3330_v37  ;;  %v3718_v60 = vadd.f32 %v12289_v26, %v3334_v33  ;;  %v6658_v12 = vshll.u32 %v15569_v55, 16  ;;  %v20073_v34 = vld [vmem:[#allocation12_spill] sm:$0xff] }
 0x3ce   : > { %5804 = vst [vmem:[#allocation3 + $0x12c] sm:$0xf] %v5803_v30  ;;  %v4875_v36 = vshrl.u32 %v11973_v49, 16  ;;  %v4878_v10 = vshll.u32 %v11973_v49, 16  ;;  %v4910_v58 = vshrl.u32 %v11977_v53, 16  ;;  %v4913_v1 = vshll.u32 %v11977_v53, 16 }
 0x3cf   : > { %v6655_v63 = vrot.slane %v6653_v52, 1  ;;  %v15879_v2 = vmul.f32 0.25, %v20073_v34  ;;  %v15882_v22 = vmul.f32 0.75, %v20073_v34  ;;  %v11971_v53 = vpack.c.bf16 %v3714_v0, %v3714_v0  ;;  %v15890_v34 = vld [vmem:[%s14860_s16 + $0x108] sm:$0xff]  }
 0x3d0   : > { %v4877_v43 = vrot.slane %v4875_v36, 7  ;;  %v4912_v6 = vrot.slane %v4910_v58, 7  ;;  %v5799_v8 = vld [vmem:[#allocation3 + $0x128] sm:$0x1]  ;;  %v11975_v30 = vpack.c.bf16 %v3718_v60, %v3718_v60  ;;  %v15884_v37 = vrot.slane %v6658_v12, 1 }
 0x3d1   : > { %v5808_v49 = vld [vmem:[#allocation3 + $0x13c] sm:$0x1]  ;;  %v6656_v29 = vor.u32 %v6655_v63, %v6651_v23  ;;  %v4857_v36 = vshrl.u32 %v11971_v53, 16  ;;  %v4860_v58 = vshll.u32 %v11971_v53, 16  ;;  %v20074_v62 = vrot.slane %v15810_v45, 4 }
 0x3d2   : > { %v4880_v33 = vor.u32 %v4878_v10, %v4877_v43  ;;  %v4882_v51 = vrot.slane %v4877_v43, 4  ;;  %v4915_v26 = vor.u32 %v4913_v1, %v4912_v6  ;;  %v4917_v52 = vrot.slane %v4912_v6, 4 }
 0x3d3   : > { %v4892_v57 = vshrl.u32 %v11975_v30, 16  ;;  %v4895_v59 = vshll.u32 %v11975_v30, 16  ;;  %v20075_v23 = vrot.slane %v15817_v3, 4  ;;  %v4859_v45 = vrot.slane %v4857_v36, 7  ;;  %v3916_v36 = vld [vmem:[#allocation3 + $0x140] sm:$0x1] }
 0x3d4   : > { %v4881_v0 = vsel %vm14086_vm11, %v20074_v62, %v4880_v33  ;;  %v5800_v1 = vsel %vm14061_vm9, %v4882_v51, %v5799_v8  ;;  %v5809_v60 = vsel %vm14061_vm9, %v4917_v52, %v5808_v49  ;;  %v6661_v3 = vsel %vm1161_vm14, %v6656_v29, %v15884_v37  ;;  %v20076_v8 = vld [vmem:[#allocation13_spill] sm:$0xff]  ;;  %v15919_v33 = vld [vmem:[%s14860_s16 + $0xf0] sm:$0xff]   ;;  %v15927_v52 = vld [vmem:[%s14860_s16 + $0x100] sm:$0xff]  }
 0x3d5   : > { %v4916_v10 = vsel %vm14086_vm11, %v20075_v23, %v4915_v26  ;;  %5798 = vst.msk [vmem:[#allocation3 + $0x124] sm:$0xf] %vm3853_vm8, %v4881_v0  ;;  %5801 = vst [vmem:[#allocation3 + $0x128] sm:$0x1] %v5800_v1  ;;  %v4894_v62 = vrot.slane %v4892_v57, 7  ;;  %v3339_v63 = vadd.f32 %v15759_v41, %v15879_v2  ;;  %7298 = vrot.lane.b32.xlu0 %v6661_v3, %s13958_s15  ;;  %v12300_v43 = vunpack.c.l.bf16 %v15887_v46 }
 0x3d6   : > { %5807 = vst.msk [vmem:[#allocation3 + $0x138] sm:$0xf] %vm3853_vm8, %v4916_v10  ;;  %5810 = vst [vmem:[#allocation3 + $0x13c] sm:$0x1] %v5809_v60  ;;  %v3343_v12 = vadd.f32 %v15882_v22, %v15742_v13  ;;  %v12308_v6 = vunpack.c.l.bf16 %v15890_v34  ;;  %v15916_v49 = vmul.f32 0.25, %v20076_v8  ;;  %v4862_v57 = vor.u32 %v4860_v58, %v4859_v45 }
 0x3d7   : > { %v4864_v53 = vrot.slane %v4859_v45, 4  ;;  %v4897_v30 = vor.u32 %v4895_v59, %v4894_v62  ;;  %v4899_v29 = vrot.slane %v4894_v62, 4  ;;  %v3723_v51 = vadd.f32 %v12300_v43, %v3339_v63  ;;  %v3919_v0 = vld [vmem:[#allocation3 + $0x154] sm:$0x1] }
 0x3d8   : > { %v3727_v41 = vadd.f32 %v12308_v6, %v3343_v12  ;;  %v15922_v26 = vmul.f32 0.75, %v20076_v8  ;;  %v3337_v13 = vadd.f32 %v15777_v39, %v15916_v49  ;;  %v20077_v23 = vrot.slane %v15843_v16, 4 }
 0x3d9   : > { %v4872_v58 = vsel %vm14086_vm11, %v4864_v53, %v15825_v31  ;;  %v20078_v10 = vrot.slane %v15849_v25, 4  ;;  %v4907_v39 = vsel %vm14086_vm11, %v4899_v29, %v15835_v14  ;;  %v11980_v16 = vpack.c.bf16 %v3723_v51, %v3723_v51  ;;  %v20079_v51 = vld [vmem:[#allocation14_spill] sm:$0xff] }
 0x3da   : > { %v4863_v59 = vsel %vm14086_vm11, %v20077_v23, %v4862_v57  ;;  %5797 = vst.msk [vmem:[#allocation3 + $0x120] sm:$0xf] %vm3853_vm8, %v4872_v58  ;;  %5806 = vst.msk [vmem:[#allocation3 + $0x134] sm:$0xf] %vm3853_vm8, %v4907_v39  ;;  %v11984_v60 = vpack.c.bf16 %v3727_v41, %v3727_v41  ;;  %v3341_v31 = vadd.f32 %v15922_v26, %v15774_v35  ;;  %v12296_v25 = vunpack.c.l.bf16 %v15919_v33 }
 0x3db   : > { %v4898_v1 = vsel %vm14086_vm11, %v20078_v10, %v4897_v30  ;;  %5796 = vst.msk [vmem:[#allocation3 + $0x11c] sm:$0xf] %vm3853_vm8, %v4863_v59  ;;  %v12304_v45 = vunpack.c.l.bf16 %v15927_v52  ;;  %v3917_v14 = vsel %vm14061_vm9, 0, %v3916_v36  ;;  %v3920_v62 = vsel %vm14061_vm9, 0, %v3919_v0  ;;  %v4019_v10 = vld [vmem:[#allocation3 + $0x150] sm:$0x1] }
 0x3dc   : > { %5805 = vst.msk [vmem:[#allocation3 + $0x130] sm:$0xf] %vm3853_vm8, %v4898_v1  ;;  %v6662_v3 = vshrl.u32 %v15569_v55, 16  ;;  %v4936_v63 = vshrl.u32 %v11980_v16, 16  ;;  %v4939_v12 = vshll.u32 %v11980_v16, 16  ;;  %v4971_v43 = vshrl.u32 %v11984_v60, 16 }
 0x3dd   : > { %v4974_v6 = vshll.u32 %v11984_v60, 16  ;;  %3918 = vst [vmem:[#allocation3 + $0x140] sm:$0x1] %v3917_v14  ;;  %3921 = vst [vmem:[#allocation3 + $0x154] sm:$0x1] %v3920_v62  ;;  %v3721_v8 = vadd.f32 %v12296_v25, %v3337_v13  ;;  %v3725_v35 = vadd.f32 %v12304_v45, %v3341_v31  ;;  %v6666_v53 = vshll.u32 %v15632_v54, 16 }
 0x3de   : > { %v6664_v57 = vor.u32 %v6662_v3, %v15884_v37  ;;  %v15958_v30 = vrot.slane %v4936_v63, 7  ;;  %v15960_v29 = vrot.slane %v4971_v43, 7  ;;  %v15963_v41 = vmul.f32 0.25, %v20079_v51  ;;  %v4022_v1 = vld [vmem:[#allocation3 + $0x164] sm:$0x1] }
 0x3df   : > { %v15966_v55 = vmul.f32 0.75, %v20079_v51  ;;  %v11978_v36 = vpack.c.bf16 %v3721_v8, %v3721_v8  ;;  %v11982_v0 = vpack.c.bf16 %v3725_v35, %v3725_v35  ;;  %v6668_v23 = vrot.slane %v6666_v53, 1 }
 0x3e0   : > { %v12301_v13 = vunpack.c.h.bf16 %v15887_v46  ;;  %v15970_v59 = vor.u32 %v4939_v12, %v15958_v30  ;;  %v4943_v54 = vrot.slane %v15958_v30, 4  ;;  %v15974_v37 = vor.u32 %v4974_v6, %v15960_v29 }
 0x3e1   : > { %v4978_v58 = vrot.slane %v15960_v29, 4  ;;  %v4919_v39 = vshrl.u32 %v11978_v36, 16  ;;  %v4922_v16 = vshll.u32 %v11978_v36, 16  ;;  %v4954_v60 = vshrl.u32 %v11982_v0, 16  ;;  %v20080_v36 = vld [vmem:[#allocation15_spill] sm:$0xff] }
 0x3e2   : > { %v4957_v31 = vshll.u32 %v11982_v0, 16  ;;  %v6669_v25 = vsel %vm1161_vm14, %v6664_v57, %v6668_v23  ;;  %v3340_v46 = vadd.f32 %v15832_v38, %v15963_v41  ;;  %v3344_v45 = vadd.f32 %v15966_v55, %v15820_v24  ;;  %v16023_v57 = vld [vmem:[%s14860_s16 + $0x118] sm:$0xff]  }
 0x3e3   : > { %v12309_v14 = vunpack.c.h.bf16 %v15890_v34  ;;  %v15983_v62 = vrot.slane %v4919_v39, 7  ;;  %v15985_v3 = vrot.slane %v4954_v60, 7  ;;  %7300 = vrot.lane.b32.xlu0 %v6669_v25, %s13958_s15  ;;  %v12297_v63 = vunpack.c.h.bf16 %v15919_v33 }
 0x3e4   : > { %v12305_v12 = vunpack.c.h.bf16 %v15927_v52  ;;  %v5811_v43 = vld [vmem:[#allocation3 + $0x140] sm:$0xf]  ;;  %v5820_v6 = vld [vmem:[#allocation3 + $0x154] sm:$0xf]  ;;  %v3724_v8 = vadd.f32 %v12301_v13, %v3340_v46  ;;  %v4020_v38 = vsel %vm14073_vm10, 0, %v4019_v10  ;;  %v4023_v24 = vsel %vm14073_vm10, 0, %v4022_v1 }
 0x3e5   : > { %v3728_v35 = vadd.f32 %v12309_v14, %v3344_v45  ;;  %v4924_v34 = vor.u32 %v4922_v16, %v15983_v62  ;;  %v4959_v53 = vor.u32 %v4957_v31, %v15985_v3  ;;  %4021 = vst [vmem:[#allocation3 + $0x150] sm:$0x1] %v4020_v38  ;;  %4024 = vst [vmem:[#allocation3 + $0x164] sm:$0x1] %v4023_v24  ;;  %v15999_v0 = vmul.f32 0.25, %v20080_v36  ;;  %v16017_v24 = vpop.f32.mrb[48].mxu1 }
 0x3e6   : > { %v11981_v52 = vpack.c.bf16 %v3724_v8, %v3724_v8  ;;  %v16002_v23 = vmul.f32 0.75, %v20080_v36  ;;  %v6671_v1 = vshrl.u32 %v15733_v47, 16  ;;  %v6673_v39 = vshll.u32 %v15733_v47, 16 }
 0x3e7   : > { %v11985_v51 = vpack.c.bf16 %v3728_v35, %v3728_v35  ;;  %v5812_v13 = vsel %vm15025_vm5, %v4924_v34, %v5811_v43  ;;  %v5821_v10 = vsel %vm15025_vm5, %v4959_v53, %v5820_v6  ;;  %v3338_v46 = vadd.f32 %v15857_v50, %v15999_v0  ;;  %v16019_v50 = vpop.f32.mrb[49].mxu1 }
 0x3e8   : > { %5813 = vst [vmem:[#allocation3 + $0x140] sm:$0xf] %v5812_v13  ;;  %5822 = vst [vmem:[#allocation3 + $0x154] sm:$0xf] %v5821_v10  ;;  %v4945_v16 = vshrl.u32 %v11981_v52, 16  ;;  %v4948_v60 = vshll.u32 %v11981_v52, 16  ;;  %v3342_v45 = vadd.f32 %v16002_v23, %v15854_v44 }
 0x3e9   : > { %v4980_v31 = vshrl.u32 %v11985_v51, 16  ;;  %v4983_v25 = vshll.u32 %v11985_v51, 16  ;;  %v6675_v14 = vrot.slane %v6673_v39, 1  ;;  %v6678_v43 = vshll.u32 %v15725_v56, 16 }
 0x3ea   : > { %v4947_v6 = vrot.slane %v4945_v16, 7  ;;  %v6682_v35 = vshrl.u32 %v15725_v56, 16  ;;  %v6686_v38 = vshll.u32 %v15789_v5, 16  ;;  %v3722_v34 = vadd.f32 %v12297_v63, %v3338_v46  ;;  %v16041_v46 = vpop.f32.mrb[50].mxu1 }
 0x3eb   : > { %v4982_v8 = vrot.slane %v4980_v31, 7  ;;  %v3726_v53 = vadd.f32 %v12305_v12, %v3342_v45  ;;  %v6676_v52 = vor.u32 %v6675_v14, %v6671_v1  ;;  %v6680_v51 = vrot.slane %v6678_v43, 1 }
 0x3ec   : > { %v4950_v36 = vor.u32 %v4948_v60, %v4947_v6  ;;  %v4952_v44 = vrot.slane %v4947_v6, 4  ;;  %v5817_v39 = vld [vmem:[#allocation3 + $0x150] sm:$0x1]  ;;  %v5826_v16 = vld [vmem:[#allocation3 + $0x164] sm:$0x1]  ;;  %v11979_v31 = vpack.c.bf16 %v3722_v34, %v3722_v34  ;;  %v6688_v45 = vrot.slane %v6686_v38, 1 }
 0x3ed   : > { %v4985_v13 = vor.u32 %v4983_v25, %v4982_v8  ;;  %v4987_v10 = vrot.slane %v4982_v8, 4  ;;  %v11983_v56 = vpack.c.bf16 %v3726_v53, %v3726_v53  ;;  %v6681_v5 = vsel %vm1161_vm14, %v6676_v52, %v6680_v51  ;;  %v16039_v25 = vld [vmem:[%s14860_s16 + $0x128] sm:$0xff]  }
 0x3ee   : > { %v6684_v33 = vor.u32 %v6682_v35, %v6680_v51  ;;  %v4951_v63 = vsel %vm14086_vm11, %v4943_v54, %v4950_v36  ;;  %v5818_v1 = vsel %vm14061_vm9, %v4952_v44, %v5817_v39  ;;  %7302 = vrot.lane.b32.xlu0 %v6681_v5, %s13958_s15  ;;  %v4927_v30 = vshrl.u32 %v11979_v31, 16  ;;  %v16066_v39 = vld [vmem:[%s14860_s16 + $0x110] sm:$0xff]  }
 0x3ef   : > { %v4986_v12 = vsel %vm14086_vm11, %v4978_v58, %v4985_v13  ;;  %v5827_v60 = vsel %vm14061_vm9, %v4987_v10, %v5826_v16  ;;  %5816 = vst.msk [vmem:[#allocation3 + $0x14c] sm:$0xf] %vm3853_vm8, %v4951_v63  ;;  %5819 = vst [vmem:[#allocation3 + $0x150] sm:$0x1] %v5818_v1  ;;  %v4930_v29 = vshll.u32 %v11979_v31, 16  ;;  %v4962_v54 = vshrl.u32 %v11983_v56, 16 }
 0x3f0   : > { %5825 = vst.msk [vmem:[#allocation3 + $0x160] sm:$0xf] %vm3853_vm8, %v4986_v12  ;;  %5828 = vst [vmem:[#allocation3 + $0x164] sm:$0x1] %v5827_v60  ;;  %v4965_v58 = vshll.u32 %v11983_v56, 16  ;;  %v16046_v14 = vmul.f32 0.25, %v15384_v20  ;;  %v12316_v6 = vunpack.c.l.bf16 %v16023_v57  ;;  %v12324_v34 = vunpack.c.l.bf16 %v16039_v25 }
 0x3f1   : > { %v16049_v43 = vmul.f32 0.75, %v15384_v20  ;;  %v4929_v8 = vrot.slane %v4927_v30, 7  ;;  %v4964_v35 = vrot.slane %v4962_v54, 7  ;;  %v16054_v53 = vmul.f32 0.25, %v15439_v17  ;;  %v16069_v16 = vld [vmem:[%s14860_s16 + $0x120] sm:$0xff]  }
 0x3f2   : > { %v6689_v52 = vsel %vm1161_vm14, %v6684_v33, %v6688_v45  ;;  %v3347_v38 = vadd.f32 %v15882_v22, %v16046_v14  ;;  %v16062_v20 = vmul.f32 0.75, %v15439_v17  ;;  %v3922_v17 = vld [vmem:[#allocation3 + $0x168] sm:$0x1]  ;;  %v3925_v56 = vld [vmem:[#allocation3 + $0x17c] sm:$0x1]  ;;  %v20081_v5 = vrot.slane %v15983_v62, 4 }
 0x3f3   : > { %v3351_v51 = vadd.f32 %v16049_v43, %v15879_v2  ;;  %v4932_v36 = vor.u32 %v4930_v29, %v4929_v8  ;;  %v4934_v44 = vrot.slane %v4929_v8, 4  ;;  %v4967_v13 = vor.u32 %v4965_v58, %v4964_v35  ;;  %7304 = vrot.lane.b32.xlu0 %v6689_v52, %s13958_s15  ;;  %v4025_v30 = vld [vmem:[#allocation3 + $0x178] sm:$0x1]  ;;  %v4028_v29 = vld [vmem:[#allocation3 + $0x18c] sm:$0x1]  ;;  %v16105_v52 = vpop.f32.mrb[51].mxu1 }
 0x3f4   : > { %v4969_v10 = vrot.slane %v4964_v35, 4  ;;  %v3731_v33 = vadd.f32 %v12316_v6, %v3347_v38  ;;  %v3345_v22 = vadd.f32 %v15922_v26, %v16054_v53  ;;  %v3349_v2 = vadd.f32 %v16062_v20, %v15916_v49 }
 0x3f5   : > { %v3735_v31 = vadd.f32 %v12324_v34, %v3351_v51  ;;  %v4933_v63 = vsel %vm14086_vm11, %v20081_v5, %v4932_v36  ;;  %v4942_v12 = vsel %vm14086_vm11, %v4934_v44, %v15970_v59  ;;  %v20082_v1 = vrot.slane %v15985_v3, 4 }
 0x3f6   : > { %v4977_v49 = vsel %vm14086_vm11, %v4969_v10, %v15974_v37  ;;  %5814 = vst.msk [vmem:[#allocation3 + $0x144] sm:$0xf] %vm3853_vm8, %v4933_v63  ;;  %5815 = vst.msk [vmem:[#allocation3 + $0x148] sm:$0xf] %vm3853_vm8, %v4942_v12  ;;  %v11988_v26 = vpack.c.bf16 %v3731_v33, %v3731_v33  ;;  %v12312_v59 = vunpack.c.l.bf16 %v16066_v39  ;;  %v12320_v3 = vunpack.c.l.bf16 %v16069_v16 }
 0x3f7   : > { %v4968_v60 = vsel %vm14086_vm11, %v20082_v1, %v4967_v13  ;;  %5824 = vst.msk [vmem:[#allocation3 + $0x15c] sm:$0xf] %vm3853_vm8, %v4977_v49  ;;  %v11992_v62 = vpack.c.bf16 %v3735_v31, %v3735_v31  ;;  %v3923_v54 = vsel %vm14061_vm9, 0, %v3922_v17  ;;  %v3926_v37 = vsel %vm14061_vm9, 0, %v3925_v56 }
 0x3f8   : > { %5823 = vst.msk [vmem:[#allocation3 + $0x158] sm:$0xf] %vm3853_vm8, %v4968_v60  ;;  %v16100_v58 = vmul.f32 0.25, %v15459_v42  ;;  %v16103_v45 = vmul.f32 0.75, %v15459_v42  ;;  %v5006_v6 = vshrl.u32 %v11988_v26, 16  ;;  %v5009_v8 = vshll.u32 %v11988_v26, 16 }
 0x3f9   : > { %v5041_v35 = vshrl.u32 %v11992_v62, 16  ;;  %v5044_v34 = vshll.u32 %v11992_v62, 16  ;;  %3924 = vst [vmem:[#allocation3 + $0x168] sm:$0x1] %v3923_v54  ;;  %3927 = vst [vmem:[#allocation3 + $0x17c] sm:$0x1] %v3926_v37  ;;  %v3729_v38 = vadd.f32 %v12312_v59, %v3345_v22  ;;  %v3733_v51 = vadd.f32 %v12320_v3, %v3349_v2 }
 0x3fa   : > { %v3348_v36 = vadd.f32 %v15966_v55, %v16100_v58  ;;  %v3352_v44 = vadd.f32 %v16103_v45, %v15963_v41  ;;  %v16111_v13 = vrot.slane %v5006_v6, 7  ;;  %v12317_v10 = vunpack.c.h.bf16 %v16023_v57  ;;  %v5985_v57 = vld [vmem:[#allocation3 + $0x68] sm:$0xf] }
 0x3fb   : > { %v16113_v42 = vrot.slane %v5041_v35, 7  ;;  %v12325_v33 = vunpack.c.h.bf16 %v16039_v25  ;;  %v11986_v31 = vpack.c.bf16 %v3729_v38, %v3729_v38  ;;  %v11990_v17 = vpack.c.bf16 %v3733_v51, %v3733_v51  ;;  %v5981_v51 = vld [vmem:[#allocation3 + $0x54] sm:$0xf] }
 0x3fc   : > { %v4026_v22 = vsel %vm14073_vm10, 0, %v4025_v30  ;;  %v4029_v2 = vsel %vm14073_vm10, 0, %v4028_v29  ;;  %v16122_v55 = vor.u32 %v5009_v8, %v16111_v13  ;;  %v5013_v41 = vrot.slane %v16111_v13, 4 }
 0x3fd   : > { %v16126_v56 = vor.u32 %v5044_v34, %v16113_v42  ;;  %4027 = vst [vmem:[#allocation3 + $0x178] sm:$0x1] %v4026_v22  ;;  %4030 = vst [vmem:[#allocation3 + $0x18c] sm:$0x1] %v4029_v2  ;;  %v4989_v25 = vshrl.u32 %v11986_v31, 16  ;;  %v4992_v5 = vshll.u32 %v11986_v31, 16  ;;  %v3732_v1 = vadd.f32 %v12317_v10, %v3348_v36 }
 0x3fe   : > { %v5024_v63 = vshrl.u32 %v11990_v17, 16  ;;  %v5027_v12 = vshll.u32 %v11990_v17, 16  ;;  %v3736_v60 = vadd.f32 %v12325_v33, %v3352_v44  ;;  %v16130_v49 = vmul.f32 0.25, %v15488_v48  ;;  %v16151_v36 = vld [vmem:[#allocation3 + $0xf8] sm:$0xff]  }
 0x3ff   : > { %v16133_v26 = vmul.f32 0.75, %v15488_v48  ;;  %v16135_v62 = vrot.slane %v4989_v25, 7  ;;  %v12313_v3 = vunpack.c.h.bf16 %v16066_v39  ;;  %v12321_v30 = vunpack.c.h.bf16 %v16069_v16  ;;  %v16145_v48 = vld [vmem:[#allocation3 + $0x58] sm:$0xff]   ;;  %v5980_v25 = vld [vmem:[#allocation3 + $0x50] sm:$0xf] }
 0x400   : > { %v16137_v59 = vrot.slane %v5024_v63, 7  ;;  %v5829_v29 = vld [vmem:[#allocation3 + $0x168] sm:$0xf]  ;;  %v5838_v54 = vld [vmem:[#allocation3 + $0x17c] sm:$0xf]  ;;  %v11989_v37 = vpack.c.bf16 %v3732_v1, %v3732_v1  ;;  %v11993_v6 = vpack.c.bf16 %v3736_v60, %v3736_v60  ;;  %v3346_v8 = vadd.f32 %v16002_v23, %v16130_v49  ;;  %v13830_v23 = vld [vmem:[%s19870_s6 + $0xc] sm:$0xff]  }
 0x401   : > { %v3350_v35 = vadd.f32 %v16133_v26, %v15999_v0  ;;  %v4994_v34 = vor.u32 %v4992_v5, %v16135_v62  ;;  %v6138_v5 = vld [vmem:[#allocation3 + $0x50] sm:$0xe]  ;;  %12988 = vmatprep.subr.bf16.mxu0 %v13830_v23  ;;  %v7549_v60 = vrot.slane %v16145_v48, 1 }
 0x402   : > { %v5029_v39 = vor.u32 %v5027_v12, %v16137_v59  ;;  %v5015_v44 = vshrl.u32 %v11989_v37, 16  ;;  %v5018_v10 = vshll.u32 %v11989_v37, 16  ;;  %v5050_v0 = vshrl.u32 %v11993_v6, 16  ;;  %v16161_v37 = vld [vmem:[#allocation3 + $0x100] ss:$0 sps:$4 sm:$0x11]   ;;  %12989 = vmatpush3.bf16.msra.mxu0 %v13830_v23 }
 0x403   : > { %v5053_v33 = vshll.u32 %v11993_v6, 16  ;;  %v5830_v31 = vsel %vm15025_vm5, %v4994_v34, %v5829_v29  ;;  %v3730_v22 = vadd.f32 %v12313_v3, %v3346_v8  ;;  %v3734_v2 = vadd.f32 %v12321_v30, %v3350_v35  ;;  %v16163_v6 = vld [vmem:[#allocation3 + $0x60] ss:$0 sps:$4 sm:$0x11]  }
 0x404   : > { %v5839_v17 = vsel %vm15025_vm5, %v5029_v39, %v5838_v54  ;;  %5831 = vst [vmem:[#allocation3 + $0x168] sm:$0xf] %v5830_v31  ;;  %v5017_v63 = vrot.slane %v5015_v44, 7  ;;  %v5052_v12 = vrot.slane %v5050_v0, 7  ;;  %v11549_v1 = vcombine.low %v6138_v5, %v5981_v51  ;;  %v5835_v29 = vld [vmem:[#allocation3 + $0x178] sm:$0x1] }
 0x405   : > { %5840 = vst [vmem:[#allocation3 + $0x17c] sm:$0xf] %v5839_v17  ;;  %v5844_v34 = vld [vmem:[#allocation3 + $0x18c] sm:$0x1]  ;;  %v11987_v54 = vpack.c.bf16 %v3730_v22, %v3730_v22  ;;  %v11991_v3 = vpack.c.bf16 %v3734_v2, %v3734_v2  ;;  %v16165_v30 = vcombine.low %v5980_v25, %v5981_v51  ;;  %v19892_v8 = vrot.slane %v16151_v36, 1 }
 0x406   : > { %v5020_v35 = vor.u32 %v5018_v10, %v5017_v63  ;;  %v5022_v39 = vrot.slane %v5017_v63, 4  ;;  %v5055_v44 = vor.u32 %v5053_v33, %v5052_v12  ;;  %v5057_v0 = vrot.slane %v5052_v12, 4  ;;  %v16168_v31 = vld [vmem:[#allocation3 + $0x10c] sm:$0xff]   ;;  %v16170_v17 = vld [vmem:[#allocation3 + $0x114] ss:$0 sps:$4 sm:$0x11]  }
 0x407   : > { %20083 = vst [vmem:[#allocation7_spill] sm:$0xff] %v16165_v30  ;;  %v4997_v5 = vshrl.u32 %v11987_v54, 16  ;;  %v5000_v16 = vshll.u32 %v11987_v54, 16  ;;  %v5032_v38 = vshrl.u32 %v11991_v3, 16  ;;  %v5035_v23 = vshll.u32 %v11991_v3, 16 }
 0x408   : > { %v5021_v51 = vsel %vm14086_vm11, %v5013_v41, %v5020_v35  ;;  %v20084_v22 = vrot.slane %v16113_v42, 4  ;;  %v5836_v33 = vsel %vm14061_vm9, %v5022_v39, %v5835_v29  ;;  %v5845_v2 = vsel %vm14061_vm9, %v5057_v0, %v5844_v34  ;;  %v5984_v63 = vld [vmem:[#allocation3 + $0x64] sm:$0xf]  ;;  %v16192_v34 = vld [vmem:[#allocation3 + $0x6c] sm:$0xff]  }
 0x409   : > { %5834 = vst.msk [vmem:[#allocation3 + $0x174] sm:$0xf] %vm3853_vm8, %v5021_v51  ;;  %5837 = vst [vmem:[#allocation3 + $0x178] sm:$0x1] %v5836_v33  ;;  %v4999_v13 = vrot.slane %v4997_v5, 7  ;;  %v5034_v25 = vrot.slane %v5032_v38, 7  ;;  %v16190_v3 = vcombine.low %v5984_v63, %v5985_v57 }
 0x40a   : > { %v5056_v10 = vsel %vm14086_vm11, %v20084_v22, %v5055_v44  ;;  %5846 = vst [vmem:[#allocation3 + $0x18c] sm:$0x1] %v5845_v2  ;;  %v7548_v41 = vrot.slane %v11549_v1, 1  ;;  %v7591_v42 = vrot.slane %v16161_v37, 1  ;;  %v7551_v12 = vrot.slane %v16163_v6, 1 }
 0x40b   : > { %5843 = vst.msk [vmem:[#allocation3 + $0x188] sm:$0xf] %vm3853_vm8, %v5056_v10  ;;  %v19891_v54 = vrot.slane %v16168_v31, 1  ;;  %v7596_v29 = vrot.slane %v16170_v17, 1  ;;  %20085 = vst [vmem:[#allocation8_spill] sm:$0xff] %v16190_v3  ;;  %v5002_v35 = vor.u32 %v5000_v16, %v4999_v13  ;;  %v5004_v39 = vrot.slane %v4999_v13, 4 }
 0x40c   : > { %v5037_v44 = vor.u32 %v5035_v23, %v5034_v25  ;;  %v5039_v38 = vrot.slane %v5034_v25, 4  ;;  %v16194_v1 = vld [vmem:[#allocation3 + $0x74] ss:$0 sps:$4 sm:$0x11]   ;;  %v7550_v0 = vsel %vm1468_vm13, %v7548_v41, %v7549_v60  ;;  %v7592_v5 = vsel %vm1468_vm13, %v19892_v8, %v7591_v42  ;;  %v6139_v13 = vld [vmem:[#allocation3 + $0x64] sm:$0xe] }
 0x40d   : > { %v7552_v51 = vsel %vm1468_vm13, %v7549_v60, %v7551_v12  ;;  %v7597_v22 = vsel %vm1468_vm13, %v19891_v54, %v7596_v29  ;;  %v20086_v16 = vrot.slane %v16135_v62, 4  ;;  %v5012_v10 = vsel %vm14086_vm11, %v5004_v39, %v16122_v55  ;;  %7714 = vrot.lane.b32.xlu0 %v7550_v0, %s13960_s17  ;;  %v16220_v62 = vld [vmem:[%s14860_s16 + $0x138] sm:$0xff]   ;;  %v16223_v25 = vld [vmem:[%s14860_s16 + $0x148] sm:$0xff]   ;;  %7748 = vrot.lane.b32.xlu1 %v7592_v5, %s13960_s17 }
 0x40e   : > { %v20087_v33 = vrot.slane %v16137_v59, 4  ;;  %v5047_v60 = vsel %vm14086_vm11, %v5039_v38, %v16126_v56  ;;  %5833 = vst.msk [vmem:[#allocation3 + $0x170] sm:$0xf] %vm3853_vm8, %v5012_v10  ;;  %v11550_v55 = vcombine.low %v6139_v13, %v5985_v57  ;;  %v7554_v56 = vrot.slane %v16192_v34, 1  ;;  %v16245_v39 = vld [vmem:[%s14860_s16 + $0x140] sm:$0xff]  }
 0x40f   : > { %v5003_v23 = vsel %vm14086_vm11, %v20086_v16, %v5002_v35  ;;  %5842 = vst.msk [vmem:[#allocation3 + $0x184] sm:$0xf] %vm3853_vm8, %v5047_v60  ;;  %v6858_v59 = vshll.u32 %v16151_v36, 16  ;;  %v6862_v41 = vshrl.u32 %v16151_v36, 16  ;;  %v6866_v42 = vshll.u32 %v16161_v37, 16  ;;  %v16242_v35 = vld [vmem:[%s14860_s16 + $0x130] sm:$0xff]  }
 0x410   : > { %v5038_v2 = vsel %vm14086_vm11, %v20087_v33, %v5037_v44  ;;  %5832 = vst.msk [vmem:[#allocation3 + $0x16c] sm:$0xf] %vm3853_vm8, %v5003_v23  ;;  %v7556_v63 = vrot.slane %v16194_v1, 1  ;;  %v16236_v12 = vmul.f32 0.25, %v15575_v7  ;;  %v16239_v29 = vmul.f32 0.75, %v15575_v7 }
 0x411   : > { %5841 = vst.msk [vmem:[#allocation3 + $0x180] sm:$0xf] %vm3853_vm8, %v5038_v2  ;;  %v7553_v57 = vrot.slane %v11550_v55, 1  ;;  %v16247_v44 = vrot.slane %v6858_v59, 1  ;;  %v12332_v38 = vunpack.c.l.bf16 %v16220_v62  ;;  %v12340_v0 = vunpack.c.l.bf16 %v16223_v25  ;;  %7716 = vrot.lane.b32.xlu0 %v7552_v51, %s13960_s17  ;;  %v3928_v23 = vld [vmem:[#allocation3 + $0x190] sm:$0x1]  ;;  %7752 = vrot.lane.b32.xlu1 %v7597_v22, %s13960_s17 }
 0x412   : > { %v6868_v37 = vrot.slane %v6866_v42, 1  ;;  %v7557_v5 = vsel %vm1468_vm13, %v7554_v56, %v7556_v63  ;;  %v3355_v7 = vadd.f32 %v16049_v43, %v16236_v12  ;;  %v3359_v16 = vadd.f32 %v16239_v29, %v16046_v14  ;;  %v3931_v60 = vld [vmem:[#allocation3 + $0x1a4] sm:$0x1] }
 0x413   : > { %v7555_v10 = vsel %vm1468_vm13, %v7553_v57, %v7554_v56  ;;  %v6864_v33 = vor.u32 %v6862_v41, %v16247_v44  ;;  %v16261_v2 = vmul.f32 0.25, %v15591_v32  ;;  %v16264_v51 = vmul.f32 0.75, %v15591_v32 }
 0x414   : > { %v3739_v13 = vadd.f32 %v12332_v38, %v3355_v7  ;;  %v3743_v55 = vadd.f32 %v12340_v0, %v3359_v16  ;;  %v12328_v43 = vunpack.c.l.bf16 %v16242_v35  ;;  %v12336_v14 = vunpack.c.l.bf16 %v16245_v39 }
 0x415   : > { %v6869_v59 = vsel %vm1161_vm14, %v6864_v33, %v6868_v37  ;;  %v3353_v22 = vadd.f32 %v16062_v20, %v16261_v2  ;;  %v3357_v56 = vadd.f32 %v16264_v51, %v16054_v53  ;;  %v3929_v41 = vsel %vm14061_vm9, 0, %v3928_v23  ;;  %7718 = vrot.lane.b32.xlu0 %v7555_v10, %s13960_s17 }
 0x416   : > { %v11996_v32 = vpack.c.bf16 %v3739_v13, %v3739_v13  ;;  %v12000_v42 = vpack.c.bf16 %v3743_v55, %v3743_v55  ;;  %3930 = vst [vmem:[#allocation3 + $0x190] sm:$0x1] %v3929_v41  ;;  %v3932_v63 = vsel %vm14061_vm9, 0, %v3931_v60  ;;  %v6878_v57 = vshll.u32 %v16168_v31, 16  ;;  %7340 = vrot.lane.b32.xlu1 %v6869_v59, %s13958_s15  ;;  %v16284_v55 = vpop.f32.mrb[52].mxu1 }
 0x417   : > { %v3737_v38 = vadd.f32 %v12328_v43, %v3353_v22  ;;  %v3741_v20 = vadd.f32 %v12336_v14, %v3357_v56  ;;  %3933 = vst [vmem:[#allocation3 + $0x1a4] sm:$0x1] %v3932_v63  ;;  %v6882_v53 = vshrl.u32 %v16168_v31, 16  ;;  %v6886_v0 = vshll.u32 %v16170_v17, 16  ;;  %20088 = vst [vmem:[#allocation9_spill] sm:$0xff] %v16284_v55  ;;  %v16297_v22 = vpop.f32.mrb[53].mxu1 }
 0x418   : > { %v5076_v37 = vshrl.u32 %v11996_v32, 16  ;;  %v5079_v7 = vshll.u32 %v11996_v32, 16  ;;  %v5111_v16 = vshrl.u32 %v12000_v42, 16  ;;  %v5114_v23 = vshll.u32 %v12000_v42, 16  ;;  %20089 = vst [vmem:[#allocation10_spill] sm:$0xff] %v16297_v22 }
 0x419   : > { %v11994_v10 = vpack.c.bf16 %v3737_v38, %v3737_v38  ;;  %v11998_v33 = vpack.c.bf16 %v3741_v20, %v3741_v20  ;;  %v16282_v13 = vrot.slane %v6878_v57, 1  ;;  %v6888_v60 = vrot.slane %v6886_v0, 1  ;;  %7720 = vrot.lane.b32.xlu0 %v7557_v5, %s13960_s17  ;;  %v4031_v63 = vld [vmem:[#allocation3 + $0x1a0] sm:$0x1]  ;;  %v16307_v0 = vpop.f32.mrb[54].mxu1 }
 0x41a   : > { %v16287_v43 = vrot.slane %v5076_v37, 7  ;;  %v16289_v14 = vrot.slane %v5111_v16, 7  ;;  %v16292_v59 = vmul.f32 0.25, %v15621_v4  ;;  %v16295_v17 = vmul.f32 0.75, %v15621_v4  ;;  %20090 = vst [vmem:[#allocation4_spill] sm:$0xff] %v16307_v0 }
 0x41b   : > { %v5059_v56 = vshrl.u32 %v11994_v10, 16  ;;  %v5062_v41 = vshll.u32 %v11994_v10, 16  ;;  %v5094_v32 = vshrl.u32 %v11998_v33, 16  ;;  %v5097_v42 = vshll.u32 %v11998_v33, 16 }
 0x41c   : > { %v16300_v57 = vor.u32 %v5079_v7, %v16287_v43  ;;  %v16304_v38 = vor.u32 %v5114_v23, %v16289_v14  ;;  %v6884_v16 = vor.u32 %v6882_v53, %v16282_v13  ;;  %v3356_v10 = vadd.f32 %v16103_v45, %v16292_v59  ;;  %v4034_v7 = vld [vmem:[#allocation3 + $0x1b4] sm:$0x1]  ;;  %v16357_v55 = vld [vmem:[#allocation3 + $0x13c] ss:$0 sps:$4 sm:$0x11]  }
 0x41d   : > { %v16309_v4 = vrot.slane %v5059_v56, 7  ;;  %v16311_v37 = vrot.slane %v5094_v32, 7  ;;  %v5847_v33 = vld [vmem:[#allocation3 + $0x190] sm:$0xf]  ;;  %v3360_v23 = vadd.f32 %v16295_v17, %v16100_v58  ;;  %v12333_v8 = vunpack.c.h.bf16 %v16220_v62 }
 0x41e   : > { %v5856_v54 = vld [vmem:[#allocation3 + $0x1a4] sm:$0xf]  ;;  %v12341_v20 = vunpack.c.h.bf16 %v16223_v25  ;;  %v4032_v56 = vsel %vm14073_vm10, 0, %v4031_v63  ;;  %v6889_v47 = vsel %vm1161_vm14, %v6884_v16, %v6888_v60  ;;  %v4035_v62 = vsel %vm14073_vm10, 0, %v4034_v7 }
 0x41f   : > { %v5064_v32 = vor.u32 %v5062_v41, %v16309_v4  ;;  %v5099_v5 = vor.u32 %v5097_v42, %v16311_v37  ;;  %4033 = vst [vmem:[#allocation3 + $0x1a0] sm:$0x1] %v4032_v56  ;;  %v3740_v0 = vadd.f32 %v12333_v8, %v3356_v10  ;;  %7344 = vrot.lane.b32.xlu1 %v6889_v47, %s13958_s15  ;;  %4036 = vst [vmem:[#allocation3 + $0x1b4] sm:$0x1] %v4035_v62  ;;  %v16342_v10 = vld [vmem:[#allocation3 + $0x120] sm:$0xff]   ;;  %v16353_v62 = vpop.f32.mrb[55].mxu1 }
 0x420   : > { %v3744_v58 = vadd.f32 %v12341_v20, %v3360_v23  ;;  %v16335_v42 = vmul.f32 0.25, %v15678_v27  ;;  %v16338_v63 = vmul.f32 0.75, %v15678_v27  ;;  %v12329_v20 = vunpack.c.h.bf16 %v16242_v35  ;;  %20091 = vst [vmem:[#allocation11_spill] sm:$0xff] %v16353_v62 }
 0x421   : > { %v5848_v25 = vsel %vm15025_vm5, %v5064_v32, %v5847_v33  ;;  %v5857_v41 = vsel %vm15025_vm5, %v5099_v5, %v5856_v54  ;;  %v11997_v8 = vpack.c.bf16 %v3740_v0, %v3740_v0  ;;  %v12337_v16 = vunpack.c.h.bf16 %v16245_v39  ;;  %v16344_v54 = vld [vmem:[#allocation3 + $0x128] ss:$0 sps:$4 sm:$0x11]  }
 0x422   : > { %5849 = vst [vmem:[#allocation3 + $0x190] sm:$0xf] %v5848_v25  ;;  %5858 = vst [vmem:[#allocation3 + $0x1a4] sm:$0xf] %v5857_v41  ;;  %v12001_v60 = vpack.c.bf16 %v3744_v58, %v3744_v58  ;;  %v3354_v47 = vadd.f32 %v16133_v26, %v16335_v42  ;;  %v3358_v5 = vadd.f32 %v16338_v63, %v16130_v49  ;;  %v6691_v27 = vshrl.u32 %v16165_v30, 16 }
 0x423   : > { %v6693_v7 = vshll.u32 %v16165_v30, 16  ;;  %v5085_v0 = vshrl.u32 %v11997_v8, 16  ;;  %v5088_v33 = vshll.u32 %v11997_v8, 16  ;;  %v6698_v58 = vshll.u32 %v16145_v48, 16 }
 0x424   : > { %v5120_v23 = vshrl.u32 %v12001_v60, 16  ;;  %v5123_v35 = vshll.u32 %v12001_v60, 16  ;;  %v3738_v56 = vadd.f32 %v12329_v20, %v3354_v47  ;;  %v3742_v39 = vadd.f32 %v12337_v16, %v3358_v5 }
 0x425   : > { %v6695_v32 = vrot.slane %v6693_v7, 1  ;;  %v5087_v25 = vrot.slane %v5085_v0, 7  ;;  %v7601_v49 = vrot.slane %v16344_v54, 1  ;;  %v6700_v8 = vrot.slane %v6698_v58, 1  ;;  %v16359_v7 = vld [vmem:[#allocation3 + $0x134] sm:$0xff]  }
 0x426   : > { %v5122_v26 = vrot.slane %v5120_v23, 7  ;;  %v5853_v45 = vld [vmem:[#allocation3 + $0x1a0] sm:$0x1]  ;;  %v11995_v53 = vpack.c.bf16 %v3738_v56, %v3738_v56  ;;  %v11999_v30 = vpack.c.bf16 %v3742_v39, %v3742_v39  ;;  %v5862_v5 = vld [vmem:[#allocation3 + $0x1b4] sm:$0x1]  ;;  %v20092_v19 = vrot.slane %v16287_v43, 4 }
 0x427   : > { %v6696_v22 = vor.u32 %v6695_v32, %v6691_v27  ;;  %v5090_v60 = vor.u32 %v5088_v33, %v5087_v25  ;;  %v5092_v20 = vrot.slane %v5087_v25, 4  ;;  %v20093_v27 = vrot.slane %v16289_v14, 4 }
 0x428   : > { %v5125_v16 = vor.u32 %v5123_v35, %v5122_v26  ;;  %v5127_v47 = vrot.slane %v5122_v26, 4  ;;  %v5067_v0 = vshrl.u32 %v11995_v53, 16  ;;  %v5070_v23 = vshll.u32 %v11995_v53, 16 }
 0x429   : > { %v5102_v62 = vshrl.u32 %v11999_v30, 16  ;;  %v5105_v41 = vshll.u32 %v11999_v30, 16  ;;  %v5091_v56 = vsel %vm14086_vm11, %v20092_v19, %v5090_v60  ;;  %v5854_v35 = vsel %vm14061_vm9, %v5092_v20, %v5853_v45 }
 0x42a   : > { %v5126_v33 = vsel %vm14086_vm11, %v20093_v27, %v5125_v16  ;;  %v5863_v39 = vsel %vm14061_vm9, %v5127_v47, %v5862_v5  ;;  %5852 = vst.msk [vmem:[#allocation3 + $0x19c] sm:$0xf] %vm3853_vm8, %v5091_v56  ;;  %5855 = vst [vmem:[#allocation3 + $0x1a0] sm:$0x1] %v5854_v35  ;;  %v5069_v30 = vrot.slane %v5067_v0, 7  ;;  %v6701_v19 = vsel %vm1161_vm14, %v6696_v22, %v6700_v8 }
 0x42b   : > { %5861 = vst.msk [vmem:[#allocation3 + $0x1b0] sm:$0xf] %vm3853_vm8, %v5126_v33  ;;  %5864 = vst [vmem:[#allocation3 + $0x1b4] sm:$0x1] %v5863_v39  ;;  %v5104_v43 = vrot.slane %v5102_v62, 7  ;;  %v20094_v14 = vrot.slane %v16342_v10, 1  ;;  %7306 = vrot.lane.b32.xlu0 %v6701_v19, %s13958_s15 }
 0x42c   : > { %v6702_v45 = vshrl.u32 %v16145_v48, 16  ;;  %v6706_v32 = vshll.u32 %v16163_v6, 16  ;;  %v19900_v58 = vrot.slane %v16359_v7, 1  ;;  %v7606_v25 = vrot.slane %v16357_v55, 1  ;;  %v16421_v39 = vld [vmem:[%s14860_s16 + $0x168] sm:$0xff]  }
 0x42d   : > { %v7602_v53 = vsel %vm1468_vm13, %v20094_v14, %v7601_v49  ;;  %v5072_v26 = vor.u32 %v5070_v23, %v5069_v30  ;;  %v5074_v62 = vrot.slane %v5069_v30, 4  ;;  %v5107_v60 = vor.u32 %v5105_v41, %v5104_v43 }
 0x42e   : > { %7756 = vrot.lane.b32.xlu1 %v7602_v53, %s13960_s17  ;;  %v5109_v22 = vrot.slane %v5104_v43, 4  ;;  %v6704_v20 = vor.u32 %v6702_v45, %v6700_v8  ;;  %v6708_v16 = vrot.slane %v6706_v32, 1  ;;  %v7607_v49 = vsel %vm1468_vm13, %v19900_v58, %v7606_v25 }
 0x42f   : > { %v6711_v47 = vshrl.u32 %v16190_v3, 16  ;;  %v20095_v48 = vrot.slane %v16309_v4, 4  ;;  %v5082_v5 = vsel %vm14086_vm11, %v5074_v62, %v16300_v57  ;;  %v20096_v41 = vrot.slane %v16311_v37, 4 }
 0x430   : > { %v5117_v0 = vsel %vm14086_vm11, %v5109_v22, %v16304_v38  ;;  %5851 = vst.msk [vmem:[#allocation3 + $0x198] sm:$0xf] %vm3853_vm8, %v5082_v5  ;;  %v6709_v57 = vsel %vm1161_vm14, %v6704_v20, %v6708_v16  ;;  %v6713_v4 = vshll.u32 %v16190_v3, 16  ;;  %v6718_v37 = vshll.u32 %v16192_v34, 16  ;;  %v16413_v38 = vld [vmem:[%s14860_s16 + $0x158] sm:$0xff]  }
 0x431   : > { %v5073_v6 = vsel %vm14086_vm11, %v20095_v48, %v5072_v26  ;;  %v5108_v8 = vsel %vm14086_vm11, %v20096_v41, %v5107_v60  ;;  %5860 = vst.msk [vmem:[#allocation3 + $0x1ac] sm:$0xf] %vm3853_vm8, %v5117_v0  ;;  %v6898_v23 = vshll.u32 %v16342_v10, 16  ;;  %7308 = vrot.lane.b32.xlu0 %v6709_v57, %s13958_s15  ;;  %v6902_v56 = vshrl.u32 %v16342_v10, 16  ;;  %v16439_v60 = vld [vmem:[%s14860_s16 + $0x160] sm:$0xff]  }
 0x432   : > { %5850 = vst.msk [vmem:[#allocation3 + $0x194] sm:$0xf] %vm3853_vm8, %v5073_v6  ;;  %5859 = vst.msk [vmem:[#allocation3 + $0x1a8] sm:$0xf] %vm3853_vm8, %v5108_v8  ;;  %7760 = vrot.lane.b32.xlu1 %v7607_v49, %s13960_s17  ;;  %v6906_v27 = vshll.u32 %v16344_v54, 16  ;;  %v6722_v33 = vshrl.u32 %v16192_v34, 16  ;;  %v12348_v54 = vunpack.c.l.bf16 %v16413_v38  ;;  %v12352_v57 = vunpack.c.l.bf16 %v16439_v60 }
 0x433   : > { %v6726_v35 = vshll.u32 %v16194_v1, 16  ;;  %v6715_v30 = vrot.slane %v6713_v4, 1  ;;  %v6720_v43 = vrot.slane %v6718_v37, 1  ;;  %v16423_v19 = vrot.slane %v6898_v23, 1  ;;  %v16433_v34 = vld [vmem:[%s14860_s16 + $0x150] sm:$0xff]  }
 0x434   : > { %v16426_v14 = vmul.f32 0.25, %v15764_v11  ;;  %v6908_v53 = vrot.slane %v6906_v27, 1  ;;  %v16429_v32 = vmul.f32 0.75, %v15764_v11  ;;  %v3934_v22 = vld [vmem:[#allocation3 + $0x1b8] sm:$0x1]  ;;  %v12356_v11 = vunpack.c.l.bf16 %v16421_v39 }
 0x435   : > { %v6728_v45 = vrot.slane %v6726_v35, 1  ;;  %v6716_v25 = vor.u32 %v6715_v30, %v6711_v47  ;;  %v6904_v1 = vor.u32 %v6902_v56, %v16423_v19  ;;  %v6724_v26 = vor.u32 %v6722_v33, %v6720_v43  ;;  %v3937_v47 = vld [vmem:[#allocation3 + $0x1cc] sm:$0x1] }
 0x436   : > { %v3363_v62 = vadd.f32 %v16239_v29, %v16426_v14  ;;  %v3367_v20 = vadd.f32 %v16429_v32, %v16236_v12  ;;  %v16445_v16 = vmul.f32 0.25, %v15785_v18  ;;  %v16448_v49 = vmul.f32 0.75, %v15785_v18 }
 0x437   : > { %v6721_v48 = vsel %vm1161_vm14, %v6716_v25, %v6720_v43  ;;  %v6909_v6 = vsel %vm1161_vm14, %v6904_v1, %v6908_v53  ;;  %v6729_v29 = vsel %vm1161_vm14, %v6724_v26, %v6728_v45  ;;  %v12344_v8 = vunpack.c.l.bf16 %v16433_v34 }
 0x438   : > { %v3747_v5 = vadd.f32 %v12348_v54, %v3363_v62  ;;  %7310 = vrot.lane.b32.xlu0 %v6721_v48, %s13958_s15  ;;  %7348 = vrot.lane.b32.xlu1 %v6909_v6, %s13958_s15  ;;  %v3751_v12 = vadd.f32 %v12356_v11, %v3367_v20  ;;  %v3361_v41 = vadd.f32 %v16264_v51, %v16445_v16  ;;  %v3935_v4 = vsel %vm14061_vm9, 0, %v3934_v22 }
 0x439   : > { %v3365_v18 = vadd.f32 %v16448_v49, %v16261_v2  ;;  %v3938_v37 = vsel %vm14061_vm9, 0, %v3937_v47  ;;  %3936 = vst [vmem:[#allocation3 + $0x1b8] sm:$0x1] %v3935_v4  ;;  %v6918_v51 = vshll.u32 %v16359_v7, 16  ;;  %v6922_v27 = vshrl.u32 %v16359_v7, 16 }
 0x43a   : > { %v12004_v0 = vpack.c.bf16 %v3747_v5, %v3747_v5  ;;  %v12008_v23 = vpack.c.bf16 %v3751_v12, %v3751_v12  ;;  %v3745_v56 = vadd.f32 %v12344_v8, %v3361_v41  ;;  %3939 = vst [vmem:[#allocation3 + $0x1cc] sm:$0x1] %v3938_v37  ;;  %v6926_v30 = vshll.u32 %v16357_v55, 16  ;;  %v4037_v5 = vld [vmem:[#allocation3 + $0x1c8] sm:$0x1] }
 0x43b   : > { %v3749_v35 = vadd.f32 %v12352_v57, %v3365_v18  ;;  %v16469_v54 = vrot.slane %v6918_v51, 1  ;;  %v16474_v62 = vmul.f32 0.25, %v15822_v15  ;;  %v16494_v4 = vmul.f32 0.75, %v15822_v15  ;;  %v16553_v15 = vld [vmem:[#allocation3 + $0x164] ss:$0 sps:$4 sm:$0x11]  }
 0x43c   : > { %v5146_v2 = vshrl.u32 %v12004_v0, 16  ;;  %v5149_v33 = vshll.u32 %v12004_v0, 16  ;;  %7312 = vrot.lane.b32.xlu0 %v6729_v29, %s13958_s15  ;;  %v5181_v43 = vshrl.u32 %v12008_v23, 16  ;;  %v5184_v53 = vshll.u32 %v12008_v23, 16 }
 0x43d   : > { %v12002_v45 = vpack.c.bf16 %v3745_v56, %v3745_v56  ;;  %v12006_v1 = vpack.c.bf16 %v3749_v35, %v3749_v35  ;;  %v6928_v26 = vrot.slane %v6926_v30, 1  ;;  %v6924_v55 = vor.u32 %v6922_v27, %v16469_v54  ;;  %v4040_v56 = vld [vmem:[#allocation3 + $0x1dc] sm:$0x1] }
 0x43e   : > { %v16471_v25 = vrot.slane %v5146_v2, 7  ;;  %v16476_v22 = vrot.slane %v5181_v43, 7  ;;  %v3364_v37 = vadd.f32 %v16295_v17, %v16474_v62  ;;  %v12349_v23 = vunpack.c.h.bf16 %v16413_v38  ;;  %v6013_v38 = vld [vmem:[#allocation3 + $0xf4] sm:$0xf] }
 0x43f   : > { %v5129_v20 = vshrl.u32 %v12002_v45, 16  ;;  %v5132_v11 = vshll.u32 %v12002_v45, 16  ;;  %v5164_v6 = vshrl.u32 %v12006_v1, 16  ;;  %v5167_v29 = vshll.u32 %v12006_v1, 16 }
 0x440   : > { %v16480_v47 = vor.u32 %v5149_v33, %v16471_v25  ;;  %v5153_v48 = vrot.slane %v16471_v25, 4  ;;  %v16484_v12 = vor.u32 %v5184_v53, %v16476_v22  ;;  %v5188_v41 = vrot.slane %v16476_v22, 4  ;;  %v5865_v57 = vld [vmem:[#allocation3 + $0x1b8] sm:$0xf] }
 0x441   : > { %v16487_v18 = vrot.slane %v5129_v20, 7  ;;  %v6929_v8 = vsel %vm1161_vm14, %v6924_v55, %v6928_v26  ;;  %v16490_v0 = vrot.slane %v5164_v6, 7  ;;  %v5874_v2 = vld [vmem:[#allocation3 + $0x1cc] sm:$0xf]  ;;  %v12357_v33 = vunpack.c.h.bf16 %v16421_v39  ;;  %v16520_v20 = vpop.f32.mrb[56].mxu1 }
 0x442   : > { %7352 = vrot.lane.b32.xlu1 %v6929_v8, %s13958_s15  ;;  %v4038_v35 = vsel %vm14073_vm10, 0, %v4037_v5  ;;  %v3368_v17 = vadd.f32 %v16494_v4, %v16292_v59  ;;  %v3748_v43 = vadd.f32 %v12349_v23, %v3364_v37  ;;  %v4041_v45 = vsel %vm14073_vm10, 0, %v4040_v56  ;;  %v16518_v26 = vld [vmem:[#allocation3 + $0x148] sm:$0xff]   ;;  %20097 = vst [vmem:[#allocation12_spill] sm:$0xff] %v16520_v20  ;;  %v16527_v8 = vpop.f32.mrb[57].mxu1 }
 0x443   : > { %v5134_v51 = vor.u32 %v5132_v11, %v16487_v18  ;;  %v5169_v30 = vor.u32 %v5167_v29, %v16490_v0  ;;  %4039 = vst [vmem:[#allocation3 + $0x1c8] sm:$0x1] %v4038_v35  ;;  %v16513_v39 = vmul.f32 0.25, %v15875_v40  ;;  %v16516_v1 = vmul.f32 0.75, %v15875_v40  ;;  %4042 = vst [vmem:[#allocation3 + $0x1dc] sm:$0x1] %v4041_v45 }
 0x444   : > { %v3752_v11 = vadd.f32 %v12357_v33, %v3368_v17  ;;  %v12005_v55 = vpack.c.bf16 %v3748_v43, %v3748_v43  ;;  %v12345_v6 = vunpack.c.h.bf16 %v16433_v34  ;;  %v6146_v29 = vld [vmem:[#allocation3 + $0xf0] sm:$0xe]  ;;  %v16525_v5 = vld [vmem:[#allocation3 + $0x150] ss:$0 sps:$4 sm:$0x11]   ;;  %20098 = vst [vmem:[#allocation13_spill] sm:$0xff] %v16527_v8  ;;  %v12353_v37 = vunpack.c.h.bf16 %v16439_v60 }
 0x445   : > { %v5866_v53 = vsel %vm15025_vm5, %v5134_v51, %v5865_v57  ;;  %v5875_v59 = vsel %vm15025_vm5, %v5169_v30, %v5874_v2  ;;  %v3362_v40 = vadd.f32 %v16338_v63, %v16513_v39  ;;  %v3366_v57 = vadd.f32 %v16516_v1, %v16335_v42  ;;  %v6012_v23 = vld [vmem:[#allocation3 + $0xf0] sm:$0xf]  ;;  %v6017_v35 = vld [vmem:[#allocation3 + $0x108] sm:$0xf]  ;;  %v6016_v45 = vld [vmem:[#allocation3 + $0x104] sm:$0xf]  ;;  %v16537_v63 = vpop.permute.xlu0 %7702 }
 0x446   : > { %5867 = vst [vmem:[#allocation3 + $0x1b8] sm:$0xf] %v5866_v53  ;;  %5876 = vst [vmem:[#allocation3 + $0x1cc] sm:$0xf] %v5875_v59  ;;  %v11557_v56 = vcombine.low %v6146_v29, %v6013_v38  ;;  %v12009_v51 = vpack.c.bf16 %v3752_v11, %v3752_v11  ;;  %v5155_v2 = vshrl.u32 %v12005_v55, 16  ;;  %v5158_v33 = vshll.u32 %v12005_v55, 16 }
 0x447   : > { %v16534_v34 = vcombine.low %v6012_v23, %v6013_v38  ;;  %v3746_v30 = vadd.f32 %v12345_v6, %v3362_v40  ;;  %v3750_v17 = vadd.f32 %v12353_v37, %v3366_v57  ;;  %v19904_v53 = vrot.slane %v16518_v26, 1  ;;  %v16540_v29 = vpop.f32.mrb[58].mxu1  ;;  %v16547_v57 = vld [vmem:[#allocation3 + $0x15c] sm:$0xff]  }
 0x448   : > { %v7588_v43 = vrot.slane %v11557_v56, 1  ;;  %v5157_v59 = vrot.slane %v5155_v2, 7  ;;  %v5190_v42 = vshrl.u32 %v12009_v51, 16  ;;  %v5193_v58 = vshll.u32 %v12009_v51, 16  ;;  %20100 = vst [vmem:[#allocation15_spill] sm:$0xff] %v16540_v29 }
 0x449   : > { %20099 = vst [vmem:[#allocation14_spill] sm:$0xff] %v16534_v34  ;;  %v7611_v60 = vrot.slane %v16525_v5, 1  ;;  %v12003_v55 = vpack.c.bf16 %v3746_v30, %v3746_v30  ;;  %v12007_v38 = vpack.c.bf16 %v3750_v17, %v3750_v17  ;;  %v20101_v23 = vrot.slane %v16151_v36, 1 }
 0x44a   : > { %v5871_v11 = vld [vmem:[#allocation3 + $0x1c8] sm:$0x1]  ;;  %v16545_v40 = vcombine.low %v6016_v45, %v6017_v35  ;;  %v5160_v37 = vor.u32 %v5158_v33, %v5157_v59  ;;  %v5162_v56 = vrot.slane %v5157_v59, 4  ;;  %v5192_v2 = vrot.slane %v5190_v42, 7  ;;  %v5880_v30 = vld [vmem:[#allocation3 + $0x1dc] sm:$0x1] }
 0x44b   : > { %v7590_v6 = vsel %vm1468_vm13, %v7588_v43, %v20101_v23  ;;  %v7612_v51 = vsel %vm1468_vm13, %v19904_v53, %v7611_v60  ;;  %v5137_v17 = vshrl.u32 %v12003_v55, 16  ;;  %v5140_v36 = vshll.u32 %v12003_v55, 16  ;;  %v6147_v60 = vld [vmem:[#allocation3 + $0x104] sm:$0xe]  ;;  %v3943_v53 = vld [vmem:[#allocation3 + $0x1f4] sm:$0x1] }
 0x44c   : > { %20102 = vst [vmem:[#allocation17_spill] sm:$0xff] %v16545_v40  ;;  %7746 = vrot.lane.b32.xlu0 %v7590_v6, %s13960_s17  ;;  %v5172_v27 = vshrl.u32 %v12007_v38, 16  ;;  %v5175_v43 = vshll.u32 %v12007_v38, 16  ;;  %7764 = vrot.lane.b32.xlu1 %v7612_v51, %s13960_s17  ;;  %v5161_v33 = vsel %vm14086_vm11, %v5153_v48, %v5160_v37  ;;  %v5195_v45 = vor.u32 %v5193_v58, %v5192_v2  ;;  %v16564_v51 = vpop.permute.xlu0 %7704 }
 0x44d   : > { %v5197_v59 = vrot.slane %v5192_v2, 4  ;;  %v5872_v42 = vsel %vm14061_vm9, %v5162_v56, %v5871_v11  ;;  %5870 = vst.msk [vmem:[#allocation3 + $0x1c4] sm:$0xf] %vm3853_vm8, %v5161_v33  ;;  %v5139_v23 = vrot.slane %v5137_v17, 7  ;;  %v11558_v6 = vcombine.low %v6147_v60, %v6017_v35 }
 0x44e   : > { %5873 = vst [vmem:[#allocation3 + $0x1c8] sm:$0x1] %v5872_v42  ;;  %v5174_v55 = vrot.slane %v5172_v27, 7  ;;  %v19903_v38 = vrot.slane %v16547_v57, 1  ;;  %v5196_v58 = vsel %vm14086_vm11, %v5188_v41, %v5195_v45  ;;  %v7616_v48 = vrot.slane %v16553_v15, 1 }
 0x44f   : > { %v5881_v25 = vsel %vm14061_vm9, %v5197_v59, %v5880_v30  ;;  %v6851_v11 = vshrl.u32 %v16534_v34, 16  ;;  %5879 = vst.msk [vmem:[#allocation3 + $0x1d8] sm:$0xf] %vm3853_vm8, %v5196_v58  ;;  %v5142_v27 = vor.u32 %v5140_v36, %v5139_v23  ;;  %v5144_v35 = vrot.slane %v5139_v23, 4  ;;  %v6021_v42 = vld [vmem:[#allocation3 + $0x11c] sm:$0xf] }
 0x450   : > { %5882 = vst [vmem:[#allocation3 + $0x1dc] sm:$0x1] %v5881_v25  ;;  %v5177_v37 = vor.u32 %v5175_v43, %v5174_v55  ;;  %v5179_v56 = vrot.slane %v5174_v55, 4  ;;  %v7593_v2 = vrot.slane %v11558_v6, 1  ;;  %v7617_v22 = vsel %vm1468_vm13, %v19903_v38, %v7616_v48  ;;  %v6148_v55 = vld [vmem:[#allocation3 + $0x118] sm:$0xe] }
 0x451   : > { %v6853_v41 = vshll.u32 %v16534_v34, 16  ;;  %v6938_v30 = vshll.u32 %v16518_v26, 16  ;;  %v20103_v17 = vrot.slane %v16487_v18, 4  ;;  %v5152_v36 = vsel %vm14086_vm11, %v5144_v35, %v16480_v47  ;;  %7768 = vrot.lane.b32.xlu1 %v7617_v22, %s13960_s17  ;;  %v16595_v18 = vpop.f32.mrb[59].mxu1  ;;  %v16612_v35 = vld [vmem:[#allocation3 + $0x170] sm:$0xff]   ;;  %v16689_v38 = vld [vmem:[%s14860_s16 + $0x180] sm:$0xff]  }
 0x452   : > { %v20104_v43 = vrot.slane %v16490_v0, 4  ;;  %v5187_v59 = vsel %vm14086_vm11, %v5179_v56, %v16484_v12  ;;  %20105 = vst [vmem:[#allocation18_spill] sm:$0xff] %v16595_v18  ;;  %5869 = vst.msk [vmem:[#allocation3 + $0x1c0] sm:$0xf] %vm3853_vm8, %v5152_v36  ;;  %v20106_v47 = vrot.slane %v16168_v31, 1  ;;  %v6942_v12 = vshrl.u32 %v16518_v26, 16  ;;  %v16616_v56 = vpop.permute.xlu0 %7294 }
 0x453   : > { %v5143_v33 = vsel %vm14086_vm11, %v20103_v17, %v5142_v27  ;;  %5878 = vst.msk [vmem:[#allocation3 + $0x1d4] sm:$0xf] %vm3853_vm8, %v5187_v59  ;;  %v6855_v60 = vrot.slane %v6853_v41, 1  ;;  %v16604_v23 = vrot.slane %v6938_v30, 1  ;;  %v6946_v58 = vshll.u32 %v16525_v5, 16 }
 0x454   : > { %v5178_v45 = vsel %vm14086_vm11, %v20104_v43, %v5177_v37  ;;  %5868 = vst.msk [vmem:[#allocation3 + $0x1bc] sm:$0xf] %vm3853_vm8, %v5143_v33  ;;  %v7595_v0 = vsel %vm1468_vm13, %v7593_v2, %v20106_v47  ;;  %v13817_v6 = vld [vmem:[#allocation3 + $0x178] ss:$0 sps:$4 sm:$0x11]   ;;  %v6871_v25 = vshrl.u32 %v16545_v40, 16  ;;  %v11559_v36 = vcombine.low %v6148_v55, %v6021_v42 }
 0x455   : > { %5877 = vst.msk [vmem:[#allocation3 + $0x1d0] sm:$0xf] %vm3853_vm8, %v5178_v45  ;;  %7750 = vrot.lane.b32.xlu0 %v7595_v0, %s13960_s17  ;;  %v6873_v48 = vshll.u32 %v16545_v40, 16  ;;  %v6958_v27 = vshll.u32 %v16547_v57, 16  ;;  %v6020_v31 = vld [vmem:[#allocation3 + $0x118] sm:$0xf]  ;;  %v6856_v2 = vor.u32 %v6855_v60, %v6851_v11  ;;  %v6944_v22 = vor.u32 %v6942_v12, %v16604_v23 }
 0x456   : > { %v16614_v37 = vld [vmem:[#allocation3 + $0x18c] ss:$0 sps:$4 sm:$0x11]   ;;  %v6962_v41 = vshrl.u32 %v16547_v57, 16  ;;  %v6966_v5 = vshll.u32 %v16553_v15, 16  ;;  %v6948_v30 = vrot.slane %v6946_v58, 1  ;;  %v16627_v0 = vcombine.low %v6020_v31, %v6021_v42 }
 0x457   : > { %v6875_v17 = vrot.slane %v6873_v48, 1  ;;  %v16621_v33 = vrot.slane %v6958_v27, 1  ;;  %v6025_v43 = vld [vmem:[#allocation3 + $0x130] sm:$0xf]  ;;  %v16623_v45 = vld [vmem:[#allocation3 + $0x184] sm:$0xff]   ;;  %v6861_v59 = vsel %vm1161_vm14, %v6856_v2, %v16247_v44  ;;  %v19901_v11 = vrot.slane %v16612_v35, 1 }
 0x458   : > { %v6968_v47 = vrot.slane %v6966_v5, 1  ;;  %20107 = vst [vmem:[#allocation19_spill] sm:$0xff] %v16627_v0  ;;  %v6949_v15 = vsel %vm1161_vm14, %v6944_v22, %v6948_v30  ;;  %v7598_v58 = vrot.slane %v11559_v36, 1  ;;  %v6024_v55 = vld [vmem:[#allocation3 + $0x12c] sm:$0xf]  ;;  %v7621_v44 = vrot.slane %v13817_v6, 1 }
 0x459   : > { %7338 = vrot.lane.b32.xlu0 %v6861_v59, %s13958_s15  ;;  %v6876_v60 = vor.u32 %v6875_v17, %v6871_v25  ;;  %v6964_v12 = vor.u32 %v6962_v41, %v16621_v33  ;;  %v6149_v48 = vld [vmem:[#allocation3 + $0x12c] sm:$0xe]  ;;  %7356 = vrot.lane.b32.xlu1 %v6949_v15, %s13958_s15  ;;  %v16634_v27 = vcombine.low %v6024_v55, %v6025_v43  ;;  %v19902_v31 = vrot.slane %v16623_v45, 1  ;;  %v16641_v41 = vpop.permute.xlu0 %7296  ;;  %v16651_v59 = vld [vmem:[%s14860_s16 + $0x178] sm:$0xff]  }
 0x45a   : > { %v11560_v42 = vcombine.low %v6149_v48, %v6025_v43  ;;  %v7626_v22 = vrot.slane %v16614_v37, 1  ;;  %v20109_v5 = vrot.slane %v16342_v10, 1  ;;  %v7622_v17 = vsel %vm1468_vm13, %v19901_v11, %v7621_v44 }
 0x45b   : > { %20108 = vst [vmem:[#allocation20_spill] sm:$0xff] %v16634_v27  ;;  %v6881_v2 = vsel %vm1161_vm14, %v6876_v60, %v16282_v13  ;;  %v6969_v25 = vsel %vm1161_vm14, %v6964_v12, %v6968_v47  ;;  %v6893_v43 = vshll.u32 %v16627_v0, 16  ;;  %v16654_v13 = vld [vmem:[%s14860_s16 + $0x188] sm:$0xff]   ;;  %v6891_v47 = vshrl.u32 %v16627_v0, 16 }
 0x45c   : > { %v7600_v30 = vsel %vm1468_vm13, %v7598_v58, %v20109_v5  ;;  %v7603_v36 = vrot.slane %v11560_v42, 1  ;;  %v6978_v10 = vshll.u32 %v16612_v35, 16  ;;  %v6982_v15 = vshrl.u32 %v16612_v35, 16 }
 0x45d   : > { %7342 = vrot.lane.b32.xlu0 %v6881_v2, %s13958_s15  ;;  %v6986_v60 = vshll.u32 %v13817_v6, 16  ;;  %7360 = vrot.lane.b32.xlu1 %v6969_v25, %s13958_s15  ;;  %v7627_v12 = vsel %vm1468_vm13, %v19902_v31, %v7626_v22  ;;  %v6895_v58 = vrot.slane %v6893_v43, 1  ;;  %v6911_v55 = vshrl.u32 %v16634_v27, 16  ;;  %v16675_v25 = vld [vmem:[%s14860_s16 + $0x170] sm:$0xff]  }
 0x45e   : > { %v6913_v48 = vshll.u32 %v16634_v27, 16  ;;  %v16666_v44 = vrot.slane %v6978_v10, 1  ;;  %v16669_v2 = vmul.f32 0.25, %v16017_v24  ;;  %v16672_v6 = vmul.f32 0.75, %v16017_v24 }
 0x45f   : > { %v6988_v42 = vrot.slane %v6986_v60, 1  ;;  %v6896_v5 = vor.u32 %v6895_v58, %v6891_v47  ;;  %v12364_v22 = vunpack.c.l.bf16 %v16651_v59  ;;  %v12372_v43 = vunpack.c.l.bf16 %v16654_v13  ;;  %v3940_v47 = vld [vmem:[#allocation3 + $0x1e0] sm:$0x1]  ;;  %v16691_v58 = vpop.permute.xlu0 %7706 }
 0x460   : > { %v6915_v11 = vrot.slane %v6913_v48, 1  ;;  %v6984_v10 = vor.u32 %v6982_v15, %v16666_v44  ;;  %v3371_v60 = vadd.f32 %v16429_v32, %v16669_v2  ;;  %v3375_v31 = vadd.f32 %v16672_v6, %v16426_v14 }
 0x461   : > { %7754 = vrot.lane.b32.xlu0 %v7600_v30, %s13960_s17  ;;  %v16686_v24 = vmul.f32 0.25, %v16019_v50  ;;  %7772 = vrot.lane.b32.xlu1 %v7622_v17, %s13960_s17  ;;  %v20110_v30 = vrot.slane %v16359_v7, 1  ;;  %v16698_v32 = vmul.f32 0.75, %v16019_v50  ;;  %v12360_v14 = vunpack.c.l.bf16 %v16675_v25 }
 0x462   : > { %v6916_v48 = vor.u32 %v6915_v11, %v6911_v55  ;;  %v6901_v27 = vsel %vm1161_vm14, %v6896_v5, %v16423_v19  ;;  %v3755_v0 = vadd.f32 %v12364_v22, %v3371_v60  ;;  %v3759_v40 = vadd.f32 %v12372_v43, %v3375_v31 }
 0x463   : > { %v7605_v15 = vsel %vm1468_vm13, %v7603_v36, %v20110_v30  ;;  %v3369_v34 = vadd.f32 %v16448_v49, %v16686_v24  ;;  %v6989_v17 = vsel %vm1161_vm14, %v6984_v10, %v6988_v42  ;;  %v3373_v7 = vadd.f32 %v16698_v32, %v16445_v16 }
 0x464   : > { %v12368_v11 = vunpack.c.l.bf16 %v16689_v38  ;;  %v3941_v50 = vsel %vm14061_vm9, 0, %v3940_v47  ;;  %v12012_v36 = vpack.c.bf16 %v3755_v0, %v3755_v0  ;;  %v12016_v55 = vpack.c.bf16 %v3759_v40, %v3759_v40 }
 0x465   : > { %7758 = vrot.lane.b32.xlu0 %v7605_v15, %s13960_s17  ;;  %v3753_v19 = vadd.f32 %v12360_v14, %v3369_v34  ;;  %3942 = vst [vmem:[#allocation3 + $0x1e0] sm:$0x1] %v3941_v50  ;;  %v3944_v31 = vsel %vm14061_vm9, 0, %v3943_v53  ;;  %7776 = vrot.lane.b32.xlu1 %v7627_v12, %s13960_s17  ;;  %v6921_v49 = vsel %vm1161_vm14, %v6916_v48, %v16469_v54  ;;  %v6998_v42 = vshll.u32 %v16623_v45, 16  ;;  %v16719_v34 = vpop.permute.xlu0 %7708 }
 0x466   : > { %v3757_v16 = vadd.f32 %v12368_v11, %v3373_v7  ;;  %3945 = vst [vmem:[#allocation3 + $0x1f4] sm:$0x1] %v3944_v31  ;;  %v7006_v5 = vshll.u32 %v16614_v37, 16  ;;  %v5216_v22 = vshrl.u32 %v12012_v36, 16  ;;  %v5219_v43 = vshll.u32 %v12012_v36, 16 }
 0x467   : > { %v5251_v0 = vshrl.u32 %v12016_v55, 16  ;;  %v5254_v40 = vshll.u32 %v12016_v55, 16  ;;  %v12010_v10 = vpack.c.bf16 %v3753_v19, %v3753_v19  ;;  %v16721_v53 = vrot.slane %v6998_v42, 1  ;;  %v4043_v11 = vld [vmem:[#allocation3 + $0x1f0] sm:$0x1]  ;;  %v16753_v42 = vld [vmem:[%s19870_s6] sm:$0xff]  }
 0x468   : > { %v12014_v60 = vpack.c.bf16 %v3757_v16, %v3757_v16  ;;  %v7002_v12 = vshrl.u32 %v16623_v45, 16  ;;  %v16725_v54 = vrot.slane %v5216_v22, 7  ;;  %v16730_v37 = vmul.f32 0.25, %v16041_v46  ;;  %v4046_v16 = vld [vmem:[#allocation3 + $0x204] sm:$0x1]  ;;  %13384 = vmatprep.subr.bf16.mxu1 %v16753_v42 }
 0x469   : > { %7346 = vrot.lane.b32.xlu0 %v6901_v27, %s13958_s15  ;;  %v16727_v47 = vrot.slane %v5251_v0, 7  ;;  %v16733_v30 = vmul.f32 0.75, %v16041_v46  ;;  %7364 = vrot.lane.b32.xlu1 %v6989_v17, %s13958_s15  ;;  %v5199_v15 = vshrl.u32 %v12010_v10, 16  ;;  %v5202_v48 = vshll.u32 %v12010_v10, 16  ;;  %v16762_v10 = vpop.permute.xlu0 %7710 }
 0x46a   : > { %v5234_v14 = vshrl.u32 %v12014_v60, 16  ;;  %v5237_v7 = vshll.u32 %v12014_v60, 16  ;;  %v16737_v50 = vor.u32 %v5219_v43, %v16725_v54  ;;  %v7008_v55 = vrot.slane %v7006_v5, 1  ;;  %13386 = vmatpush3.bf16.msra.mxu1 %v16753_v42  ;;  %v6028_v60 = vld [vmem:[#allocation3 + $0x140] sm:$0xf] }
 0x46b   : > { %v16741_v36 = vor.u32 %v5254_v40, %v16727_v47  ;;  %v16743_v19 = vrot.slane %v5199_v15, 7  ;;  %v7004_v17 = vor.u32 %v7002_v12, %v16721_v53  ;;  %v3372_v31 = vadd.f32 %v16494_v4, %v16730_v37 }
 0x46c   : > { %v16745_v46 = vrot.slane %v5234_v14, 7  ;;  %v5883_v22 = vld [vmem:[#allocation3 + $0x1e0] sm:$0xf]  ;;  %v3376_v5 = vadd.f32 %v16733_v30, %v16474_v62  ;;  %v12365_v0 = vunpack.c.h.bf16 %v16651_v59  ;;  %v12373_v40 = vunpack.c.h.bf16 %v16654_v13 }
 0x46d   : > { %7350 = vrot.lane.b32.xlu0 %v6921_v49, %s13958_s15  ;;  %v5892_v43 = vld [vmem:[#allocation3 + $0x1f4] sm:$0xf]  ;;  %v4044_v4 = vsel %vm14073_vm10, 0, %v4043_v11  ;;  %v5204_v12 = vor.u32 %v5202_v48, %v16743_v19  ;;  %v7009_v62 = vsel %vm1161_vm14, %v7004_v17, %v7008_v55  ;;  %v4047_v14 = vsel %vm14073_vm10, 0, %v4046_v16  ;;  %v6029_v11 = vld [vmem:[#allocation3 + $0x144] sm:$0xf] }
 0x46e   : > { %v5239_v15 = vor.u32 %v5237_v7, %v16745_v46  ;;  %4045 = vst [vmem:[#allocation3 + $0x1f0] sm:$0x1] %v4044_v4  ;;  %v3756_v59 = vadd.f32 %v12365_v0, %v3372_v31  ;;  %v3760_v13 = vadd.f32 %v12373_v40, %v3376_v5  ;;  %7368 = vrot.lane.b32.xlu1 %v7009_v62, %s13958_s15  ;;  %4048 = vst [vmem:[#allocation3 + $0x204] sm:$0x1] %v4047_v14  ;;  %v16784_v17 = vpop.f32.mrb[60].mxu1  ;;  %v16793_v14 = vld [vmem:[#allocation3 + $0x198] sm:$0xff]  }
 0x46f   : > { %v5884_v48 = vsel %vm15025_vm5, %v5204_v12, %v5883_v22  ;;  %v16779_v7 = vmul.f32 0.25, %v16105_v52  ;;  %v16782_v55 = vmul.f32 0.75, %v16105_v52  ;;  %20111 = vst [vmem:[#allocation21_spill] sm:$0xff] %v16784_v17  ;;  %v12361_v22 = vunpack.c.h.bf16 %v16675_v25  ;;  %v6154_v0 = vld [vmem:[#allocation3 + $0x190] sm:$0xe]  ;;  %v16795_v25 = vpop.permute.xlu0 %7712 }
 0x470   : > { %v5893_v49 = vsel %vm15025_vm5, %v5239_v15, %v5892_v43  ;;  %5885 = vst [vmem:[#allocation3 + $0x1e0] sm:$0xf] %v5884_v48  ;;  %v12013_v31 = vpack.c.bf16 %v3756_v59, %v3756_v59  ;;  %v12017_v16 = vpack.c.bf16 %v3760_v13, %v3760_v13  ;;  %v12369_v5 = vunpack.c.h.bf16 %v16689_v38  ;;  %v6150_v43 = vld [vmem:[#allocation3 + $0x140] sm:$0xe]  ;;  %v6045_v15 = vld [vmem:[#allocation3 + $0x194] sm:$0xf] }
 0x471   : > { %5894 = vst [vmem:[#allocation3 + $0x1f4] sm:$0xf] %v5893_v49  ;;  %v3370_v4 = vadd.f32 %v16516_v1, %v16779_v7  ;;  %v3374_v52 = vadd.f32 %v16782_v55, %v16513_v39  ;;  %v11561_v12 = vcombine.low %v6150_v43, %v6029_v11  ;;  %v16797_v38 = vpop.f32.mrb[61].mxu1  ;;  %v11565_v1 = vcombine.low %v6154_v0, %v6045_v15 }
 0x472   : > { %v5225_v62 = vshrl.u32 %v12013_v31, 16  ;;  %v5228_v49 = vshll.u32 %v12013_v31, 16  ;;  %v5260_v59 = vshrl.u32 %v12017_v16, 16  ;;  %v5263_v13 = vshll.u32 %v12017_v16, 16  ;;  %20112 = vst [vmem:[#allocation22_spill] sm:$0xff] %v16797_v38 }
 0x473   : > { %v3754_v48 = vadd.f32 %v12361_v22, %v3370_v4  ;;  %v3758_v40 = vadd.f32 %v12369_v5, %v3374_v52  ;;  %v7608_v27 = vrot.slane %v11561_v12, 1  ;;  %v16799_v39 = vcombine.low %v6028_v60, %v6029_v11  ;;  %v16805_v38 = vld [vmem:[#allocation3 + $0x1a0] ss:$0 sps:$4 sm:$0x11]   ;;  %v6044_v60 = vld [vmem:[#allocation3 + $0x190] sm:$0xf] }
 0x474   : > { %v5227_v17 = vrot.slane %v5225_v62, 7  ;;  %v5262_v3 = vrot.slane %v5260_v59, 7  ;;  %v7629_v43 = vrot.slane %v16793_v14, 1  ;;  %v20114_v29 = vrot.slane %v16518_v26, 1 }
 0x475   : > { %20113 = vst [vmem:[#allocation23_spill] sm:$0xff] %v16799_v39  ;;  %v5889_v31 = vld [vmem:[#allocation3 + $0x1f0] sm:$0x1]  ;;  %v12011_v18 = vpack.c.bf16 %v3754_v48, %v3754_v48  ;;  %v12015_v16 = vpack.c.bf16 %v3758_v40, %v3758_v40  ;;  %v7628_v20 = vrot.slane %v11565_v1, 1  ;;  %v5898_v52 = vld [vmem:[#allocation3 + $0x204] sm:$0x1] }
 0x476   : > { %v7610_v8 = vsel %vm1468_vm13, %v7608_v27, %v20114_v29  ;;  %v5230_v22 = vor.u32 %v5228_v49, %v5227_v17  ;;  %v5232_v5 = vrot.slane %v5227_v17, 4  ;;  %v5265_v4 = vor.u32 %v5263_v13, %v5262_v3  ;;  %v6033_v40 = vld [vmem:[#allocation3 + $0x158] sm:$0xf]  ;;  %v6032_v48 = vld [vmem:[#allocation3 + $0x154] sm:$0xf] }
 0x477   : > { %v5267_v0 = vrot.slane %v5262_v3, 4  ;;  %7762 = vrot.lane.b32.xlu0 %v7610_v8, %s13960_s17  ;;  %v5207_v11 = vshrl.u32 %v12011_v18, 16  ;;  %v5210_v12 = vshll.u32 %v12011_v18, 16  ;;  %v5242_v62 = vshrl.u32 %v12015_v16, 16  ;;  %v16820_v18 = vpop.permute.xlu0 %7298  ;;  %v6151_v1 = vld [vmem:[#allocation3 + $0x154] sm:$0xe] }
 0x478   : > { %v5245_v59 = vshll.u32 %v12015_v16, 16  ;;  %v20115_v26 = vrot.slane %v16725_v54, 4  ;;  %v20116_v27 = vrot.slane %v16727_v47, 4  ;;  %v5890_v3 = vsel %vm14061_vm9, %v5232_v5, %v5889_v31 }
 0x479   : > { %v5899_v8 = vsel %vm14061_vm9, %v5267_v0, %v5898_v52  ;;  %5891 = vst [vmem:[#allocation3 + $0x1f0] sm:$0x1] %v5890_v3  ;;  %v5209_v54 = vrot.slane %v5207_v11, 7  ;;  %v5244_v49 = vrot.slane %v5242_v62, 7  ;;  %v7630_v47 = vsel %vm1468_vm13, %v7628_v20, %v7629_v43  ;;  %v16835_v0 = vpop.f32.mrb[62].mxu1 }
 0x47a   : > { %v5231_v29 = vsel %vm14086_vm11, %v20115_v26, %v5230_v22  ;;  %v5266_v17 = vsel %vm14086_vm11, %v20116_v27, %v5265_v4  ;;  %5900 = vst [vmem:[#allocation3 + $0x204] sm:$0x1] %v5899_v8  ;;  %v16825_v13 = vcombine.low %v6044_v60, %v6045_v15  ;;  %7778 = vrot.lane.b32.xlu1 %v7630_v47, %s13960_s17  ;;  %v7631_v22 = vrot.slane %v16805_v38, 1  ;;  %v13834_v4 = vld [vmem:[%s19870_s6 + $0x14] ss:$0 sps:$4 sm:$0xff]  }
 0x47b   : > { %5888 = vst.msk [vmem:[#allocation3 + $0x1ec] sm:$0xf] %vm3853_vm8, %v5231_v29  ;;  %5897 = vst.msk [vmem:[#allocation3 + $0x200] sm:$0xf] %vm3853_vm8, %v5266_v17  ;;  %v16828_v31 = vcombine.low %v6032_v48, %v6033_v40  ;;  %v11562_v16 = vcombine.low %v6151_v1, %v6033_v40  ;;  %v6933_v5 = vshll.u32 %v16799_v39, 16  ;;  %v5212_v20 = vor.u32 %v5210_v12, %v5209_v54  ;;  %v16839_v17 = vld [vmem:[#allocation3 + $0x1ac] sm:$0xff]  }
 0x47c   : > { %20117 = vst [vmem:[#allocation24_spill] sm:$0xff] %v16825_v13  ;;  %20119 = vst [vmem:[#allocation26_spill] sm:$0xff] %v16835_v0  ;;  %v5214_v15 = vrot.slane %v5209_v54, 4  ;;  %v5247_v52 = vor.u32 %v5245_v59, %v5244_v49  ;;  %v5249_v60 = vrot.slane %v5244_v49, 4  ;;  %v6048_v11 = vld [vmem:[#allocation3 + $0x1a4] sm:$0xf]  ;;  %v7632_v29 = vsel %vm1468_vm13, %v7629_v43, %v7631_v22  ;;  %13711 = vmatprep.subr.msk.bf16.mxu0 %vm8251_vm3, %v13834_v4 }
 0x47d   : > { %20118 = vst [vmem:[#allocation25_spill] sm:$0xff] %v16828_v31  ;;  %v6155_v62 = vld [vmem:[#allocation3 + $0x1a4] sm:$0xe]  ;;  %v7613_v26 = vrot.slane %v11562_v16, 1  ;;  %v6931_v40 = vshrl.u32 %v16799_v39, 16  ;;  %v6935_v27 = vrot.slane %v6933_v5, 1  ;;  %v16871_v5 = vpop.permute.xlu0 %7300 }
 0x47e   : > { %v16844_v3 = vld [vmem:[%s19870_s6 + $0x8] ss:$0 sps:$4 sm:$0xff]   ;;  %v20120_v12 = vrot.slane %v16743_v19, 4  ;;  %v5222_v8 = vsel %vm14086_vm11, %v5214_v15, %v16737_v50  ;;  %v20121_v43 = vrot.slane %v16745_v46, 4  ;;  %v5257_v49 = vsel %vm14086_vm11, %v5249_v60, %v16741_v36  ;;  %v6049_v47 = vld [vmem:[#allocation3 + $0x1a8] sm:$0xf]  ;;  %7780 = vrot.lane.b32.xlu1 %v7632_v29, %s13960_s17 }
 0x47f   : > { %v16860_v48 = vld [vmem:[#allocation3 + $0x1b4] ss:$0 sps:$4 sm:$0x11]   ;;  %5887 = vst.msk [vmem:[#allocation3 + $0x1e8] sm:$0xf] %vm3853_vm8, %v5222_v8  ;;  %v20122_v50 = vrot.slane %v16547_v57, 1  ;;  %v6936_v46 = vor.u32 %v6935_v27, %v6931_v40  ;;  %v11566_v1 = vcombine.low %v6155_v62, %v6049_v47  ;;  %13713 = vmatprep.subr.msk.bf16.mxu1 %vm8251_vm3, %v16844_v3 }
 0x480   : > { %v5213_v59 = vsel %vm14086_vm11, %v20120_v12, %v5212_v20  ;;  %v5248_v54 = vsel %vm14086_vm11, %v20121_v43, %v5247_v52  ;;  %5896 = vst.msk [vmem:[#allocation3 + $0x1fc] sm:$0xf] %vm3853_vm8, %v5257_v49  ;;  %v7634_v36 = vrot.slane %v16839_v17, 1  ;;  %v6036_v16 = vld [vmem:[#allocation3 + $0x168] sm:$0xf]  ;;  %v6951_v57 = vshrl.u32 %v16828_v31, 16 }
 0x481   : > { %5886 = vst.msk [vmem:[#allocation3 + $0x1e4] sm:$0xf] %vm3853_vm8, %v5213_v59  ;;  %5895 = vst.msk [vmem:[#allocation3 + $0x1f8] sm:$0xf] %vm3853_vm8, %v5248_v54  ;;  %v7615_v19 = vsel %vm1468_vm13, %v7613_v26, %v20122_v50  ;;  %v6152_v22 = vld [vmem:[#allocation3 + $0x168] sm:$0xe]  ;;  %v16879_v26 = vcombine.low %v6048_v11, %v6049_v47 }
 0x482   : > { %7766 = vrot.lane.b32.xlu0 %v7615_v19, %s13960_s17  ;;  %v20123_v20 = vld [vmem:[#allocation16_spill] sm:$0xff]  ;;  %v6953_v52 = vshll.u32 %v16828_v31, 16  ;;  %v7633_v62 = vrot.slane %v11566_v1, 1  ;;  %v6040_v40 = vld [vmem:[#allocation3 + $0x17c] sm:$0xf]  ;;  %v8253_v27 = vsel %vm8251_vm3, %v13834_v4, 0 }
 0x483   : > { %v7839_v15 = vsel %vm1596_vm1, %v20123_v20, %v16616_v56  ;;  %v6037_v60 = vld [vmem:[#allocation3 + $0x16c] sm:$0xf]  ;;  %20124 = vst [vmem:[#allocation16_spill] sm:$0xff] %v16879_v26  ;;  %v7636_v11 = vrot.slane %v16860_v48, 1  ;;  %v13923_v12 = vld [vmem:[#allocation3 + $0x1c] sm:$0xff]   ;;  %12991 = vmatpush3.bf16.msra.mxu0 %v8253_v27  ;;  %v7018_v1 = vshll.u32 %v16793_v14, 16  ;;  %v16909_v20 = vpop.permute.xlu0 %7302 }
 0x484   : > { %v16884_v29 = vsel %vm2358_vm4, %v7839_v15, %v16537_v63  ;;  %v6955_v56 = vrot.slane %v6953_v52, 1  ;;  %v7841_v59 = vsel %vm1596_vm1, %v13923_v12, %v16641_v41  ;;  %v6153_v8 = vld [vmem:[#allocation3 + $0x17c] sm:$0xe]  ;;  %v6941_v63 = vsel %vm1161_vm14, %v6936_v46, %v16604_v23  ;;  %v6041_v47 = vld [vmem:[#allocation3 + $0x180] sm:$0xf]  ;;  %13120 = vmatprep.subr.bf16.mxu0 %v16753_v42  ;;  %v16932_v12 = vpop.f32.mrb[63].mxu1 }
 0x485   : > { %20125 = vst [vmem:[#allocation27_spill] sm:$0xff] %v16884_v29  ;;  %12992 = vmatprep.mubr.msk.bf16.mxu0 %vm8122_vm6, %v16884_v29  ;;  %v7635_v43 = vsel %vm1468_vm13, %v7633_v62, %v7634_v36  ;;  %v16899_v54 = vsel %vm2358_vm4, %v7841_v59, %v16564_v51  ;;  %v11563_v49 = vcombine.low %v6152_v22, %v6037_v60  ;;  %v7011_v41 = vshrl.u32 %v16825_v13, 16  ;;  %v16918_v52 = vld [vmem:[#allocation3 + $0x80] sm:$0xff]  }
 0x486   : > { %20126 = vst [vmem:[#allocation28_spill] sm:$0xff] %v16899_v54  ;;  %7354 = vrot.lane.b32.xlu0 %v6941_v63, %s13958_s15  ;;  %7782 = vrot.lane.b32.xlu1 %v7635_v43, %s13960_s17  ;;  %v6956_v4 = vor.u32 %v6955_v56, %v6951_v57  ;;  %v16903_v50 = vcombine.low %v6036_v16, %v6037_v60  ;;  %v7013_v23 = vshll.u32 %v16825_v13, 16  ;;  %v7022_v15 = vshrl.u32 %v16793_v14, 16 }
 0x487   : > { %v7637_v19 = vsel %vm1468_vm13, %v7634_v36, %v7636_v11  ;;  %v7618_v46 = vrot.slane %v11563_v49, 1  ;;  %v11564_v51 = vcombine.low %v6153_v8, %v6041_v47  ;;  %12993 = vmatmul.mubr.msk.bf16.vlgmr.msra.gmra.mrb[32].mxu0 %vm8122_vm6, %v16899_v54  ;;  %v16914_v16 = vcombine.low %v6040_v40, %v6041_v47  ;;  %v16925_v11 = vld [vmem:[#allocation3 + $0x7c] sm:$0xf]  ;;  %20130 = vst [vmem:[#allocation31_spill] sm:$0xff] %v16932_v12 }
 0x488   : > { %20127 = vst [vmem:[#allocation29_spill] sm:$0xff] %v16903_v50  ;;  %v7015_v22 = vrot.slane %v7013_v23, 1  ;;  %v7026_v57 = vshll.u32 %v16805_v38, 16  ;;  %v6961_v36 = vsel %vm1161_vm14, %v6956_v4, %v16621_v33  ;;  %v20129_v60 = vrot.slane %v16612_v35, 1  ;;  %13121 = vmatpush3.bf16.msra.mxu0 %v16753_v42  ;;  %v5988_v35 = vld [vmem:[#allocation3 + $0x78] sm:$0xf] }
 0x489   : > { %20128 = vst [vmem:[#allocation30_spill] sm:$0xff] %v16914_v16  ;;  %v7020_v56 = vrot.slane %v7018_v1, 1  ;;  %v7623_v27 = vrot.slane %v11564_v51, 1  ;;  %v6971_v40 = vshrl.u32 %v16903_v50, 16  ;;  %v6973_v33 = vshll.u32 %v16903_v50, 16  ;;  %13712 = vmatprep.subr.msk.bf16.mxu0 %vm8251_vm3, %v16844_v3  ;;  %v16947_v23 = vld [vmem:[%s14860_s16 + $0x198] sm:$0xff]  }
 0x48a   : > { %v7620_v62 = vsel %vm1468_vm13, %v7618_v46, %v20129_v60  ;;  %7358 = vrot.lane.b32.xlu0 %v6961_v36, %s13958_s15  ;;  %7784 = vrot.lane.b32.xlu1 %v7637_v19, %s13960_s17  ;;  %v7016_v14 = vor.u32 %v7015_v22, %v7011_v41  ;;  %v7028_v38 = vrot.slane %v7026_v57, 1  ;;  %v7031_v8 = vshrl.u32 %v16879_v26, 16  ;;  %v20133_v3 = vld [vmem:[#allocation9_spill] sm:$0xff]  ;;  %v16957_v22 = vpop.permute.xlu0 %7304 }
 0x48b   : > { %v7024_v59 = vor.u32 %v7022_v15, %v7020_v56  ;;  %v7033_v42 = vshll.u32 %v16879_v26, 16  ;;  %v7038_v63 = vshll.u32 %v16839_v17, 16  ;;  %v20131_v43 = vrot.slane %v16623_v45, 1  ;;  %v16955_v45 = vld [vmem:[%s14860_s16 + $0x1a8] sm:$0xff]  }
 0x48c   : > { %v6975_v47 = vrot.slane %v6973_v33, 1  ;;  %v16943_v4 = vcombine.low %v5988_v35, %v16925_v11  ;;  %v6738_v41 = vshll.u32 %v16918_v52, 16  ;;  %v7021_v19 = vsel %vm1161_vm14, %v7016_v14, %v7020_v56  ;;  %v16970_v33 = vld [vmem:[%s14860_s16 + $0x190] sm:$0xff]  }
 0x48d   : > { %v7625_v49 = vsel %vm1468_vm13, %v7623_v27, %v20131_v43  ;;  %v7029_v46 = vsel %vm1161_vm14, %v7024_v59, %v7028_v38  ;;  %v7035_v1 = vrot.slane %v7033_v42, 1  ;;  %v16952_v51 = vmul.f32 0.25, %v20133_v3  ;;  %v20134_v42 = vld [vmem:[#allocation10_spill] sm:$0xff] }
 0x48e   : > { %20132 = vst [vmem:[#allocation32_spill] sm:$0xff] %v16943_v4  ;;  %7770 = vrot.lane.b32.xlu0 %v7620_v62, %s13960_s17  ;;  %7370 = vrot.lane.b32.xlu1 %v7021_v19, %s13958_s15  ;;  %v6976_v15 = vor.u32 %v6975_v47, %v6971_v40  ;;  %v7040_v57 = vrot.slane %v7038_v63, 1  ;;  %v6731_v36 = vshrl.u32 %v16943_v4, 16  ;;  %v6733_v60 = vshll.u32 %v16943_v4, 16  ;;  %v16973_v62 = vld [vmem:[%s14860_s16 + $0x1a0] sm:$0xff]  }
 0x48f   : > { %v7036_v56 = vor.u32 %v7035_v1, %v7031_v8  ;;  %v16964_v27 = vmul.f32 0.75, %v20133_v3  ;;  %v3379_v14 = vadd.f32 %v16672_v6, %v16952_v51  ;;  %v12380_v38 = vunpack.c.l.bf16 %v16947_v23  ;;  %v3946_v8 = vld [vmem:[#allocation3 + $0x208] sm:$0x1]  ;;  %v3949_v1 = vld [vmem:[#allocation3 + $0x21c] sm:$0x1] }
 0x490   : > { %v6735_v35 = vrot.slane %v6733_v60, 1  ;;  %v16975_v40 = vrot.slane %v6738_v41, 1  ;;  %v12388_v59 = vunpack.c.l.bf16 %v16955_v45  ;;  %v16979_v63 = vmul.f32 0.25, %v20134_v42 }
 0x491   : > { %v6981_v43 = vsel %vm1161_vm14, %v6976_v15, %v16666_v44  ;;  %v3383_v6 = vadd.f32 %v16964_v27, %v16669_v2  ;;  %v3763_v47 = vadd.f32 %v12380_v38, %v3379_v14  ;;  %v16986_v19 = vmul.f32 0.75, %v20134_v42  ;;  %v16995_v15 = vpop.permute.xlu1 %7748 }
 0x492   : > { %7774 = vrot.lane.b32.xlu0 %v7625_v49, %s13960_s17  ;;  %7372 = vrot.lane.b32.xlu1 %v7029_v46, %s13958_s15  ;;  %v7041_v41 = vsel %vm1161_vm14, %v7036_v56, %v7040_v57  ;;  %v3377_v3 = vadd.f32 %v16698_v32, %v16979_v63  ;;  %v12376_v60 = vunpack.c.l.bf16 %v16970_v33  ;;  %v12384_v44 = vunpack.c.l.bf16 %v16973_v62  ;;  %v17001_v46 = vpop.permute.xlu0 %7714 }
 0x493   : > { %v3767_v2 = vadd.f32 %v12388_v59, %v3383_v6  ;;  %v12020_v14 = vpack.c.bf16 %v3763_v47, %v3763_v47  ;;  %v3381_v38 = vadd.f32 %v16986_v19, %v16686_v24  ;;  %v3947_v49 = vsel %vm14061_vm9, 0, %v3946_v8 }
 0x494   : > { %v6736_v56 = vor.u32 %v6735_v35, %v6731_v36  ;;  %v3761_v42 = vadd.f32 %v12376_v60, %v3377_v3  ;;  %3948 = vst [vmem:[#allocation3 + $0x208] sm:$0x1] %v3947_v49  ;;  %v3950_v32 = vsel %vm14061_vm9, 0, %v3949_v1  ;;  %v7042_v54 = vshrl.u32 %v16839_v17, 16  ;;  %v20135_v35 = vld [vmem:[#allocation4_spill] sm:$0xff] }
 0x495   : > { %v12024_v29 = vpack.c.bf16 %v3767_v2, %v3767_v2  ;;  %v5286_v26 = vshrl.u32 %v12020_v14, 16  ;;  %v5289_v59 = vshll.u32 %v12020_v14, 16  ;;  %v3765_v6 = vadd.f32 %v12384_v44, %v3381_v38  ;;  %3951 = vst [vmem:[#allocation3 + $0x21c] sm:$0x1] %v3950_v32 }
 0x496   : > { %7362 = vrot.lane.b32.xlu0 %v6981_v43, %s13958_s15  ;;  %7374 = vrot.lane.b32.xlu1 %v7041_v41, %s13958_s15  ;;  %v12018_v24 = vpack.c.bf16 %v3761_v42, %v3761_v42  ;;  %v7044_v8 = vor.u32 %v7042_v54, %v7040_v57  ;;  %v7046_v36 = vshll.u32 %v16860_v48, 16  ;;  %v17010_v47 = vmul.f32 0.25, %v20135_v35  ;;  %v17017_v43 = vpop.permute.xlu1 %7752  ;;  %v17026_v41 = vpop.permute.xlu0 %7716 }
 0x497   : > { %v17012_v3 = vrot.slane %v5286_v26, 7  ;;  %v5321_v1 = vshrl.u32 %v12024_v29, 16  ;;  %v5324_v17 = vshll.u32 %v12024_v29, 16  ;;  %v12022_v60 = vpack.c.bf16 %v3765_v6, %v3765_v6  ;;  %20136 = vst [vmem:[#allocation9_spill] sm:$0xff] %v17017_v43  ;;  %v4049_v6 = vld [vmem:[#allocation3 + $0x218] sm:$0x1] }
 0x498   : > { %v5269_v2 = vshrl.u32 %v12018_v24, 16  ;;  %v5272_v14 = vshll.u32 %v12018_v24, 16  ;;  %v7048_v44 = vrot.slane %v7046_v36, 1  ;;  %v17015_v38 = vmul.f32 0.75, %v20135_v35 }
 0x499   : > { %v6741_v54 = vsel %vm1161_vm14, %v6736_v56, %v16975_v40  ;;  %v17022_v48 = vor.u32 %v5289_v59, %v17012_v3  ;;  %v17024_v57 = vrot.slane %v5321_v1, 7  ;;  %v5304_v26 = vshrl.u32 %v12022_v60, 16  ;;  %v4052_v56 = vld [vmem:[#allocation3 + $0x22c] sm:$0x1] }
 0x49a   : > { %7314 = vrot.lane.b32.xlu0 %v6741_v54, %s13958_s15  ;;  %v17029_v29 = vrot.slane %v5269_v2, 7  ;;  %v5307_v49 = vshll.u32 %v12022_v60, 16  ;;  %v7049_v42 = vsel %vm1161_vm14, %v7044_v8, %v7048_v44  ;;  %v3380_v32 = vadd.f32 %v16733_v30, %v17010_v47  ;;  %v17085_v43 = vld [vmem:[#allocation3 + $0x88] ss:$0 sps:$4 sm:$0x11]  }
 0x49b   : > { %v17036_v24 = vor.u32 %v5324_v17, %v17024_v57  ;;  %v17038_v36 = vrot.slane %v5304_v26, 7  ;;  %v5901_v35 = vld [vmem:[#allocation3 + $0x208] sm:$0xf]  ;;  %7376 = vrot.lane.b32.xlu1 %v7049_v42, %s13958_s15  ;;  %v3384_v1 = vadd.f32 %v17015_v38, %v16730_v37  ;;  %v12381_v2 = vunpack.c.h.bf16 %v16947_v23  ;;  %v20137_v23 = vld [vmem:[#allocation11_spill] sm:$0xff]  ;;  %v17058_v17 = vpop.permute.xlu1 %7340 }
 0x49c   : > { %v5274_v60 = vor.u32 %v5272_v14, %v17029_v29  ;;  %v5910_v30 = vld [vmem:[#allocation3 + $0x21c] sm:$0xf]  ;;  %v12389_v44 = vunpack.c.h.bf16 %v16955_v45  ;;  %v4050_v26 = vsel %vm14073_vm10, 0, %v4049_v6  ;;  %v4053_v42 = vsel %vm14073_vm10, 0, %v4052_v56  ;;  %v6156_v45 = vld [vmem:[#allocation3 + $0x1b8] sm:$0xe] }
 0x49d   : > { %v5309_v54 = vor.u32 %v5307_v49, %v17038_v36  ;;  %v3764_v8 = vadd.f32 %v12381_v2, %v3380_v32  ;;  %4051 = vst [vmem:[#allocation3 + $0x218] sm:$0x1] %v4050_v26  ;;  %4054 = vst [vmem:[#allocation3 + $0x22c] sm:$0x1] %v4053_v42  ;;  %v17056_v59 = vmul.f32 0.25, %v20137_v23  ;;  %v17063_v6 = vmul.f32 0.75, %v20137_v23 }
 0x49e   : > { %v5902_v37 = vsel %vm15025_vm5, %v5274_v60, %v5901_v35  ;;  %v3768_v14 = vadd.f32 %v12389_v44, %v3384_v1  ;;  %v12377_v56 = vunpack.c.h.bf16 %v16970_v33  ;;  %v12385_v32 = vunpack.c.h.bf16 %v16973_v62  ;;  %v17067_v35 = vld [vmem:[#allocation3 + $0x1c0] sm:$0xff]   ;;  %v17069_v1 = vpop.permute.xlu0 %7718 }
 0x49f   : > { %5903 = vst [vmem:[#allocation3 + $0x208] sm:$0xf] %v5902_v37  ;;  %v5911_v49 = vsel %vm15025_vm5, %v5309_v54, %v5910_v30  ;;  %v12021_v60 = vpack.c.bf16 %v3764_v8, %v3764_v8  ;;  %v3378_v44 = vadd.f32 %v16782_v55, %v17056_v59  ;;  %v6991_v26 = vshrl.u32 %v16914_v16, 16  ;;  %v17074_v30 = vld [vmem:[#allocation3 + $0x1bc] sm:$0xf] }
 0x4a0   : > { %5912 = vst [vmem:[#allocation3 + $0x21c] sm:$0xf] %v5911_v49  ;;  %v12025_v2 = vpack.c.bf16 %v3768_v14, %v3768_v14  ;;  %v3382_v54 = vadd.f32 %v17063_v6, %v16779_v7  ;;  %v6993_v33 = vshll.u32 %v16914_v16, 16  ;;  %v11567_v62 = vcombine.low %v6156_v45, %v17074_v30  ;;  %v20138_v7 = vld [vmem:[#allocation5_spill] sm:$0xff]  ;;  %v17087_v45 = vpop.permute.xlu1 %7344 }
 0x4a1   : > { %v7639_v42 = vrot.slane %v17067_v35, 1  ;;  %v5295_v37 = vshrl.u32 %v12021_v60, 16  ;;  %v5298_v23 = vshll.u32 %v12021_v60, 16  ;;  %v3762_v49 = vadd.f32 %v12377_v56, %v3378_v44  ;;  %20139 = vst [vmem:[#allocation10_spill] sm:$0xff] %v17087_v45 }
 0x4a2   : > { %v5330_v8 = vshrl.u32 %v12025_v2, 16  ;;  %v5333_v14 = vshll.u32 %v12025_v2, 16  ;;  %v3766_v13 = vadd.f32 %v12385_v32, %v3382_v54  ;;  %v6995_v55 = vrot.slane %v6993_v33, 1  ;;  %v17090_v44 = vpop.permute.xlu0 %7720 }
 0x4a3   : > { %v7638_v4 = vrot.slane %v11567_v62, 1  ;;  %v5310_v50 = vrot.slane %v17038_v36, 4  ;;  %v5297_v31 = vrot.slane %v5295_v37, 7  ;;  %v7843_v16 = vsel %vm1596_vm1, %v20138_v7, %v16820_v18  ;;  %v17093_v18 = vld [vmem:[#allocation3 + $0x1c8] ss:$0 sps:$4 sm:$0x11]  }
 0x4a4   : > { %v5332_v39 = vrot.slane %v5330_v8, 7  ;;  %v5907_v12 = vld [vmem:[#allocation3 + $0x218] sm:$0x1]  ;;  %v5916_v60 = vld [vmem:[#allocation3 + $0x22c] sm:$0x1]  ;;  %v12019_v0 = vpack.c.bf16 %v3762_v49, %v3762_v49  ;;  %v12023_v2 = vpack.c.bf16 %v3766_v13, %v3766_v13  ;;  %v6996_v56 = vor.u32 %v6995_v55, %v6991_v26 }
 0x4a5   : > { %v7640_v32 = vsel %vm1468_vm13, %v7638_v4, %v7639_v42  ;;  %v5300_v36 = vor.u32 %v5298_v23, %v5297_v31  ;;  %v5302_v54 = vrot.slane %v5297_v31, 4  ;;  %v20140_v49 = vrot.slane %v17012_v3, 4 }
 0x4a6   : > { %v5335_v33 = vor.u32 %v5333_v14, %v5332_v39  ;;  %v5337_v62 = vrot.slane %v5332_v39, 4  ;;  %7786 = vrot.lane.b32.xlu1 %v7640_v32, %s13960_s17  ;;  %v5277_v37 = vshrl.u32 %v12019_v0, 16  ;;  %v5280_v8 = vshll.u32 %v12019_v0, 16  ;;  %v17121_v32 = vpop.permute.xlu1 %7756 }
 0x4a7   : > { %v5312_v7 = vshrl.u32 %v12023_v2, 16  ;;  %v5315_v45 = vshll.u32 %v12023_v2, 16  ;;  %v5301_v13 = vsel %vm14086_vm11, %v20140_v49, %v5300_v36  ;;  %v20141_v4 = vrot.slane %v17024_v57, 4  ;;  %v6157_v49 = vld [vmem:[#allocation3 + $0x1cc] sm:$0xe] }
 0x4a8   : > { %v5908_v39 = vsel %vm14061_vm9, %v5302_v54, %v5907_v12  ;;  %v5917_v26 = vsel %vm14061_vm9, %v5337_v62, %v5916_v60  ;;  %5906 = vst.msk [vmem:[#allocation3 + $0x214] sm:$0xf] %vm3853_vm8, %v5301_v13  ;;  %v5279_v0 = vrot.slane %v5277_v37, 7  ;;  %v7001_v57 = vsel %vm1161_vm14, %v6996_v56, %v16721_v53  ;;  %v13924_v60 = vld [vmem:[#allocation3 + $0x30] sm:$0xff]   ;;  %v17125_v62 = vpop.permute.xlu0 %7306 }
 0x4a9   : > { %v5336_v31 = vsel %vm14086_vm11, %v20141_v4, %v5335_v33  ;;  %5909 = vst [vmem:[#allocation3 + $0x218] sm:$0x1] %v5908_v39  ;;  %5918 = vst [vmem:[#allocation3 + $0x22c] sm:$0x1] %v5917_v26  ;;  %v5314_v3 = vrot.slane %v5312_v7, 7  ;;  %v6742_v23 = vshrl.u32 %v16918_v52, 16  ;;  %7366 = vrot.lane.b32.xlu0 %v7001_v57, %s13958_s15  ;;  %v17116_v14 = vsel %vm2358_vm4, %v7843_v16, %v16691_v58 }
 0x4aa   : > { %5915 = vst.msk [vmem:[#allocation3 + $0x228] sm:$0xf] %vm3853_vm8, %v5336_v31  ;;  %v6746_v12 = vshll.u32 %v17085_v43, 16  ;;  %20142 = vst [vmem:[#allocation4_spill] sm:$0xff] %v17116_v14  ;;  %v7641_v55 = vrot.slane %v17093_v18, 1  ;;  %v7845_v2 = vsel %vm1596_vm1, %v13924_v60, %v16871_v5  ;;  %v5282_v36 = vor.u32 %v5280_v8, %v5279_v0  ;;  %12996 = vmatprep.mubr.msk.bf16.mxu0 %vm8122_vm6, %v17116_v14  ;;  %v17132_v8 = vld [vmem:[#allocation3 + $0x94] sm:$0xff]  }
 0x4ab   : > { %v5284_v53 = vrot.slane %v5279_v0, 4  ;;  %v5317_v56 = vor.u32 %v5315_v45, %v5314_v3  ;;  %v5319_v54 = vrot.slane %v5314_v3, 4  ;;  %v6140_v33 = vld [vmem:[#allocation3 + $0x78] sm:$0xe]  ;;  %v6744_v16 = vor.u32 %v6742_v23, %v16975_v40  ;;  %v17130_v13 = vld [vmem:[#allocation3 + $0x90] sm:$0xf] }
 0x4ac   : > { %v6052_v58 = vld [vmem:[#allocation3 + $0x1b8] sm:$0xf]  ;;  %v6748_v37 = vrot.slane %v6746_v12, 1  ;;  %v7642_v7 = vsel %vm1468_vm13, %v7639_v42, %v7641_v55  ;;  %v11551_v5 = vcombine.low %v6140_v33, %v16925_v11  ;;  %v20143_v45 = vrot.slane %v17029_v29, 4  ;;  %v6056_v42 = vld [vmem:[#allocation3 + $0x1cc] sm:$0xf] }
 0x4ad   : > { %v5292_v31 = vsel %vm14086_vm11, %v5284_v53, %v17022_v48  ;;  %v5318_v40 = vsel %vm14086_vm11, %v5310_v50, %v5317_v56  ;;  %v5327_v11 = vsel %vm14086_vm11, %v5319_v54, %v17036_v24  ;;  %7788 = vrot.lane.b32.xlu1 %v7642_v7, %s13960_s17  ;;  %v6057_v39 = vld [vmem:[#allocation3 + $0x1d0] sm:$0xf]  ;;  %v17147_v26 = vld [vmem:[#allocation3 + $0x1d4] sm:$0xff]   ;;  %v7559_v29 = vrot.slane %v16918_v52, 1  ;;  %v5992_v55 = vld [vmem:[#allocation3 + $0x8c] sm:$0xf]  ;;  %v17181_v53 = vpop.permute.xlu1 %7760 }
 0x4ae   : > { %v5283_v4 = vsel %vm14086_vm11, %v20143_v45, %v5282_v36  ;;  %5905 = vst.msk [vmem:[#allocation3 + $0x210] sm:$0xf] %vm3853_vm8, %v5292_v31  ;;  %5913 = vst.msk [vmem:[#allocation3 + $0x220] sm:$0xf] %vm3853_vm8, %v5318_v40  ;;  %v6749_v50 = vsel %vm1161_vm14, %v6744_v16, %v6748_v37  ;;  %v7558_v48 = vrot.slane %v11551_v5, 1  ;;  %v17157_v24 = vsel %vm2358_vm4, %v7845_v2, %v16719_v34  ;;  %v20146_v12 = vld [vmem:[#allocation6_spill] sm:$0xff] }
 0x4af   : > { %5904 = vst.msk [vmem:[#allocation3 + $0x20c] sm:$0xf] %vm3853_vm8, %v5283_v4  ;;  %5914 = vst.msk [vmem:[#allocation3 + $0x224] sm:$0xf] %vm3853_vm8, %v5327_v11  ;;  %v17162_v3 = vcombine.low %v6052_v58, %v17074_v30  ;;  %7316 = vrot.lane.b32.xlu0 %v6749_v50, %s13958_s15  ;;  %12997 = vmatmul.mubr.msk.bf16.gmra.mrb[36].mxu0 %vm8122_vm6, %v17157_v24  ;;  %v11568_v57 = vcombine.low %v6157_v49, %v6057_v39  ;;  %v7644_v23 = vrot.slane %v17147_v26, 1 }
 0x4b0   : > { %20144 = vst [vmem:[#allocation11_spill] sm:$0xff] %v17157_v24  ;;  %v17159_v0 = vld [vmem:[#allocation3 + $0x1dc] ss:$0 sps:$4 sm:$0x11]   ;;  %v7847_v52 = vsel %vm1596_vm1, %v20146_v12, %v16909_v20  ;;  %v7560_v60 = vsel %vm1468_vm13, %v7558_v48, %v7559_v29  ;;  %v17174_v2 = vcombine.low %v6056_v42, %v6057_v39  ;;  %v7561_v30 = vrot.slane %v17085_v43, 1  ;;  %v13925_v20 = vld [vmem:[#allocation3 + $0x44] sm:$0xff]   ;;  %v17191_v43 = vpop.permute.xlu0 %7308 }
 0x4b1   : > { %20145 = vst [vmem:[#allocation5_spill] sm:$0xff] %v17162_v3  ;;  %v17171_v34 = vld [vmem:[#allocation3 + $0x9c] ss:$0 sps:$4 sm:$0x11]   ;;  %v17179_v36 = vsel %vm2358_vm4, %v7847_v52, %v16762_v10  ;;  %v7643_v56 = vrot.slane %v11568_v57, 1  ;;  %v7849_v54 = vsel %vm1596_vm1, %v13925_v20, %v16957_v22  ;;  %v17188_v33 = vcombine.low %v5992_v55, %v17130_v13  ;;  %v17213_v55 = vpop.permute.xlu1 %7348 }
 0x4b2   : > { %20147 = vst [vmem:[#allocation6_spill] sm:$0xff] %v17174_v2  ;;  %20148 = vst [vmem:[#allocation33_spill] sm:$0xff] %v17179_v36  ;;  %13000 = vmatprep.mubr.msk.bf16.mxu0 %vm8122_vm6, %v17179_v36  ;;  %v6758_v58 = vshll.u32 %v17132_v8, 16  ;;  %v7562_v10 = vsel %vm1468_vm13, %v7559_v29, %v7561_v30  ;;  %v7646_v16 = vrot.slane %v17159_v0, 1  ;;  %v17197_v37 = vsel %vm2358_vm4, %v7849_v54, %v16795_v25  ;;  %v6141_v11 = vld [vmem:[#allocation3 + $0x8c] sm:$0xe] }
 0x4b3   : > { %20149 = vst [vmem:[#allocation34_spill] sm:$0xff] %v17188_v33  ;;  %20150 = vst [vmem:[#allocation35_spill] sm:$0xff] %v17197_v37  ;;  %v7051_v7 = vshrl.u32 %v17162_v3, 16  ;;  %7722 = vrot.lane.b32.xlu0 %v7560_v60, %s13960_s17  ;;  %v7645_v22 = vsel %vm1468_vm13, %v7643_v56, %v7644_v23  ;;  %v6751_v5 = vshrl.u32 %v17188_v33, 16  ;;  %v6753_v49 = vshll.u32 %v17188_v33, 16 }
 0x4b4   : > { %v6760_v45 = vrot.slane %v6758_v58, 1  ;;  %7790 = vrot.lane.b32.xlu1 %v7645_v22, %s13960_s17  ;;  %v7053_v4 = vshll.u32 %v17162_v3, 16  ;;  %v7058_v31 = vshll.u32 %v17067_v35, 16  ;;  %v6762_v25 = vshrl.u32 %v17132_v8, 16  ;;  %v17229_v22 = vld [vmem:[%s14860_s16 + $0x1c8] sm:$0xff]  }
 0x4b5   : > { %v6766_v40 = vshll.u32 %v17171_v34, 16  ;;  %v6755_v42 = vrot.slane %v6753_v49, 1  ;;  %v7062_v39 = vshrl.u32 %v17067_v35, 16  ;;  %v7066_v50 = vshll.u32 %v17093_v18, 16 }
 0x4b6   : > { %v11552_v48 = vcombine.low %v6141_v11, %v17130_v13  ;;  %v7647_v29 = vsel %vm1468_vm13, %v7644_v23, %v7646_v16  ;;  %v7055_v57 = vrot.slane %v7053_v4, 1  ;;  %v7060_v12 = vrot.slane %v7058_v31, 1  ;;  %v17219_v13 = vpop.permute.xlu0 %7310  ;;  %v17226_v16 = vld [vmem:[%s14860_s16 + $0x1b8] sm:$0xff]   ;;  %v17236_v4 = vld [vmem:[%s14860_s16 + $0x1b0] sm:$0xff]   ;;  %v20151_v11 = vld [vmem:[#allocation12_spill] sm:$0xff] }
 0x4b7   : > { %v6764_v52 = vor.u32 %v6762_v25, %v6760_v45  ;;  %7724 = vrot.lane.b32.xlu0 %v7562_v10, %s13960_s17  ;;  %v6756_v60 = vor.u32 %v6755_v42, %v6751_v5  ;;  %13001 = vmatmul.mubr.msk.bf16.gmra.mrb[40].mxu0 %vm8122_vm6, %v17197_v37  ;;  %v7068_v35 = vrot.slane %v7066_v50, 1  ;;  %v7564_v18 = vrot.slane %v17132_v8, 1  ;;  %v17364_v33 = vld [vmem:[#allocation3 + $0xb0] ss:$0 sps:$4 sm:$0x11]  }
 0x4b8   : > { %v7563_v30 = vrot.slane %v11552_v48, 1  ;;  %7792 = vrot.lane.b32.xlu1 %v7647_v29, %s13960_s17  ;;  %v7056_v23 = vor.u32 %v7055_v57, %v7051_v7  ;;  %v6768_v56 = vrot.slane %v6766_v40, 1  ;;  %v7064_v20 = vor.u32 %v7062_v39, %v7060_v12  ;;  %v17245_v39 = vld [vmem:[%s14860_s16 + $0x1c0] sm:$0xff]  }
 0x4b9   : > { %v7071_v54 = vshrl.u32 %v17174_v2, 16  ;;  %v7073_v58 = vshll.u32 %v17174_v2, 16  ;;  %v7078_v10 = vshll.u32 %v17147_v26, 16  ;;  %v6761_v8 = vsel %vm1161_vm14, %v6756_v60, %v6760_v45  ;;  %v3952_v45 = vld [vmem:[#allocation3 + $0x230] sm:$0x1] }
 0x4ba   : > { %v7061_v5 = vsel %vm1161_vm14, %v7056_v23, %v7060_v12  ;;  %v6769_v49 = vsel %vm1161_vm14, %v6764_v52, %v6768_v56  ;;  %v7565_v7 = vsel %vm1468_vm13, %v7563_v30, %v7564_v18  ;;  %v7069_v31 = vsel %vm1161_vm14, %v7064_v20, %v7068_v35  ;;  %v17253_v12 = vpop.permute.xlu1 %7352  ;;  %v20152_v60 = vld [vmem:[#allocation13_spill] sm:$0xff]  ;;  %v3955_v23 = vld [vmem:[#allocation3 + $0x244] sm:$0x1]  ;;  %v17263_v56 = vpop.permute.xlu0 %7312 }
 0x4bb   : > { %7318 = vrot.lane.b32.xlu0 %v6761_v8, %s13958_s15  ;;  %v7075_v25 = vrot.slane %v7073_v58, 1  ;;  %v7566_v40 = vrot.slane %v17171_v34, 1  ;;  %v17242_v42 = vmul.f32 0.25, %v20151_v11  ;;  %v7080_v50 = vrot.slane %v7078_v10, 1  ;;  %v20245_v9 = vld [vmem:[#allocation33_spill] sm:$0xff] }
 0x4bc   : > { %7378 = vrot.lane.b32.xlu1 %v7061_v5, %s13958_s15  ;;  %v17249_v48 = vmul.f32 0.75, %v20151_v11  ;;  %v12396_v29 = vunpack.c.l.bf16 %v17226_v16  ;;  %v12404_v57 = vunpack.c.l.bf16 %v17229_v22  ;;  %v17258_v35 = vmul.f32 0.25, %v20152_v60 }
 0x4bd   : > { %v7076_v52 = vor.u32 %v7075_v25, %v7071_v54  ;;  %v3387_v34 = vadd.f32 %v16964_v27, %v17242_v42  ;;  %v17261_v30 = vmul.f32 0.75, %v20152_v60  ;;  %v12392_v58 = vunpack.c.l.bf16 %v17236_v4 }
 0x4be   : > { %v3391_v20 = vadd.f32 %v17249_v48, %v16952_v51  ;;  %v12400_v10 = vunpack.c.l.bf16 %v17245_v39  ;;  %v3953_v54 = vsel %vm14061_vm9, 0, %v3952_v45  ;;  %v7567_v27 = vsel %vm1468_vm13, %v7564_v18, %v7566_v40 }
 0x4bf   : > { %7320 = vrot.lane.b32.xlu0 %v6769_v49, %s13958_s15  ;;  %v3771_v8 = vadd.f32 %v12396_v29, %v3387_v34  ;;  %v3385_v5 = vadd.f32 %v16986_v19, %v17258_v35  ;;  %v3389_v25 = vadd.f32 %v17261_v30, %v16979_v63  ;;  %3954 = vst [vmem:[#allocation3 + $0x230] sm:$0x1] %v3953_v54  ;;  %v3956_v11 = vsel %vm14061_vm9, 0, %v3955_v23  ;;  %v20153_v29 = vld [vmem:[#allocation15_spill] sm:$0xff] }
 0x4c0   : > { %7380 = vrot.lane.b32.xlu1 %v7069_v31, %s13958_s15  ;;  %v3775_v51 = vadd.f32 %v12404_v57, %v3391_v20  ;;  %v7082_v45 = vshrl.u32 %v17147_v26, 16  ;;  %v7086_v49 = vshll.u32 %v17159_v0, 16  ;;  %3957 = vst [vmem:[#allocation3 + $0x244] sm:$0x1] %v3956_v11  ;;  %v17283_v19 = vmul.f32 0.25, %v20153_v29  ;;  %v17289_v57 = vpop.permute.xlu1 %7764 }
 0x4c1   : > { %v12028_v60 = vpack.c.bf16 %v3771_v8, %v3771_v8  ;;  %v3769_v18 = vadd.f32 %v12392_v58, %v3385_v5  ;;  %v3773_v40 = vadd.f32 %v12400_v10, %v3389_v25  ;;  %v7081_v63 = vsel %vm1161_vm14, %v7076_v52, %v7080_v50  ;;  %20154 = vst [vmem:[#allocation12_spill] sm:$0xff] %v17289_v57  ;;  %v17292_v58 = vpop.permute.xlu0 %7746 }
 0x4c2   : > { %v12032_v34 = vpack.c.bf16 %v3775_v51, %v3775_v51  ;;  %v7084_v54 = vor.u32 %v7082_v45, %v7080_v50  ;;  %v17287_v31 = vmul.f32 0.75, %v20153_v29  ;;  %v7088_v20 = vrot.slane %v7086_v49, 1  ;;  %v4055_v29 = vld [vmem:[#allocation3 + $0x240] sm:$0x1] }
 0x4c3   : > { %7726 = vrot.lane.b32.xlu0 %v7565_v7, %s13960_s17  ;;  %v5356_v26 = vshrl.u32 %v12028_v60, 16  ;;  %v12026_v0 = vpack.c.bf16 %v3769_v18, %v3769_v18  ;;  %v12030_v23 = vpack.c.bf16 %v3773_v40, %v3773_v40  ;;  %v5359_v10 = vshll.u32 %v12028_v60, 16 }
 0x4c4   : > { %7382 = vrot.lane.b32.xlu1 %v7081_v63, %s13958_s15  ;;  %v5391_v8 = vshrl.u32 %v12032_v34, 16  ;;  %v5394_v52 = vshll.u32 %v12032_v34, 16  ;;  %v3388_v50 = vadd.f32 %v17015_v38, %v17283_v19  ;;  %v3392_v49 = vadd.f32 %v17287_v31, %v17010_v47  ;;  %v4058_v63 = vld [vmem:[#allocation3 + $0x254] sm:$0x1] }
 0x4c5   : > { %v17297_v5 = vrot.slane %v5356_v26, 7  ;;  %v5339_v25 = vshrl.u32 %v12026_v0, 16  ;;  %v5342_v51 = vshll.u32 %v12026_v0, 16  ;;  %v5374_v11 = vshrl.u32 %v12030_v23, 16 }
 0x4c6   : > { %v17299_v7 = vrot.slane %v5391_v8, 7  ;;  %v5377_v45 = vshll.u32 %v12030_v23, 16  ;;  %v12397_v18 = vunpack.c.h.bf16 %v17226_v16  ;;  %v7089_v38 = vsel %vm1161_vm14, %v7084_v54, %v7088_v20  ;;  %v5919_v0 = vld [vmem:[#allocation3 + $0x230] sm:$0xf] }
 0x4c7   : > { %7728 = vrot.lane.b32.xlu0 %v7567_v27, %s13960_s17  ;;  %v17305_v60 = vrot.slane %v5339_v25, 7  ;;  %v17307_v40 = vrot.slane %v5374_v11, 7  ;;  %v17311_v34 = vor.u32 %v5359_v10, %v17297_v5  ;;  %v5363_v26 = vrot.slane %v17297_v5, 4  ;;  %v5928_v23 = vld [vmem:[#allocation3 + $0x244] sm:$0xf]  ;;  %v17316_v27 = vpop.permute.xlu1 %7768  ;;  %v17324_v25 = vpop.permute.xlu0 %7750 }
 0x4c8   : > { %7384 = vrot.lane.b32.xlu1 %v7089_v38, %s13958_s15  ;;  %v12405_v47 = vunpack.c.h.bf16 %v17229_v22  ;;  %v3772_v16 = vadd.f32 %v12397_v18, %v3388_v50  ;;  %20155 = vst [vmem:[#allocation13_spill] sm:$0xff] %v17316_v27  ;;  %v17319_v8 = vor.u32 %v5394_v52, %v17299_v7  ;;  %v4056_v11 = vsel %vm14073_vm10, 0, %v4055_v29  ;;  %v17340_v38 = vld [vmem:[#allocation3 + $0xa4] sm:$0xf]  ;;  %v17342_v29 = vld [vmem:[#allocation3 + $0xa8] sm:$0xff]  }
 0x4c9   : > { %v5344_v20 = vor.u32 %v5342_v51, %v17305_v60  ;;  %v5379_v10 = vor.u32 %v5377_v45, %v17307_v40  ;;  %v4059_v22 = vsel %vm14073_vm10, 0, %v4058_v63  ;;  %4057 = vst [vmem:[#allocation3 + $0x240] sm:$0x1] %v4056_v11  ;;  %v20156_v51 = vld [vmem:[#allocation18_spill] sm:$0xff]  ;;  %v6778_v36 = vshll.u32 %v17342_v29, 16 }
 0x4ca   : > { %v3776_v5 = vadd.f32 %v12405_v47, %v3392_v49  ;;  %v12029_v50 = vpack.c.bf16 %v3772_v16, %v3772_v16  ;;  %4060 = vst [vmem:[#allocation3 + $0x254] sm:$0x1] %v4059_v22  ;;  %v17335_v45 = vmul.f32 0.25, %v20156_v51  ;;  %v17338_v49 = vmul.f32 0.75, %v20156_v51  ;;  %v5996_v51 = vld [vmem:[#allocation3 + $0xa0] sm:$0xf] }
 0x4cb   : > { %v5920_v52 = vsel %vm15025_vm5, %v5344_v20, %v5919_v0  ;;  %v5929_v18 = vsel %vm15025_vm5, %v5379_v10, %v5928_v23  ;;  %v12393_v16 = vunpack.c.h.bf16 %v17236_v4  ;;  %v6158_v23 = vld [vmem:[#allocation3 + $0x1e0] sm:$0xe]  ;;  %v12401_v22 = vunpack.c.h.bf16 %v17245_v39  ;;  %v17351_v54 = vpop.permute.xlu0 %7338  ;;  %v17356_v4 = vld [vmem:[#allocation3 + $0x1e4] sm:$0xf]  ;;  %v17358_v20 = vpop.permute.xlu1 %7356 }
 0x4cc   : > { %5921 = vst [vmem:[#allocation3 + $0x230] sm:$0xf] %v5920_v52  ;;  %5930 = vst [vmem:[#allocation3 + $0x244] sm:$0xf] %v5929_v18  ;;  %v12033_v63 = vpack.c.bf16 %v3776_v5, %v3776_v5  ;;  %v5365_v47 = vshrl.u32 %v12029_v50, 16  ;;  %v5368_v0 = vshll.u32 %v12029_v50, 16  ;;  %v3386_v10 = vadd.f32 %v17063_v6, %v17335_v45 }
 0x4cd   : > { %v3390_v11 = vadd.f32 %v17338_v49, %v17056_v59  ;;  %v17354_v50 = vcombine.low %v5996_v51, %v17340_v38  ;;  %20158 = vst [vmem:[#allocation18_spill] sm:$0xff] %v17358_v20  ;;  %v11569_v59 = vcombine.low %v6158_v23, %v17356_v4  ;;  %v6780_v3 = vrot.slane %v6778_v36, 1 }
 0x4ce   : > { %v5367_v52 = vrot.slane %v5365_v47, 7  ;;  %v5400_v5 = vshrl.u32 %v12033_v63, 16  ;;  %v5403_v18 = vshll.u32 %v12033_v63, 16  ;;  %v3770_v37 = vadd.f32 %v12393_v16, %v3386_v10 }
 0x4cf   : > { %20157 = vst [vmem:[#allocation15_spill] sm:$0xff] %v17354_v50  ;;  %v3774_v6 = vadd.f32 %v12401_v22, %v3390_v11  ;;  %v6771_v47 = vshrl.u32 %v17354_v50, 16  ;;  %v6773_v51 = vshll.u32 %v17354_v50, 16  ;;  %v17366_v27 = vpop.permute.xlu0 %7342  ;;  %v7648_v22 = vrot.slane %v11569_v59, 1  ;;  %v17375_v50 = vld [vmem:[#allocation3 + $0x1e8] sm:$0xff]  }
 0x4d0   : > { %v5370_v39 = vor.u32 %v5368_v0, %v5367_v52  ;;  %v5372_v24 = vrot.slane %v5367_v52, 4  ;;  %v5402_v14 = vrot.slane %v5400_v5, 7  ;;  %v12027_v2 = vpack.c.bf16 %v3770_v37, %v3770_v37  ;;  %v5925_v23 = vld [vmem:[#allocation3 + $0x240] sm:$0x1]  ;;  %v17370_v52 = vpop.permute.xlu1 %7360 }
 0x4d1   : > { %v12031_v63 = vpack.c.bf16 %v3774_v6, %v3774_v6  ;;  %v5934_v0 = vld [vmem:[#allocation3 + $0x254] sm:$0x1]  ;;  %20159 = vst [vmem:[#allocation36_spill] sm:$0xff] %v17370_v52  ;;  %v20160_v57 = vrot.slane %v17299_v7, 4  ;;  %v6775_v59 = vrot.slane %v6773_v51, 1  ;;  %v20161_v7 = vld [vmem:[#allocation7_spill] sm:$0xff] }
 0x4d2   : > { %v5371_v16 = vsel %vm14086_vm11, %v5363_v26, %v5370_v39  ;;  %v5405_v10 = vor.u32 %v5403_v18, %v5402_v14  ;;  %v5407_v11 = vrot.slane %v5402_v14, 4  ;;  %v5926_v37 = vsel %vm14061_vm9, %v5372_v24, %v5925_v23  ;;  %v6142_v52 = vld [vmem:[#allocation3 + $0xa0] sm:$0xe] }
 0x4d3   : > { %5924 = vst.msk [vmem:[#allocation3 + $0x23c] sm:$0xf] %vm3853_vm8, %v5371_v16  ;;  %v5347_v36 = vshrl.u32 %v12027_v2, 16  ;;  %v5350_v5 = vshll.u32 %v12027_v2, 16  ;;  %v5382_v6 = vshrl.u32 %v12031_v63, 16  ;;  %v5385_v18 = vshll.u32 %v12031_v63, 16  ;;  %v17393_v51 = vpop.permute.xlu0 %7754 }
 0x4d4   : > { %v5406_v14 = vsel %vm14086_vm11, %v20160_v57, %v5405_v10  ;;  %5927 = vst [vmem:[#allocation3 + $0x240] sm:$0x1] %v5926_v37  ;;  %v5935_v26 = vsel %vm14061_vm9, %v5407_v11, %v5934_v0  ;;  %v5380_v39 = vrot.slane %v17307_v40, 4  ;;  %v7649_v16 = vrot.slane %v17375_v50, 1 }
 0x4d5   : > { %5933 = vst.msk [vmem:[#allocation3 + $0x250] sm:$0xf] %vm3853_vm8, %v5406_v14  ;;  %5936 = vst [vmem:[#allocation3 + $0x254] sm:$0x1] %v5935_v26  ;;  %v5349_v24 = vrot.slane %v5347_v36, 7  ;;  %v5384_v2 = vrot.slane %v5382_v6, 7  ;;  %v6776_v23 = vor.u32 %v6775_v59, %v6771_v47  ;;  %v7851_v57 = vsel %vm1596_vm1, %v20161_v7, %v17125_v62  ;;  %v17395_v6 = vpop.permute.xlu1 %7772 }
 0x4d6   : > { %v6782_v10 = vshrl.u32 %v17342_v29, 16  ;;  %v6786_v11 = vshll.u32 %v17364_v33, 16  ;;  %v17391_v63 = vld [vmem:[#allocation3 + $0x1f0] ss:$0 sps:$4 sm:$0x11]   ;;  %v13926_v14 = vld [vmem:[#allocation3 + $0xf8] sm:$0xff]   ;;  %v7650_v59 = vsel %vm1468_vm13, %v7648_v22, %v7649_v16 }
 0x4d7   : > { %v5352_v40 = vor.u32 %v5350_v5, %v5349_v24  ;;  %v5354_v0 = vrot.slane %v5349_v24, 4  ;;  %v5387_v37 = vor.u32 %v5385_v18, %v5384_v2  ;;  %v5389_v36 = vrot.slane %v5384_v2, 4  ;;  %v6060_v26 = vld [vmem:[#allocation3 + $0x1e0] sm:$0xf]  ;;  %v6159_v22 = vld [vmem:[#allocation3 + $0x1f4] sm:$0xe]  ;;  %7794 = vrot.lane.b32.xlu1 %v7650_v59, %s13960_s17 }
 0x4d8   : > { %v17399_v47 = vsel %vm1596_vm1, %v13926_v14, %v17058_v17  ;;  %v6781_v62 = vsel %vm1161_vm14, %v6776_v23, %v6780_v3  ;;  %v6784_v7 = vor.u32 %v6782_v10, %v6780_v3  ;;  %v20162_v20 = vrot.slane %v17305_v60, 4  ;;  %v6064_v3 = vld [vmem:[#allocation3 + $0x1f4] sm:$0xf]  ;;  %v17416_v2 = vld [vmem:[#allocation3 + $0x204] ss:$0 sps:$4 sm:$0x11]  }
 0x4d9   : > { %v5362_v18 = vsel %vm14086_vm11, %v5354_v0, %v17311_v34  ;;  %v5388_v17 = vsel %vm14086_vm11, %v5380_v39, %v5387_v37  ;;  %v5397_v24 = vsel %vm14086_vm11, %v5389_v36, %v17319_v8  ;;  %7322 = vrot.lane.b32.xlu0 %v6781_v62, %s13958_s15  ;;  %v6788_v60 = vrot.slane %v6786_v11, 1  ;;  %v17430_v23 = vld [vmem:[#allocation3 + $0x1fc] sm:$0xff]   ;;  %v17432_v10 = vld [vmem:[#allocation3 + $0xb8] sm:$0xf]  ;;  %v20166_v14 = vld [vmem:[#allocation8_spill] sm:$0xff] }
 0x4da   : > { %v5353_v5 = vsel %vm14086_vm11, %v20162_v20, %v5352_v40  ;;  %5923 = vst.msk [vmem:[#allocation3 + $0x238] sm:$0xf] %vm3853_vm8, %v5362_v18  ;;  %5931 = vst.msk [vmem:[#allocation3 + $0x248] sm:$0xf] %vm3853_vm8, %v5388_v17  ;;  %v17425_v34 = vsel %vm2358_vm4, %v7851_v57, %v17001_v46  ;;  %v7651_v8 = vrot.slane %v17391_v63, 1  ;;  %v13927_v20 = vld [vmem:[#allocation3 + $0x58] sm:$0xff]   ;;  %v17435_v40 = vcombine.low %v6060_v26, %v17356_v4 }
 0x4db   : > { %5922 = vst.msk [vmem:[#allocation3 + $0x234] sm:$0xf] %vm3853_vm8, %v5353_v5  ;;  %5932 = vst.msk [vmem:[#allocation3 + $0x24c] sm:$0xf] %vm3853_vm8, %v5397_v24  ;;  %v7853_v39 = vsel %vm1596_vm1, %v13927_v20, %v17191_v43  ;;  %13004 = vmatprep.mubr.msk.bf16.mxu0 %vm8122_vm6, %v17425_v34  ;;  %v11553_v11 = vcombine.low %v6142_v52, %v17340_v38  ;;  %v7569_v46 = vrot.slane %v17342_v29, 1  ;;  %v17445_v43 = vld [vmem:[#allocation3 + $0xbc] sm:$0xff]   ;;  %v17454_v29 = vpop.permute.xlu0 %7758 }
 0x4dc   : > { %20163 = vst [vmem:[#allocation7_spill] sm:$0xff] %v17425_v34  ;;  %20164 = vst [vmem:[#allocation37_spill] sm:$0xff] %v17435_v40  ;;  %v17443_v57 = vsel %vm2358_vm4, %v7853_v39, %v17026_v41  ;;  %v6065_v0 = vld [vmem:[#allocation3 + $0x1f8] sm:$0xf]  ;;  %v6789_v37 = vsel %vm1161_vm14, %v6784_v7, %v6788_v60  ;;  %v7654_v36 = vrot.slane %v17430_v23, 1  ;;  %v7855_v38 = vsel %vm1596_vm1, %v20166_v14, %v17219_v13  ;;  %v17463_v7 = vpop.permute.xlu1 %7776  ;;  %v13928_v18 = vld [vmem:[#allocation3 + $0x6c] sm:$0xff]  }
 0x4dd   : > { %20165 = vst [vmem:[#allocation38_spill] sm:$0xff] %v17443_v57  ;;  %13005 = vmatmul.mubr.msk.bf16.gmra.mrb[44].mxu0 %vm8122_vm6, %v17443_v57  ;;  %v11570_v4 = vcombine.low %v6159_v22, %v6065_v0  ;;  %7324 = vrot.lane.b32.xlu0 %v6789_v37, %s13958_s15  ;;  %v7652_v41 = vsel %vm1468_vm13, %v7649_v16, %v7651_v8  ;;  %v7568_v52 = vrot.slane %v11553_v11, 1  ;;  %v7571_v62 = vrot.slane %v17364_v33, 1  ;;  %v6000_v59 = vld [vmem:[#allocation3 + $0xb4] sm:$0xf] }
 0x4de   : > { %v17461_v26 = vsel %vm2358_vm4, %v7855_v38, %v17069_v1  ;;  %7796 = vrot.lane.b32.xlu1 %v7652_v41, %s13960_s17  ;;  %v17466_v5 = vcombine.low %v6064_v3, %v6065_v0  ;;  %v7656_v16 = vrot.slane %v17416_v2, 1  ;;  %v7857_v33 = vsel %vm1596_vm1, %v13928_v18, %v17263_v56  ;;  %v17473_v17 = vld [vmem:[#allocation3 + $0xc4] ss:$0 sps:$4 sm:$0x11]   ;;  %v6143_v37 = vld [vmem:[#allocation3 + $0xb4] sm:$0xe] }
 0x4df   : > { %20167 = vst [vmem:[#allocation8_spill] sm:$0xff] %v17461_v26  ;;  %v7653_v13 = vrot.slane %v11570_v4, 1  ;;  %13008 = vmatprep.mubr.msk.bf16.mxu0 %vm8122_vm6, %v17461_v26  ;;  %v7570_v1 = vsel %vm1468_vm13, %v7568_v52, %v7569_v46  ;;  %v7572_v24 = vsel %vm1468_vm13, %v7569_v46, %v7571_v62  ;;  %v17478_v22 = vcombine.low %v6000_v59, %v17432_v10  ;;  %v17497_v38 = vpop.permute.xlu0 %7346 }
 0x4e0   : > { %20168 = vst [vmem:[#allocation39_spill] sm:$0xff] %v17466_v5  ;;  %v6798_v3 = vshll.u32 %v17445_v43, 16  ;;  %v7657_v8 = vsel %vm1468_vm13, %v7654_v36, %v7656_v16  ;;  %v17485_v20 = vsel %vm2358_vm4, %v7857_v33, %v17090_v44  ;;  %v7091_v56 = vshrl.u32 %v17435_v40, 16 }
 0x4e1   : > { %20169 = vst [vmem:[#allocation40_spill] sm:$0xff] %v17478_v22  ;;  %v7655_v60 = vsel %vm1468_vm13, %v7653_v13, %v7654_v36  ;;  %20170 = vst [vmem:[#allocation41_spill] sm:$0xff] %v17485_v20  ;;  %7730 = vrot.lane.b32.xlu0 %v7570_v1, %s13960_s17  ;;  %v6791_v39 = vshrl.u32 %v17478_v22, 16  ;;  %v6793_v11 = vshll.u32 %v17478_v22, 16  ;;  %v7093_v0 = vshll.u32 %v17435_v40, 16  ;;  %v17501_v13 = vpop.permute.xlu1 %7364 }
 0x4e2   : > { %v6800_v46 = vrot.slane %v6798_v3, 1  ;;  %7798 = vrot.lane.b32.xlu1 %v7655_v60, %s13960_s17  ;;  %v7098_v4 = vshll.u32 %v17375_v50, 16  ;;  %v6802_v36 = vshrl.u32 %v17445_v43, 16  ;;  %v6806_v44 = vshll.u32 %v17473_v17, 16 }
 0x4e3   : > { %v7102_v14 = vshrl.u32 %v17375_v50, 16  ;;  %v6795_v41 = vrot.slane %v6793_v11, 1  ;;  %v7095_v52 = vrot.slane %v7093_v0, 1  ;;  %v7106_v62 = vshll.u32 %v17391_v63, 16 }
 0x4e4   : > { %v11554_v59 = vcombine.low %v6143_v37, %v17432_v10  ;;  %v7100_v16 = vrot.slane %v7098_v4, 1  ;;  %v6804_v18 = vor.u32 %v6802_v36, %v6800_v46  ;;  %v6808_v33 = vrot.slane %v6806_v44, 1  ;;  %v17513_v37 = vld [vmem:[%s19870_s6 + $0x18] sm:$0xff]   ;;  %v17527_v36 = vld [vmem:[%s14860_s16 + $0x1e8] sm:$0xff]  }
 0x4e5   : > { %13009 = vmatmul.mubr.msk.bf16.gmra.mrb[48].mxu0 %vm8122_vm6, %v17485_v20  ;;  %v19939_v1 = vrot.slane %v17445_v43, 1  ;;  %7732 = vrot.lane.b32.xlu0 %v7572_v24, %s13960_s17  ;;  %v6796_v50 = vor.u32 %v6795_v41, %v6791_v39  ;;  %v7096_v3 = vor.u32 %v7095_v52, %v7091_v56  ;;  %v7108_v63 = vrot.slane %v7106_v62, 1  ;;  %v17524_v4 = vld [vmem:[%s14860_s16 + $0x1d8] sm:$0xff]   ;;  %v17540_v52 = vpop.permute.xlu0 %7350  ;;  %v17567_v20 = vld [vmem:[%s14860_s16 + $0x1e0] sm:$0xff]  }
 0x4e6   : > { %v7573_v60 = vrot.slane %v11554_v59, 1  ;;  %7800 = vrot.lane.b32.xlu1 %v7657_v8, %s13960_s17  ;;  %v7104_v10 = vor.u32 %v7102_v14, %v7100_v16  ;;  %v7111_v11 = vshrl.u32 %v17466_v5, 16  ;;  %v7113_v0 = vshll.u32 %v17466_v5, 16  ;;  %v17530_v44 = vld [vmem:[%s14860_s16 + $0x1f8] sm:$0xff]   ;;  %v20171_v59 = vld [vmem:[#allocation14_spill] sm:$0xff] }
 0x4e7   : > { %v17518_v24 = vsel %vm2358_vm4, %v17399_v47, %v16995_v15  ;;  %v6801_v56 = vsel %vm1161_vm14, %v6796_v50, %v6800_v46  ;;  %v6809_v39 = vsel %vm1161_vm14, %v6804_v18, %v6808_v33  ;;  %v7118_v8 = vshll.u32 %v17430_v23, 16  ;;  %v13929_v46 = vld [vmem:[%s19870_s6 + $0x8] ss:$0 sps:$4 sm:$0xff]  }
 0x4e8   : > { %v7101_v14 = vsel %vm1161_vm14, %v7096_v3, %v7100_v16  ;;  %v7575_v15 = vsel %vm1468_vm13, %v7573_v60, %v19939_v1  ;;  %v7115_v47 = vrot.slane %v7113_v0, 1  ;;  %v8814_v41 = vsel %vm8251_vm3, %v13929_v46, 0  ;;  %v20172_v18 = vld [vmem:[#allocation21_spill] sm:$0xff]  ;;  %v17552_v3 = vld [vmem:[%s14860_s16 + $0x1d0] sm:$0xff]   ;;  %v17554_v60 = vpop.permute.xlu1 %7368 }
 0x4e9   : > { %7326 = vrot.lane.b32.xlu0 %v6801_v56, %s13958_s15  ;;  %v7109_v62 = vsel %vm1161_vm14, %v7104_v10, %v7108_v63  ;;  %v17547_v16 = vsel %vm1596_vm1, %v20171_v59, %v17351_v54  ;;  %13387 = vmatpush3.bf16.msra.mxu1 %v8814_v41  ;;  %v3211_v33 = vmul.f32 0.25, %v20172_v18  ;;  %v3275_v50 = vmul.f32 0.75, %v20172_v18  ;;  %v20173_v18 = vld [vmem:[#allocation22_spill] sm:$0xff] }
 0x4ea   : > { %7386 = vrot.lane.b32.xlu1 %v7101_v14, %s13958_s15  ;;  %v7116_v0 = vor.u32 %v7115_v47, %v7111_v11  ;;  %v12412_v63 = vunpack.c.l.bf16 %v17524_v4  ;;  %v12420_v10 = vunpack.c.l.bf16 %v17527_v36  ;;  %v12428_v54 = vunpack.c.l.bf16 %v17530_v44  ;;  %13252 = vmatprep.subr.bf16.mxu1 %v17513_v37  ;;  %v17570_v14 = vld [vmem:[%s14860_s16 + $0x1f0] sm:$0xff]  }
 0x4eb   : > { %v17561_v56 = vrot.slane %v7118_v8, 1  ;;  %v3395_v46 = vadd.f32 %v17249_v48, %v3211_v33  ;;  %v3399_v59 = vadd.f32 %v3275_v50, %v17242_v42  ;;  %v3209_v1 = vmul.f32 0.25, %v20173_v18  ;;  %13123 = vmatpush3.bf16.msra.mxu0 %v8814_v41  ;;  %v3958_v8 = vld [vmem:[#allocation3 + $0x258] sm:$0x1] }
 0x4ec   : > { %v3787_v11 = vadd.f32 %v12428_v54, %v3275_v50  ;;  %v7576_v47 = vrot.slane %v17473_v17, 1  ;;  %v3273_v26 = vmul.f32 0.75, %v20173_v18  ;;  %v12408_v57 = vunpack.c.l.bf16 %v17552_v3  ;;  %v17583_v18 = vpop.permute.xlu0 %7762 }
 0x4ed   : > { %7328 = vrot.lane.b32.xlu0 %v6809_v39, %s13958_s15  ;;  %v7121_v42 = vsel %vm1161_vm14, %v7116_v0, %v17561_v56  ;;  %v3779_v48 = vadd.f32 %v12412_v63, %v3395_v46  ;;  %v3783_v33 = vadd.f32 %v12420_v10, %v3399_v59  ;;  %v3393_v34 = vadd.f32 %v17261_v30, %v3209_v1  ;;  %v3961_v63 = vld [vmem:[#allocation3 + $0x26c] sm:$0x1]  ;;  %v3964_v10 = vld [vmem:[#allocation3 + $0x280] sm:$0x1]  ;;  %v17587_v30 = vpop.permute.xlu1 %7778 }
 0x4ee   : > { %7388 = vrot.lane.b32.xlu1 %v7109_v62, %s13958_s15  ;;  %v12044_v41 = vpack.c.bf16 %v3787_v11, %v3787_v11  ;;  %v3397_v50 = vadd.f32 %v3273_v26, %v17258_v35  ;;  %v12416_v17 = vunpack.c.l.bf16 %v17567_v20  ;;  %v12424_v54 = vunpack.c.l.bf16 %v17570_v14 }
 0x4ef   : > { %v12036_v5 = vpack.c.bf16 %v3779_v48, %v3779_v48  ;;  %v12040_v39 = vpack.c.bf16 %v3783_v33, %v3783_v33  ;;  %v3777_v22 = vadd.f32 %v12408_v57, %v3393_v34  ;;  %v3959_v0 = vsel %vm14061_vm9, 0, %v3958_v8 }
 0x4f0   : > { %v5496_v1 = vshrl.u32 %v12044_v41, 16  ;;  %v5499_v62 = vshll.u32 %v12044_v41, 16  ;;  %v3781_v46 = vadd.f32 %v12416_v17, %v3397_v50  ;;  %v3785_v35 = vadd.f32 %v12424_v54, %v3273_v26  ;;  %3960 = vst [vmem:[#allocation3 + $0x258] sm:$0x1] %v3959_v0 }
 0x4f1   : > { %7734 = vrot.lane.b32.xlu0 %v7575_v15, %s13960_s17  ;;  %v5426_v59 = vshrl.u32 %v12036_v5, 16  ;;  %v5429_v11 = vshll.u32 %v12036_v5, 16  ;;  %v5461_v40 = vshrl.u32 %v12040_v39, 16  ;;  %v5464_v48 = vshll.u32 %v12040_v39, 16  ;;  %v17601_v50 = vpop.permute.xlu1 %7780 }
 0x4f2   : > { %7390 = vrot.lane.b32.xlu1 %v7121_v42, %s13958_s15  ;;  %v17591_v34 = vrot.slane %v5496_v1, 7  ;;  %v3962_v57 = vsel %vm14061_vm9, 0, %v3961_v63  ;;  %v3965_v8 = vsel %vm14061_vm9, 0, %v3964_v10  ;;  %v12034_v33 = vpack.c.bf16 %v3777_v22, %v3777_v22  ;;  %20174 = vst [vmem:[#allocation14_spill] sm:$0xff] %v17601_v50 }
 0x4f3   : > { %v17597_v41 = vrot.slane %v5426_v59, 7  ;;  %v17599_v26 = vrot.slane %v5461_v40, 7  ;;  %3963 = vst [vmem:[#allocation3 + $0x26c] sm:$0x1] %v3962_v57  ;;  %3966 = vst [vmem:[#allocation3 + $0x280] sm:$0x1] %v3965_v8  ;;  %v12038_v5 = vpack.c.bf16 %v3781_v46, %v3781_v46  ;;  %v12042_v15 = vpack.c.bf16 %v3785_v35, %v3785_v35 }
 0x4f4   : > { %v17604_v42 = vor.u32 %v5499_v62, %v17591_v34  ;;  %v20175_v17 = vrot.slane %v17445_v43, 1  ;;  %v5409_v39 = vshrl.u32 %v12034_v33, 16  ;;  %v5412_v0 = vshll.u32 %v12034_v33, 16  ;;  %v17609_v22 = vpop.permute.xlu0 %7766 }
 0x4f5   : > { %v17612_v40 = vor.u32 %v5429_v11, %v17597_v41  ;;  %v17616_v10 = vor.u32 %v5464_v48, %v17599_v26  ;;  %v5444_v43 = vshrl.u32 %v12038_v5, 16  ;;  %v5479_v46 = vshrl.u32 %v12042_v15, 16 }
 0x4f6   : > { %v7577_v54 = vsel %vm1468_vm13, %v20175_v17, %v7576_v47  ;;  %v17620_v62 = vrot.slane %v5409_v39, 7  ;;  %v5447_v47 = vshll.u32 %v12038_v5, 16  ;;  %v5482_v35 = vshll.u32 %v12042_v15, 16  ;;  %v4061_v15 = vld [vmem:[#allocation3 + $0x268] sm:$0x1]  ;;  %v20178_v39 = vld [vmem:[#allocation26_spill] sm:$0xff] }
 0x4f7   : > { %7736 = vrot.lane.b32.xlu0 %v7577_v54, %s13960_s17  ;;  %v17625_v59 = vsel %vm2358_vm4, %v17547_v16, %v17292_v58  ;;  %v7122_v11 = vshrl.u32 %v17430_v23, 16  ;;  %v7126_v48 = vshll.u32 %v17416_v2, 16  ;;  %v17631_v33 = vrot.slane %v5444_v43, 7  ;;  %v5937_v5 = vld [vmem:[#allocation3 + $0x258] sm:$0xf] }
 0x4f8   : > { %20176 = vst [vmem:[#allocation21_spill] sm:$0xff] %v17625_v59  ;;  %v5414_v8 = vor.u32 %v5412_v0, %v17620_v62  ;;  %v17633_v17 = vrot.slane %v5479_v46, 7  ;;  %13172 = vmatprep.mubr.msk.bf16.mxu1 %vm8122_vm6, %v17625_v59  ;;  %v4064_v54 = vld [vmem:[#allocation3 + $0x27c] sm:$0x1]  ;;  %v17637_v58 = vpop.permute.xlu0 %7354  ;;  %v17639_v16 = vpop.permute.xlu1 %7782  ;;  %v3212_v1 = vmul.f32 0.25, %v20178_v39  ;;  %v3276_v0 = vmul.f32 0.75, %v20178_v39 }
 0x4f9   : > { %20177 = vst [vmem:[#allocation22_spill] sm:$0xff] %v17639_v16  ;;  %v7124_v2 = vor.u32 %v7122_v11, %v17561_v56  ;;  %v7128_v23 = vrot.slane %v7126_v48, 1  ;;  %v4067_v43 = vld [vmem:[#allocation3 + $0x290] sm:$0x1]  ;;  %13173 = vmatmul.mubr.msk.bf16.vlgmr.msra.gmra.mrb[64].mxu1 %vm8122_vm6, %v17518_v24  ;;  %v5449_v57 = vor.u32 %v5447_v47, %v17631_v33  ;;  %v12421_v63 = vunpack.c.h.bf16 %v17527_v36 }
 0x4fa   : > { %v5484_v59 = vor.u32 %v5482_v35, %v17633_v17  ;;  %v5946_v16 = vld [vmem:[#allocation3 + $0x26c] sm:$0xf]  ;;  %v5955_v50 = vld [vmem:[#allocation3 + $0x280] sm:$0xf]  ;;  %13253 = vmatpush3.bf16.msra.mxu1 %v17513_v37  ;;  %v5938_v56 = vsel %vm15025_vm5, %v5414_v8, %v5937_v5  ;;  %v3396_v48 = vadd.f32 %v17287_v31, %v3212_v1  ;;  %v3400_v39 = vadd.f32 %v3276_v0, %v17283_v19 }
 0x4fb   : > { %v7129_v11 = vsel %vm1161_vm14, %v7124_v2, %v7128_v23  ;;  %5939 = vst [vmem:[#allocation3 + $0x258] sm:$0xf] %v5938_v56  ;;  %v5947_v47 = vsel %vm15025_vm5, %v5449_v57, %v5946_v16  ;;  %v12413_v37 = vunpack.c.h.bf16 %v17524_v4  ;;  %v12429_v8 = vunpack.c.h.bf16 %v17530_v44  ;;  %v20179_v4 = vld [vmem:[#allocation31_spill] sm:$0xff]  ;;  %v17672_v57 = vld [vmem:[#allocation3 + $0xcc] sm:$0xf] }
 0x4fc   : > { %v5956_v35 = vsel %vm15025_vm5, %v5484_v59, %v5955_v50  ;;  %7392 = vrot.lane.b32.xlu1 %v7129_v11, %s13958_s15  ;;  %5948 = vst [vmem:[#allocation3 + $0x26c] sm:$0xf] %v5947_v47  ;;  %v4062_v19 = vsel %vm14073_vm10, 0, %v4061_v15  ;;  %v4065_v31 = vsel %vm14073_vm10, 0, %v4064_v54  ;;  %v4068_v21 = vsel %vm14073_vm10, 0, %v4067_v43  ;;  %v17674_v44 = vpop.permute.xlu0 %7358  ;;  %v17676_v5 = vpop.permute.xlu1 %7784 }
 0x4fd   : > { %5957 = vst [vmem:[#allocation3 + $0x280] sm:$0xf] %v5956_v35  ;;  %v3780_v1 = vadd.f32 %v12413_v37, %v3396_v48  ;;  %v3784_v59 = vadd.f32 %v12421_v63, %v3400_v39  ;;  %4063 = vst [vmem:[#allocation3 + $0x268] sm:$0x1] %v4062_v19  ;;  %v3210_v36 = vmul.f32 0.25, %v20179_v4  ;;  %v3788_v15 = vadd.f32 %v12429_v8, %v3276_v0  ;;  %v20180_v39 = vld [vmem:[#allocation17_spill] sm:$0xff] }
 0x4fe   : > { %4066 = vst [vmem:[#allocation3 + $0x27c] sm:$0x1] %v4065_v31  ;;  %4069 = vst [vmem:[#allocation3 + $0x290] sm:$0x1] %v4068_v21  ;;  %v3274_v54 = vmul.f32 0.75, %v20179_v4  ;;  %v12409_v16 = vunpack.c.h.bf16 %v17552_v3  ;;  %v12417_v2 = vunpack.c.h.bf16 %v17567_v20  ;;  %v12425_v56 = vunpack.c.h.bf16 %v17570_v14 }
 0x4ff   : > { %v12037_v23 = vpack.c.bf16 %v3780_v1, %v3780_v1  ;;  %v12041_v63 = vpack.c.bf16 %v3784_v59, %v3784_v59  ;;  %v3394_v43 = vadd.f32 %v17338_v49, %v3210_v36  ;;  %v6004_v11 = vld [vmem:[#allocation3 + $0xc8] sm:$0xf]  ;;  %v12045_v48 = vpack.c.bf16 %v3788_v15, %v3788_v15 }
 0x500   : > { %v7887_v47 = vsel %vm1596_vm1, %v20180_v39, %v17366_v27  ;;  %v3398_v0 = vadd.f32 %v3274_v54, %v17335_v45  ;;  %v17688_v35 = vcombine.low %v6004_v11, %v17672_v57  ;;  %v3786_v59 = vadd.f32 %v12425_v56, %v3274_v54  ;;  %v17691_v36 = vpop.permute.xlu0 %7770  ;;  %v17693_v27 = vpop.permute.xlu1 %7370 }
 0x501   : > { %v5435_v3 = vshrl.u32 %v12037_v23, 16  ;;  %v5438_v37 = vshll.u32 %v12037_v23, 16  ;;  %v5470_v20 = vshrl.u32 %v12041_v63, 16  ;;  %v5473_v8 = vshll.u32 %v12041_v63, 16 }
 0x502   : > { %v5505_v19 = vshrl.u32 %v12045_v48, 16  ;;  %v5508_v31 = vshll.u32 %v12045_v48, 16  ;;  %v3778_v49 = vadd.f32 %v12409_v16, %v3394_v43  ;;  %v3782_v21 = vadd.f32 %v12417_v2, %v3398_v0 }
 0x503   : > { %v5437_v14 = vrot.slane %v5435_v3, 7  ;;  %v5472_v1 = vrot.slane %v5470_v20, 7  ;;  %v6811_v4 = vshrl.u32 %v17688_v35, 16  ;;  %v6813_v63 = vshll.u32 %v17688_v35, 16  ;;  %v17696_v20 = vld [vmem:[#allocation3 + $0xd0] sm:$0xff]  }
 0x504   : > { %v5507_v45 = vrot.slane %v5505_v19, 7  ;;  %v5943_v15 = vld [vmem:[#allocation3 + $0x268] sm:$0x1]  ;;  %v12035_v39 = vpack.c.bf16 %v3778_v49, %v3778_v49  ;;  %v12039_v23 = vpack.c.bf16 %v3782_v21, %v3782_v21  ;;  %v12043_v56 = vpack.c.bf16 %v3786_v59, %v3786_v59 }
 0x505   : > { %v5952_v11 = vld [vmem:[#allocation3 + $0x27c] sm:$0x1]  ;;  %v5440_v50 = vor.u32 %v5438_v37, %v5437_v14  ;;  %v5442_v48 = vrot.slane %v5437_v14, 4  ;;  %v5475_v16 = vor.u32 %v5473_v8, %v5472_v1  ;;  %v5477_v2 = vrot.slane %v5472_v1, 4  ;;  %v5961_v43 = vld [vmem:[#allocation3 + $0x290] sm:$0x1] }
 0x506   : > { %v5510_v0 = vor.u32 %v5508_v31, %v5507_v45  ;;  %v5512_v54 = vrot.slane %v5507_v45, 4  ;;  %v5417_v3 = vshrl.u32 %v12035_v39, 16  ;;  %v20181_v46 = vrot.slane %v17597_v41, 4 }
 0x507   : > { %v20182_v49 = vrot.slane %v17599_v26, 4  ;;  %v5944_v8 = vsel %vm14061_vm9, %v5442_v48, %v5943_v15  ;;  %v5953_v31 = vsel %vm14061_vm9, %v5477_v2, %v5952_v11  ;;  %v20183_v21 = vrot.slane %v17591_v34, 4  ;;  %v17719_v15 = vpop.permute.xlu0 %7774  ;;  %v17721_v11 = vpop.permute.xlu1 %7372 }
 0x508   : > { %v5441_v19 = vsel %vm14086_vm11, %v20181_v46, %v5440_v50  ;;  %5945 = vst [vmem:[#allocation3 + $0x268] sm:$0x1] %v5944_v8  ;;  %5954 = vst [vmem:[#allocation3 + $0x27c] sm:$0x1] %v5953_v31  ;;  %v5962_v41 = vsel %vm14061_vm9, %v5512_v54, %v5961_v43  ;;  %v5419_v26 = vrot.slane %v5417_v3, 7  ;;  %v5420_v46 = vshll.u32 %v12035_v39, 16 }
 0x509   : > { %v5476_v37 = vsel %vm14086_vm11, %v20182_v49, %v5475_v16  ;;  %v5511_v14 = vsel %vm14086_vm11, %v20183_v21, %v5510_v0  ;;  %5942 = vst.msk [vmem:[#allocation3 + $0x264] sm:$0xf] %vm3853_vm8, %v5441_v19  ;;  %v6160_v50 = vld [vmem:[#allocation3 + $0x208] sm:$0xe]  ;;  %5963 = vst [vmem:[#allocation3 + $0x290] sm:$0x1] %v5962_v41  ;;  %v17726_v3 = vsel %vm2358_vm4, %v7887_v47, %v17324_v25 }
 0x50a   : > { %5951 = vst.msk [vmem:[#allocation3 + $0x278] sm:$0xf] %vm3853_vm8, %v5476_v37  ;;  %5960 = vst.msk [vmem:[#allocation3 + $0x28c] sm:$0xf] %vm3853_vm8, %v5511_v14  ;;  %v5452_v1 = vshrl.u32 %v12039_v23, 16  ;;  %v5455_v34 = vshll.u32 %v12039_v23, 16  ;;  %v5422_v48 = vor.u32 %v5420_v46, %v5419_v26  ;;  %13176 = vmatprep.mubr.msk.bf16.mxu1 %vm8122_vm6, %v17726_v3 }
 0x50b   : > { %v5487_v59 = vshrl.u32 %v12043_v56, 16  ;;  %v5490_v45 = vshll.u32 %v12043_v56, 16  ;;  %v5424_v16 = vrot.slane %v5419_v26, 4  ;;  %v6815_v2 = vrot.slane %v6813_v63, 1  ;;  %v6069_v43 = vld [vmem:[#allocation3 + $0x20c] sm:$0xf] }
 0x50c   : > { %v6818_v0 = vshll.u32 %v17696_v20, 16  ;;  %v5454_v54 = vrot.slane %v5452_v1, 7  ;;  %v11571_v19 = vcombine.low %v6160_v50, %v6069_v43  ;;  %v17728_v23 = vld [vmem:[#allocation3 + $0xd8] ss:$0 sps:$4 sm:$0x11]   ;;  %v20184_v56 = vrot.slane %v17620_v62, 4 }
 0x50d   : > { %v5489_v39 = vrot.slane %v5487_v59, 7  ;;  %v5432_v63 = vsel %vm14086_vm11, %v5424_v16, %v17612_v40  ;;  %v6816_v37 = vor.u32 %v6815_v2, %v6811_v4  ;;  %v17739_v31 = vld [vmem:[#allocation3 + $0x210] sm:$0xff]   ;;  %v17741_v25 = vld [vmem:[#allocation3 + $0x218] ss:$0 sps:$4 sm:$0x11]   ;;  %v20187_v2 = vrot.slane %v17633_v17, 4 }
 0x50e   : > { %v5423_v49 = vsel %vm14086_vm11, %v20184_v56, %v5422_v48  ;;  %v6820_v8 = vrot.slane %v6818_v0, 1  ;;  %v5457_v47 = vor.u32 %v5455_v34, %v5454_v54  ;;  %v5459_v21 = vrot.slane %v5454_v54, 4  ;;  %5941 = vst.msk [vmem:[#allocation3 + $0x260] sm:$0xf] %vm3853_vm8, %v5432_v63  ;;  %v13930_v41 = vld [vmem:[#allocation3 + $0x10c] sm:$0xff]   ;;  %v20185_v26 = vld [vmem:[#allocation10_spill] sm:$0xff] }
 0x50f   : > { %v5492_v14 = vor.u32 %v5490_v45, %v5489_v39  ;;  %v5494_v62 = vrot.slane %v5489_v39, 4  ;;  %5940 = vst.msk [vmem:[#allocation3 + $0x25c] sm:$0xf] %vm3853_vm8, %v5423_v49  ;;  %v7889_v40 = vsel %vm1596_vm1, %v13930_v41, %v20185_v26  ;;  %v6068_v46 = vld [vmem:[#allocation3 + $0x208] sm:$0xf]  ;;  %v7658_v50 = vrot.slane %v11571_v19, 1  ;;  %v17764_v39 = vpop.permute.xlu0 %7362 }
 0x510   : > { %v6821_v4 = vsel %vm1161_vm14, %v6816_v37, %v6820_v8  ;;  %v7659_v1 = vrot.slane %v17739_v31, 1  ;;  %v6144_v59 = vld [vmem:[#allocation3 + $0xc8] sm:$0xe]  ;;  %v6161_v48 = vld [vmem:[#allocation3 + $0x21c] sm:$0xe]  ;;  %v20186_v34 = vrot.slane %v17631_v33, 4  ;;  %v5467_v16 = vsel %vm14086_vm11, %v5459_v21, %v17616_v10  ;;  %v17766_v33 = vpop.permute.xlu1 %7374 }
 0x511   : > { %v5493_v0 = vsel %vm14086_vm11, %v20187_v2, %v5492_v14  ;;  %v5502_v54 = vsel %vm14086_vm11, %v5494_v62, %v17604_v42  ;;  %7330 = vrot.lane.b32.xlu0 %v6821_v4, %s13958_s15  ;;  %5950 = vst.msk [vmem:[#allocation3 + $0x274] sm:$0xf] %vm3853_vm8, %v5467_v16  ;;  %v6822_v17 = vshrl.u32 %v17696_v20, 16  ;;  %v6826_v28 = vshll.u32 %v17728_v23, 16  ;;  %v20188_v19 = vld [vmem:[#allocation9_spill] sm:$0xff]  ;;  %v17782_v37 = vld [vmem:[#allocation3 + $0x224] sm:$0xff]  }
 0x512   : > { %v5458_v45 = vsel %vm14086_vm11, %v20186_v34, %v5457_v47  ;;  %5958 = vst.msk [vmem:[#allocation3 + $0x284] sm:$0xf] %vm3853_vm8, %v5493_v0  ;;  %5959 = vst.msk [vmem:[#allocation3 + $0x288] sm:$0xf] %vm3853_vm8, %v5502_v54  ;;  %v7660_v10 = vsel %vm1468_vm13, %v7658_v50, %v7659_v1  ;;  %v7661_v42 = vrot.slane %v17741_v25, 1  ;;  %v17779_v56 = vsel %vm2358_vm4, %v7889_v40, %v20188_v19 }
 0x513   : > { %5949 = vst.msk [vmem:[#allocation3 + $0x270] sm:$0xf] %vm3853_vm8, %v5458_v45  ;;  %7802 = vrot.lane.b32.xlu1 %v7660_v10, %s13960_s17  ;;  %20189 = vst [vmem:[#allocation26_spill] sm:$0xff] %v17779_v56  ;;  %v11555_v49 = vcombine.low %v6144_v59, %v17672_v57  ;;  %v6073_v63 = vld [vmem:[#allocation3 + $0x220] sm:$0xf]  ;;  %v6824_v47 = vor.u32 %v6822_v17, %v6820_v8  ;;  %v6828_v21 = vrot.slane %v6826_v28, 1  ;;  %13177 = vmatmul.mubr.msk.bf16.gmra.mrb[68].mxu1 %vm8122_vm6, %v17779_v56  ;;  %v17810_v2 = vpop.permute.xlu0 %7314 }
 0x514   : > { %v7579_v14 = vrot.slane %v17696_v20, 1  ;;  %v11572_v62 = vcombine.low %v6161_v48, %v6073_v63  ;;  %v17787_v41 = vld [vmem:[#allocation3 + $0xe0] sm:$0xf]  ;;  %v17789_v26 = vcombine.low %v6068_v46, %v6069_v43  ;;  %v7664_v40 = vrot.slane %v17782_v37, 1  ;;  %v17797_v8 = vld [vmem:[#allocation3 + $0xe4] sm:$0xff]   ;;  %v17812_v0 = vpop.permute.xlu1 %7376 }
 0x515   : > { %v7578_v4 = vrot.slane %v11555_v49, 1  ;;  %v20190_v57 = vld [vmem:[#allocation19_spill] sm:$0xff]  ;;  %v17795_v59 = vld [vmem:[#allocation3 + $0x22c] ss:$0 sps:$4 sm:$0x11]   ;;  %v6829_v34 = vsel %vm1161_vm14, %v6824_v47, %v6828_v21  ;;  %v7662_v45 = vsel %vm1468_vm13, %v7659_v1, %v7661_v42  ;;  %v7581_v28 = vrot.slane %v17728_v23, 1 }
 0x516   : > { %v7891_v50 = vsel %vm1596_vm1, %v20190_v57, %v17497_v38  ;;  %v7663_v48 = vrot.slane %v11572_v62, 1  ;;  %7332 = vrot.lane.b32.xlu0 %v6829_v34, %s13958_s15  ;;  %v20192_v46 = vld [vmem:[#allocation20_spill] sm:$0xff]  ;;  %v6008_v16 = vld [vmem:[#allocation3 + $0xdc] sm:$0xf]  ;;  %v7666_v19 = vrot.slane %v17795_v59, 1  ;;  %v6838_v49 = vshll.u32 %v17797_v8, 16 }
 0x517   : > { %v17803_v43 = vsel %vm2358_vm4, %v7891_v50, %v17393_v51  ;;  %7804 = vrot.lane.b32.xlu1 %v7662_v45, %s13960_s17  ;;  %v7895_v38 = vsel %vm1596_vm1, %v20192_v46, %v17540_v52  ;;  %v17817_v1 = vld [vmem:[%s19870_s6 + $0x20] ss:$0 sps:$4 sm:$0xff]   ;;  %v13931_v51 = vld [vmem:[#allocation3 + $0x120] sm:$0xff]   ;;  %v7580_v10 = vsel %vm1468_vm13, %v7578_v4, %v7579_v14  ;;  %v6072_v17 = vld [vmem:[#allocation3 + $0x21c] sm:$0xf]  ;;  %v17826_v52 = vcombine.low %v6008_v16, %v17787_v41 }
 0x518   : > { %20191 = vst [vmem:[#allocation31_spill] sm:$0xff] %v17803_v43  ;;  %v7893_v54 = vsel %vm1596_vm1, %v13931_v51, %v17213_v55  ;;  %13180 = vmatprep.mubr.msk.bf16.mxu1 %vm8122_vm6, %v17803_v43  ;;  %v7665_v42 = vsel %vm1468_vm13, %v7663_v48, %v7664_v40  ;;  %v17833_v55 = vsel %vm2358_vm4, %v7895_v38, %v17454_v29  ;;  %v7131_v47 = vshrl.u32 %v17789_v26, 16  ;;  %v17850_v34 = vld [vmem:[#allocation3 + $0xec] ss:$0 sps:$4 sm:$0x11]   ;;  %v17861_v51 = vpop.permute.xlu1 %7786 }
 0x519   : > { %20193 = vst [vmem:[#allocation17_spill] sm:$0xff] %v17833_v55  ;;  %13714 = vmatprep.subr.msk.bf16.mxu1 %vm8251_vm3, %v17817_v1  ;;  %v6833_v23 = vshll.u32 %v17826_v52, 16  ;;  %v7133_v21 = vshll.u32 %v17789_v26, 16  ;;  %v7138_v62 = vshll.u32 %v17739_v31, 16  ;;  %v17842_v4 = vcombine.low %v6072_v17, %v6073_v63  ;;  %v20205_v43 = vld [vmem:[#allocation36_spill] sm:$0xff] }
 0x51a   : > { %7738 = vrot.lane.b32.xlu0 %v7580_v10, %s13960_s17  ;;  %v17847_v29 = vsel %vm2358_vm4, %v7893_v54, %v17121_v32  ;;  %v6831_v57 = vshrl.u32 %v17826_v52, 16  ;;  %v6840_v50 = vrot.slane %v6838_v49, 1  ;;  %v7142_v63 = vshrl.u32 %v17739_v31, 16  ;;  %v13932_v49 = vld [vmem:[#allocation3 + $0x134] sm:$0xff]   ;;  %v6166_v56 = vld [vmem:[#allocation3 + $0x280] sm:$0xe] }
 0x51b   : > { %7806 = vrot.lane.b32.xlu1 %v7665_v42, %s13960_s17  ;;  %20194 = vst [vmem:[#allocation10_spill] sm:$0xff] %v17847_v29  ;;  %13181 = vmatmul.mubr.msk.bf16.gmra.mrb[72].mxu1 %vm8122_vm6, %v17847_v29  ;;  %v6835_v45 = vrot.slane %v6833_v23, 1  ;;  %v7135_v48 = vrot.slane %v7133_v21, 1  ;;  %v7140_v46 = vrot.slane %v7138_v62, 1  ;;  %v7582_v38 = vsel %vm1468_vm13, %v7579_v14, %v7581_v28  ;;  %v17859_v16 = vpop.permute.xlu0 %7366  ;;  %v6145_v14 = vld [vmem:[#allocation3 + $0xdc] sm:$0xe] }
 0x51c   : > { %13184 = vmatprep.mubr.msk.bf16.mxu1 %vm8122_vm6, %v17833_v55  ;;  %v7146_v32 = vshll.u32 %v17741_v25, 16  ;;  %v7667_v54 = vsel %vm1468_vm13, %v7664_v40, %v7666_v19  ;;  %v6842_v42 = vshrl.u32 %v17797_v8, 16  ;;  %v7897_v23 = vsel %vm1596_vm1, %v13932_v49, %v17253_v12  ;;  %v6088_v19 = vld [vmem:[#allocation3 + $0x26c] sm:$0xf]  ;;  %v20195_v12 = vld [vmem:[#allocation23_spill] sm:$0xff] }
 0x51d   : > { %v6836_v10 = vor.u32 %v6835_v45, %v6831_v57  ;;  %v7136_v17 = vor.u32 %v7135_v48, %v7131_v47  ;;  %v6846_v25 = vshll.u32 %v17850_v34, 16  ;;  %v7144_v21 = vor.u32 %v7142_v63, %v7140_v46  ;;  %v13934_v29 = vld [vmem:[#allocation3 + $0x15c] sm:$0xff]  }
 0x51e   : > { %7740 = vrot.lane.b32.xlu0 %v7582_v38, %s13960_s17  ;;  %v6844_v28 = vor.u32 %v6842_v42, %v6840_v50  ;;  %v11556_v62 = vcombine.low %v6145_v14, %v17787_v41  ;;  %v7153_v40 = vshll.u32 %v17842_v4, 16  ;;  %v7148_v47 = vrot.slane %v7146_v32, 1  ;;  %v17877_v38 = vld [vmem:[#allocation3 + $0x270] sm:$0xf] }
 0x51f   : > { %7808 = vrot.lane.b32.xlu1 %v7667_v54, %s13960_s17  ;;  %v7151_v57 = vshrl.u32 %v17842_v4, 16  ;;  %v7158_v45 = vshll.u32 %v17782_v37, 16  ;;  %v7899_v48 = vsel %vm1596_vm1, %v20195_v12, %v17637_v58  ;;  %v6841_v54 = vsel %vm1161_vm14, %v6836_v10, %v6840_v50  ;;  %v17893_v14 = vpop.permute.xlu1 %7788 }
 0x520   : > { %v7141_v63 = vsel %vm1161_vm14, %v7136_v17, %v7140_v46  ;;  %v7155_v42 = vrot.slane %v7153_v40, 1  ;;  %v17883_v41 = vsel %vm2358_vm4, %v7899_v48, %v17583_v18  ;;  %v6848_v49 = vrot.slane %v6846_v25, 1  ;;  %v6092_v48 = vld [vmem:[#allocation3 + $0x280] sm:$0xf] }
 0x521   : > { %20196 = vst [vmem:[#allocation9_spill] sm:$0xff] %v17883_v41  ;;  %v17885_v32 = vpop.permute.xlu0 %7316  ;;  %v17891_v58 = vsel %vm2358_vm4, %v7897_v23, %v17181_v53  ;;  %v7583_v50 = vrot.slane %v11556_v62, 1  ;;  %v7584_v18 = vrot.slane %v17797_v8, 1  ;;  %v17899_v46 = vcombine.low %v6088_v19, %v17877_v38  ;;  %v20199_v62 = vld [vmem:[#allocation25_spill] sm:$0xff] }
 0x522   : > { %7334 = vrot.lane.b32.xlu0 %v6841_v54, %s13958_s15  ;;  %20197 = vst [vmem:[#allocation19_spill] sm:$0xff] %v17891_v58  ;;  %v6849_v10 = vsel %vm1161_vm14, %v6844_v28, %v6848_v49  ;;  %v7160_v17 = vrot.slane %v7158_v45, 1  ;;  %v7162_v53 = vshrl.u32 %v17782_v37, 16  ;;  %v7166_v23 = vshll.u32 %v17795_v59, 16  ;;  %v17911_v54 = vld [vmem:[#allocation3 + $0x284] sm:$0xf] }
 0x523   : > { %7394 = vrot.lane.b32.xlu1 %v7141_v63, %s13958_s15  ;;  %13185 = vmatmul.mubr.msk.bf16.gmra.mrb[76].mxu1 %vm8122_vm6, %v17891_v58  ;;  %20198 = vst [vmem:[#allocation20_spill] sm:$0xff] %v17899_v46  ;;  %v7149_v25 = vsel %vm1161_vm14, %v7144_v21, %v7148_v47  ;;  %v7156_v40 = vor.u32 %v7155_v42, %v7151_v57  ;;  %v7233_v19 = vshll.u32 %v17899_v46, 16  ;;  %v6162_v45 = vld [vmem:[#allocation3 + $0x230] sm:$0xe]  ;;  %v13933_v59 = vld [vmem:[#allocation3 + $0x148] sm:$0xff]   ;;  %v20200_v63 = vld [vmem:[#allocation18_spill] sm:$0xff] }
 0x524   : > { %13188 = vmatprep.mubr.msk.bf16.mxu1 %vm8122_vm6, %v17883_v41  ;;  %v7903_v12 = vsel %vm1596_vm1, %v20199_v62, %v17674_v44  ;;  %v7901_v21 = vsel %vm1596_vm1, %v13933_v59, %v20200_v63  ;;  %v7585_v47 = vsel %vm1468_vm13, %v7583_v50, %v7584_v18  ;;  %v7586_v44 = vrot.slane %v17850_v34, 1  ;;  %v17921_v57 = vld [vmem:[#allocation3 + $0x274] sm:$0xff]   ;;  %v6165_v58 = vld [vmem:[#allocation3 + $0x26c] sm:$0xe] }
 0x525   : > { %v17913_v28 = vpop.permute.xlu0 %7722  ;;  %v7164_v42 = vor.u32 %v7162_v53, %v7160_v17  ;;  %v7168_v49 = vrot.slane %v7166_v23, 1  ;;  %v17925_v62 = vsel %vm2358_vm4, %v7903_v12, %v17609_v22  ;;  %v7161_v59 = vsel %vm1161_vm14, %v7156_v40, %v7160_v17  ;;  %v20203_v22 = vld [vmem:[#allocation12_spill] sm:$0xff]  ;;  %v17945_v23 = vld [vmem:[#allocation3 + $0x238] sm:$0xff]  }
 0x526   : > { %7336 = vrot.lane.b32.xlu0 %v6849_v10, %s13958_s15  ;;  %20201 = vst [vmem:[#allocation23_spill] sm:$0xff] %v17925_v62  ;;  %v6077_v10 = vld [vmem:[#allocation3 + $0x234] sm:$0xf]  ;;  %v17930_v41 = vpop.permute.xlu1 %7790  ;;  %v7231_v50 = vshrl.u32 %v17899_v46, 16  ;;  %v7235_v63 = vrot.slane %v7233_v19, 1  ;;  %v17940_v53 = vsel %vm2358_vm4, %v7901_v21, %v20203_v22  ;;  %v7238_v17 = vshll.u32 %v17921_v57, 16 }
 0x527   : > { %7396 = vrot.lane.b32.xlu1 %v7149_v25, %s13958_s15  ;;  %v17928_v25 = vcombine.low %v6092_v48, %v17911_v54  ;;  %v11573_v34 = vcombine.low %v6162_v45, %v6077_v10  ;;  %20204 = vst [vmem:[#allocation18_spill] sm:$0xff] %v17940_v53  ;;  %v17947_v40 = vld [vmem:[#allocation3 + $0x288] sm:$0xff]   ;;  %v7587_v19 = vsel %vm1468_vm13, %v7584_v18, %v7586_v44  ;;  %v17954_v45 = vld [vmem:[#allocation3 + $0x240] ss:$0 sps:$4 sm:$0x11]   ;;  %v7669_v46 = vrot.slane %v17945_v23, 1 }
 0x528   : > { %v11576_v48 = vcombine.low %v6165_v58, %v17877_v38  ;;  %v7169_v21 = vsel %vm1161_vm14, %v7164_v42, %v7168_v49  ;;  %v7905_v18 = vsel %vm1596_vm1, %v13934_v29, %v20205_v43  ;;  %v6163_v38 = vld [vmem:[#allocation3 + $0x244] sm:$0xe]  ;;  %v20206_v58 = vld [vmem:[#allocation29_spill] sm:$0xff]  ;;  %v17969_v49 = vrot.slane %v7238_v17, 1 }
 0x529   : > { %20202 = vst [vmem:[#allocation25_spill] sm:$0xff] %v17928_v25  ;;  %v17934_v55 = vpop.permute.xlu0 %7724  ;;  %v7253_v12 = vshll.u32 %v17928_v25, 16  ;;  %v7668_v22 = vrot.slane %v11573_v34, 1  ;;  %v7907_v44 = vsel %vm1596_vm1, %v20206_v58, %v17764_v39  ;;  %v7258_v34 = vshll.u32 %v17947_v40, 16 }
 0x52a   : > { %7742 = vrot.lane.b32.xlu0 %v7585_v47, %s13960_s17  ;;  %v7236_v47 = vor.u32 %v7235_v63, %v7231_v50  ;;  %v17967_v42 = vpop.permute.xlu1 %7792  ;;  %v7251_v50 = vshrl.u32 %v17928_v25, 16  ;;  %v7683_v29 = vrot.slane %v11576_v48, 1 }
 0x52b   : > { %7398 = vrot.lane.b32.xlu1 %v7161_v59, %s13958_s15  ;;  %13189 = vmatmul.mubr.msk.bf16.gmra.mrb[80].mxu1 %vm8122_vm6, %v17940_v53  ;;  %v6076_v59 = vld [vmem:[#allocation3 + $0x230] sm:$0xf]  ;;  %v7255_v63 = vrot.slane %v7253_v12, 1  ;;  %v7670_v17 = vsel %vm1468_vm13, %v7668_v22, %v7669_v46  ;;  %v17982_v12 = vsel %vm2358_vm4, %v7907_v44, %v17691_v36  ;;  %v11577_v36 = vcombine.low %v6166_v56, %v17911_v54  ;;  %v20208_v44 = vld [vmem:[#allocation32_spill] sm:$0xff]  ;;  %v6080_v54 = vld [vmem:[#allocation3 + $0x244] sm:$0xf] }
 0x52c   : > { %13192 = vmatprep.mubr.msk.bf16.mxu1 %vm8122_vm6, %v17925_v62  ;;  %v6081_v62 = vld [vmem:[#allocation3 + $0x248] sm:$0xf]  ;;  %v17973_v43 = vcombine.low %v6076_v59, %v6077_v10  ;;  %v7241_v39 = vsel %vm1161_vm14, %v7236_v47, %v17969_v49  ;;  %v20207_v10 = vld [vmem:[#allocation13_spill] sm:$0xff]  ;;  %v17992_v59 = vrot.slane %v7258_v34, 1 }
 0x52d   : > { %v17958_v53 = vpop.permute.xlu0 %7318  ;;  %v11574_v58 = vcombine.low %v6163_v38, %v6081_v62  ;;  %v17988_v48 = vsel %vm2358_vm4, %v7905_v18, %v20207_v10  ;;  %v7256_v47 = vor.u32 %v7255_v63, %v7251_v50  ;;  %v17994_v22 = vld [vmem:[#allocation3 + $0x24c] sm:$0xff]   ;;  %v17997_v38 = vld [vmem:[#allocation3 + $0x254] ss:$0 sps:$4 sm:$0x11]   ;;  %v13935_v10 = vld [vmem:[#allocation3 + $0x80] sm:$0xff]  }
 0x52e   : > { %7744 = vrot.lane.b32.xlu0 %v7587_v19, %s13960_s17  ;;  %v19971_v19 = vrot.slane %v17921_v57, 1  ;;  %v18012_v56 = vpop.permute.xlu1 %7378  ;;  %v7674_v34 = vrot.slane %v17994_v22, 1 }
 0x52f   : > { %7400 = vrot.lane.b32.xlu1 %v7169_v21, %s13958_s15  ;;  %v7671_v21 = vrot.slane %v17954_v45, 1  ;;  %v7673_v63 = vrot.slane %v11574_v58, 1  ;;  %v20209_v58 = vld [vmem:[#allocation30_spill] sm:$0xff] }
 0x530   : > { %v7685_v18 = vsel %vm1468_vm13, %v7683_v29, %v19971_v19  ;;  %v7861_v29 = vsel %vm1596_vm1, %v13935_v10, %v17885_v32  ;;  %v7261_v32 = vsel %vm1161_vm14, %v7256_v47, %v17992_v59  ;;  %v7688_v10 = vrot.slane %v11577_v36, 1 }
 0x531   : > { %v7321_v25 = vpop.permute.xlu0 %7320  ;;  %v19972_v19 = vrot.slane %v17947_v40, 1 }
 0x532   : > { %7414 = vrot.lane.b32.xlu0 %v7241_v39, %s13958_s15  ;;  %v7859_v39 = vsel %vm1596_vm1, %v20208_v44, %v17810_v2  ;;  %v7173_v2 = vshll.u32 %v17973_v43, 16  ;;  %v7911_v44 = vsel %vm1596_vm1, %v20209_v58, %v17859_v16  ;;  %v7675_v16 = vsel %vm1468_vm13, %v7673_v63, %v7674_v34 }
 0x533   : > { %7810 = vrot.lane.b32.xlu1 %v7670_v17, %s13960_s17  ;;  %13193 = vmatmul.mubr.msk.bf16.gmra.mrb[84].mxu1 %vm8122_vm6, %v17988_v48  ;;  %v7672_v17 = vsel %vm1468_vm13, %v7669_v46, %v7671_v21  ;;  %v18010_v50 = vsel %vm2358_vm4, %v7859_v39, %v17913_v28  ;;  %v13936_v21 = vld [vmem:[#allocation3 + $0x170] sm:$0xff]   ;;  %v18029_v39 = vsel %vm2358_vm4, %v7861_v29, %v17934_v55  ;;  %v7171_v55 = vshrl.u32 %v17973_v43, 16 }
 0x534   : > { %13196 = vmatprep.mubr.msk.bf16.mxu1 %vm8122_vm6, %v17982_v12  ;;  %13012 = vmatprep.mubr.msk.bf16.mxu0 %vm8122_vm6, %v18010_v50  ;;  %v7909_v28 = vsel %vm1596_vm1, %v13936_v21, %v17501_v13  ;;  %20210 = vst [vmem:[#allocation12_spill] sm:$0xff] %v18029_v39  ;;  %v7676_v13 = vrot.slane %v17997_v38, 1  ;;  %v7175_v29 = vrot.slane %v7173_v2, 1  ;;  %v18044_v47 = vsel %vm2358_vm4, %v7911_v44, %v17719_v15 }
 0x535   : > { %v7727_v46 = vpop.permute.xlu0 %7726  ;;  %13013 = vmatmul.mubr.msk.bf16.gmra.mrb[52].mxu0 %vm8122_vm6, %v18029_v39  ;;  %20211 = vst [vmem:[#allocation36_spill] sm:$0xff] %v18044_v47  ;;  %v18050_v36 = vsel %vm2358_vm4, %v7909_v28, %v17395_v6  ;;  %v7182_v21 = vshrl.u32 %v17945_v23, 16  ;;  %v7186_v6 = vshll.u32 %v17954_v45, 16  ;;  %v20213_v28 = vld [vmem:[#allocation34_spill] sm:$0xff]  ;;  %v13938_v45 = vld [vmem:[#allocation3 + $0x184] sm:$0xff]   ;;  %v20230_v39 = vrot.slane %v17921_v57, 1 }
 0x536   : > { %7822 = vrot.lane.b32.xlu0 %v7685_v18, %s13960_s17  ;;  %v18037_v18 = vcombine.low %v6080_v54, %v6081_v62  ;;  %20212 = vst [vmem:[#allocation29_spill] sm:$0xff] %v18050_v36  ;;  %v18052_v62 = vpop.permute.xlu1 %7380  ;;  %v7690_v54 = vsel %vm1468_vm13, %v7688_v10, %v19972_v19  ;;  %v7677_v63 = vsel %vm1468_vm13, %v7674_v34, %v7676_v13  ;;  %v13937_v34 = vld [vmem:[#allocation3 + $0x94] sm:$0xff]   ;;  %v7242_v19 = vshrl.u32 %v17921_v57, 16 }
 0x537   : > { %7812 = vrot.lane.b32.xlu1 %v7672_v17, %s13960_s17  ;;  %v7178_v17 = vshll.u32 %v17945_v23, 16  ;;  %v7863_v58 = vsel %vm1596_vm1, %v20213_v28, %v17958_v53  ;;  %v7176_v44 = vor.u32 %v7175_v29, %v7171_v55  ;;  %v7865_v10 = vsel %vm1596_vm1, %v13937_v34, %v7321_v25 }
 0x538   : > { %v18070_v13 = vsel %vm2358_vm4, %v7863_v58, %v7727_v46  ;;  %v7913_v53 = vsel %vm1596_vm1, %v13938_v45, %v17554_v60  ;;  %v7188_v46 = vrot.slane %v7186_v6, 1  ;;  %v7191_v55 = vshrl.u32 %v18037_v18, 16  ;;  %v6085_v6 = vld [vmem:[#allocation3 + $0x25c] sm:$0xf] }
 0x539   : > { %v7729_v15 = vpop.permute.xlu0 %7728  ;;  %v7180_v2 = vrot.slane %v7178_v17, 1  ;;  %20214 = vst [vmem:[#allocation13_spill] sm:$0xff] %v18070_v13  ;;  %13016 = vmatprep.mubr.msk.bf16.mxu0 %vm8122_vm6, %v18070_v13  ;;  %v7198_v60 = vshll.u32 %v17994_v22, 16  ;;  %v18094_v28 = vsel %vm2358_vm4, %v7913_v53, %v17463_v7  ;;  %v9379_v58 = vsel %vm8251_vm3, %v17817_v1, 0  ;;  %v6164_v1 = vld [vmem:[#allocation3 + $0x258] sm:$0xe] }
 0x53a   : > { %7418 = vrot.lane.b32.xlu0 %v7261_v32, %s13958_s15  ;;  %v7193_v32 = vshll.u32 %v18037_v18, 16  ;;  %v18075_v17 = vsel %vm2358_vm4, %v7865_v10, %v7729_v15  ;;  %v18085_v29 = vpop.permute.xlu1 %7382  ;;  %20217 = vst [vmem:[#allocation30_spill] sm:$0xff] %v18094_v28  ;;  %v7206_v7 = vshll.u32 %v17997_v38, 16  ;;  %13255 = vmatpush3.bf16.msra.mxu1 %v9379_v58 }
 0x53b   : > { %7814 = vrot.lane.b32.xlu1 %v7675_v16, %s13960_s17  ;;  %13197 = vmatmul.mubr.msk.bf16.gmra.mrb[88].mxu1 %vm8122_vm6, %v18050_v36  ;;  %20215 = vst [vmem:[#allocation32_spill] sm:$0xff] %v18075_v17  ;;  %v20216_v16 = vld [vmem:[#allocation24_spill] sm:$0xff]  ;;  %v7200_v34 = vrot.slane %v7198_v60, 1  ;;  %v20220_v60 = vld [vmem:[#allocation14_spill] sm:$0xff] }
 0x53c   : > { %13200 = vmatprep.mubr.msk.bf16.mxu1 %vm8122_vm6, %v18044_v47  ;;  %v7915_v25 = vsel %vm1596_vm1, %v20216_v16, %v17693_v27  ;;  %v7195_v15 = vrot.slane %v7193_v32, 1  ;;  %v6084_v27 = vld [vmem:[#allocation3 + $0x258] sm:$0xf]  ;;  %v20219_v16 = vld [vmem:[#allocation16_spill] sm:$0xff] }
 0x53d   : > { %13017 = vmatmul.mubr.msk.bf16.gmra.mrb[56].mxu0 %vm8122_vm6, %v18075_v17  ;;  %v18109_v10 = vcombine.low %v6084_v27, %v6085_v6  ;;  %v7919_v38 = vsel %vm1596_vm1, %v20219_v16, %v17766_v33 }
 0x53e   : > { %7826 = vrot.lane.b32.xlu0 %v7690_v54, %s13960_s17  ;;  %v7181_v54 = vsel %vm1161_vm14, %v7176_v44, %v7180_v2  ;;  %v7196_v32 = vor.u32 %v7195_v15, %v7191_v55  ;;  %v18112_v45 = vpop.permute.xlu1 %7384 }
 0x53f   : > { %7816 = vrot.lane.b32.xlu1 %v7677_v63, %s13960_s17  ;;  %v7184_v63 = vor.u32 %v7182_v21, %v7180_v2  ;;  %v18102_v2 = vsel %vm2358_vm4, %v7915_v25, %v17587_v30  ;;  %v7202_v21 = vshrl.u32 %v17994_v22, 16  ;;  %v13939_v30 = vld [vmem:[#allocation3 + $0x198] sm:$0xff]   ;;  %v18119_v25 = vld [vmem:[#allocation3 + $0x260] sm:$0xff]   ;;  %v7213_v15 = vshll.u32 %v18109_v10, 16 }
 0x540   : > { %20218 = vst [vmem:[#allocation34_spill] sm:$0xff] %v18102_v2  ;;  %v7917_v53 = vsel %vm1596_vm1, %v13939_v30, %v17721_v11  ;;  %v7201_v55 = vsel %vm1161_vm14, %v7196_v32, %v7200_v34  ;;  %v20221_v11 = vld [vmem:[#allocation22_spill] sm:$0xff]  ;;  %v13907_v30 = vld [vmem:[#allocation3 + $0x268] ss:$0 sps:$4 sm:$0x11]  }
 0x541   : > { %v7189_v44 = vsel %vm1161_vm14, %v7184_v63, %v7188_v46  ;;  %v11575_v46 = vcombine.low %v6164_v1, %v6085_v6  ;;  %v7208_v63 = vrot.slane %v7206_v7, 1  ;;  %v18126_v27 = vsel %vm2358_vm4, %v7917_v53, %v20220_v60  ;;  %v20222_v53 = vld [vmem:[#allocation5_spill] sm:$0xff] }
 0x542   : > { %v18132_v33 = vsel %vm2358_vm4, %v7919_v38, %v20221_v11  ;;  %v7218_v7 = vshll.u32 %v18119_v25, 16  ;;  %v7215_v1 = vrot.slane %v7213_v15, 1  ;;  %v7923_v16 = vsel %vm1596_vm1, %v20222_v53, %v18012_v56  ;;  %v13940_v38 = vld [vmem:[#allocation3 + $0x1ac] sm:$0xff]  }
 0x543   : > { %7402 = vrot.lane.b32.xlu1 %v7181_v54, %s13958_s15  ;;  %13201 = vmatmul.mubr.msk.bf16.gmra.mrb[92].mxu1 %vm8122_vm6, %v18094_v28  ;;  %v7204_v54 = vor.u32 %v7202_v21, %v7200_v34  ;;  %v7678_v58 = vrot.slane %v11575_v46, 1  ;;  %v7679_v21 = vrot.slane %v18119_v25, 1  ;;  %v7211_v34 = vshrl.u32 %v18109_v10, 16 }
 0x544   : > { %13204 = vmatprep.mubr.msk.bf16.mxu1 %vm8122_vm6, %v18102_v2  ;;  %v7921_v46 = vsel %vm1596_vm1, %v13940_v38, %v17812_v0  ;;  %v18155_v11 = vsel %vm2358_vm4, %v7923_v16, %v17861_v51  ;;  %v7226_v56 = vshll.u32 %v13907_v30, 16  ;;  %v18169_v51 = vld [vmem:[#allocation3 + $0x27c] ss:$0 sps:$4 sm:$0x11]  }
 0x545   : > { %v7209_v32 = vsel %vm1161_vm14, %v7204_v54, %v7208_v63  ;;  %v7680_v60 = vsel %vm1468_vm13, %v7678_v58, %v7679_v21  ;;  %v7220_v54 = vrot.slane %v7218_v7, 1  ;;  %v7216_v15 = vor.u32 %v7215_v1, %v7211_v34  ;;  %v20223_v58 = vld [vmem:[#allocation15_spill] sm:$0xff] }
 0x546   : > { %v18161_v0 = vsel %vm2358_vm4, %v7921_v46, %v17676_v5  ;;  %v7228_v38 = vrot.slane %v7226_v56, 1  ;;  %v3868_v46 = vld [vmem:[#allocation3] sm:$0x1] }
 0x547   : > { %7404 = vrot.lane.b32.xlu1 %v7189_v44, %s13958_s15  ;;  %v7221_v5 = vsel %vm1161_vm14, %v7216_v15, %v7220_v54 }
 0x549   : > { %v18138_v44 = vpop.permute.xlu1 %7794 }
 0x54b   : > { %7406 = vrot.lane.b32.xlu1 %v7201_v55, %s13958_s15  ;;  %13205 = vmatmul.mubr.msk.bf16.gmra.mrb[96].mxu1 %vm8122_vm6, %v18126_v27  ;;  %v7323_v6 = vpop.permute.xlu0 %7322 }
 0x54c   : > { %13208 = vmatprep.mubr.msk.bf16.mxu1 %vm8122_vm6, %v18132_v33  ;;  %v7867_v7 = vsel %vm1596_vm1, %v20223_v58, %v7323_v6  ;;  %v20225_v6 = vld [vmem:[#allocation6_spill] sm:$0xff]  ;;  %v3869_v58 = vsel %vm14061_vm9, 0, %v3868_v46 }
 0x54d   : > { %3870 = vst [vmem:[#allocation3] sm:$0x1] %v3869_v58 }
 0x54f   : > { %7408 = vrot.lane.b32.xlu1 %v7209_v32, %s13958_s15  ;;  %v7325_v55 = vpop.permute.xlu0 %7324  ;;  %v7222_v32 = vshrl.u32 %v18119_v25, 16 }
 0x550   : > { %v18151_v63 = vpop.permute.xlu1 %7796 }
 0x551   : > { %v7224_v16 = vor.u32 %v7222_v32, %v7220_v54  ;;  %v13942_v54 = vld [vmem:[#allocation3 + $0xa8] sm:$0xff]  }
 0x552   : > { %v7869_v32 = vsel %vm1596_vm1, %v13942_v54, %v7325_v55  ;;  %v18211_v54 = vld [vmem:[#allocation3 + $0x8] sm:$0xff]  }
 0x553   : > { %7818 = vrot.lane.b32.xlu1 %v7680_v60, %s13960_s17  ;;  %13209 = vmatmul.mubr.msk.bf16.gmra.mrb[100].mxu1 %vm8122_vm6, %v18161_v0  ;;  %v7731_v34 = vpop.permute.xlu0 %7730  ;;  %v7927_v60 = vsel %vm1596_vm1, %v20225_v6, %v18085_v29  ;;  %v7246_v29 = vshll.u32 %v18169_v51, 16 }
 0x554   : > { %13212 = vmatprep.mubr.msk.bf16.mxu1 %vm8122_vm6, %v18155_v11  ;;  %v18172_v1 = vsel %vm2358_vm4, %v7867_v7, %v7731_v34  ;;  %v18174_v53 = vpop.permute.xlu1 %7798  ;;  %v3971_v7 = vld [vmem:[#allocation3 + $0x10] sm:$0x1]  ;;  %v13941_v34 = vld [vmem:[#allocation3 + $0x1c0] sm:$0xff]   ;;  %v18200_v55 = vsel %vm2358_vm4, %v7927_v60, %v17930_v41  ;;  %v7244_v41 = vor.u32 %v7242_v19, %v17969_v49 }
 0x555   : > { %20224 = vst [vmem:[#allocation24_spill] sm:$0xff] %v18172_v1  ;;  %13020 = vmatprep.mubr.msk.bf16.mxu0 %vm8122_vm6, %v18172_v1  ;;  %v7925_v15 = vsel %vm1596_vm1, %v13941_v34, %v18052_v62  ;;  %v7229_v62 = vsel %vm1161_vm14, %v7224_v16, %v7228_v38  ;;  %v7681_v34 = vrot.slane %v13907_v30, 1  ;;  %v7248_v30 = vrot.slane %v7246_v29, 1  ;;  %v18216_v16 = vld [vmem:[#allocation3 + $0x290] ss:$0 sps:$4 sm:$0x11]  }
 0x556   : > { %v18207_v58 = vsel %vm2358_vm4, %v7925_v15, %v17893_v14  ;;  %v5965_v60 = vld [vmem:[#allocation3 + $0x4] sm:$0xf]  ;;  %v20227_v15 = vld [vmem:[#allocation37_spill] sm:$0xff] }
 0x557   : > { %7410 = vrot.lane.b32.xlu1 %v7221_v5, %s13958_s15  ;;  %v7733_v56 = vpop.permute.xlu0 %7732  ;;  %v3972_v5 = vsel %vm14073_vm10, 0, %v3971_v7  ;;  %v7682_v14 = vsel %vm1468_vm13, %v7679_v21, %v7681_v34  ;;  %v7249_v1 = vsel %vm1161_vm14, %v7244_v41, %v7248_v30  ;;  %v7686_v21 = vrot.slane %v18169_v51, 1  ;;  %v20229_v51 = vld [vmem:[#allocation40_spill] sm:$0xff] }
 0x558   : > { %v18193_v6 = vsel %vm2358_vm4, %v7869_v32, %v7733_v56  ;;  %v18195_v46 = vpop.permute.xlu1 %7800  ;;  %3973 = vst [vmem:[#allocation3 + $0x10] sm:$0x1] %v3972_v5  ;;  %v5964_v56 = vld [vmem:[#allocation3] sm:$0xf]  ;;  %v7262_v34 = vshrl.u32 %v17947_v40, 16 }
 0x559   : > { %20226 = vst [vmem:[#allocation16_spill] sm:$0xff] %v18193_v6  ;;  %13021 = vmatmul.mubr.msk.bf16.gmra.mrb[60].mxu0 %vm8122_vm6, %v18193_v6  ;;  %v6134_v5 = vld [vmem:[#allocation3] sm:$0xe]  ;;  %v18226_v29 = vcombine.low %v5964_v56, %v5965_v60  ;;  %v6618_v6 = vshll.u32 %v18211_v54, 16 }
 0x55b   : > { %7412 = vrot.lane.b32.xlu1 %v7229_v62, %s13958_s15  ;;  %13213 = vmatmul.mubr.msk.bf16.gmra.mrb[104].mxu1 %vm8122_vm6, %v18207_v58  ;;  %v7327_v7 = vpop.permute.xlu0 %7326  ;;  %v13943_v62 = vld [vmem:[#allocation3 + $0x1d4] sm:$0xff]   ;;  %20228 = vst [vmem:[#allocation14_spill] sm:$0xff] %v18226_v29  ;;  %v6613_v56 = vshll.u32 %v18226_v29, 16 }
 0x55c   : > { %13216 = vmatprep.mubr.msk.bf16.mxu1 %vm8122_vm6, %v18200_v55  ;;  %v7387_v38 = vpop.permute.xlu1 %7386  ;;  %v7929_v49 = vsel %vm1596_vm1, %v13943_v62, %v18112_v45  ;;  %v6611_v45 = vshrl.u32 %v18226_v29, 16  ;;  %v11545_v62 = vcombine.low %v6134_v5, %v5965_v60  ;;  %v7871_v30 = vsel %vm1596_vm1, %v20229_v51, %v7327_v7  ;;  %v13944_v29 = vld [vmem:[#allocation3 + $0x1e8] sm:$0xff]  }
 0x55d   : > { %v7931_v32 = vsel %vm1596_vm1, %v20227_v15, %v7387_v38  ;;  %v18242_v41 = vsel %vm2358_vm4, %v7929_v49, %v17967_v42  ;;  %v7687_v60 = vsel %vm1468_vm13, %v20230_v39, %v7686_v21  ;;  %v7529_v39 = vrot.slane %v18211_v54, 1 }
 0x55e   : > { %v18235_v15 = vsel %vm2358_vm4, %v7931_v32, %v18138_v44  ;;  %v6615_v44 = vrot.slane %v6613_v56, 1  ;;  %v6620_v32 = vrot.slane %v6618_v6, 1  ;;  %v7528_v56 = vrot.slane %v11545_v62, 1 }
 0x55f   : > { %7820 = vrot.lane.b32.xlu1 %v7682_v14, %s13960_s17  ;;  %v7329_v19 = vpop.permute.xlu0 %7328  ;;  %v7266_v14 = vshll.u32 %v18216_v16, 16  ;;  %v13913_v13 = vld [vmem:[#allocation3 + $0x10] ss:$0 sps:$4 sm:$0x11]  }
 0x560   : > { %v7389_v38 = vpop.permute.xlu1 %7388  ;;  %v6616_v6 = vor.u32 %v6615_v44, %v6611_v45  ;;  %v7691_v44 = vrot.slane %v18216_v16, 1 }
 0x561   : > { %v7268_v5 = vrot.slane %v7266_v14, 1  ;;  %v7933_v7 = vsel %vm1596_vm1, %v13944_v29, %v7389_v38  ;;  %v6622_v29 = vshrl.u32 %v18211_v54, 16  ;;  %v6626_v38 = vshll.u32 %v13913_v13, 16 }
 0x562   : > { %v6621_v51 = vsel %vm1161_vm14, %v6616_v6, %v6620_v32  ;;  %v18269_v45 = vsel %vm2358_vm4, %v7933_v7, %v18151_v63 }
 0x563   : > { %7416 = vrot.lane.b32.xlu1 %v7249_v1, %s13958_s15  ;;  %13217 = vmatmul.mubr.msk.bf16.gmra.mrb[108].mxu1 %vm8122_vm6, %v18242_v41  ;;  %v7735_v17 = vpop.permute.xlu0 %7734  ;;  %v7264_v1 = vor.u32 %v7262_v34, %v17992_v59  ;;  %v20231_v59 = vld [vmem:[#allocation39_spill] sm:$0xff]  ;;  %v6624_v63 = vor.u32 %v6622_v29, %v6620_v32 }
 0x564   : > { %13220 = vmatprep.mubr.msk.bf16.mxu1 %vm8122_vm6, %v18235_v15  ;;  %v18255_v42 = vsel %vm2358_vm4, %v7871_v30, %v7735_v17  ;;  %v7391_v49 = vpop.permute.xlu1 %7390  ;;  %v13945_v34 = vld [vmem:[#allocation3 + $0xbc] sm:$0xff]   ;;  %7290 = vrot.lane.b32.xlu0 %v6621_v51, %s13958_s15 }
 0x565   : > { %13024 = vmatprep.mubr.msk.bf16.mxu0 %vm8122_vm6, %v18255_v42  ;;  %v7935_v21 = vsel %vm1596_vm1, %v20231_v59, %v7391_v49  ;;  %v7873_v17 = vsel %vm1596_vm1, %v13945_v34, %v7329_v19  ;;  %v7269_v30 = vsel %vm1161_vm14, %v7264_v1, %v7268_v5  ;;  %v6628_v49 = vrot.slane %v6626_v38, 1  ;;  %v13946_v5 = vld [vmem:[#allocation3 + $0x1fc] sm:$0xff]  }
 0x566   : > { %v18279_v19 = vsel %vm2358_vm4, %v7935_v21, %v18174_v53  ;;  %v20232_v53 = vrot.slane %v17947_v40, 1 }
 0x567   : > { %7824 = vrot.lane.b32.xlu1 %v7687_v60, %s13960_s17  ;;  %v7530_v60 = vsel %vm1468_vm13, %v7528_v56, %v7529_v39  ;;  %v6629_v6 = vsel %vm1161_vm14, %v6624_v63, %v6628_v49  ;;  %v7531_v56 = vrot.slane %v13913_v13, 1 }
 0x568   : > { %7698 = vrot.lane.b32.xlu0 %v7530_v60, %s13960_s17  ;;  %v7692_v16 = vsel %vm1468_vm13, %v20232_v53, %v7691_v44 }
 0x569   : > { %v7737_v14 = vpop.permute.xlu0 %7736  ;;  %v7532_v59 = vsel %vm1468_vm13, %v7529_v39, %v7531_v56 }
 0x56a   : > { %v18272_v62 = vsel %vm2358_vm4, %v7873_v17, %v7737_v14 }
 0x56b   : > { %13025 = vmatmul.mubr.msk.bf16.gmra.mrb[64].mxu0 %vm8122_vm6, %v18272_v62  ;;  %7420 = vrot.lane.b32.xlu1 %v7269_v30, %s13958_s15 }
 0x56c   : > { %13221 = vmatmul.mubr.msk.bf16.gmra.mrb[112].mxu1 %vm8122_vm6, %v18269_v45 }
 0x56d   : > { %13224 = vmatprep.mubr.msk.bf16.mxu1 %vm8122_vm6, %v18279_v19 }
 0x56e   : > { %v7393_v1 = vpop.permute.xlu1 %7392 }
 0x56f   : > { %7828 = vrot.lane.b32.xlu1 %v7692_v16, %s13960_s17  ;;  %v7937_v7 = vsel %vm1596_vm1, %v13946_v5, %v7393_v1 }
 0x570   : > { %v18298_v32 = vsel %vm2358_vm4, %v7937_v7, %v18195_v46 }
 0x573   : > { %7292 = vrot.lane.b32.xlu1 %v6629_v6, %s13958_s15 }
 0x574   : > { %13225 = vmatmul.mubr.msk.bf16.gmra.mrb[116].mxu1 %vm8122_vm6, %v18298_v32 }
 0x577   : > { %7700 = vrot.lane.b32.xlu1 %v7532_v59, %s13960_s17 }
 0x583   : > { %v7331_v21 = vpop.permute.xlu0 %7330 }
 0x584   : > { %v7875_v13 = vsel %vm1596_vm1, %v17688_v35, %v7331_v21 }
 0x585   : > { %v7803_v34 = vpop.permute.xlu1 %7802 }
 0x588   : > { %v7333_v17 = vpop.permute.xlu0 %7332 }
 0x589   : > { %v7805_v14 = vpop.permute.xlu1 %7804  ;;  %v7877_v39 = vsel %vm1596_vm1, %v17696_v20, %v7333_v17 }
 0x58c   : > { %v7739_v51 = vpop.permute.xlu0 %7738 }
 0x58d   : > { %v7807_v29 = vpop.permute.xlu1 %7806  ;;  %v18308_v46 = vsel %vm2358_vm4, %v7875_v13, %v7739_v51 }
 0x58e   : > { %13028 = vmatprep.mubr.msk.bf16.mxu0 %vm8122_vm6, %v18308_v46 }
 0x590   : > { %v7741_v38 = vpop.permute.xlu0 %7740 }
 0x591   : > { %v7809_v30 = vpop.permute.xlu1 %7808  ;;  %v18315_v44 = vsel %vm2358_vm4, %v7877_v39, %v7741_v38  ;;  %v20235_v39 = vld [vmem:[#allocation31_spill] sm:$0xff] }
 0x592   : > { %13029 = vmatmul.mubr.msk.bf16.gmra.mrb[68].mxu0 %vm8122_vm6, %v18315_v44 }
 0x594   : > { %v7335_v35 = vpop.permute.xlu0 %7334 }
 0x595   : > { %v7395_v60 = vpop.permute.xlu1 %7394 }
 0x596   : > { %v7939_v63 = vsel %vm1596_vm1, %v17789_v26, %v7395_v60  ;;  %v7879_v26 = vsel %vm1596_vm1, %v17826_v52, %v7335_v35 }
 0x597   : > { %v18322_v49 = vsel %vm2358_vm4, %v7939_v63, %v7803_v34 }
 0x598   : > { %13228 = vmatprep.mubr.msk.bf16.mxu1 %vm8122_vm6, %v18322_v49  ;;  %v7337_v20 = vpop.permute.xlu0 %7336 }
 0x599   : > { %v7397_v53 = vpop.permute.xlu1 %7396  ;;  %v7881_v52 = vsel %vm1596_vm1, %v17797_v8, %v7337_v20  ;;  %v20236_v20 = vld [vmem:[#allocation10_spill] sm:$0xff] }
 0x59a   : > { %v7941_v16 = vsel %vm1596_vm1, %v17739_v31, %v7397_v53 }
 0x59b   : > { %v18329_v1 = vsel %vm2358_vm4, %v7941_v16, %v7805_v14  ;;  %v20233_v14 = vld [vmem:[#allocation21_spill] sm:$0xff] }
 0x59c   : > { %13229 = vmatmul.mubr.msk.bf16.gmra.mrb[120].mxu1 %vm8122_vm6, %v18329_v1  ;;  %v7743_v5 = vpop.permute.xlu0 %7742  ;;  %v20237_v16 = vld [vmem:[#allocation17_spill] sm:$0xff] }
 0x59d   : > { %v7399_v7 = vpop.permute.xlu1 %7398  ;;  %v18336_v6 = vsel %vm2358_vm4, %v7879_v26, %v7743_v5 }
 0x59e   : > { %v7943_v56 = vsel %vm1596_vm1, %v17842_v4, %v7399_v7  ;;  %13032 = vmatprep.mubr.msk.bf16.mxu0 %vm8122_vm6, %v18336_v6 }
 0x59f   : > { %v18343_v31 = vsel %vm2358_vm4, %v7943_v56, %v7807_v29  ;;  %v20234_v29 = vld [vmem:[#allocation26_spill] sm:$0xff]  ;;  %v20238_v56 = vld [vmem:[#allocation19_spill] sm:$0xff] }
 0x5a0   : > { %13232 = vmatprep.mubr.msk.bf16.mxu1 %vm8122_vm6, %v18343_v31  ;;  %v7745_v59 = vpop.permute.xlu0 %7744 }
 0x5a1   : > { %v7401_v21 = vpop.permute.xlu1 %7400  ;;  %v18350_v34 = vsel %vm2358_vm4, %v7881_v52, %v7745_v59  ;;  %v20239_v59 = vld [vmem:[#allocation9_spill] sm:$0xff] }
 0x5a2   : > { %v7945_v4 = vsel %vm1596_vm1, %v17782_v37, %v7401_v21  ;;  %13033 = vmatmul.mubr.msk.bf16.gmra.mrb[72].mxu0 %vm8122_vm6, %v18350_v34 }
 0x5a3   : > { %v18357_v17 = vsel %vm2358_vm4, %v7945_v4, %v7809_v30  ;;  %13036 = vmatprep.mubr.msk.bf16.mxu0 %vm8122_vm6, %v20233_v14 }
 0x5a4   : > { %13233 = vmatmul.mubr.msk.bf16.gmra.mrb[124].mxu1 %vm8122_vm6, %v18357_v17  ;;  %v7415_v4 = vpop.permute.xlu0 %7414 }
 0x5a5   : > { %v7811_v8 = vpop.permute.xlu1 %7810 }
 0x5a9   : > { %v7813_v13 = vpop.permute.xlu1 %7812 }
 0x5aa   : > { %13037 = vmatmul.mubr.msk.bf16.gmra.mrb[76].mxu0 %vm8122_vm6, %v17518_v24 }
 0x5ab   : > { %13040 = vmatprep.mubr.msk.bf16.mxu0 %vm8122_vm6, %v17726_v3 }
 0x5ad   : > { %v7815_v37 = vpop.permute.xlu1 %7814 }
 0x5b1   : > { %v7817_v51 = vpop.permute.xlu1 %7816 }
 0x5b2   : > { %13041 = vmatmul.mubr.msk.bf16.gmra.mrb[80].mxu0 %vm8122_vm6, %v20234_v29 }
 0x5b3   : > { %13044 = vmatprep.mubr.msk.bf16.mxu0 %vm8122_vm6, %v20235_v39 }
 0x5b5   : > { %v7403_v38 = vpop.permute.xlu1 %7402 }
 0x5b6   : > { %v7947_v30 = vsel %vm1596_vm1, %v17973_v43, %v7403_v38  ;;  %v7823_v38 = vpop.permute.xlu0 %7822 }
 0x5b7   : > { %v18374_v35 = vsel %vm2358_vm4, %v7947_v30, %v7811_v8 }
 0x5b8   : > { %13236 = vmatprep.mubr.msk.bf16.mxu1 %vm8122_vm6, %v18374_v35 }
 0x5b9   : > { %v7405_v60 = vpop.permute.xlu1 %7404 }
 0x5ba   : > { %v7949_v63 = vsel %vm1596_vm1, %v17945_v23, %v7405_v60  ;;  %13045 = vmatmul.mubr.msk.bf16.gmra.mrb[84].mxu0 %vm8122_vm6, %v20236_v20 }
 0x5bb   : > { %v18383_v53 = vsel %vm2358_vm4, %v7949_v63, %v7813_v13  ;;  %13048 = vmatprep.mubr.msk.bf16.mxu0 %vm8122_vm6, %v20237_v16  ;;  %v20240_v13 = vld [vmem:[#allocation18_spill] sm:$0xff]  ;;  %v20242_v63 = vld [vmem:[#allocation20_spill] sm:$0xff] }
 0x5bc   : > { %13237 = vmatmul.mubr.msk.bf16.gmra.mrb[128].mxu1 %vm8122_vm6, %v18383_v53 }
 0x5bd   : > { %v7407_v43 = vpop.permute.xlu1 %7406 }
 0x5be   : > { %v7951_v26 = vsel %vm1596_vm1, %v18037_v18, %v7407_v43 }
 0x5bf   : > { %v18392_v5 = vsel %vm2358_vm4, %v7951_v26, %v7815_v37  ;;  %v20241_v37 = vld [vmem:[#allocation23_spill] sm:$0xff] }
 0x5c0   : > { %13240 = vmatprep.mubr.msk.bf16.mxu1 %vm8122_vm6, %v18392_v5 }
 0x5c1   : > { %v7409_v23 = vpop.permute.xlu1 %7408 }
 0x5c2   : > { %v7953_v7 = vsel %vm1596_vm1, %v17994_v22, %v7409_v23  ;;  %13049 = vmatmul.mubr.msk.bf16.gmra.mrb[88].mxu0 %vm8122_vm6, %v20238_v56 }
 0x5c3   : > { %v18401_v52 = vsel %vm2358_vm4, %v7953_v7, %v7817_v51  ;;  %13052 = vmatprep.mubr.msk.bf16.mxu0 %vm8122_vm6, %v20239_v59 }
 0x5c4   : > { %13241 = vmatmul.mubr.msk.bf16.gmra.mrb[132].mxu1 %vm8122_vm6, %v18401_v52 }
 0x5c5   : > { %v7819_v18 = vpop.permute.xlu1 %7818 }
 0x5c9   : > { %v7411_v21 = vpop.permute.xlu1 %7410 }
 0x5ca   : > { %v7955_v8 = vsel %vm1596_vm1, %v18109_v10, %v7411_v21  ;;  %13053 = vmatmul.mubr.msk.bf16.gmra.mrb[92].mxu0 %vm8122_vm6, %v20240_v13  ;;  %v7959_v10 = vsel %vm1596_vm1, %v20242_v63, %v7415_v4  ;;  %v20243_v21 = vld [vmem:[#allocation4_spill] sm:$0xff]  ;;  %v3967_v4 = vld [vmem:[#allocation3 + $0x294] sm:$0x1]  ;;  %v6097_v63 = vld [vmem:[#allocation3 + $0x298] sm:$0xf] }
 0x5cb   : > { %v18412_v22 = vsel %vm2358_vm4, %v7955_v8, %v7819_v18  ;;  %13056 = vmatprep.mubr.msk.bf16.mxu0 %vm8122_vm6, %v20241_v37  ;;  %v18426_v26 = vsel %vm2358_vm4, %v7959_v10, %v7823_v38  ;;  %v18449_v8 = vld [vmem:[#allocation3 + $0x29c] sm:$0xff]  }
 0x5cc   : > { %13244 = vmatprep.mubr.msk.bf16.mxu1 %vm8122_vm6, %v18412_v22  ;;  %v7282_v61 = vshrl.u32 %v18449_v8, 16 }
 0x5cd   : > { %v7413_v51 = vpop.permute.xlu1 %7412 }
 0x5ce   : > { %v7957_v30 = vsel %vm1596_vm1, %v18119_v25, %v7413_v51  ;;  %v4070_v51 = vld [vmem:[#allocation3 + $0x2a4] sm:$0x1] }
 0x5cf   : > { %v4071_v38 = vsel %vm14073_vm10, 0, %v4070_v51 }
 0x5d0   : > { %4072 = vst [vmem:[#allocation3 + $0x2a4] sm:$0x1] %v4071_v38 }
 0x5d1   : > { %v7821_v60 = vpop.permute.xlu1 %7820 }
 0x5d2   : > { %v18423_v43 = vsel %vm2358_vm4, %v7957_v30, %v7821_v60  ;;  %13057 = vmatmul.mubr.msk.bf16.gmra.mrb[96].mxu0 %vm8122_vm6, %v17988_v48  ;;  %v7278_v30 = vshll.u32 %v18449_v8, 16  ;;  %v20244_v60 = vld [vmem:[#allocation11_spill] sm:$0xff] }
 0x5d3   : > { %13245 = vmatmul.mubr.msk.bf16.gmra.mrb[136].mxu1 %vm8122_vm6, %v18423_v43  ;;  %13060 = vmatprep.mubr.msk.bf16.mxu0 %vm8122_vm6, %v17982_v12 }
 0x5d4   : > { %13248 = vmatprep.mubr.msk.bf16.mxu1 %vm8122_vm6, %v18426_v26  ;;  %v7280_v10 = vrot.slane %v7278_v30, 1  ;;  %v20247_v30 = vld [vmem:[#allocation35_spill] sm:$0xff] }
 0x5d5   : > { %v7417_v25 = vpop.permute.xlu1 %7416 }
 0x5d6   : > { %v7961_v23 = vsel %vm1596_vm1, %v17921_v57, %v7417_v25  ;;  %v3968_v57 = vsel %vm14061_vm9, 0, %v3967_v4  ;;  %v6167_v4 = vld [vmem:[#allocation3 + $0x294] sm:$0xe]  ;;  %v7284_v38 = vor.u32 %v7282_v61, %v7280_v10 }
 0x5d7   : > { %3969 = vst [vmem:[#allocation3 + $0x294] sm:$0x1] %v3968_v57 }
 0x5d9   : > { %v7825_v7 = vpop.permute.xlu1 %7824 }
 0x5da   : > { %v18439_v18 = vsel %vm2358_vm4, %v7961_v23, %v7825_v7  ;;  %13061 = vmatmul.mubr.msk.bf16.gmra.mrb[100].mxu0 %vm8122_vm6, %v18050_v36  ;;  %v13917_v7 = vld [vmem:[#allocation3 + $0x2a4] ss:$0 sps:$4 sm:$0x11]  }
 0x5db   : > { %13249 = vmatmul.mubr.msk.bf16.gmra.mrb[140].mxu1 %vm8122_vm6, %v18439_v18  ;;  %13064 = vmatprep.mubr.msk.bf16.mxu0 %vm8122_vm6, %v18044_v47  ;;  %v7694_v47 = vrot.slane %v18449_v8, 1 }
 0x5dc   : > { %13256 = vmatprep.mubr.msk.bf16.mxu1 %vm8122_vm6, %v20243_v21 }
 0x5de   : > { %v6096_v25 = vld [vmem:[#allocation3 + $0x294] sm:$0xf] }
 0x5df   : > { %v18465_v23 = vcombine.low %v6096_v25, %v6097_v63  ;;  %v20248_v25 = vld [vmem:[#allocation7_spill] sm:$0xff] }
 0x5e1   : > { %20246 = vst [vmem:[#allocation22_spill] sm:$0xff] %v18465_v23  ;;  %v7271_v57 = vshrl.u32 %v18465_v23, 16  ;;  %v7273_v51 = vshll.u32 %v18465_v23, 16 }
 0x5e2   : > { %13065 = vmatmul.mubr.msk.bf16.gmra.mrb[104].mxu0 %vm8122_vm6, %v18094_v28  ;;  %v7286_v28 = vshll.u32 %v13917_v7, 16 }
 0x5e3   : > { %13257 = vmatmul.mubr.msk.bf16.vlgmr.msra.gmra.mrb[144].mxu1 %vm8122_vm6, %v20244_v60  ;;  %13068 = vmatprep.mubr.msk.bf16.mxu0 %vm8122_vm6, %v18102_v2  ;;  %v7275_v2 = vrot.slane %v7273_v51, 1  ;;  %v11578_v60 = vcombine.low %v6167_v4, %v6097_v63  ;;  %v20249_v51 = vld [vmem:[#allocation38_spill] sm:$0xff] }
 0x5e4   : > { %13260 = vmatprep.mubr.msk.bf16.mxu1 %vm8122_vm6, %v20245_v9  ;;  %v7288_v36 = vrot.slane %v7286_v28, 1  ;;  %v7696_v9 = vrot.slane %v13917_v7, 1 }
 0x5e5   : > { %v7276_v61 = vor.u32 %v7275_v2, %v7271_v57  ;;  %v7693_v63 = vrot.slane %v11578_v60, 1  ;;  %v20251_v2 = vld [vmem:[#allocation41_spill] sm:$0xff]  ;;  %v7419_v57 = vpop.permute.xlu0 %7418 }
 0x5e6   : > { %v7289_v23 = vsel %vm1161_vm14, %v7284_v38, %v7288_v36  ;;  %v7697_v7 = vsel %vm1468_vm13, %v7694_v47, %v7696_v9  ;;  %v20250_v36 = vld [vmem:[#allocation8_spill] sm:$0xff]  ;;  %v20253_v60 = vld [vmem:[#allocation13_spill] sm:$0xff] }
 0x5e7   : > { %7424 = vrot.lane.b32.xlu1 %v7289_v23, %s13958_s15  ;;  %v7281_v28 = vsel %vm1161_vm14, %v7276_v61, %v7280_v10  ;;  %v7695_v4 = vsel %vm1468_vm13, %v7693_v63, %v7694_v47  ;;  %v20252_v47 = vld [vmem:[#allocation12_spill] sm:$0xff]  ;;  %v20257_v61 = vld [vmem:[#allocation25_spill] sm:$0xff] }
 0x5e8   : > { %7422 = vrot.lane.b32.xlu0 %v7281_v28, %s13958_s15  ;;  %v20254_v9 = vld [vmem:[#allocation32_spill] sm:$0xff]  ;;  %v7963_v28 = vsel %vm1596_vm1, %v20257_v61, %v7419_v57 }
 0x5e9   : > { %v20255_v10 = vld [vmem:[#allocation24_spill] sm:$0xff] }
 0x5ea   : > { %13069 = vmatmul.mubr.msk.bf16.gmra.mrb[108].mxu0 %vm8122_vm6, %v18126_v27  ;;  %v20256_v23 = vld [vmem:[#allocation16_spill] sm:$0xff] }
 0x5eb   : > { %13261 = vmatmul.mubr.msk.bf16.gmra.mrb[148].mxu1 %vm8122_vm6, %v20247_v30  ;;  %13072 = vmatprep.mubr.msk.bf16.mxu0 %vm8122_vm6, %v18132_v33 }
 0x5ec   : > { %13264 = vmatprep.mubr.msk.bf16.mxu1 %vm8122_vm6, %v20248_v25  ;;  %7832 = vrot.lane.b32.xlu1 %v7697_v7, %s13960_s17 }
 0x5ed   : > { %7830 = vrot.lane.b32.xlu0 %v7695_v4, %s13960_s17 }
 0x5f2   : > { %13073 = vmatmul.mubr.msk.bf16.gmra.mrb[112].mxu0 %vm8122_vm6, %v18161_v0 }
 0x5f3   : > { %13265 = vmatmul.mubr.msk.bf16.gmra.mrb[152].mxu1 %vm8122_vm6, %v20249_v51  ;;  %13076 = vmatprep.mubr.msk.bf16.mxu0 %vm8122_vm6, %v18155_v11 }
 0x5f4   : > { %13268 = vmatprep.mubr.msk.bf16.mxu1 %vm8122_vm6, %v20250_v36 }
 0x5fa   : > { %13077 = vmatmul.mubr.msk.bf16.gmra.mrb[116].mxu0 %vm8122_vm6, %v18207_v58 }
 0x5fb   : > { %13269 = vmatmul.mubr.msk.bf16.gmra.mrb[156].mxu1 %vm8122_vm6, %v20251_v2  ;;  %13080 = vmatprep.mubr.msk.bf16.mxu0 %vm8122_vm6, %v18200_v55 }
 0x5fc   : > { %13272 = vmatprep.mubr.msk.bf16.mxu1 %vm8122_vm6, %v18010_v50 }
 0x602   : > { %13081 = vmatmul.mubr.msk.bf16.gmra.mrb[120].mxu0 %vm8122_vm6, %v18242_v41 }
 0x603   : > { %13273 = vmatmul.mubr.msk.bf16.gmra.mrb[160].mxu1 %vm8122_vm6, %v20252_v47  ;;  %13084 = vmatprep.mubr.msk.bf16.mxu0 %vm8122_vm6, %v18235_v15 }
 0x604   : > { %13276 = vmatprep.mubr.msk.bf16.mxu1 %vm8122_vm6, %v20253_v60 }
 0x60a   : > { %13085 = vmatmul.mubr.msk.bf16.gmra.mrb[124].mxu0 %vm8122_vm6, %v18269_v45 }
 0x60b   : > { %13277 = vmatmul.mubr.msk.bf16.gmra.mrb[164].mxu1 %vm8122_vm6, %v20254_v9  ;;  %13088 = vmatprep.mubr.msk.bf16.mxu0 %vm8122_vm6, %v18279_v19 }
 0x60c   : > { %13280 = vmatprep.mubr.msk.bf16.mxu1 %vm8122_vm6, %v20255_v10 }
 0x612   : > { %13089 = vmatmul.mubr.msk.bf16.gmra.mrb[128].mxu0 %vm8122_vm6, %v18298_v32 }
 0x613   : > { %13281 = vmatmul.mubr.msk.bf16.gmra.mrb[168].mxu1 %vm8122_vm6, %v20256_v23  ;;  %13092 = vmatprep.mubr.msk.bf16.mxu0 %vm8122_vm6, %v18322_v49 }
 0x614   : > { %13284 = vmatprep.mubr.msk.bf16.mxu1 %vm8122_vm6, %v18255_v42 }
 0x61a   : > { %13093 = vmatmul.mubr.msk.bf16.gmra.mrb[132].mxu0 %vm8122_vm6, %v18329_v1 }
 0x61b   : > { %13285 = vmatmul.mubr.msk.bf16.gmra.mrb[172].mxu1 %vm8122_vm6, %v18272_v62  ;;  %13096 = vmatprep.mubr.msk.bf16.mxu0 %vm8122_vm6, %v18343_v31 }
 0x61c   : > { %13288 = vmatprep.mubr.msk.bf16.mxu1 %vm8122_vm6, %v18308_v46 }
 0x622   : > { %13097 = vmatmul.mubr.msk.bf16.gmra.mrb[136].mxu0 %vm8122_vm6, %v18357_v17 }
 0x623   : > { %13289 = vmatmul.mubr.msk.bf16.gmra.mrb[176].mxu1 %vm8122_vm6, %v18315_v44  ;;  %13100 = vmatprep.mubr.msk.bf16.mxu0 %vm8122_vm6, %v18374_v35 }
 0x624   : > { %13292 = vmatprep.mubr.msk.bf16.mxu1 %vm8122_vm6, %v18336_v6 }
 0x62a   : > { %13101 = vmatmul.mubr.msk.bf16.gmra.mrb[140].mxu0 %vm8122_vm6, %v18383_v53 }
 0x62b   : > { %13293 = vmatmul.mubr.msk.bf16.gmra.mrb[180].mxu1 %vm8122_vm6, %v18350_v34  ;;  %13104 = vmatprep.mubr.msk.bf16.mxu0 %vm8122_vm6, %v18392_v5 }
 0x62c   : > { %13296 = vmatprep.mubr.msk.bf16.mxu1 %vm8122_vm6, %v20233_v14  ;;  %v7827_v14 = vpop.permute.xlu0 %7826 }
 0x630   : > { %v7291_v38 = vpop.permute.xlu0 %7290 }
 0x632   : > { %13105 = vmatmul.mubr.msk.bf16.gmra.mrb[144].mxu0 %vm8122_vm6, %v18401_v52 }
 0x633   : > { %13297 = vmatmul.mubr.msk.bf16.gmra.mrb[184].mxu1 %vm8122_vm6, %v17518_v24  ;;  %13108 = vmatprep.mubr.msk.bf16.mxu0 %vm8122_vm6, %v18412_v22  ;;  %v7421_v24 = vpop.permute.xlu1 %7420 }
 0x634   : > { %13300 = vmatprep.mubr.msk.bf16.mxu1 %vm8122_vm6, %v17726_v3  ;;  %v18569_v3 = vsel %vm2358_vm4, %v7963_v28, %v7827_v14  ;;  %v7699_v7 = vpop.permute.xlu0 %7698  ;;  %v7965_v57 = vsel %vm1596_vm1, %v17947_v40, %v7421_v24  ;;  %v20259_v24 = vld [vmem:[#allocation27_spill] sm:$0xff] }
 0x637   : > { %v7829_v63 = vpop.permute.xlu1 %7828 }
 0x638   : > { %v18585_v61 = vsel %vm2358_vm4, %v7965_v57, %v7829_v63 }
 0x63a   : > { %13109 = vmatmul.mubr.msk.bf16.gmra.mrb[148].mxu0 %vm8122_vm6, %v18423_v43 }
 0x63b   : > { %13301 = vmatmul.mubr.msk.bf16.gmra.mrb[188].mxu1 %vm8122_vm6, %v20234_v29  ;;  %13112 = vmatprep.mubr.msk.bf16.mxu0 %vm8122_vm6, %v18426_v26  ;;  %v20258_v29 = vld [vmem:[#allocation14_spill] sm:$0xff]  ;;  %v7293_v4 = vpop.permute.xlu1 %7292 }
 0x63c   : > { %13304 = vmatprep.mubr.msk.bf16.mxu1 %vm8122_vm6, %v20235_v39  ;;  %v7835_v39 = vsel %vm1596_vm1, %v20258_v29, %v7291_v38 }
 0x63d   : > { %v7971_v14 = vsel %vm2358_vm4, %v7835_v39, %v7699_v7 }
 0x63f   : > { %v7701_v40 = vpop.permute.xlu1 %7700 }
 0x642   : > { %13113 = vmatmul.mubr.msk.bf16.gmra.mrb[152].mxu0 %vm8122_vm6, %v18439_v18 }
 0x643   : > { %13305 = vmatmul.mubr.msk.bf16.gmra.mrb[64].mxu1 %vm8122_vm6, %v20236_v20  ;;  %13116 = vmatprep.mubr.msk.bf16.mxu0 %vm8122_vm6, %v18569_v3  ;;  %v7837_v20 = vsel %vm1596_vm1, %v18211_v54, %v7293_v4  ;;  %v20261_v54 = vld [vmem:[#allocation11_spill] sm:$0xff] }
 0x644   : > { %13308 = vmatprep.mubr.msk.bf16.mxu1 %vm8122_vm6, %v20237_v16  ;;  %v7973_v16 = vsel %vm2358_vm4, %v7837_v20, %v7701_v40 }
 0x64a   : > { %13117 = vmatmul.mubr.msk.bf16.gmra.mrb[156].mxu0 %vm8122_vm6, %v18585_v61 }
 0x64b   : > { %13309 = vmatmul.mubr.msk.bf16.gmra.mrb[68].mxu1 %vm8122_vm6, %v20238_v56  ;;  %13124 = vmatprep.mubr.msk.bf16.mxu0 %vm8122_vm6, %v7971_v14  ;;  %v20260_v56 = vld [vmem:[#allocation28_spill] sm:$0xff] }
 0x64c   : > { %13312 = vmatprep.mubr.msk.bf16.mxu1 %vm8122_vm6, %v20239_v59  ;;  %v20262_v59 = vld [vmem:[#allocation29_spill] sm:$0xff] }
 0x652   : > { %13125 = vmatmul.mubr.msk.bf16.vlgmr.msra.gmra.mrb[32].mxu0 %vm8122_vm6, %v7973_v16 }
 0x653   : > { %13313 = vmatmul.mubr.msk.bf16.gmra.mrb[72].mxu1 %vm8122_vm6, %v20240_v13  ;;  %13128 = vmatprep.mubr.msk.bf16.mxu0 %vm8122_vm6, %v20259_v24  ;;  %v20263_v13 = vld [vmem:[#allocation33_spill] sm:$0xff] }
 0x654   : > { %13316 = vmatprep.mubr.msk.bf16.mxu1 %vm8122_vm6, %v20241_v37  ;;  %v20264_v37 = vld [vmem:[#allocation36_spill] sm:$0xff] }
 0x65a   : > { %13129 = vmatmul.mubr.msk.bf16.gmra.mrb[36].mxu0 %vm8122_vm6, %v20260_v56  ;;  %v20276_v56 = vld [vmem:[#allocation22_spill] sm:$0xff] }
 0x65b   : > { %13317 = vmatmul.mubr.msk.bf16.gmra.mrb[76].mxu1 %vm8122_vm6, %v17988_v48  ;;  %13132 = vmatprep.mubr.msk.bf16.mxu0 %vm8122_vm6, %v20243_v21  ;;  %v20265_v48 = vld [vmem:[#allocation30_spill] sm:$0xff] }
 0x65c   : > { %13320 = vmatprep.mubr.msk.bf16.mxu1 %vm8122_vm6, %v17982_v12  ;;  %v20266_v12 = vld [vmem:[#allocation34_spill] sm:$0xff] }
 0x662   : > { %13133 = vmatmul.mubr.msk.bf16.gmra.mrb[40].mxu0 %vm8122_vm6, %v20261_v54 }
 0x663   : > { %13321 = vmatmul.mubr.msk.bf16.gmra.mrb[80].mxu1 %vm8122_vm6, %v20262_v59  ;;  %13136 = vmatprep.mubr.msk.bf16.mxu0 %vm8122_vm6, %v20263_v13 }
 0x664   : > { %13324 = vmatprep.mubr.msk.bf16.mxu1 %vm8122_vm6, %v20264_v37 }
 0x66a   : > { %13137 = vmatmul.mubr.msk.bf16.gmra.mrb[44].mxu0 %vm8122_vm6, %v20247_v30 }
 0x66b   : > { %13325 = vmatmul.mubr.msk.bf16.gmra.mrb[84].mxu1 %vm8122_vm6, %v20265_v48  ;;  %13140 = vmatprep.mubr.msk.bf16.mxu0 %vm8122_vm6, %v20248_v25 }
 0x66c   : > { %13328 = vmatprep.mubr.msk.bf16.mxu1 %vm8122_vm6, %v20266_v12 }
 0x672   : > { %13141 = vmatmul.mubr.msk.bf16.gmra.mrb[48].mxu0 %vm8122_vm6, %v20249_v51 }
 0x673   : > { %13329 = vmatmul.mubr.msk.bf16.gmra.mrb[88].mxu1 %vm8122_vm6, %v18126_v27  ;;  %13144 = vmatprep.mubr.msk.bf16.mxu0 %vm8122_vm6, %v20250_v36 }
 0x674   : > { %13332 = vmatprep.mubr.msk.bf16.mxu1 %vm8122_vm6, %v18132_v33 }
 0x67a   : > { %13145 = vmatmul.mubr.msk.bf16.gmra.mrb[52].mxu0 %vm8122_vm6, %v20251_v2 }
 0x67b   : > { %13333 = vmatmul.mubr.msk.bf16.gmra.mrb[92].mxu1 %vm8122_vm6, %v18161_v0  ;;  %13148 = vmatprep.mubr.msk.bf16.mxu0 %vm8122_vm6, %v18010_v50 }
 0x67c   : > { %13336 = vmatprep.mubr.msk.bf16.mxu1 %vm8122_vm6, %v18155_v11 }
 0x682   : > { %13149 = vmatmul.mubr.msk.bf16.gmra.mrb[56].mxu0 %vm8122_vm6, %v20252_v47 }
 0x683   : > { %13337 = vmatmul.mubr.msk.bf16.gmra.mrb[96].mxu1 %vm8122_vm6, %v18207_v58  ;;  %13152 = vmatprep.mubr.msk.bf16.mxu0 %vm8122_vm6, %v20253_v60 }
 0x684   : > { %13340 = vmatprep.mubr.msk.bf16.mxu1 %vm8122_vm6, %v18200_v55 }
 0x685   : > { %v18652_v27 = vpop.f32.mrb[80].mxu0 }
 0x686   : > { %v18654_v33 = vpop.f32.mrb[81].mxu0 }
 0x687   : > { %v18656_v50 = vpop.f32.mrb[82].mxu0 }
 0x688   : > { %v18658_v0 = vpop.f32.mrb[83].mxu0 }
 0x68a   : > { %13153 = vmatmul.mubr.msk.bf16.gmra.mrb[60].mxu0 %vm8122_vm6, %v20254_v9 }
 0x68b   : > { %13341 = vmatmul.mubr.msk.bf16.gmra.mrb[100].mxu1 %vm8122_vm6, %v18242_v41  ;;  %13156 = vmatprep.mubr.msk.bf16.mxu0 %vm8122_vm6, %v20255_v10 }
 0x68c   : > { %13344 = vmatprep.mubr.msk.bf16.mxu1 %vm8122_vm6, %v18235_v15 }
 0x68d   : > { %v18668_v11 = vpop.f32.mrb[84].mxu0 }
 0x68e   : > { %v18670_v55 = vpop.f32.mrb[85].mxu0 }
 0x68f   : > { %v18672_v58 = vpop.f32.mrb[86].mxu0 }
 0x690   : > { %v18674_v21 = vpop.f32.mrb[87].mxu0 }
 0x692   : > { %13157 = vmatmul.mubr.msk.bf16.gmra.mrb[64].mxu0 %vm8122_vm6, %v20256_v23 }
 0x693   : > { %13345 = vmatmul.mubr.msk.bf16.gmra.mrb[104].mxu1 %vm8122_vm6, %v18269_v45  ;;  %13160 = vmatprep.mubr.msk.bf16.mxu0 %vm8122_vm6, %v18255_v42 }
 0x694   : > { %13348 = vmatprep.mubr.msk.bf16.mxu1 %vm8122_vm6, %v18279_v19 }
 0x695   : > { %v18684_v15 = vpop.f32.mrb[88].mxu0 }
 0x696   : > { %v18686_v41 = vpop.f32.mrb[89].mxu0 }
 0x697   : > { %v18688_v30 = vpop.f32.mrb[90].mxu0 }
 0x698   : > { %v18690_v25 = vpop.f32.mrb[91].mxu0 }
 0x69a   : > { %13161 = vmatmul.mubr.msk.bf16.gmra.mrb[68].mxu0 %vm8122_vm6, %v18272_v62 }
 0x69b   : > { %13349 = vmatmul.mubr.msk.bf16.gmra.mrb[108].mxu1 %vm8122_vm6, %v18298_v32  ;;  %13164 = vmatprep.mubr.msk.bf16.mxu0 %vm8122_vm6, %v18308_v46 }
 0x69c   : > { %13352 = vmatprep.mubr.msk.bf16.mxu1 %vm8122_vm6, %v18322_v49 }
 0x69d   : > { %v18700_v42 = vpop.f32.mrb[92].mxu0 }
 0x69e   : > { %v18702_v45 = vpop.f32.mrb[93].mxu0 }
 0x69f   : > { %v18704_v19 = vpop.f32.mrb[94].mxu0 }
 0x6a0   : > { %v18706_v51 = vpop.f32.mrb[95].mxu0 }
 0x6a2   : > { %13165 = vmatmul.mubr.msk.bf16.gmra.mrb[72].mxu0 %vm8122_vm6, %v18315_v44 }
 0x6a3   : > { %13353 = vmatmul.mubr.msk.bf16.gmra.mrb[112].mxu1 %vm8122_vm6, %v18329_v1  ;;  %13168 = vmatprep.mubr.msk.bf16.mxu0 %vm8122_vm6, %v18336_v6 }
 0x6a4   : > { %13356 = vmatprep.mubr.msk.bf16.mxu1 %vm8122_vm6, %v18343_v31 }
 0x6a5   : > { %v18716_v62 = vpop.f32.mrb[96].mxu0 }
 0x6a6   : > { %v18718_v32 = vpop.f32.mrb[97].mxu0 }
 0x6a7   : > { %v18720_v46 = vpop.f32.mrb[98].mxu0 }
 0x6a8   : > { %v18722_v49 = vpop.f32.mrb[99].mxu0 }
 0x6aa   : > { %13169 = vmatmul.mubr.msk.bf16.gmra.mrb[76].mxu0 %vm8122_vm6, %v18350_v34 }
 0x6ab   : > { %13357 = vmatmul.mubr.msk.bf16.gmra.mrb[116].mxu1 %vm8122_vm6, %v18357_v17 }
 0x6ac   : > { %13360 = vmatprep.mubr.msk.bf16.mxu1 %vm8122_vm6, %v18374_v35 }
 0x6ad   : > { %v18730_v44 = vpop.f32.mrb[100].mxu0 }
 0x6ae   : > { %v18732_v1 = vpop.f32.mrb[101].mxu0 }
 0x6af   : > { %v18734_v6 = vpop.f32.mrb[102].mxu0 }
 0x6b0   : > { %v18736_v31 = vpop.f32.mrb[103].mxu0 }
 0x6b3   : > { %13361 = vmatmul.mubr.msk.bf16.gmra.mrb[120].mxu1 %vm8122_vm6, %v18383_v53 }
 0x6b4   : > { %13364 = vmatprep.mubr.msk.bf16.mxu1 %vm8122_vm6, %v18392_v5 }
 0x6b5   : > { %v18742_v34 = vpop.f32.mrb[104].mxu0 }
 0x6b6   : > { %v18744_v17 = vpop.f32.mrb[144].mxu1  ;;  %v18746_v36 = vpop.f32.mrb[105].mxu0 }
 0x6b7   : > { %v18748_v35 = vpop.f32.mrb[145].mxu1  ;;  %v18750_v2 = vpop.f32.mrb[106].mxu0 }
 0x6b8   : > { %v18752_v47 = vpop.f32.mrb[146].mxu1  ;;  %v18754_v60 = vpop.f32.mrb[107].mxu0 }
 0x6b9   : > { %v18756_v9 = vpop.f32.mrb[147].mxu1 }
 0x6bb   : > { %13365 = vmatmul.mubr.msk.bf16.gmra.mrb[124].mxu1 %vm8122_vm6, %v18401_v52  ;;  %v7423_v52 = vpop.permute.xlu0 %7422 }
 0x6bc   : > { %13368 = vmatprep.mubr.msk.bf16.mxu1 %vm8122_vm6, %v18412_v22  ;;  %v7967_v54 = vsel %vm1596_vm1, %v20276_v56, %v7423_v52 }
 0x6bd   : > { %v18762_v53 = vpop.f32.mrb[108].mxu0 }
 0x6be   : > { %20267 = vst [vmem:[#allocation5_spill] sm:$0xff] %v18762_v53  ;;  %v18764_v5 = vpop.f32.mrb[148].mxu1  ;;  %v18766_v10 = vpop.f32.mrb[109].mxu0 }
 0x6bf   : > { %20268 = vst [vmem:[#allocation15_spill] sm:$0xff] %v18766_v10  ;;  %v18768_v23 = vpop.f32.mrb[149].mxu1  ;;  %v18770_v38 = vpop.f32.mrb[110].mxu0 }
 0x6c0   : > { %20269 = vst [vmem:[#allocation6_spill] sm:$0xff] %v18770_v38  ;;  %v18772_v28 = vpop.f32.mrb[150].mxu1  ;;  %v18774_v63 = vpop.f32.mrb[111].mxu0 }
 0x6c1   : > { %20270 = vst [vmem:[#allocation37_spill] sm:$0xff] %v18774_v63  ;;  %v18776_v29 = vpop.f32.mrb[151].mxu1 }
 0x6c3   : > { %13369 = vmatmul.mubr.msk.bf16.gmra.mrb[128].mxu1 %vm8122_vm6, %v18423_v43  ;;  %v7425_v43 = vpop.permute.xlu1 %7424 }
 0x6c4   : > { %13372 = vmatprep.mubr.msk.bf16.mxu1 %vm8122_vm6, %v18426_v26  ;;  %v7831_v26 = vpop.permute.xlu0 %7830 }
 0x6c5   : > { %v18782_v22 = vpop.f32.mrb[112].mxu0  ;;  %v8103_v12 = vsel %vm2358_vm4, %v7967_v54, %v7831_v26 }
 0x6c6   : > { %20271 = vst [vmem:[#allocation40_spill] sm:$0xff] %v18782_v22  ;;  %v18784_v39 = vpop.f32.mrb[152].mxu1  ;;  %v18786_v7 = vpop.f32.mrb[113].mxu0 }
 0x6c7   : > { %20272 = vst [vmem:[#allocation39_spill] sm:$0xff] %v18786_v7  ;;  %v18788_v4 = vpop.f32.mrb[153].mxu1  ;;  %v18790_v57 = vpop.f32.mrb[114].mxu0 }
 0x6c8   : > { %20273 = vst [vmem:[#allocation21_spill] sm:$0xff] %v18790_v57  ;;  %v18792_v14 = vpop.f32.mrb[154].mxu1  ;;  %v18794_v20 = vpop.f32.mrb[115].mxu0 }
 0x6c9   : > { %20274 = vst [vmem:[#allocation26_spill] sm:$0xff] %v18794_v20  ;;  %v18796_v40 = vpop.f32.mrb[155].mxu1  ;;  %v7833_v52 = vpop.permute.xlu1 %7832 }
 0x6cb   : > { %13373 = vmatmul.mubr.msk.bf16.gmra.mrb[132].mxu1 %vm8122_vm6, %v18439_v18 }
 0x6cc   : > { %13376 = vmatprep.mubr.msk.bf16.mxu1 %vm8122_vm6, %v18569_v3 }
 0x6cd   : > { %v18802_v16 = vpop.f32.mrb[116].mxu0 }
 0x6ce   : > { %20275 = vst [vmem:[#allocation31_spill] sm:$0xff] %v18802_v16  ;;  %v18804_v24 = vpop.f32.mrb[156].mxu1  ;;  %v18808_v59 = vpop.f32.mrb[117].mxu0 }
 0x6cf   : > { %20277 = vst [vmem:[#allocation10_spill] sm:$0xff] %v18808_v59  ;;  %v18810_v13 = vpop.f32.mrb[157].mxu1  ;;  %v18812_v37 = vpop.f32.mrb[118].mxu0 }
 0x6d0   : > { %20278 = vst [vmem:[#allocation17_spill] sm:$0xff] %v18812_v37  ;;  %v18814_v48 = vpop.f32.mrb[158].mxu1  ;;  %v18816_v18 = vpop.f32.mrb[119].mxu0  ;;  %v7969_v37 = vsel %vm1596_vm1, %v18449_v8, %v7425_v43 }
 0x6d1   : > { %20279 = vst [vmem:[#allocation19_spill] sm:$0xff] %v18816_v18  ;;  %v18818_v3 = vpop.f32.mrb[159].mxu1 }
 0x6d3   : > { %13377 = vmatmul.mubr.msk.bf16.gmra.mrb[136].mxu1 %vm8122_vm6, %v18585_v61 }
 0x6d4   : > { %13380 = vmatprep.mubr.msk.bf16.mxu1 %vm8122_vm6, %v8103_v12  ;;  %v8105_v12 = vsel %vm2358_vm4, %v7969_v37, %v7833_v52 }
 0x6d5   : > { %v18824_v56 = vpop.f32.mrb[120].mxu0 }
 0x6d6   : > { %20280 = vst [vmem:[#allocation9_spill] sm:$0xff] %v18824_v56  ;;  %v18826_v59 = vpop.f32.mrb[160].mxu1  ;;  %v18830_v16 = vpop.f32.mrb[121].mxu0 }
 0x6d7   : > { %20281 = vst [vmem:[#allocation18_spill] sm:$0xff] %v18830_v16  ;;  %v18832_v18 = vpop.f32.mrb[161].mxu1  ;;  %v18834_v20 = vpop.f32.mrb[122].mxu0 }
 0x6d8   : > { %20282 = vst [vmem:[#allocation23_spill] sm:$0xff] %v18834_v20  ;;  %v18836_v26 = vpop.f32.mrb[162].mxu1  ;;  %v18838_v54 = vpop.f32.mrb[123].mxu0 }
 0x6d9   : > { %20283 = vst [vmem:[#allocation20_spill] sm:$0xff] %v18838_v54  ;;  %v18840_v61 = vpop.f32.mrb[163].mxu1 }
 0x6db   : > { %13381 = vmatmul.mubr.msk.bf16.gmra.mrb[140].mxu1 %vm8122_vm6, %v8105_v12 }
 0x6dd   : > { %v18844_v56 = vpop.f32.mrb[124].mxu0 }
 0x6de   : > { %20284 = vst [vmem:[#allocation4_spill] sm:$0xff] %v18844_v56  ;;  %v18846_v57 = vpop.f32.mrb[164].mxu1  ;;  %v18848_v8 = vpop.f32.mrb[125].mxu0 }
 0x6df   : > { %20285 = vst [vmem:[#allocation35_spill] sm:$0xff] %v18848_v8  ;;  %v18850_v43 = vpop.f32.mrb[165].mxu1  ;;  %v18852_v16 = vpop.f32.mrb[126].mxu0 }
 0x6e0   : > { %20286 = vst [vmem:[#allocation7_spill] sm:$0xff] %v18852_v16  ;;  %v18854_v20 = vpop.f32.mrb[166].mxu1  ;;  %v18856_v7 = vpop.f32.mrb[127].mxu0 }
 0x6e1   : > { %20287 = vst [vmem:[#allocation38_spill] sm:$0xff] %v18854_v20  ;;  %20288 = vst [vmem:[#allocation8_spill] sm:$0xff] %v18856_v7  ;;  %v18858_v54 = vpop.f32.mrb[167].mxu1 }
 0x6e2   : > { %20289 = vst [vmem:[#allocation41_spill] sm:$0xff] %v18858_v54 }
 0x6e5   : > { %v18860_v22 = vpop.f32.mrb[128].mxu0 }
 0x6e6   : > { %20290 = vst [vmem:[#allocation12_spill] sm:$0xff] %v18860_v22  ;;  %v18862_v37 = vpop.f32.mrb[168].mxu1  ;;  %v18864_v52 = vpop.f32.mrb[129].mxu0 }
 0x6e7   : > { %20291 = vst [vmem:[#allocation13_spill] sm:$0xff] %v18862_v37  ;;  %20292 = vst [vmem:[#allocation32_spill] sm:$0xff] %v18864_v52  ;;  %v18866_v12 = vpop.f32.mrb[169].mxu1  ;;  %v18868_v56 = vpop.f32.mrb[130].mxu0 }
 0x6e8   : > { %20293 = vst [vmem:[#allocation24_spill] sm:$0xff] %v18866_v12  ;;  %20294 = vst [vmem:[#allocation16_spill] sm:$0xff] %v18868_v56  ;;  %v18870_v8 = vpop.f32.mrb[170].mxu1  ;;  %v18872_v63 = vpop.f32.mrb[131].mxu0 }
 0x6e9   : > { %20295 = vst [vmem:[#allocation25_spill] sm:$0xff] %v18870_v8  ;;  %20296 = vst [vmem:[#allocation14_spill] sm:$0xff] %v18872_v63  ;;  %v18874_v16 = vpop.f32.mrb[171].mxu1 }
 0x6ea   : > { %20297 = vst [vmem:[#allocation27_spill] sm:$0xff] %v18874_v16 }
 0x6ed   : > { %v18876_v38 = vpop.f32.mrb[132].mxu0 }
 0x6ee   : > { %20298 = vst [vmem:[#allocation28_spill] sm:$0xff] %v18876_v38  ;;  %v18878_v7 = vpop.f32.mrb[172].mxu1  ;;  %v18880_v10 = vpop.f32.mrb[133].mxu0 }
 0x6ef   : > { %20299 = vst [vmem:[#allocation11_spill] sm:$0xff] %v18878_v7  ;;  %20300 = vst [vmem:[#allocation29_spill] sm:$0xff] %v18880_v10  ;;  %v18882_v22 = vpop.f32.mrb[173].mxu1  ;;  %v18884_v37 = vpop.f32.mrb[134].mxu0 }
 0x6f0   : > { %20301 = vst [vmem:[#allocation33_spill] sm:$0xff] %v18882_v22  ;;  %20302 = vst [vmem:[#allocation36_spill] sm:$0xff] %v18884_v37  ;;  %v18886_v52 = vpop.f32.mrb[174].mxu1  ;;  %v18888_v12 = vpop.f32.mrb[135].mxu0 }
 0x6f1   : > { %20303 = vst [vmem:[#allocation30_spill] sm:$0xff] %v18886_v52  ;;  %20304 = vst [vmem:[#allocation34_spill] sm:$0xff] %v18888_v12  ;;  %v18890_v56 = vpop.f32.mrb[175].mxu1 }
 0x6f2   : > { %20305 = vst [vmem:[#allocation22_spill] sm:$0xff] %v18890_v56 }
 0x6f5   : > { %v18892_v8 = vpop.f32.mrb[136].mxu0 }
 0x6f6   : > { %20306 = vst [vmem:[#allocation42_spill] sm:$0xff] %v18892_v8  ;;  %v18894_v63 = vpop.f32.mrb[176].mxu1  ;;  %v18896_v16 = vpop.f32.mrb[137].mxu0 }
 0x6f7   : > { %20307 = vst [vmem:[#allocation43_spill] sm:$0xff] %v18894_v63  ;;  %20308 = vst [vmem:[#allocation44_spill] sm:$0xff] %v18896_v16  ;;  %v18898_v38 = vpop.f32.mrb[177].mxu1  ;;  %v18900_v7 = vpop.f32.mrb[138].mxu0 }
 0x6f8   : > { %20309 = vst [vmem:[#allocation45_spill] sm:$0xff] %v18898_v38  ;;  %20310 = vst [vmem:[#allocation46_spill] sm:$0xff] %v18900_v7  ;;  %v18902_v10 = vpop.f32.mrb[178].mxu1  ;;  %v18904_v22 = vpop.f32.mrb[139].mxu0 }
 0x6f9   : > { %20311 = vst [vmem:[#allocation47_spill] sm:$0xff] %v18902_v10  ;;  %20312 = vst [vmem:[#allocation48_spill] sm:$0xff] %v18904_v22  ;;  %v18906_v37 = vpop.f32.mrb[179].mxu1 }
 0x6fa   : > { %20313 = vst [vmem:[#allocation49_spill] sm:$0xff] %v18906_v37 }
 0x6fd   : > { %v18908_v52 = vpop.f32.mrb[140].mxu0 }
 0x6fe   : > { %20314 = vst [vmem:[#allocation50_spill] sm:$0xff] %v18908_v52  ;;  %v18910_v12 = vpop.f32.mrb[180].mxu1  ;;  %v18912_v56 = vpop.f32.mrb[141].mxu0 }
 0x6ff   : > { %20315 = vst [vmem:[#allocation51_spill] sm:$0xff] %v18910_v12  ;;  %20316 = vst [vmem:[#allocation52_spill] sm:$0xff] %v18912_v56  ;;  %v18914_v8 = vpop.f32.mrb[181].mxu1  ;;  %v18916_v63 = vpop.f32.mrb[142].mxu0 }
 0x700   : > { %20317 = vst [vmem:[#allocation53_spill] sm:$0xff] %v18914_v8  ;;  %20318 = vst [vmem:[#allocation54_spill] sm:$0xff] %v18916_v63  ;;  %v18918_v16 = vpop.f32.mrb[182].mxu1  ;;  %v18920_v38 = vpop.f32.mrb[143].mxu0 }
 0x701   : > { %20319 = vst [vmem:[#allocation55_spill] sm:$0xff] %v18918_v16  ;;  %20320 = vst [vmem:[#allocation56_spill] sm:$0xff] %v18920_v38  ;;  %v18922_v7 = vpop.f32.mrb[183].mxu1 }
 0x702   : > { %20321 = vst [vmem:[#allocation57_spill] sm:$0xff] %v18922_v7 }
 0x705   : > { %v18924_v10 = vpop.f32.mrb[144].mxu0 }
 0x706   : > { %20322 = vst [vmem:[#allocation58_spill] sm:$0xff] %v18924_v10  ;;  %v18926_v22 = vpop.f32.mrb[184].mxu1  ;;  %v18928_v37 = vpop.f32.mrb[145].mxu0 }
 0x707   : > { %20323 = vst [vmem:[#allocation59_spill] sm:$0xff] %v18926_v22  ;;  %20324 = vst [vmem:[#allocation60_spill] sm:$0xff] %v18928_v37  ;;  %v18930_v52 = vpop.f32.mrb[185].mxu1  ;;  %v18932_v12 = vpop.f32.mrb[146].mxu0 }
 0x708   : > { %20325 = vst [vmem:[#allocation61_spill] sm:$0xff] %v18930_v52  ;;  %20326 = vst [vmem:[#allocation62_spill] sm:$0xff] %v18932_v12  ;;  %v18934_v56 = vpop.f32.mrb[186].mxu1  ;;  %v18936_v8 = vpop.f32.mrb[147].mxu0 }
 0x709   : > { %20327 = vst [vmem:[#allocation63_spill] sm:$0xff] %v18934_v56  ;;  %20328 = vst [vmem:[#allocation64_spill] sm:$0xff] %v18936_v8  ;;  %v18938_v63 = vpop.f32.mrb[187].mxu1 }
 0x70a   : > { %20329 = vst [vmem:[#allocation65_spill] sm:$0xff] %v18938_v63 }
 0x70d   : > { %v18940_v16 = vpop.f32.mrb[148].mxu0 }
 0x70e   : > { %20330 = vst [vmem:[#allocation66_spill] sm:$0xff] %v18940_v16  ;;  %v18942_v38 = vpop.f32.mrb[188].mxu1  ;;  %v18944_v7 = vpop.f32.mrb[149].mxu0  ;;  %v18961_v16 = vld [vmem:[%s19871_s7] ss:$0 sm:$0xff] }
 0x70f   : > { %20331 = vst [vmem:[#allocation67_spill] sm:$0xff] %v18942_v38  ;;  %20332 = vst [vmem:[#allocation68_spill] sm:$0xff] %v18944_v7  ;;  %v18946_v10 = vpop.f32.mrb[189].mxu1  ;;  %v18948_v22 = vpop.f32.mrb[150].mxu0 }
 0x710   : > { %20333 = vst [vmem:[#allocation69_spill] sm:$0xff] %v18946_v10  ;;  %20334 = vst [vmem:[#allocation70_spill] sm:$0xff] %v18948_v22  ;;  %v18950_v37 = vpop.f32.mrb[190].mxu1  ;;  %v18952_v52 = vpop.f32.mrb[151].mxu0 }
 0x711   : > { %20335 = vst [vmem:[#allocation71_spill] sm:$0xff] %v18950_v37  ;;  %20336 = vst [vmem:[#allocation72_spill] sm:$0xff] %v18952_v52  ;;  %v18954_v12 = vpop.f32.mrb[191].mxu1  ;;  %v18971_v52 = vld [vmem:[%s19872_s8] ss:$0 sm:$0xff] }
 0x712   : > { %20337 = vst [vmem:[#allocation73_spill] sm:$0xff] %v18954_v12 }
 0x715   : > { %v18956_v56 = vpop.f32.mrb[152].mxu0 }
 0x716   : > { %20338 = vst [vmem:[#allocation74_spill] sm:$0xff] %v18956_v56  ;;  %v13306_v8 = vpop.f32.mrb[64].mxu1  ;;  %v18963_v38 = vpop.f32.mrb[153].mxu0 }
 0x717   : > { %20339 = vst [vmem:[#allocation75_spill] sm:$0xff] %v18963_v38  ;;  %v13436_v7 = vadd.f32 %v13306_v8, %v18652_v27  ;;  %v9607_v10 = vpop.f32.mrb[65].mxu1  ;;  %v18966_v22 = vpop.f32.mrb[154].mxu0 }
 0x718   : > { %20340 = vst [vmem:[#allocation76_spill] sm:$0xff] %v18966_v22  ;;  %v13437_v56 = vadd.f32 %v9607_v10, %v18654_v33  ;;  %v13307_v12 = vpop.f32.mrb[66].mxu1  ;;  %v18975_v63 = vpop.f32.mrb[155].mxu0 }
 0x719   : > { %v10111_v37 = vmul.f32 %v13436_v7, %v18961_v16  ;;  %20341 = vst [vmem:[#allocation77_spill] sm:$0xff] %v18975_v63  ;;  %v13438_v38 = vadd.f32 %v13307_v12, %v18656_v50  ;;  %v9610_v54 = vpop.f32.mrb[67].mxu1 }
 0x71a   : > { %v10109_v27 = vmul.f32 %v13437_v56, %v18961_v16  ;;  %v13439_v8 = vadd.f32 %v9610_v54, %v18658_v0 }
 0x71b   : > { %v10246_v22 = vadd.f32 %v18971_v52, %v10111_v37  ;;  %v10112_v53 = vmul.f32 %v13438_v38, %v18961_v16 }
 0x71c   : > { %v10244_v20 = vadd.f32 %v18971_v52, %v10109_v27  ;;  %v10110_v33 = vmul.f32 %v13439_v8, %v18961_v16 }
 0x71d   : > { %v10374_v10 = vmax.f32 %v10246_v22, 0.0  ;;  %v10247_v7 = vadd.f32 %v18971_v52, %v10112_v53  ;;  %v18993_v56 = vpop.f32.mrb[156].mxu0 }
 0x71e   : > { %v10372_v50 = vmax.f32 %v10244_v20, 0.0  ;;  %v10245_v0 = vadd.f32 %v18971_v52, %v10110_v33  ;;  %20342 = vst [vmem:[#allocation78_spill] sm:$0xff] %v18993_v56  ;;  %v13310_v38 = vpop.f32.mrb[68].mxu1  ;;  %v18995_v12 = vpop.f32.mrb[157].mxu0 }
 0x71f   : > { %v12096_v54 = vpack.c.bf16 %v10374_v10, %v10374_v10  ;;  %v10375_v37 = vmax.f32 %v10247_v7, 0.0  ;;  %20343 = vst [vmem:[#allocation79_spill] sm:$0xff] %v18995_v12  ;;  %v13440_v53 = vadd.f32 %v13310_v38, %v18668_v11  ;;  %v9623_v22 = vpop.f32.mrb[69].mxu1  ;;  %v18998_v63 = vpop.f32.mrb[158].mxu0 }
 0x720   : > { %v12094_v27 = vpack.c.bf16 %v10372_v50, %v10372_v50  ;;  %v10373_v8 = vmax.f32 %v10245_v0, 0.0  ;;  %v13441_v20 = vadd.f32 %v9623_v22, %v18670_v55  ;;  %v13311_v33 = vpop.f32.mrb[70].mxu1  ;;  %v19004_v7 = vpop.f32.mrb[159].mxu0 }
 0x721   : > { %11014 = vst.msk [vmem:[%s18990_s20 + $0xc8] sm:$0xf] %vm3853_vm8, %v12096_v54  ;;  %v12097_v56 = vpack.c.bf16 %v10375_v37, %v10375_v37  ;;  %v10115_v10 = vmul.f32 %v13440_v53, %v18961_v16  ;;  %v13442_v12 = vadd.f32 %v13311_v33, %v18672_v58  ;;  %v9626_v11 = vpop.f32.mrb[71].mxu1 }
 0x722   : > { %11012 = vst.msk [vmem:[%s18990_s20 + $0xc0] sm:$0xf] %vm3853_vm8, %v12094_v27  ;;  %v12095_v50 = vpack.c.bf16 %v10373_v8, %v10373_v8  ;;  %v10113_v0 = vmul.f32 %v13441_v20, %v18961_v16  ;;  %v13443_v38 = vadd.f32 %v9626_v11, %v18674_v21 }
 0x723   : > { %11015 = vst.msk [vmem:[%s18990_s20 + $0xcc] sm:$0xf] %vm3853_vm8, %v12097_v56  ;;  %v10250_v55 = vadd.f32 %v18971_v52, %v10115_v10  ;;  %v10116_v54 = vmul.f32 %v13442_v12, %v18961_v16 }
 0x724   : > { %11013 = vst.msk [vmem:[%s18990_s20 + $0xc4] sm:$0xf] %vm3853_vm8, %v12095_v50  ;;  %v10248_v37 = vadd.f32 %v18971_v52, %v10113_v0  ;;  %v10114_v58 = vmul.f32 %v13443_v38, %v18961_v16 }
 0x725   : > { %v10378_v53 = vmax.f32 %v10250_v55, 0.0  ;;  %v10251_v22 = vadd.f32 %v18971_v52, %v10116_v54  ;;  %v13126_v21 = vpop.f32.mrb[32].mxu0 }
 0x726   : > { %v10376_v27 = vmax.f32 %v10248_v37, 0.0  ;;  %v10249_v8 = vadd.f32 %v18971_v52, %v10114_v58  ;;  %v13314_v20 = vpop.f32.mrb[72].mxu1  ;;  %v13388_v10 = vadd.f32 %v18744_v17, %v13126_v21  ;;  %v8850_v12 = vpop.f32.mrb[33].mxu0 }
 0x727   : > { %v12100_v56 = vpack.c.bf16 %v10378_v53, %v10378_v53  ;;  %v10379_v33 = vmax.f32 %v10251_v22, 0.0  ;;  %v13444_v11 = vadd.f32 %v13314_v20, %v18684_v15  ;;  %v9639_v50 = vpop.f32.mrb[73].mxu1  ;;  %v13389_v55 = vadd.f32 %v18748_v35, %v8850_v12  ;;  %v13127_v54 = vpop.f32.mrb[34].mxu0 }
 0x728   : > { %v12098_v0 = vpack.c.bf16 %v10376_v27, %v10376_v27  ;;  %v10377_v38 = vmax.f32 %v10249_v8, 0.0  ;;  %v13445_v37 = vadd.f32 %v9639_v50, %v18686_v41  ;;  %v13315_v58 = vpop.f32.mrb[74].mxu1  ;;  %v10063_v17 = vmul.f32 %v13388_v10, %v18961_v16  ;;  %v8853_v21 = vpop.f32.mrb[35].mxu0 }
 0x729   : > { %11018 = vst.msk [vmem:[%s18990_s20 + $0xd8] sm:$0xf] %vm3853_vm8, %v12100_v56  ;;  %v12101_v53 = vpack.c.bf16 %v10379_v33, %v10379_v33  ;;  %v13390_v22 = vadd.f32 %v18752_v47, %v13127_v54  ;;  %v10119_v15 = vmul.f32 %v13444_v11, %v18961_v16  ;;  %v9642_v27 = vpop.f32.mrb[75].mxu1  ;;  %v10061_v8 = vmul.f32 %v13389_v55, %v18961_v16 }
 0x72a   : > { %11016 = vst.msk [vmem:[%s18990_s20 + $0xd0] sm:$0xf] %vm3853_vm8, %v12098_v0  ;;  %v12099_v35 = vpack.c.bf16 %v10377_v38, %v10377_v38  ;;  %v13391_v41 = vadd.f32 %v18756_v9, %v8853_v21  ;;  %v10117_v20 = vmul.f32 %v13445_v37, %v18961_v16  ;;  %v10198_v56 = vadd.f32 %v18971_v52, %v10063_v17 }
 0x72b   : > { %11019 = vst.msk [vmem:[%s18990_s20 + $0xdc] sm:$0xf] %vm3853_vm8, %v12101_v53  ;;  %v10064_v33 = vmul.f32 %v13390_v22, %v18961_v16  ;;  %v10254_v47 = vadd.f32 %v18971_v52, %v10119_v15  ;;  %v13446_v10 = vadd.f32 %v13315_v58, %v18688_v30  ;;  %v10196_v12 = vadd.f32 %v18971_v52, %v10061_v8 }
 0x72c   : > { %11017 = vst.msk [vmem:[%s18990_s20 + $0xd4] sm:$0xf] %vm3853_vm8, %v12099_v35  ;;  %v10062_v11 = vmul.f32 %v13391_v41, %v18961_v16  ;;  %v10252_v9 = vadd.f32 %v18971_v52, %v10117_v20  ;;  %v13447_v50 = vadd.f32 %v9642_v27, %v18690_v25  ;;  %v10326_v0 = vmax.f32 %v10198_v56, 0.0 }
 0x72d   : > { %v10199_v38 = vadd.f32 %v18971_v52, %v10064_v33  ;;  %v10382_v55 = vmax.f32 %v10254_v47, 0.0  ;;  %v10120_v54 = vmul.f32 %v13446_v10, %v18961_v16  ;;  %v10324_v37 = vmax.f32 %v10196_v12, 0.0  ;;  %v13130_v17 = vpop.f32.mrb[36].mxu0 }
 0x72e   : > { %v10197_v53 = vadd.f32 %v18971_v52, %v10062_v11  ;;  %v10380_v30 = vmax.f32 %v10252_v9, 0.0  ;;  %v10118_v58 = vmul.f32 %v13447_v50, %v18961_v16  ;;  %v13318_v22 = vpop.f32.mrb[76].mxu1  ;;  %v12048_v15 = vpack.c.bf16 %v10326_v0, %v10326_v0  ;;  %v8866_v27 = vpop.f32.mrb[37].mxu0 }
 0x72f   : > { %v10327_v21 = vmax.f32 %v10199_v38, 0.0  ;;  %v12104_v35 = vpack.c.bf16 %v10382_v55, %v10382_v55  ;;  %v10255_v25 = vadd.f32 %v18971_v52, %v10120_v54  ;;  %v9655_v8 = vpop.f32.mrb[77].mxu1  ;;  %v12046_v41 = vpack.c.bf16 %v10324_v37, %v10324_v37  ;;  %v13131_v47 = vpop.f32.mrb[38].mxu0 }
 0x730   : > { %v10325_v20 = vmax.f32 %v10197_v53, 0.0  ;;  %v12102_v56 = vpack.c.bf16 %v10380_v30, %v10380_v30  ;;  %v10253_v33 = vadd.f32 %v18971_v52, %v10118_v58  ;;  %v13319_v10 = vpop.f32.mrb[78].mxu1  ;;  %10966 = vst.msk [vmem:[%s18990_s20 + $0x8] sm:$0xf] %vm3853_vm8, %v12048_v15  ;;  %v13392_v9 = vadd.f32 %v18764_v5, %v13130_v17  ;;  %v8869_v0 = vpop.f32.mrb[39].mxu0 }
 0x731   : > { %v12049_v12 = vpack.c.bf16 %v10327_v21, %v10327_v21  ;;  %11022 = vst.msk [vmem:[%s18990_s20 + $0xe8] sm:$0xf] %vm3853_vm8, %v12104_v35  ;;  %v10383_v11 = vmax.f32 %v10255_v25, 0.0  ;;  %v13393_v50 = vadd.f32 %v18768_v23, %v8866_v27  ;;  %v9658_v38 = vpop.f32.mrb[79].mxu1  ;;  %10964 = vst.msk [vmem:[%s18990_s20] sm:$0xf] %vm3853_vm8, %v12046_v41  ;;  %v13394_v37 = vadd.f32 %v18772_v28, %v13131_v47 }
 0x732   : > { %v12047_v55 = vpack.c.bf16 %v10325_v20, %v10325_v20  ;;  %11020 = vst.msk [vmem:[%s18990_s20 + $0xe0] sm:$0xf] %vm3853_vm8, %v12102_v56  ;;  %v10381_v54 = vmax.f32 %v10253_v33, 0.0  ;;  %v13448_v53 = vadd.f32 %v13318_v22, %v18700_v42  ;;  %v10067_v5 = vmul.f32 %v13392_v9, %v18961_v16 }
 0x733   : > { %10967 = vst.msk [vmem:[%s18990_s20 + $0xc] sm:$0xf] %vm3853_vm8, %v12049_v12  ;;  %v12105_v30 = vpack.c.bf16 %v10383_v11, %v10383_v11  ;;  %v10065_v23 = vmul.f32 %v13393_v50, %v18961_v16  ;;  %v13395_v58 = vadd.f32 %v18776_v29, %v8869_v0  ;;  %v10068_v15 = vmul.f32 %v13394_v37, %v18961_v16 }
 0x734   : > { %10965 = vst.msk [vmem:[%s18990_s20 + $0x4] sm:$0xf] %vm3853_vm8, %v12047_v55  ;;  %v12103_v17 = vpack.c.bf16 %v10381_v54, %v10381_v54  ;;  %v10123_v21 = vmul.f32 %v13448_v53, %v18961_v16  ;;  %v13449_v28 = vadd.f32 %v9655_v8, %v18702_v45  ;;  %v10202_v42 = vadd.f32 %v18971_v52, %v10067_v5 }
 0x735   : > { %11023 = vst.msk [vmem:[%s18990_s20 + $0xec] sm:$0xf] %vm3853_vm8, %v12105_v30  ;;  %v10200_v22 = vadd.f32 %v18971_v52, %v10065_v23  ;;  %v10066_v35 = vmul.f32 %v13395_v58, %v18961_v16  ;;  %v13450_v25 = vadd.f32 %v13319_v10, %v18704_v19  ;;  %v10203_v29 = vadd.f32 %v18971_v52, %v10068_v15  ;;  %v13134_v8 = vpop.f32.mrb[40].mxu0 }
 0x736   : > { %11021 = vst.msk [vmem:[%s18990_s20 + $0xe4] sm:$0xf] %vm3853_vm8, %v12103_v17  ;;  %v10258_v27 = vadd.f32 %v18971_v52, %v10123_v21  ;;  %v10121_v41 = vmul.f32 %v13449_v28, %v18961_v16  ;;  %v13451_v45 = vadd.f32 %v9658_v38, %v18706_v51  ;;  %v13322_v20 = vpop.f32.mrb[80].mxu1  ;;  %v10330_v56 = vmax.f32 %v10202_v42, 0.0  ;;  %v8882_v11 = vpop.f32.mrb[41].mxu0 }
 0x737   : > { %v10328_v33 = vmax.f32 %v10200_v22, 0.0  ;;  %v10201_v47 = vadd.f32 %v18971_v52, %v10066_v35  ;;  %v10124_v12 = vmul.f32 %v13450_v25, %v18961_v16  ;;  %v9671_v19 = vpop.f32.mrb[81].mxu1  ;;  %v10331_v10 = vmax.f32 %v10203_v29, 0.0  ;;  %v13135_v55 = vpop.f32.mrb[42].mxu0 }
 0x738   : > { %v10386_v9 = vmax.f32 %v10258_v27, 0.0  ;;  %v10256_v50 = vadd.f32 %v18971_v52, %v10121_v41  ;;  %v10122_v0 = vmul.f32 %v13451_v45, %v18961_v16  ;;  %v13323_v51 = vpop.f32.mrb[82].mxu1  ;;  %v12052_v38 = vpack.c.bf16 %v10330_v56, %v10330_v56  ;;  %v8885_v30 = vpop.f32.mrb[43].mxu0 }
 0x739   : > { %v12050_v54 = vpack.c.bf16 %v10328_v33, %v10328_v33  ;;  %v10329_v37 = vmax.f32 %v10201_v47, 0.0  ;;  %v10259_v53 = vadd.f32 %v18971_v52, %v10124_v12  ;;  %v9674_v5 = vpop.f32.mrb[83].mxu1  ;;  %v12053_v23 = vpack.c.bf16 %v10331_v10, %v10331_v10 }
 0x73a   : > { %v12108_v58 = vpack.c.bf16 %v10386_v9, %v10386_v9  ;;  %v10384_v17 = vmax.f32 %v10256_v50, 0.0  ;;  %v10257_v15 = vadd.f32 %v18971_v52, %v10122_v0  ;;  %10970 = vst.msk [vmem:[%s18990_s20 + $0x18] sm:$0xf] %vm3853_vm8, %v12052_v38  ;;  %v13396_v42 = vadd.f32 %v18784_v39, %v13134_v8 }
 0x73b   : > { %10968 = vst.msk [vmem:[%s18990_s20 + $0x10] sm:$0xf] %vm3853_vm8, %v12050_v54  ;;  %v12051_v21 = vpack.c.bf16 %v10329_v37, %v10329_v37  ;;  %v10387_v28 = vmax.f32 %v10259_v53, 0.0  ;;  %v13397_v22 = vadd.f32 %v18788_v4, %v8882_v11  ;;  %10971 = vst.msk [vmem:[%s18990_s20 + $0x1c] sm:$0xf] %vm3853_vm8, %v12053_v23  ;;  %v13398_v29 = vadd.f32 %v18792_v14, %v13135_v55 }
 0x73c   : > { %11026 = vst.msk [vmem:[%s18990_s20 + $0xf8] sm:$0xf] %vm3853_vm8, %v12108_v58  ;;  %v12106_v35 = vpack.c.bf16 %v10384_v17, %v10384_v17  ;;  %v10385_v25 = vmax.f32 %v10257_v15, 0.0  ;;  %v13452_v27 = vadd.f32 %v13322_v20, %v18716_v62  ;;  %v10071_v45 = vmul.f32 %v13396_v42, %v18961_v16 }
 0x73d   : > { %10969 = vst.msk [vmem:[%s18990_s20 + $0x14] sm:$0xf] %vm3853_vm8, %v12051_v21  ;;  %v12109_v41 = vpack.c.bf16 %v10387_v28, %v10387_v28  ;;  %v10069_v39 = vmul.f32 %v13397_v22, %v18961_v16  ;;  %v13399_v4 = vadd.f32 %v18796_v40, %v8885_v30  ;;  %v10072_v56 = vmul.f32 %v13398_v29, %v18961_v16  ;;  %v13138_v62 = vpop.f32.mrb[44].mxu0 }
 0x73e   : > { %11024 = vst.msk [vmem:[%s18990_s20 + $0xf0] sm:$0xf] %vm3853_vm8, %v12106_v35  ;;  %v12107_v8 = vpack.c.bf16 %v10385_v25, %v10385_v25  ;;  %v10127_v33 = vmul.f32 %v13452_v27, %v18961_v16  ;;  %v13453_v14 = vadd.f32 %v9671_v19, %v18718_v32  ;;  %v13326_v20 = vpop.f32.mrb[84].mxu1  ;;  %v10206_v47 = vadd.f32 %v18971_v52, %v10071_v45  ;;  %v8898_v10 = vpop.f32.mrb[45].mxu0 }
 0x73f   : > { %11027 = vst.msk [vmem:[%s18990_s20 + $0xfc] sm:$0xf] %vm3853_vm8, %v12109_v41  ;;  %v10204_v12 = vadd.f32 %v18971_v52, %v10069_v39  ;;  %v10070_v11 = vmul.f32 %v13399_v4, %v18961_v16  ;;  %v13454_v40 = vadd.f32 %v13323_v51, %v18720_v46  ;;  %v9687_v9 = vpop.f32.mrb[85].mxu1  ;;  %v10207_v50 = vadd.f32 %v18971_v52, %v10072_v56  ;;  %v13139_v55 = vpop.f32.mrb[46].mxu0 }
 0x740   : > { %11025 = vst.msk [vmem:[%s18990_s20 + $0xf4] sm:$0xf] %vm3853_vm8, %v12107_v8  ;;  %v10262_v32 = vadd.f32 %v18971_v52, %v10127_v33  ;;  %v10125_v19 = vmul.f32 %v13453_v14, %v18961_v16  ;;  %v13455_v0 = vadd.f32 %v9674_v5, %v18722_v49  ;;  %v13327_v38 = vpop.f32.mrb[86].mxu1  ;;  %v10334_v54 = vmax.f32 %v10206_v47, 0.0  ;;  %v8901_v51 = vpop.f32.mrb[47].mxu0 }
 0x741   : > { %v10332_v37 = vmax.f32 %v10204_v12, 0.0  ;;  %v10205_v53 = vadd.f32 %v18971_v52, %v10070_v11  ;;  %v10128_v46 = vmul.f32 %v13454_v40, %v18961_v16  ;;  %v9690_v30 = vpop.f32.mrb[87].mxu1  ;;  %v10335_v23 = vmax.f32 %v10207_v50, 0.0 }
 0x742   : > { %v10390_v58 = vmax.f32 %v10262_v32, 0.0  ;;  %v10260_v17 = vadd.f32 %v18971_v52, %v10125_v19  ;;  %v10126_v15 = vmul.f32 %v13455_v0, %v18961_v16  ;;  %v12056_v49 = vpack.c.bf16 %v10334_v54, %v10334_v54 }
 0x743   : > { %v12054_v5 = vpack.c.bf16 %v10332_v37, %v10332_v37  ;;  %v10333_v21 = vmax.f32 %v10205_v53, 0.0  ;;  %v10263_v28 = vadd.f32 %v18971_v52, %v10128_v46  ;;  %v12057_v42 = vpack.c.bf16 %v10335_v23, %v10335_v23 }
 0x744   : > { %v12112_v22 = vpack.c.bf16 %v10390_v58, %v10390_v58  ;;  %v10388_v35 = vmax.f32 %v10260_v17, 0.0  ;;  %v10261_v25 = vadd.f32 %v18971_v52, %v10126_v15  ;;  %10974 = vst.msk [vmem:[%s18990_s20 + $0x28] sm:$0xf] %vm3853_vm8, %v12056_v49  ;;  %v13400_v41 = vadd.f32 %v18804_v24, %v13138_v62 }
 0x745   : > { %10972 = vst.msk [vmem:[%s18990_s20 + $0x20] sm:$0xf] %vm3853_vm8, %v12054_v5  ;;  %v12055_v29 = vpack.c.bf16 %v10333_v21, %v10333_v21  ;;  %v10391_v27 = vmax.f32 %v10263_v28, 0.0  ;;  %v13401_v45 = vadd.f32 %v18810_v13, %v8898_v10  ;;  %10975 = vst.msk [vmem:[%s18990_s20 + $0x2c] sm:$0xf] %vm3853_vm8, %v12057_v42  ;;  %v13402_v8 = vadd.f32 %v18814_v48, %v13139_v55  ;;  %v13142_v33 = vpop.f32.mrb[48].mxu0 }
 0x746   : > { %11030 = vst.msk [vmem:[%s18990_s20 + $0x108] sm:$0xf] %vm3853_vm8, %v12112_v22  ;;  %v12110_v39 = vpack.c.bf16 %v10388_v35, %v10388_v35  ;;  %v10389_v4 = vmax.f32 %v10261_v25, 0.0  ;;  %v13456_v56 = vadd.f32 %v13326_v20, %v18730_v44  ;;  %v13330_v14 = vpop.f32.mrb[88].mxu1  ;;  %v10075_v24 = vmul.f32 %v13400_v41, %v18961_v16  ;;  %v8914_v12 = vpop.f32.mrb[49].mxu0 }
 0x747   : > { %10973 = vst.msk [vmem:[%s18990_s20 + $0x24] sm:$0xf] %vm3853_vm8, %v12055_v29  ;;  %v12113_v47 = vpack.c.bf16 %v10391_v27, %v10391_v27  ;;  %v10073_v13 = vmul.f32 %v13401_v45, %v18961_v16  ;;  %v13403_v62 = vadd.f32 %v18818_v3, %v8901_v51  ;;  %v19150_v11 = vpop.f32.mrb[89].mxu1  ;;  %v10076_v44 = vmul.f32 %v13402_v8, %v18961_v16  ;;  %v13143_v10 = vpop.f32.mrb[50].mxu0 }
 0x748   : > { %11028 = vst.msk [vmem:[%s18990_s20 + $0x100] sm:$0xf] %vm3853_vm8, %v12110_v39  ;;  %v12111_v48 = vpack.c.bf16 %v10389_v4, %v10389_v4  ;;  %v10131_v20 = vmul.f32 %v13456_v56, %v18961_v16  ;;  %v13457_v40 = vadd.f32 %v9687_v9, %v18732_v1  ;;  %v19157_v50 = vpop.f32.mrb[90].mxu1  ;;  %v10210_v3 = vadd.f32 %v18971_v52, %v10075_v24  ;;  %v8917_v55 = vpop.f32.mrb[51].mxu0 }
 0x749   : > { %11031 = vst.msk [vmem:[%s18990_s20 + $0x10c] sm:$0xf] %vm3853_vm8, %v12113_v47  ;;  %v10208_v32 = vadd.f32 %v18971_v52, %v10073_v13  ;;  %v10074_v19 = vmul.f32 %v13403_v62, %v18961_v16  ;;  %v13458_v0 = vadd.f32 %v13327_v38, %v18734_v6  ;;  %v9706_v54 = vpop.f32.mrb[91].mxu1  ;;  %v10211_v37 = vadd.f32 %v18971_v52, %v10076_v44 }
 0x74a   : > { %11029 = vst.msk [vmem:[%s18990_s20 + $0x104] sm:$0xf] %vm3853_vm8, %v12111_v48  ;;  %v10266_v1 = vadd.f32 %v18971_v52, %v10131_v20  ;;  %v10129_v9 = vmul.f32 %v13457_v40, %v18961_v16  ;;  %v13459_v53 = vadd.f32 %v9690_v30, %v18736_v31  ;;  %v10338_v46 = vmax.f32 %v10210_v3, 0.0 }
 0x74b   : > { %v10336_v51 = vmax.f32 %v10208_v32, 0.0  ;;  %v10209_v23 = vadd.f32 %v18971_v52, %v10074_v19  ;;  %v10132_v58 = vmul.f32 %v13458_v0, %v18961_v16  ;;  %v10339_v6 = vmax.f32 %v10211_v37, 0.0 }
 0x74c   : > { %v10394_v38 = vmax.f32 %v10266_v1, 0.0  ;;  %v10264_v17 = vadd.f32 %v18971_v52, %v10129_v9  ;;  %v10130_v15 = vmul.f32 %v13459_v53, %v18961_v16  ;;  %v12060_v49 = vpack.c.bf16 %v10338_v46, %v10338_v46 }
 0x74d   : > { %v12058_v5 = vpack.c.bf16 %v10336_v51, %v10336_v51  ;;  %v10337_v21 = vmax.f32 %v10209_v23, 0.0  ;;  %v10267_v31 = vadd.f32 %v18971_v52, %v10132_v58  ;;  %v12061_v30 = vpack.c.bf16 %v10339_v6, %v10339_v6  ;;  %v19177_v35 = vpop.f32.mrb[52].mxu0 }
 0x74e   : > { %v12116_v28 = vpack.c.bf16 %v10394_v38, %v10394_v38  ;;  %v10392_v42 = vmax.f32 %v10264_v17, 0.0  ;;  %v10265_v22 = vadd.f32 %v18971_v52, %v10130_v15  ;;  %v19179_v25 = vpop.f32.mrb[92].mxu1  ;;  %10978 = vst.msk [vmem:[%s18990_s20 + $0x38] sm:$0xf] %vm3853_vm8, %v12060_v49  ;;  %v13404_v41 = vadd.f32 %v18826_v59, %v13142_v33  ;;  %v8930_v39 = vpop.f32.mrb[53].mxu0 }
 0x74f   : > { %10976 = vst.msk [vmem:[%s18990_s20 + $0x30] sm:$0xf] %vm3853_vm8, %v12058_v5  ;;  %v12059_v29 = vpack.c.bf16 %v10337_v21, %v10337_v21  ;;  %v10395_v27 = vmax.f32 %v10267_v31, 0.0  ;;  %v13405_v45 = vadd.f32 %v18832_v18, %v8914_v12  ;;  %v19187_v4 = vpop.f32.mrb[93].mxu1  ;;  %10979 = vst.msk [vmem:[%s18990_s20 + $0x3c] sm:$0xf] %vm3853_vm8, %v12061_v30  ;;  %v13406_v47 = vadd.f32 %v18836_v26, %v13143_v10 }
 0x750   : > { %11034 = vst.msk [vmem:[%s18990_s20 + $0x118] sm:$0xf] %vm3853_vm8, %v12116_v28  ;;  %v12114_v8 = vpack.c.bf16 %v10392_v42, %v10392_v42  ;;  %v10393_v56 = vmax.f32 %v10265_v22, 0.0  ;;  %v13460_v24 = vadd.f32 %v13330_v14, %v18742_v34  ;;  %v13147_v13 = vpop.f32.mrb[54].mxu0  ;;  %v19195_v62 = vpop.f32.mrb[94].mxu1  ;;  %v10079_v18 = vmul.f32 %v13404_v41, %v18961_v16 }
 0x751   : > { %10977 = vst.msk [vmem:[%s18990_s20 + $0x34] sm:$0xf] %vm3853_vm8, %v12059_v29  ;;  %v12117_v59 = vpack.c.bf16 %v10395_v27, %v10395_v27  ;;  %v10077_v33 = vmul.f32 %v13405_v45, %v18961_v16  ;;  %v13407_v12 = vadd.f32 %v18840_v61, %v8917_v55  ;;  %v8933_v48 = vpop.f32.mrb[55].mxu0  ;;  %v19202_v44 = vpop.f32.mrb[95].mxu1  ;;  %v10080_v34 = vmul.f32 %v13406_v47, %v18961_v16  ;;  %v20345_v47 = vld [vmem:[#allocation5_spill] sm:$0xff] }
 0x752   : > { %11032 = vst.msk [vmem:[%s18990_s20 + $0x110] sm:$0xf] %vm3853_vm8, %v12114_v8  ;;  %v12115_v26 = vpack.c.bf16 %v10393_v56, %v10393_v56  ;;  %v10135_v14 = vmul.f32 %v13460_v24, %v18961_v16  ;;  %v13461_v20 = vadd.f32 %v19150_v11, %v18746_v36  ;;  %v10214_v40 = vadd.f32 %v18971_v52, %v10079_v18  ;;  %v20344_v8 = vld [vmem:[#allocation38_spill] sm:$0xff] }
 0x753   : > { %11035 = vst.msk [vmem:[%s18990_s20 + $0x11c] sm:$0xf] %vm3853_vm8, %v12117_v59  ;;  %v10212_v10 = vadd.f32 %v18971_v52, %v10077_v33  ;;  %v10078_v61 = vmul.f32 %v13407_v12, %v18961_v16  ;;  %v13462_v3 = vadd.f32 %v19157_v50, %v18750_v2  ;;  %v10215_v32 = vadd.f32 %v18971_v52, %v10080_v34  ;;  %v20347_v12 = vld [vmem:[#allocation15_spill] sm:$0xff] }
 0x754   : > { %11033 = vst.msk [vmem:[%s18990_s20 + $0x114] sm:$0xf] %vm3853_vm8, %v12115_v26  ;;  %v10270_v19 = vadd.f32 %v18971_v52, %v10135_v14  ;;  %v10133_v0 = vmul.f32 %v13461_v20, %v18961_v16  ;;  %v13463_v36 = vadd.f32 %v9706_v54, %v18754_v60  ;;  %v10342_v11 = vmax.f32 %v10214_v40, 0.0  ;;  %v20348_v20 = vld [vmem:[#allocation6_spill] sm:$0xff] }
 0x755   : > { %v10340_v55 = vmax.f32 %v10212_v10, 0.0  ;;  %v10213_v37 = vadd.f32 %v18971_v52, %v10078_v61  ;;  %v10136_v1 = vmul.f32 %v13462_v3, %v18961_v16  ;;  %v10343_v9 = vmax.f32 %v10215_v32, 0.0  ;;  %v19227_v46 = vpop.f32.mrb[56].mxu0 }
 0x756   : > { %v10398_v53 = vmax.f32 %v10270_v19, 0.0  ;;  %v10268_v2 = vadd.f32 %v18971_v52, %v10133_v0  ;;  %v10134_v50 = vmul.f32 %v13463_v36, %v18961_v16  ;;  %v19229_v51 = vpop.f32.mrb[96].mxu1  ;;  %v12064_v23 = vpack.c.bf16 %v10342_v11, %v10342_v11  ;;  %v19232_v6 = vpop.f32.mrb[57].mxu0 }
 0x757   : > { %v12062_v60 = vpack.c.bf16 %v10340_v55, %v10340_v55  ;;  %v10341_v54 = vmax.f32 %v10213_v37, 0.0  ;;  %v10271_v58 = vadd.f32 %v18971_v52, %v10136_v1  ;;  %v19234_v38 = vpop.f32.mrb[97].mxu1  ;;  %v12065_v17 = vpack.c.bf16 %v10343_v9, %v10343_v9  ;;  %v19237_v21 = vpop.f32.mrb[58].mxu0 }
 0x758   : > { %v12120_v15 = vpack.c.bf16 %v10398_v53, %v10398_v53  ;;  %v10396_v49 = vmax.f32 %v10268_v2, 0.0  ;;  %v10269_v5 = vadd.f32 %v18971_v52, %v10134_v50  ;;  %v19239_v31 = vpop.f32.mrb[98].mxu1  ;;  %10982 = vst.msk [vmem:[%s18990_s20 + $0x48] sm:$0xf] %vm3853_vm8, %v12064_v23  ;;  %v13408_v42 = vadd.f32 %v18846_v57, %v19177_v35  ;;  %v19248_v29 = vpop.f32.mrb[59].mxu0 }
 0x759   : > { %10980 = vst.msk [vmem:[%s18990_s20 + $0x40] sm:$0xf] %vm3853_vm8, %v12062_v60  ;;  %v12063_v30 = vpack.c.bf16 %v10341_v54, %v10341_v54  ;;  %v10399_v28 = vmax.f32 %v10271_v58, 0.0  ;;  %v13409_v22 = vadd.f32 %v18850_v43, %v8930_v39  ;;  %v19250_v27 = vpop.f32.mrb[99].mxu1  ;;  %10983 = vst.msk [vmem:[%s18990_s20 + $0x4c] sm:$0xf] %vm3853_vm8, %v12065_v17  ;;  %v13410_v56 = vadd.f32 %v20344_v8, %v13147_v13 }
 0x75a   : > { %11038 = vst.msk [vmem:[%s18990_s20 + $0x128] sm:$0xf] %vm3853_vm8, %v12120_v15  ;;  %v12118_v41 = vpack.c.bf16 %v10396_v49, %v10396_v49  ;;  %v10397_v45 = vmax.f32 %v10269_v5, 0.0  ;;  %v13464_v24 = vadd.f32 %v19179_v25, %v20345_v47  ;;  %v10083_v43 = vmul.f32 %v13408_v42, %v18961_v16  ;;  %v20346_v39 = vld [vmem:[#allocation41_spill] sm:$0xff]  ;;  %v20351_v8 = vld [vmem:[#allocation24_spill] sm:$0xff] }
 0x75b   : > { %10981 = vst.msk [vmem:[%s18990_s20 + $0x44] sm:$0xf] %vm3853_vm8, %v12063_v30  ;;  %v12121_v57 = vpack.c.bf16 %v10399_v28, %v10399_v28  ;;  %v10081_v35 = vmul.f32 %v13409_v22, %v18961_v16  ;;  %v13411_v59 = vadd.f32 %v20346_v39, %v8933_v48  ;;  %v10084_v33 = vmul.f32 %v13410_v56, %v18961_v16 }
 0x75c   : > { %11036 = vst.msk [vmem:[%s18990_s20 + $0x120] sm:$0xf] %vm3853_vm8, %v12118_v41  ;;  %v12119_v18 = vpack.c.bf16 %v10397_v45, %v10397_v45  ;;  %v10139_v13 = vmul.f32 %v13464_v24, %v18961_v16  ;;  %v13465_v25 = vadd.f32 %v19187_v4, %v20347_v12  ;;  %v10218_v26 = vadd.f32 %v18971_v52, %v10083_v43  ;;  %v20349_v4 = vld [vmem:[#allocation37_spill] sm:$0xff] }
 0x75d   : > { %11039 = vst.msk [vmem:[%s18990_s20 + $0x12c] sm:$0xf] %vm3853_vm8, %v12121_v57  ;;  %v10216_v34 = vadd.f32 %v18971_v52, %v10081_v35  ;;  %v10082_v14 = vmul.f32 %v13411_v59, %v18961_v16  ;;  %v13466_v48 = vadd.f32 %v19195_v62, %v20348_v20  ;;  %v10219_v40 = vadd.f32 %v18971_v52, %v10084_v33  ;;  %v19284_v32 = vpop.f32.mrb[60].mxu0  ;;  %v20350_v41 = vld [vmem:[#allocation13_spill] sm:$0xff]  ;;  %v20353_v35 = vld [vmem:[#allocation40_spill] sm:$0xff] }
 0x75e   : > { %11037 = vst.msk [vmem:[%s18990_s20 + $0x124] sm:$0xf] %vm3853_vm8, %v12119_v18  ;;  %v10274_v10 = vadd.f32 %v18971_v52, %v10139_v13  ;;  %v10137_v61 = vmul.f32 %v13465_v25, %v18961_v16  ;;  %v13467_v3 = vadd.f32 %v19202_v44, %v20349_v4  ;;  %v19286_v19 = vpop.f32.mrb[100].mxu1  ;;  %v10346_v0 = vmax.f32 %v10218_v26, 0.0  ;;  %v19290_v55 = vpop.f32.mrb[61].mxu0  ;;  %v20352_v57 = vld [vmem:[#allocation25_spill] sm:$0xff] }
 0x75f   : > { %v10344_v36 = vmax.f32 %v10216_v34, 0.0  ;;  %v10217_v11 = vadd.f32 %v18971_v52, %v10082_v14  ;;  %v10140_v62 = vmul.f32 %v13466_v48, %v18961_v16  ;;  %v19292_v37 = vpop.f32.mrb[101].mxu1  ;;  %v10347_v1 = vmax.f32 %v10219_v40, 0.0  ;;  %v19296_v2 = vpop.f32.mrb[62].mxu0  ;;  %v20354_v18 = vld [vmem:[#allocation27_spill] sm:$0xff]  ;;  %v20356_v48 = vld [vmem:[#allocation21_spill] sm:$0xff] }
 0x760   : > { %v10402_v9 = vmax.f32 %v10274_v10, 0.0  ;;  %v10272_v44 = vadd.f32 %v18971_v52, %v10137_v61  ;;  %v10138_v53 = vmul.f32 %v13467_v3, %v18961_v16  ;;  %v19298_v50 = vpop.f32.mrb[102].mxu1  ;;  %v12068_v23 = vpack.c.bf16 %v10346_v0, %v10346_v0  ;;  %v19301_v17 = vpop.f32.mrb[63].mxu0  ;;  %v20355_v25 = vld [vmem:[#allocation39_spill] sm:$0xff]  ;;  %v20357_v0 = vld [vmem:[#allocation26_spill] sm:$0xff] }
 0x761   : > { %v12066_v60 = vpack.c.bf16 %v10344_v36, %v10344_v36  ;;  %v10345_v54 = vmax.f32 %v10217_v11, 0.0  ;;  %v10275_v58 = vadd.f32 %v18971_v52, %v10140_v62  ;;  %v19303_v15 = vpop.f32.mrb[103].mxu1  ;;  %v12069_v49 = vpack.c.bf16 %v10347_v1, %v10347_v1 }
 0x762   : > { %v12124_v5 = vpack.c.bf16 %v10402_v9, %v10402_v9  ;;  %v10400_v30 = vmax.f32 %v10272_v44, 0.0  ;;  %v10273_v28 = vadd.f32 %v18971_v52, %v10138_v53  ;;  %10986 = vst.msk [vmem:[%s18990_s20 + $0x58] sm:$0xf] %vm3853_vm8, %v12068_v23  ;;  %v13412_v45 = vadd.f32 %v20350_v41, %v19227_v46 }
 0x763   : > { %10984 = vst.msk [vmem:[%s18990_s20 + $0x50] sm:$0xf] %vm3853_vm8, %v12066_v60  ;;  %v12067_v42 = vpack.c.bf16 %v10345_v54, %v10345_v54  ;;  %v10403_v22 = vmax.f32 %v10275_v58, 0.0  ;;  %v13413_v56 = vadd.f32 %v20351_v8, %v19232_v6  ;;  %10987 = vst.msk [vmem:[%s18990_s20 + $0x5c] sm:$0xf] %vm3853_vm8, %v12069_v49  ;;  %v13414_v43 = vadd.f32 %v20352_v57, %v19237_v21  ;;  %v20359_v57 = vld [vmem:[#allocation33_spill] sm:$0xff] }
 0x764   : > { %11042 = vst.msk [vmem:[%s18990_s20 + $0x138] sm:$0xf] %vm3853_vm8, %v12124_v5  ;;  %v12122_v47 = vpack.c.bf16 %v10400_v30, %v10400_v30  ;;  %v10401_v24 = vmax.f32 %v10273_v28, 0.0  ;;  %v13468_v39 = vadd.f32 %v19229_v51, %v20353_v35  ;;  %v10087_v46 = vmul.f32 %v13412_v45, %v18961_v16 }
 0x765   : > { %10985 = vst.msk [vmem:[%s18990_s20 + $0x54] sm:$0xf] %vm3853_vm8, %v12067_v42  ;;  %v12125_v59 = vpack.c.bf16 %v10403_v22, %v10403_v22  ;;  %v10085_v6 = vmul.f32 %v13413_v56, %v18961_v16  ;;  %v13415_v33 = vadd.f32 %v20354_v18, %v19248_v29  ;;  %v10088_v12 = vmul.f32 %v13414_v43, %v18961_v16  ;;  %v19334_v26 = vpop.f32.mrb[64].mxu0 }
 0x766   : > { %11040 = vst.msk [vmem:[%s18990_s20 + $0x130] sm:$0xf] %vm3853_vm8, %v12122_v47  ;;  %v12123_v13 = vpack.c.bf16 %v10401_v24, %v10401_v24  ;;  %v10143_v21 = vmul.f32 %v13468_v39, %v18961_v16  ;;  %v13469_v51 = vadd.f32 %v19234_v38, %v20355_v25  ;;  %v19336_v34 = vpop.f32.mrb[104].mxu1  ;;  %v10222_v14 = vadd.f32 %v18971_v52, %v10087_v46  ;;  %v19345_v10 = vpop.f32.mrb[65].mxu0  ;;  %v20358_v47 = vld [vmem:[#allocation11_spill] sm:$0xff] }
 0x767   : > { %11043 = vst.msk [vmem:[%s18990_s20 + $0x13c] sm:$0xf] %vm3853_vm8, %v12125_v59  ;;  %v10220_v29 = vadd.f32 %v18971_v52, %v10085_v6  ;;  %v10086_v20 = vmul.f32 %v13415_v33, %v18961_v16  ;;  %v13470_v40 = vadd.f32 %v19239_v31, %v20356_v48  ;;  %v19347_v61 = vpop.f32.mrb[105].mxu1  ;;  %v10223_v38 = vadd.f32 %v18971_v52, %v10088_v12  ;;  %v19356_v11 = vpop.f32.mrb[66].mxu0  ;;  %v20360_v59 = vld [vmem:[#allocation30_spill] sm:$0xff]  ;;  %v20361_v6 = vld [vmem:[#allocation31_spill] sm:$0xff] }
 0x768   : > { %11041 = vst.msk [vmem:[%s18990_s20 + $0x134] sm:$0xf] %vm3853_vm8, %v12123_v13  ;;  %v10278_v4 = vadd.f32 %v18971_v52, %v10143_v21  ;;  %v10141_v3 = vmul.f32 %v13469_v51, %v18961_v16  ;;  %v13471_v36 = vadd.f32 %v19250_v27, %v20357_v0  ;;  %v19358_v62 = vpop.f32.mrb[106].mxu1  ;;  %v10350_v31 = vmax.f32 %v10222_v14, 0.0  ;;  %v19362_v53 = vpop.f32.mrb[67].mxu0  ;;  %v20362_v21 = vld [vmem:[#allocation22_spill] sm:$0xff] }
 0x769   : > { %v10348_v1 = vmax.f32 %v10220_v29, 0.0  ;;  %v10221_v9 = vadd.f32 %v18971_v52, %v10086_v20  ;;  %v10144_v44 = vmul.f32 %v13470_v40, %v18961_v16  ;;  %v19364_v23 = vpop.f32.mrb[107].mxu1  ;;  %v10351_v60 = vmax.f32 %v10223_v38, 0.0  ;;  %v20363_v20 = vld [vmem:[#allocation10_spill] sm:$0xff]  ;;  %v20364_v0 = vld [vmem:[#allocation17_spill] sm:$0xff] }
 0x76a   : > { %v10406_v54 = vmax.f32 %v10278_v4, 0.0  ;;  %v10276_v27 = vadd.f32 %v18971_v52, %v10141_v3  ;;  %v10142_v58 = vmul.f32 %v13471_v36, %v18961_v16  ;;  %v12072_v49 = vpack.c.bf16 %v10350_v31, %v10350_v31 }
 0x76b   : > { %v12070_v5 = vpack.c.bf16 %v10348_v1, %v10348_v1  ;;  %v10349_v30 = vmax.f32 %v10221_v9, 0.0  ;;  %v10279_v28 = vadd.f32 %v18971_v52, %v10144_v44  ;;  %v12073_v42 = vpack.c.bf16 %v10351_v60, %v10351_v60  ;;  %v20365_v60 = vld [vmem:[#allocation19_spill] sm:$0xff] }
 0x76c   : > { %v12128_v22 = vpack.c.bf16 %v10406_v54, %v10406_v54  ;;  %v10404_v41 = vmax.f32 %v10276_v27, 0.0  ;;  %v10277_v45 = vadd.f32 %v18971_v52, %v10142_v58  ;;  %10990 = vst.msk [vmem:[%s18990_s20 + $0x68] sm:$0xf] %vm3853_vm8, %v12072_v49  ;;  %v13416_v24 = vadd.f32 %v20358_v47, %v19284_v32 }
 0x76d   : > { %10988 = vst.msk [vmem:[%s18990_s20 + $0x60] sm:$0xf] %vm3853_vm8, %v12070_v5  ;;  %v12071_v8 = vpack.c.bf16 %v10349_v30, %v10349_v30  ;;  %v10407_v56 = vmax.f32 %v10279_v28, 0.0  ;;  %v13417_v43 = vadd.f32 %v20359_v57, %v19290_v55  ;;  %10991 = vst.msk [vmem:[%s18990_s20 + $0x6c] sm:$0xf] %vm3853_vm8, %v12073_v42  ;;  %v13418_v46 = vadd.f32 %v20360_v59, %v19296_v2  ;;  %v19386_v33 = vpop.f32.mrb[68].mxu0 }
 0x76e   : > { %11046 = vst.msk [vmem:[%s18990_s20 + $0x148] sm:$0xf] %vm3853_vm8, %v12128_v22  ;;  %v12126_v35 = vpack.c.bf16 %v10404_v41, %v10404_v41  ;;  %v10405_v39 = vmax.f32 %v10277_v45, 0.0  ;;  %v13472_v18 = vadd.f32 %v19286_v19, %v20361_v6  ;;  %v19388_v32 = vpop.f32.mrb[108].mxu1  ;;  %v10091_v13 = vmul.f32 %v13416_v24, %v18961_v16  ;;  %v19396_v51 = vpop.f32.mrb[69].mxu0 }
 0x76f   : > { %10989 = vst.msk [vmem:[%s18990_s20 + $0x64] sm:$0xf] %vm3853_vm8, %v12071_v8  ;;  %v12129_v55 = vpack.c.bf16 %v10407_v56, %v10407_v56  ;;  %v10089_v12 = vmul.f32 %v13417_v43, %v18961_v16  ;;  %v13419_v25 = vadd.f32 %v20362_v21, %v19301_v17  ;;  %v19398_v2 = vpop.f32.mrb[109].mxu1  ;;  %v10092_v14 = vmul.f32 %v13418_v46, %v18961_v16  ;;  %v19406_v40 = vpop.f32.mrb[70].mxu0  ;;  %v20367_v46 = vld [vmem:[#allocation45_spill] sm:$0xff] }
 0x770   : > { %11044 = vst.msk [vmem:[%s18990_s20 + $0x140] sm:$0xf] %vm3853_vm8, %v12126_v35  ;;  %v12127_v19 = vpack.c.bf16 %v10405_v39, %v10405_v39  ;;  %v10147_v29 = vmul.f32 %v13472_v18, %v18961_v16  ;;  %v13473_v48 = vadd.f32 %v19292_v37, %v20363_v20  ;;  %v19408_v38 = vpop.f32.mrb[110].mxu1  ;;  %v10226_v17 = vadd.f32 %v18971_v52, %v10091_v13  ;;  %v19417_v31 = vpop.f32.mrb[71].mxu0  ;;  %v20366_v39 = vld [vmem:[#allocation43_spill] sm:$0xff] }
 0x771   : > { %11047 = vst.msk [vmem:[%s18990_s20 + $0x14c] sm:$0xf] %vm3853_vm8, %v12129_v55  ;;  %v10224_v4 = vadd.f32 %v18971_v52, %v10089_v12  ;;  %v10090_v3 = vmul.f32 %v13419_v25, %v18961_v16  ;;  %v13474_v36 = vadd.f32 %v19298_v50, %v20364_v0  ;;  %v19419_v1 = vpop.f32.mrb[111].mxu1  ;;  %v10227_v37 = vadd.f32 %v18971_v52, %v10092_v14  ;;  %v20368_v12 = vld [vmem:[#allocation47_spill] sm:$0xff]  ;;  %v20369_v25 = vld [vmem:[#allocation9_spill] sm:$0xff] }
 0x772   : > { %11045 = vst.msk [vmem:[%s18990_s20 + $0x144] sm:$0xf] %vm3853_vm8, %v12127_v19  ;;  %v10282_v9 = vadd.f32 %v18971_v52, %v10147_v29  ;;  %v10145_v44 = vmul.f32 %v13473_v48, %v18961_v16  ;;  %v13475_v54 = vadd.f32 %v19303_v15, %v20365_v60  ;;  %v10354_v27 = vmax.f32 %v10226_v17, 0.0  ;;  %v19467_v29 = vld [vmem:[%s19871_s7] ss:$0 sm:$0xff] }
 0x773   : > { %v10352_v58 = vmax.f32 %v10224_v4, 0.0  ;;  %v10225_v49 = vadd.f32 %v18971_v52, %v10090_v3  ;;  %v10148_v50 = vmul.f32 %v13474_v36, %v18961_v16  ;;  %v10355_v5 = vmax.f32 %v10227_v37, 0.0  ;;  %v20371_v37 = vld [vmem:[#allocation18_spill] sm:$0xff] }
 0x774   : > { %v10410_v30 = vmax.f32 %v10282_v9, 0.0  ;;  %v10280_v28 = vadd.f32 %v18971_v52, %v10145_v44  ;;  %v10146_v42 = vmul.f32 %v13475_v54, %v18961_v16  ;;  %v12076_v22 = vpack.c.bf16 %v10354_v27, %v10354_v27  ;;  %v20372_v27 = vld [vmem:[#allocation23_spill] sm:$0xff] }
 0x775   : > { %v12074_v41 = vpack.c.bf16 %v10352_v58, %v10352_v58  ;;  %v10353_v45 = vmax.f32 %v10225_v49, 0.0  ;;  %v10283_v15 = vadd.f32 %v18971_v52, %v10148_v50  ;;  %v12077_v8 = vpack.c.bf16 %v10355_v5, %v10355_v5  ;;  %v19434_v57 = vpop.f32.mrb[72].mxu0  ;;  %v20373_v5 = vld [vmem:[#allocation20_spill] sm:$0xff] }
 0x776   : > { %v12132_v56 = vpack.c.bf16 %v10410_v30, %v10410_v30  ;;  %v10408_v47 = vmax.f32 %v10280_v28, 0.0  ;;  %v10281_v24 = vadd.f32 %v18971_v52, %v10146_v42  ;;  %v19436_v43 = vpop.f32.mrb[112].mxu1  ;;  %10994 = vst.msk [vmem:[%s18990_s20 + $0x78] sm:$0xf] %vm3853_vm8, %v12076_v22  ;;  %v13420_v59 = vadd.f32 %v20366_v39, %v19334_v26  ;;  %v19446_v18 = vpop.f32.mrb[73].mxu0 }
 0x777   : > { %10992 = vst.msk [vmem:[%s18990_s20 + $0x70] sm:$0xf] %vm3853_vm8, %v12074_v41  ;;  %v12075_v16 = vpack.c.bf16 %v10353_v45, %v10353_v45  ;;  %v10411_v35 = vmax.f32 %v10283_v15, 0.0  ;;  %v13421_v6 = vadd.f32 %v20367_v46, %v19345_v10  ;;  %v19448_v52 = vpop.f32.mrb[113].mxu1  ;;  %10995 = vst.msk [vmem:[%s18990_s20 + $0x7c] sm:$0xf] %vm3853_vm8, %v12077_v8  ;;  %v13422_v21 = vadd.f32 %v20368_v12, %v19356_v11 }
 0x778   : > { %11050 = vst.msk [vmem:[%s18990_s20 + $0x158] sm:$0xf] %vm3853_vm8, %v12132_v56  ;;  %v12130_v55 = vpack.c.bf16 %v10408_v47, %v10408_v47  ;;  %v10409_v13 = vmax.f32 %v10281_v24, 0.0  ;;  %v13476_v26 = vadd.f32 %v19336_v34, %v20369_v25  ;;  %v19458_v19 = vpop.f32.mrb[74].mxu0  ;;  %v19460_v10 = vpop.f32.mrb[114].mxu1  ;;  %v10095_v20 = vmul.f32 %v19467_v29, %v13420_v59  ;;  %v20370_v34 = vld [vmem:[#allocation49_spill] sm:$0xff] }
 0x779   : > { %10993 = vst.msk [vmem:[%s18990_s20 + $0x74] sm:$0xf] %vm3853_vm8, %v12075_v16  ;;  %v12133_v14 = vpack.c.bf16 %v10411_v35, %v10411_v35  ;;  %v10093_v11 = vmul.f32 %v19467_v29, %v13421_v6  ;;  %v13423_v48 = vadd.f32 %v20370_v34, %v19362_v53  ;;  %v19473_v17 = vpop.f32.mrb[75].mxu0  ;;  %v19475_v4 = vpop.f32.mrb[115].mxu1  ;;  %v10096_v0 = vmul.f32 %v19467_v29, %v13422_v21  ;;  %v19488_v53 = vld [vmem:[%s19872_s8] ss:$0 sm:$0xff] }
 0x77a   : > { %11048 = vst.msk [vmem:[%s18990_s20 + $0x150] sm:$0xf] %vm3853_vm8, %v12130_v55  ;;  %v12131_v3 = vpack.c.bf16 %v10409_v13, %v10409_v13  ;;  %v10151_v36 = vmul.f32 %v19467_v29, %v13476_v26  ;;  %v13477_v9 = vadd.f32 %v19347_v61, %v20371_v37  ;;  %v10230_v44 = vadd.f32 %v19488_v53, %v10095_v20  ;;  %v20376_v37 = vld [vmem:[#allocation55_spill] sm:$0xff] }
 0x77b   : > { %11051 = vst.msk [vmem:[%s18990_s20 + $0x15c] sm:$0xf] %vm3853_vm8, %v12133_v14  ;;  %v10228_v60 = vadd.f32 %v19488_v53, %v10093_v11  ;;  %v10094_v54 = vmul.f32 %v19467_v29, %v13423_v48  ;;  %v13478_v58 = vadd.f32 %v19358_v62, %v20372_v27  ;;  %v10231_v61 = vadd.f32 %v19488_v53, %v10096_v0  ;;  %v20374_v14 = vld [vmem:[#allocation51_spill] sm:$0xff]  ;;  %v20375_v11 = vld [vmem:[#allocation53_spill] sm:$0xff] }
 0x77c   : > { %11049 = vst.msk [vmem:[%s18990_s20 + $0x154] sm:$0xf] %vm3853_vm8, %v12131_v3  ;;  %v10286_v49 = vadd.f32 %v19488_v53, %v10151_v36  ;;  %v10149_v50 = vmul.f32 %v19467_v29, %v13477_v9  ;;  %v13479_v30 = vadd.f32 %v19364_v23, %v20373_v5  ;;  %v10358_v28 = vmax.f32 %v10230_v44, 0.0  ;;  %v20377_v44 = vld [vmem:[#allocation4_spill] sm:$0xff]  ;;  %v20378_v27 = vld [vmem:[#allocation57_spill] sm:$0xff] }
 0x77d   : > { %v10356_v42 = vmax.f32 %v10228_v60, 0.0  ;;  %v10229_v22 = vadd.f32 %v19488_v53, %v10094_v54  ;;  %v10152_v41 = vmul.f32 %v19467_v29, %v13478_v58  ;;  %v10359_v45 = vmax.f32 %v10231_v61, 0.0  ;;  %v19506_v56 = vpop.f32.mrb[76].mxu0 }
 0x77e   : > { %v10414_v15 = vmax.f32 %v10286_v49, 0.0  ;;  %v10284_v62 = vadd.f32 %v19488_v53, %v10149_v50  ;;  %v10150_v8 = vmul.f32 %v19467_v29, %v13479_v30  ;;  %v19508_v47 = vpop.f32.mrb[116].mxu1  ;;  %v12080_v24 = vpack.c.bf16 %v10358_v28, %v10358_v28  ;;  %v19511_v39 = vpop.f32.mrb[77].mxu0  ;;  %v20379_v50 = vld [vmem:[#allocation35_spill] sm:$0xff] }
 0x77f   : > { %v12078_v23 = vpack.c.bf16 %v10356_v42, %v10356_v42  ;;  %v10357_v16 = vmax.f32 %v10229_v22, 0.0  ;;  %v10287_v35 = vadd.f32 %v19488_v53, %v10152_v41  ;;  %v19513_v59 = vpop.f32.mrb[117].mxu1  ;;  %v12081_v46 = vpack.c.bf16 %v10359_v45, %v10359_v45  ;;  %v19516_v12 = vpop.f32.mrb[78].mxu0  ;;  %v20380_v42 = vld [vmem:[#allocation7_spill] sm:$0xff] }
 0x780   : > { %v12136_v6 = vpack.c.bf16 %v10414_v15, %v10414_v15  ;;  %v10412_v55 = vmax.f32 %v10284_v62, 0.0  ;;  %v10285_v13 = vadd.f32 %v19488_v53, %v10150_v8  ;;  %v19518_v21 = vpop.f32.mrb[118].mxu1  ;;  %10998 = vst.msk [vmem:[%s18990_s20 + $0x88] sm:$0xf] %vm3853_vm8, %v12080_v24  ;;  %v13424_v20 = vadd.f32 %v20374_v14, %v19386_v33  ;;  %v19528_v48 = vpop.f32.mrb[79].mxu0 }
 0x781   : > { %10996 = vst.msk [vmem:[%s18990_s20 + $0x80] sm:$0xf] %vm3853_vm8, %v12078_v23  ;;  %v12079_v25 = vpack.c.bf16 %v10357_v16, %v10357_v16  ;;  %v10415_v26 = vmax.f32 %v10287_v35, 0.0  ;;  %v13425_v34 = vadd.f32 %v20375_v11, %v19396_v51  ;;  %v19530_v3 = vpop.f32.mrb[119].mxu1  ;;  %10999 = vst.msk [vmem:[%s18990_s20 + $0x8c] sm:$0xf] %vm3853_vm8, %v12081_v46  ;;  %v13426_v9 = vadd.f32 %v20376_v37, %v19406_v40 }
 0x782   : > { %11054 = vst.msk [vmem:[%s18990_s20 + $0x168] sm:$0xf] %vm3853_vm8, %v12136_v6  ;;  %v12134_v0 = vpack.c.bf16 %v10412_v55, %v10412_v55  ;;  %v10413_v36 = vmax.f32 %v10285_v13, 0.0  ;;  %v13480_v33 = vadd.f32 %v19388_v32, %v20377_v44  ;;  %v10099_v60 = vmul.f32 %v19467_v29, %v13424_v20  ;;  %v20382_v44 = vld [vmem:[#allocation59_spill] sm:$0xff] }
 0x783   : > { %10997 = vst.msk [vmem:[%s18990_s20 + $0x84] sm:$0xf] %vm3853_vm8, %v12079_v25  ;;  %v12137_v51 = vpack.c.bf16 %v10415_v26, %v10415_v26  ;;  %v10097_v54 = vmul.f32 %v19467_v29, %v13425_v34  ;;  %v13427_v58 = vadd.f32 %v20378_v27, %v19417_v31  ;;  %v10100_v49 = vmul.f32 %v19467_v29, %v13426_v9 }
 0x784   : > { %11052 = vst.msk [vmem:[%s18990_s20 + $0x160] sm:$0xf] %vm3853_vm8, %v12134_v0  ;;  %v12135_v61 = vpack.c.bf16 %v10413_v36, %v10413_v36  ;;  %v10155_v40 = vmul.f32 %v19467_v29, %v13480_v33  ;;  %v13481_v32 = vadd.f32 %v19398_v2, %v20379_v50  ;;  %v10234_v5 = vadd.f32 %v19488_v53, %v10099_v60  ;;  %v20381_v2 = vld [vmem:[#allocation8_spill] sm:$0xff] }
 0x785   : > { %11055 = vst.msk [vmem:[%s18990_s20 + $0x16c] sm:$0xf] %vm3853_vm8, %v12137_v51  ;;  %v10232_v30 = vadd.f32 %v19488_v53, %v10097_v54  ;;  %v10098_v28 = vmul.f32 %v19467_v29, %v13427_v58  ;;  %v13482_v31 = vadd.f32 %v19408_v38, %v20380_v42  ;;  %v10235_v22 = vadd.f32 %v19488_v53, %v10100_v49  ;;  %v20383_v51 = vld [vmem:[#allocation61_spill] sm:$0xff]  ;;  %v20384_v58 = vld [vmem:[#allocation63_spill] sm:$0xff]  ;;  %v20385_v49 = vld [vmem:[#allocation12_spill] sm:$0xff] }
 0x786   : > { %11053 = vst.msk [vmem:[%s18990_s20 + $0x164] sm:$0xf] %vm3853_vm8, %v12135_v61  ;;  %v10290_v41 = vadd.f32 %v19488_v53, %v10155_v40  ;;  %v10153_v45 = vmul.f32 %v19467_v29, %v13481_v32  ;;  %v13483_v15 = vadd.f32 %v19419_v1, %v20381_v2  ;;  %v19566_v62 = vpop.f32.mrb[120].mxu1  ;;  %v10362_v8 = vmax.f32 %v10234_v5, 0.0  ;;  %v20386_v32 = vld [vmem:[#allocation65_spill] sm:$0xff]  ;;  %v20387_v42 = vld [vmem:[#allocation32_spill] sm:$0xff] }
 0x787   : > { %v10360_v24 = vmax.f32 %v10232_v30, 0.0  ;;  %v10233_v23 = vadd.f32 %v19488_v53, %v10098_v28  ;;  %v10156_v16 = vmul.f32 %v19467_v29, %v13482_v31  ;;  %v19570_v38 = vpop.f32.mrb[121].mxu1  ;;  %v10363_v35 = vmax.f32 %v10235_v22, 0.0 }
 0x788   : > { %v10418_v46 = vmax.f32 %v10290_v41, 0.0  ;;  %v10288_v6 = vadd.f32 %v19488_v53, %v10153_v45  ;;  %v10154_v55 = vmul.f32 %v19467_v29, %v13483_v15  ;;  %v19574_v13 = vpop.f32.mrb[122].mxu1  ;;  %v12084_v1 = vpack.c.bf16 %v10362_v8, %v10362_v8  ;;  %v20388_v45 = vld [vmem:[#allocation16_spill] sm:$0xff] }
 0x789   : > { %v12082_v25 = vpack.c.bf16 %v10360_v24, %v10360_v24  ;;  %v10361_v26 = vmax.f32 %v10233_v23, 0.0  ;;  %v10291_v14 = vadd.f32 %v19488_v53, %v10156_v16  ;;  %v19577_v20 = vpop.f32.mrb[123].mxu1  ;;  %v12085_v11 = vpack.c.bf16 %v10363_v35, %v10363_v35  ;;  %v20389_v23 = vld [vmem:[#allocation14_spill] sm:$0xff] }
 0x78a   : > { %v12140_v34 = vpack.c.bf16 %v10418_v46, %v10418_v46  ;;  %v10416_v0 = vmax.f32 %v10288_v6, 0.0  ;;  %v10289_v36 = vadd.f32 %v19488_v53, %v10154_v55  ;;  %11002 = vst.msk [vmem:[%s18990_s20 + $0x98] sm:$0xf] %vm3853_vm8, %v12084_v1  ;;  %v13428_v33 = vadd.f32 %v20382_v44, %v19434_v57 }
 0x78b   : > { %11000 = vst.msk [vmem:[%s18990_s20 + $0x90] sm:$0xf] %vm3853_vm8, %v12082_v25  ;;  %v12083_v37 = vpack.c.bf16 %v10361_v26, %v10361_v26  ;;  %v10419_v9 = vmax.f32 %v10291_v14, 0.0  ;;  %v13429_v60 = vadd.f32 %v20383_v51, %v19446_v18  ;;  %11003 = vst.msk [vmem:[%s18990_s20 + $0x9c] sm:$0xf] %vm3853_vm8, %v12085_v11  ;;  %v13430_v61 = vadd.f32 %v20384_v58, %v19458_v19  ;;  %v20391_v58 = vld [vmem:[#allocation69_spill] sm:$0xff] }
 0x78c   : > { %11058 = vst.msk [vmem:[%s18990_s20 + $0x178] sm:$0xf] %vm3853_vm8, %v12140_v34  ;;  %v12138_v54 = vpack.c.bf16 %v10416_v0, %v10416_v0  ;;  %v10417_v27 = vmax.f32 %v10289_v36, 0.0  ;;  %v13484_v40 = vadd.f32 %v19436_v43, %v20385_v49  ;;  %v10103_v57 = vmul.f32 %v19467_v29, %v13428_v33 }
 0x78d   : > { %11001 = vst.msk [vmem:[%s18990_s20 + $0x94] sm:$0xf] %vm3853_vm8, %v12083_v37  ;;  %v12141_v50 = vpack.c.bf16 %v10419_v9, %v10419_v9  ;;  %v10101_v18 = vmul.f32 %v19467_v29, %v13429_v60  ;;  %v13431_v5 = vadd.f32 %v20386_v32, %v19473_v17  ;;  %v10104_v28 = vmul.f32 %v19467_v29, %v13430_v61 }
 0x78e   : > { %11056 = vst.msk [vmem:[%s18990_s20 + $0x170] sm:$0xf] %vm3853_vm8, %v12138_v54  ;;  %v12139_v30 = vpack.c.bf16 %v10417_v27, %v10417_v27  ;;  %v10159_v19 = vmul.f32 %v19467_v29, %v13484_v40  ;;  %v13485_v43 = vadd.f32 %v19448_v52, %v20387_v42  ;;  %v19608_v31 = vpop.f32.mrb[124].mxu1  ;;  %v10238_v22 = vadd.f32 %v19488_v53, %v10103_v57  ;;  %v20390_v54 = vld [vmem:[#allocation67_spill] sm:$0xff] }
 0x78f   : > { %11059 = vst.msk [vmem:[%s18990_s20 + $0x17c] sm:$0xf] %vm3853_vm8, %v12141_v50  ;;  %v10236_v41 = vadd.f32 %v19488_v53, %v10101_v18  ;;  %v10102_v17 = vmul.f32 %v19467_v29, %v13431_v5  ;;  %v13486_v2 = vadd.f32 %v19460_v10, %v20388_v45  ;;  %v19617_v15 = vpop.f32.mrb[125].mxu1  ;;  %v10239_v8 = vadd.f32 %v19488_v53, %v10104_v28  ;;  %v20392_v50 = vld [vmem:[#allocation71_spill] sm:$0xff]  ;;  %v20393_v18 = vld [vmem:[#allocation28_spill] sm:$0xff]  ;;  %v20394_v28 = vld [vmem:[#allocation73_spill] sm:$0xff] }
 0x790   : > { %11057 = vst.msk [vmem:[%s18990_s20 + $0x174] sm:$0xf] %vm3853_vm8, %v12139_v30  ;;  %v10294_v52 = vadd.f32 %v19488_v53, %v10159_v19  ;;  %v10157_v24 = vmul.f32 %v19467_v29, %v13485_v43  ;;  %v13487_v16 = vadd.f32 %v19475_v4, %v20389_v23  ;;  %v19626_v35 = vpop.f32.mrb[126].mxu1  ;;  %v10366_v46 = vmax.f32 %v10238_v22, 0.0  ;;  %v20395_v22 = vld [vmem:[#allocation29_spill] sm:$0xff] }
 0x791   : > { %v10364_v6 = vmax.f32 %v10236_v41, 0.0  ;;  %v10237_v10 = vadd.f32 %v19488_v53, %v10102_v17  ;;  %v10160_v55 = vmul.f32 %v19467_v29, %v13486_v2  ;;  %v19630_v1 = vpop.f32.mrb[127].mxu1  ;;  %v10367_v25 = vmax.f32 %v10239_v8, 0.0  ;;  %v20396_v8 = vld [vmem:[#allocation36_spill] sm:$0xff] }
 0x792   : > { %v10422_v26 = vmax.f32 %v10294_v52, 0.0  ;;  %v10292_v14 = vadd.f32 %v19488_v53, %v10157_v24  ;;  %v10158_v11 = vmul.f32 %v19467_v29, %v13487_v16  ;;  %v12088_v4 = vpack.c.bf16 %v10366_v46, %v10366_v46  ;;  %v20397_v46 = vld [vmem:[#allocation34_spill] sm:$0xff] }
 0x793   : > { %v12086_v34 = vpack.c.bf16 %v10364_v6, %v10364_v6  ;;  %v10365_v0 = vmax.f32 %v10237_v10, 0.0  ;;  %v10295_v36 = vadd.f32 %v19488_v53, %v10160_v55  ;;  %v12089_v37 = vpack.c.bf16 %v10367_v25, %v10367_v25 }
 0x794   : > { %v12144_v9 = vpack.c.bf16 %v10422_v26, %v10422_v26  ;;  %v10420_v44 = vmax.f32 %v10292_v14, 0.0  ;;  %v10293_v33 = vadd.f32 %v19488_v53, %v10158_v11  ;;  %11006 = vst.msk [vmem:[%s18990_s20 + $0xa8] sm:$0xf] %vm3853_vm8, %v12088_v4  ;;  %v13432_v27 = vadd.f32 %v20390_v54, %v19506_v56 }
 0x795   : > { %11004 = vst.msk [vmem:[%s18990_s20 + $0xa0] sm:$0xf] %vm3853_vm8, %v12086_v34  ;;  %v12087_v51 = vpack.c.bf16 %v10365_v0, %v10365_v0  ;;  %v10423_v60 = vmax.f32 %v10295_v36, 0.0  ;;  %v13433_v61 = vadd.f32 %v20391_v58, %v19511_v39  ;;  %11007 = vst.msk [vmem:[%s18990_s20 + $0xac] sm:$0xf] %vm3853_vm8, %v12089_v37  ;;  %v13434_v57 = vadd.f32 %v20392_v50, %v19516_v12 }
 0x796   : > { %11062 = vst.msk [vmem:[%s18990_s20 + $0x188] sm:$0xf] %vm3853_vm8, %v12144_v9  ;;  %v12142_v49 = vpack.c.bf16 %v10420_v44, %v10420_v44  ;;  %v10421_v40 = vmax.f32 %v10293_v33, 0.0  ;;  %v13488_v32 = vadd.f32 %v19508_v47, %v20393_v18  ;;  %v19652_v5 = vpop.f32.mrb[128].mxu1  ;;  %v10107_v39 = vmul.f32 %v19467_v29, %v13432_v27  ;;  %v20398_v27 = vld [vmem:[#allocation42_spill] sm:$0xff] }
 0x797   : > { %11005 = vst.msk [vmem:[%s18990_s20 + $0xa4] sm:$0xf] %vm3853_vm8, %v12087_v51  ;;  %v12145_v56 = vpack.c.bf16 %v10423_v60, %v10423_v60  ;;  %v10105_v30 = vmul.f32 %v19467_v29, %v13433_v61  ;;  %v13435_v19 = vadd.f32 %v20394_v28, %v19528_v48  ;;  %v19660_v42 = vpop.f32.mrb[129].mxu1  ;;  %v10108_v47 = vmul.f32 %v19467_v29, %v13434_v57  ;;  %v20399_v61 = vld [vmem:[#allocation44_spill] sm:$0xff]  ;;  %v20400_v18 = vld [vmem:[#allocation46_spill] sm:$0xff] }
 0x798   : > { %11060 = vst.msk [vmem:[%s18990_s20 + $0x180] sm:$0xf] %vm3853_vm8, %v12142_v49  ;;  %v12143_v12 = vpack.c.bf16 %v10421_v40, %v10421_v40  ;;  %v10163_v43 = vmul.f32 %v19467_v29, %v13488_v32  ;;  %v13489_v41 = vadd.f32 %v19513_v59, %v20395_v22  ;;  %v19668_v17 = vpop.f32.mrb[130].mxu1  ;;  %v10242_v45 = vadd.f32 %v19488_v53, %v10107_v39  ;;  %v20403_v22 = vld [vmem:[#allocation52_spill] sm:$0xff] }
 0x799   : > { %11063 = vst.msk [vmem:[%s18990_s20 + $0x18c] sm:$0xf] %vm3853_vm8, %v12145_v56  ;;  %v10240_v48 = vadd.f32 %v19488_v53, %v10105_v30  ;;  %v10106_v2 = vmul.f32 %v19467_v29, %v13435_v19  ;;  %v13490_v52 = vadd.f32 %v19518_v21, %v20396_v8  ;;  %v19677_v24 = vpop.f32.mrb[131].mxu1  ;;  %v10243_v23 = vadd.f32 %v19488_v53, %v10108_v47  ;;  %v20401_v56 = vld [vmem:[#allocation48_spill] sm:$0xff]  ;;  %v20402_v19 = vld [vmem:[#allocation50_spill] sm:$0xff] }
 0x79a   : > { %11061 = vst.msk [vmem:[%s18990_s20 + $0x184] sm:$0xf] %vm3853_vm8, %v12143_v12  ;;  %v10298_v59 = vadd.f32 %v19488_v53, %v10163_v43  ;;  %v10161_v16 = vmul.f32 %v19467_v29, %v13489_v41  ;;  %v13491_v6 = vadd.f32 %v19530_v3, %v20397_v46  ;;  %v10370_v10 = vmax.f32 %v10242_v45, 0.0 }
 0x79b   : > { %v10368_v55 = vmax.f32 %v10240_v48, 0.0  ;;  %v10241_v25 = vadd.f32 %v19488_v53, %v10106_v2  ;;  %v10164_v21 = vmul.f32 %v19467_v29, %v13490_v52  ;;  %v10371_v26 = vmax.f32 %v10243_v23, 0.0  ;;  %v20404_v2 = vld [vmem:[#allocation54_spill] sm:$0xff] }
 0x79c   : > { %v10426_v14 = vmax.f32 %v10298_v59, 0.0  ;;  %v10296_v11 = vadd.f32 %v19488_v53, %v10161_v16  ;;  %v10162_v4 = vmul.f32 %v19467_v29, %v13491_v6  ;;  %v12092_v34 = vpack.c.bf16 %v10370_v10, %v10370_v10 }
 0x79d   : > { %v12090_v0 = vpack.c.bf16 %v10368_v55, %v10368_v55  ;;  %v10369_v36 = vmax.f32 %v10241_v25, 0.0  ;;  %v10299_v3 = vadd.f32 %v19488_v53, %v10164_v21  ;;  %v12093_v37 = vpack.c.bf16 %v10371_v26, %v10371_v26 }
 0x79e   : > { %v12148_v9 = vpack.c.bf16 %v10426_v14, %v10426_v14  ;;  %v10424_v44 = vmax.f32 %v10296_v11, 0.0  ;;  %v10297_v33 = vadd.f32 %v19488_v53, %v10162_v4  ;;  %v19692_v51 = vpop.f32.mrb[132].mxu1  ;;  %11010 = vst.msk [vmem:[%s18990_s20 + $0xb8] sm:$0xf] %vm3853_vm8, %v12092_v34  ;;  %v13492_v58 = vadd.f32 %v19566_v62, %v20398_v27 }
 0x79f   : > { %11008 = vst.msk [vmem:[%s18990_s20 + $0xb0] sm:$0xf] %vm3853_vm8, %v12090_v0  ;;  %v12091_v60 = vpack.c.bf16 %v10369_v36, %v10369_v36  ;;  %v10427_v54 = vmax.f32 %v10299_v3, 0.0  ;;  %v13493_v49 = vadd.f32 %v19570_v38, %v20399_v61  ;;  %v19702_v40 = vpop.f32.mrb[133].mxu1  ;;  %11011 = vst.msk [vmem:[%s18990_s20 + $0xbc] sm:$0xf] %vm3853_vm8, %v12093_v37  ;;  %v13494_v32 = vadd.f32 %v19574_v13, %v20400_v18 }
 0x7a0   : > { %11066 = vst.msk [vmem:[%s18990_s20 + $0x198] sm:$0xf] %vm3853_vm8, %v12148_v9  ;;  %v12146_v50 = vpack.c.bf16 %v10424_v44, %v10424_v44  ;;  %v10425_v57 = vmax.f32 %v10297_v33, 0.0  ;;  %v13495_v39 = vadd.f32 %v19577_v20, %v20401_v56  ;;  %v19712_v62 = vpop.f32.mrb[134].mxu1  ;;  %v10167_v30 = vmul.f32 %v19467_v29, %v13492_v58  ;;  %v20407_v58 = vld [vmem:[#allocation60_spill] sm:$0xff]  ;;  %v20408_v18 = vld [vmem:[#allocation62_spill] sm:$0xff] }
 0x7a1   : > { %11009 = vst.msk [vmem:[%s18990_s20 + $0xb4] sm:$0xf] %vm3853_vm8, %v12091_v60  ;;  %v12149_v38 = vpack.c.bf16 %v10427_v54, %v10427_v54  ;;  %v10165_v28 = vmul.f32 %v19467_v29, %v13493_v49  ;;  %v13496_v12 = vadd.f32 %v19608_v31, %v20402_v19  ;;  %v19720_v47 = vpop.f32.mrb[135].mxu1  ;;  %v10168_v20 = vmul.f32 %v19467_v29, %v13494_v32  ;;  %v20406_v54 = vld [vmem:[#allocation58_spill] sm:$0xff]  ;;  %v20409_v56 = vld [vmem:[#allocation64_spill] sm:$0xff] }
 0x7a2   : > { %11064 = vst.msk [vmem:[%s18990_s20 + $0x190] sm:$0xf] %vm3853_vm8, %v12146_v50  ;;  %v12147_v13 = vpack.c.bf16 %v10425_v57, %v10425_v57  ;;  %v10166_v43 = vmul.f32 %v19467_v29, %v13495_v39  ;;  %v13497_v41 = vadd.f32 %v19617_v15, %v20403_v22  ;;  %v10302_v45 = vadd.f32 %v19488_v53, %v10167_v30  ;;  %v20405_v15 = vld [vmem:[#allocation56_spill] sm:$0xff]  ;;  %v20410_v30 = vld [vmem:[#allocation66_spill] sm:$0xff] }
 0x7a3   : > { %11067 = vst.msk [vmem:[%s18990_s20 + $0x19c] sm:$0xf] %vm3853_vm8, %v12149_v38  ;;  %v10300_v48 = vadd.f32 %v19488_v53, %v10165_v28  ;;  %v10171_v31 = vmul.f32 %v19467_v29, %v13496_v12  ;;  %v13498_v8 = vadd.f32 %v19626_v35, %v20404_v2  ;;  %v10303_v52 = vadd.f32 %v19488_v53, %v10168_v20 }
 0x7a4   : > { %11065 = vst.msk [vmem:[%s18990_s20 + $0x194] sm:$0xf] %vm3853_vm8, %v12147_v13  ;;  %v10301_v23 = vadd.f32 %v19488_v53, %v10166_v43  ;;  %v10169_v59 = vmul.f32 %v19467_v29, %v13497_v41  ;;  %v13499_v16 = vadd.f32 %v19630_v1, %v20405_v15  ;;  %v10430_v46 = vmax.f32 %v10302_v45, 0.0  ;;  %v20411_v13 = vld [vmem:[#allocation68_spill] sm:$0xff]  ;;  %v20412_v41 = vld [vmem:[#allocation70_spill] sm:$0xff] }
 0x7a5   : > { %v10428_v6 = vmax.f32 %v10300_v48, 0.0  ;;  %v10306_v10 = vadd.f32 %v19488_v53, %v10171_v31  ;;  %v10172_v55 = vmul.f32 %v19467_v29, %v13498_v8  ;;  %v10431_v25 = vmax.f32 %v10303_v52, 0.0 }
 0x7a6   : > { %v10429_v35 = vmax.f32 %v10301_v23, 0.0  ;;  %v10304_v21 = vadd.f32 %v19488_v53, %v10169_v59  ;;  %v10170_v26 = vmul.f32 %v19467_v29, %v13499_v16  ;;  %v19746_v14 = vpop.f32.mrb[136].mxu1  ;;  %v12152_v11 = vpack.c.bf16 %v10430_v46, %v10430_v46 }
 0x7a7   : > { %v12150_v4 = vpack.c.bf16 %v10428_v6, %v10428_v6  ;;  %v10434_v1 = vmax.f32 %v10306_v10, 0.0  ;;  %v10307_v34 = vadd.f32 %v19488_v53, %v10172_v55  ;;  %v19749_v0 = vpop.f32.mrb[137].mxu1  ;;  %v12153_v36 = vpack.c.bf16 %v10431_v25, %v10431_v25 }
 0x7a8   : > { %v12151_v3 = vpack.c.bf16 %v10429_v35, %v10429_v35  ;;  %v10432_v37 = vmax.f32 %v10304_v21, 0.0  ;;  %v10305_v9 = vadd.f32 %v19488_v53, %v10170_v26  ;;  %v19752_v44 = vpop.f32.mrb[138].mxu1  ;;  %11070 = vst.msk [vmem:[%s18990_s20 + $0x1a8] sm:$0xf] %vm3853_vm8, %v12152_v11  ;;  %v13500_v27 = vadd.f32 %v19652_v5, %v20406_v54 }
 0x7a9   : > { %11068 = vst.msk [vmem:[%s18990_s20 + $0x1a0] sm:$0xf] %vm3853_vm8, %v12150_v4  ;;  %v12156_v33 = vpack.c.bf16 %v10434_v1, %v10434_v1  ;;  %v10435_v60 = vmax.f32 %v10307_v34, 0.0  ;;  %v13501_v61 = vadd.f32 %v19660_v42, %v20407_v58  ;;  %v9898_v49 = vpop.f32.mrb[139].mxu1  ;;  %11071 = vst.msk [vmem:[%s18990_s20 + $0x1ac] sm:$0xf] %vm3853_vm8, %v12153_v36  ;;  %v13502_v32 = vadd.f32 %v19668_v17, %v20408_v18 }
 0x7aa   : > { %11069 = vst.msk [vmem:[%s18990_s20 + $0x1a4] sm:$0xf] %vm3853_vm8, %v12151_v3  ;;  %v12154_v50 = vpack.c.bf16 %v10432_v37, %v10432_v37  ;;  %v10433_v57 = vmax.f32 %v10305_v9, 0.0  ;;  %v13503_v39 = vadd.f32 %v19677_v24, %v20409_v56  ;;  %v10175_v42 = vmul.f32 %v19467_v29, %v13500_v27  ;;  %v20414_v37 = vld [vmem:[#allocation74_spill] sm:$0xff]  ;;  %v20416_v58 = vld [vmem:[#allocation76_spill] sm:$0xff] }
 0x7ab   : > { %11074 = vst.msk [vmem:[%s18990_s20 + $0x1b8] sm:$0xf] %vm3853_vm8, %v12156_v33  ;;  %v12157_v5 = vpack.c.bf16 %v10435_v60, %v10435_v60  ;;  %v10173_v38 = vmul.f32 %v19467_v29, %v13501_v61  ;;  %v13504_v28 = vadd.f32 %v19692_v51, %v20410_v30  ;;  %v10176_v12 = vmul.f32 %v19467_v29, %v13502_v32  ;;  %v20415_v33 = vld [vmem:[#allocation75_spill] sm:$0xff]  ;;  %v20418_v32 = vld [vmem:[#allocation78_spill] sm:$0xff] }
 0x7ac   : > { %11072 = vst.msk [vmem:[%s18990_s20 + $0x1b0] sm:$0xf] %vm3853_vm8, %v12154_v50  ;;  %v12155_v19 = vpack.c.bf16 %v10433_v57, %v10433_v57  ;;  %v10174_v17 = vmul.f32 %v19467_v29, %v13503_v39  ;;  %v13505_v24 = vadd.f32 %v19702_v40, %v20411_v13  ;;  %v10310_v20 = vadd.f32 %v19488_v53, %v10175_v42  ;;  %v20413_v40 = vld [vmem:[#allocation72_spill] sm:$0xff]  ;;  %v20417_v50 = vld [vmem:[#allocation77_spill] sm:$0xff] }
 0x7ad   : > { %11075 = vst.msk [vmem:[%s18990_s20 + $0x1bc] sm:$0xf] %vm3853_vm8, %v12157_v5  ;;  %v10308_v43 = vadd.f32 %v19488_v53, %v10173_v38  ;;  %v10179_v22 = vmul.f32 %v19467_v29, %v13504_v28  ;;  %v13506_v51 = vadd.f32 %v19712_v62, %v20412_v41  ;;  %v10311_v45 = vadd.f32 %v19488_v53, %v10176_v12 }
 0x7ae   : > { %11073 = vst.msk [vmem:[%s18990_s20 + $0x1b4] sm:$0xf] %vm3853_vm8, %v12155_v19  ;;  %v10309_v48 = vadd.f32 %v19488_v53, %v10174_v17  ;;  %v10177_v31 = vmul.f32 %v19467_v29, %v13505_v24  ;;  %v13507_v2 = vadd.f32 %v19720_v47, %v20413_v40  ;;  %v13382_v8 = vpop.f32.mrb[140].mxu1  ;;  %v10438_v52 = vmax.f32 %v10310_v20, 0.0 }
 0x7af   : > { %v10436_v23 = vmax.f32 %v10308_v43, 0.0  ;;  %v10314_v59 = vadd.f32 %v19488_v53, %v10179_v22  ;;  %v10180_v15 = vmul.f32 %v19467_v29, %v13506_v51  ;;  %v9911_v62 = vpop.f32.mrb[141].mxu1  ;;  %v10439_v16 = vmax.f32 %v10311_v45, 0.0 }
 0x7b0   : > { %v10437_v46 = vmax.f32 %v10309_v48, 0.0  ;;  %v10312_v6 = vadd.f32 %v19488_v53, %v10177_v31  ;;  %v10178_v10 = vmul.f32 %v19467_v29, %v13507_v2  ;;  %v13383_v55 = vpop.f32.mrb[142].mxu1  ;;  %v12160_v25 = vpack.c.bf16 %v10438_v52, %v10438_v52 }
 0x7b1   : > { %v12158_v47 = vpack.c.bf16 %v10436_v23, %v10436_v23  ;;  %v10442_v35 = vmax.f32 %v10314_v59, 0.0  ;;  %v10315_v21 = vadd.f32 %v19488_v53, %v10180_v15  ;;  %v9914_v26 = vpop.f32.mrb[143].mxu1  ;;  %v12161_v11 = vpack.c.bf16 %v10439_v16, %v10439_v16 }
 0x7b2   : > { %v12159_v4 = vpack.c.bf16 %v10437_v46, %v10437_v46  ;;  %v10440_v1 = vmax.f32 %v10312_v6, 0.0  ;;  %v10313_v34 = vadd.f32 %v19488_v53, %v10178_v10  ;;  %11078 = vst.msk [vmem:[%s18990_s20 + $0x1c8] sm:$0xf] %vm3853_vm8, %v12160_v25  ;;  %v13508_v9 = vadd.f32 %v19746_v14, %v20414_v37 }
 0x7b3   : > { %11076 = vst.msk [vmem:[%s18990_s20 + $0x1c0] sm:$0xf] %vm3853_vm8, %v12158_v47  ;;  %v12164_v36 = vpack.c.bf16 %v10442_v35, %v10442_v35  ;;  %v10443_v3 = vmax.f32 %v10315_v21, 0.0  ;;  %v13509_v60 = vadd.f32 %v19749_v0, %v20415_v33  ;;  %11079 = vst.msk [vmem:[%s18990_s20 + $0x1cc] sm:$0xf] %vm3853_vm8, %v12161_v11  ;;  %v13510_v61 = vadd.f32 %v19752_v44, %v20416_v58  ;;  %v20419_v44 = vld [vmem:[#allocation79_spill] sm:$0xff] }
 0x7b4   : > { %11077 = vst.msk [vmem:[%s18990_s20 + $0x1c4] sm:$0xf] %vm3853_vm8, %v12159_v4  ;;  %v12162_v54 = vpack.c.bf16 %v10440_v1, %v10440_v1  ;;  %v10441_v27 = vmax.f32 %v10313_v34, 0.0  ;;  %v13511_v57 = vadd.f32 %v9898_v49, %v20417_v50  ;;  %v10183_v14 = vmul.f32 %v19467_v29, %v13508_v9 }
 0x7b5   : > { %11082 = vst.msk [vmem:[%s18990_s20 + $0x1d8] sm:$0xf] %vm3853_vm8, %v12164_v36  ;;  %v12165_v18 = vpack.c.bf16 %v10443_v3, %v10443_v3  ;;  %v10181_v0 = vmul.f32 %v19467_v29, %v13509_v60  ;;  %v13512_v56 = vadd.f32 %v13382_v8, %v20418_v32  ;;  %v10184_v5 = vmul.f32 %v19467_v29, %v13510_v61 }
 0x7b6   : > { %11080 = vst.msk [vmem:[%s18990_s20 + $0x1d0] sm:$0xf] %vm3853_vm8, %v12162_v54  ;;  %v12163_v39 = vpack.c.bf16 %v10441_v27, %v10441_v27  ;;  %v10182_v42 = vmul.f32 %v19467_v29, %v13511_v57  ;;  %v13513_v38 = vadd.f32 %v9911_v62, %v20419_v44  ;;  %v10318_v49 = vadd.f32 %v19488_v53, %v10183_v14 }
 0x7b7   : > { %11083 = vst.msk [vmem:[%s18990_s20 + $0x1dc] sm:$0xf] %vm3853_vm8, %v12165_v18  ;;  %v10316_v30 = vadd.f32 %v19488_v53, %v10181_v0  ;;  %v10187_v28 = vmul.f32 %v19467_v29, %v13512_v56  ;;  %v13514_v19 = vadd.f32 %v13383_v55, %v18998_v63  ;;  %v10319_v12 = vadd.f32 %v19488_v53, %v10184_v5 }
 0x7b8   : > { %11081 = vst.msk [vmem:[%s18990_s20 + $0x1d4] sm:$0xf] %vm3853_vm8, %v12163_v39  ;;  %v10317_v17 = vadd.f32 %v19488_v53, %v10182_v42  ;;  %v10185_v13 = vmul.f32 %v19467_v29, %v13513_v38  ;;  %v13515_v24 = vadd.f32 %v9914_v26, %v19004_v7  ;;  %v10446_v20 = vmax.f32 %v10318_v49, 0.0 }
 0x7b9   : > { %v10444_v43 = vmax.f32 %v10316_v30, 0.0  ;;  %v10322_v22 = vadd.f32 %v19488_v53, %v10187_v28  ;;  %v10188_v41 = vmul.f32 %v19467_v29, %v13514_v19  ;;  %v10447_v51 = vmax.f32 %v10319_v12, 0.0 }
 0x7ba   : > { %v10445_v63 = vmax.f32 %v10317_v17, 0.0  ;;  %v10320_v45 = vadd.f32 %v19488_v53, %v10185_v13  ;;  %v10186_v48 = vmul.f32 %v19467_v29, %v13515_v24  ;;  %v12168_v31 = vpack.c.bf16 %v10446_v20, %v10446_v20 }
 0x7bb   : > { %v12166_v40 = vpack.c.bf16 %v10444_v43, %v10444_v43  ;;  %v10450_v7 = vmax.f32 %v10322_v22, 0.0  ;;  %v10323_v2 = vadd.f32 %v19488_v53, %v10188_v41  ;;  %v12169_v8 = vpack.c.bf16 %v10447_v51, %v10447_v51 }
 0x7bc   : > { %v12167_v52 = vpack.c.bf16 %v10445_v63, %v10445_v63  ;;  %v10448_v23 = vmax.f32 %v10320_v45, 0.0  ;;  %v10321_v59 = vadd.f32 %v19488_v53, %v10186_v48  ;;  %11086 = vst.msk [vmem:[%s18990_s20 + $0x1e8] sm:$0xf] %vm3853_vm8, %v12168_v31 }
 0x7bd   : > { %11084 = vst.msk [vmem:[%s18990_s20 + $0x1e0] sm:$0xf] %vm3853_vm8, %v12166_v40  ;;  %v12172_v15 = vpack.c.bf16 %v10450_v7, %v10450_v7  ;;  %v10451_v29 = vmax.f32 %v10323_v2, 0.0  ;;  %11087 = vst.msk [vmem:[%s18990_s20 + $0x1ec] sm:$0xf] %vm3853_vm8, %v12169_v8 }
 0x7be   : > { %11085 = vst.msk [vmem:[%s18990_s20 + $0x1e4] sm:$0xf] %vm3853_vm8, %v12167_v52  ;;  %v12170_v62 = vpack.c.bf16 %v10448_v23, %v10448_v23  ;;  %v10449_v16 = vmax.f32 %v10321_v59, 0.0 }
 0x7bf   : > { %11090 = vst.msk [vmem:[%s18990_s20 + $0x1f8] sm:$0xf] %vm3853_vm8, %v12172_v15  ;;  %v12173_v46 = vpack.c.bf16 %v10451_v29, %v10451_v29 }
 0x7c0   : > { %11088 = vst.msk [vmem:[%s18990_s20 + $0x1f0] sm:$0xf] %vm3853_vm8, %v12170_v62  ;;  %v12171_v6 = vpack.c.bf16 %v10449_v16, %v10449_v16 }
 0x7c1   : > { %11091 = vst.msk [vmem:[%s18990_s20 + $0x1fc] sm:$0xf] %vm3853_vm8, %v12173_v46 }
 0x7c2   : > { %11089 = vst.msk [vmem:[%s18990_s20 + $0x1f4] sm:$0xf] %vm3853_vm8, %v12171_v6 }
 0x7c3 PF: > { %s19_s30 = sadd.s32 1, %s13955_s30  }
 0x7c4   : > { %p16_p4 = scmp.ge.s32.totalorder %s19_s30, 4  }
 0x7c6   :  { %18 = sbr.rel (!%p16_p4) target bundleno = 1 (0x1), region = 97 }

</bundles_post_ra>
